<compile_context>
chip_gen: v5e
topology: v5e:2x2
jax: 0.10.0
libtpu: 0.0.40
codegen_flags: <defaults>
</compile_context>

<pallas_src>
import functools

import jax
import jax.numpy as jnp
from jax import lax
from jax.experimental import pallas as pl
from jax.experimental.pallas import tpu as pltpu


# ---------------------------------------------------------------------------
# Per-generation VMEM sizing (v5e/v6e: 128 MiB physical, v7x: 64 MiB).
# ---------------------------------------------------------------------------
@functools.lru_cache(maxsize=None)
def _vmem_budget():
    """Returns (vmem_limit_bytes, per-tile byte budget for the row-tile pick)."""
    phys = None
    try:
        phys = int(pltpu.get_tpu_info().vmem_capacity_bytes)
    except Exception:
        phys = None
    if phys is not None and phys >= 100 * 1024 * 1024:      # v5e / v6e
        return 96 * 1024 * 1024, 28 * 1024 * 1024
    # v7x (64 MiB physical) or unknown backend: stay conservative.
    return 48 * 1024 * 1024, 12 * 1024 * 1024


def _choose_row_tile(Ho, Wo, maxd, G, Cin, Co, k, out_bytes, budget):
    """Largest row tile t (divisor of Ho, %8==0 or == Ho) fitting the budget.

    Counts the double-buffered bf16 input slab, double-buffered bf16 weights,
    the double-buffered output tile and the live f32 accumulator (the review
    flagged that deep-layer weights were previously uncounted).
    """
    cands = [d for d in range(1, Ho + 1)
             if Ho % d == 0 and (d % 8 == 0 or d == Ho)]
    w_bytes = 2 * k * k * Cin * Co * 2

    def need(tt):
        p = 2 * G * (tt + maxd) * (Wo + maxd) * Cin * 2      # input slab, bf16
        y = 2 * tt * Wo * Co * out_bytes                     # output tile
        acc = tt * Wo * Co * 4                               # f32 accumulator
        return p + y + acc + w_bytes + (1 << 20)

    best = cands[0]
    for tt in cands:
        if need(tt) <= budget:
            best = tt
    return best, need(best)


# ---------------------------------------------------------------------------
# Kernels
# ---------------------------------------------------------------------------
def _conv_kernel(p_ref, w_ref, b_ref, *refs, taps, t, Wo, rows_blk,
                 act, emit_stats, fold_taps, neg_slope=0.2):
    """Fused 4x4 conv (+bias [+activation] [+IN partial stats]) per (n, tile).

    p_ref : (G*rows_blk, cols_all, Cin) bf16 phase-split input slab (w/ halo)
    w_ref : (k*k*Cin, Co) bf16 when fold_taps else (k*k, Cin, Co) bf16
    b_ref : (1, Co) f32
    refs  : y_ref (t*Wo, Co) [+ stats_ref (2, Co)] [+ xs_buf scratch]
    """
    if fold_taps:
        xs_buf = refs[-1]
        refs = refs[:-1]
    if emit_stats:
        y_ref, stats_ref = refs
    else:
        (y_ref,) = refs
    Cin = p_ref.shape[-1]
    Co = w_ref.shape[-1]
    M = t * Wo

    if fold_taps:
        # Gather the 16 taps into VMEM scratch (t, Wo, k*k*Cin) via plain ref
        # stores, then ONE MXU dot with K = k*k*Cin instead of 16 tiny K=Cin
        # dots (review: MXU occupancy on the small-Cin layers).
        for i, (g, dr, dc, _) in enumerate(taps):
            r0 = g * rows_blk + dr
            xs_buf[:, :, i * Cin:(i + 1) * Cin] = p_ref[r0:r0 + t, dc:dc + Wo, :]
        acc = jnp.dot(xs_buf[...].reshape(M, len(taps) * Cin), w_ref[...],
                      preferred_element_type=jnp.float32)            # (M, Co)
    else:
        # Large-Cin layers: per-tap dots, K = Cin already fills the MXU.
        acc = jnp.zeros((M, Co), jnp.float32)
        for (g, dr, dc, widx) in taps:
            r0 = g * rows_blk + dr
            xs = p_ref[r0:r0 + t, dc:dc + Wo, :]
            acc = acc + jnp.dot(xs.reshape(M, Cin), w_ref[widx],
                                preferred_element_type=jnp.float32)

    y = acc + b_ref[...]                                             # (M, Co)

    if emit_stats:
        # Per-tile partial InstanceNorm stats (reduced over tiles in XLA so
        # BOTH grid axes stay "parallel" -> both v7x TensorCores used).
        # TODO(synk): one-pass E[x^2]-mean^2; switch to centered sums if
        # catastrophic cancellation ever shows up on much deeper nets.
        stats_ref[0:1, :] = jnp.sum(y, axis=0, keepdims=True)
        stats_ref[1:2, :] = jnp.sum(y * y, axis=0, keepdims=True)

    if act == "leaky":
        y = jnp.where(y > 0, y, neg_slope * y)
    elif act == "sigmoid":
        y = jax.nn.sigmoid(y)
    y_ref[...] = y.astype(y_ref.dtype)


def _norm_act_kernel(y_ref, ms_ref, o_ref, *, neg_slope):
    """InstanceNorm (affine=False) + LeakyReLU with precomputed mean / rsqrt."""
    y = y_ref[...]                                           # (t*Wo, Co) f32
    xhat = (y - ms_ref[0:1, :]) * ms_ref[1:2, :]
    o_ref[...] = jnp.where(xhat > 0, xhat, neg_slope * xhat).astype(o_ref.dtype)


def _head_kernel(p_ref, w_ref, b_ref, o_ref, *, taps, t, Wo, rows_blk,
                 use_sigmoid):
    """Final Co=1 layer on the VPU: bf16 per-tap MACs into an f32 (t, Wo, Cin)
    accumulator, then a SINGLE cross-lane (XLU) reduction; writes a lane-dense
    (t, Wo) block instead of an (M, 1) masked-store column."""
    Cin = p_ref.shape[-1]
    acc = jnp.zeros((t, Wo, Cin), jnp.float32)
    for (g, dr, dc, widx) in taps:
        r0 = g * rows_blk + dr
        xs = p_ref[r0:r0 + t, dc:dc + Wo, :]                 # (t, Wo, Cin) bf16
        wv = w_ref[widx:widx + 1, :].reshape(1, 1, Cin)      # bf16
        acc = acc + xs * wv                                  # f32 accumulate
    y = jnp.sum(acc, axis=-1) + b_ref[...]                   # (t, Wo) f32
    if use_sigmoid:
        y = jax.nn.sigmoid(y)
    o_ref[...] = y.astype(o_ref.dtype)


# ---------------------------------------------------------------------------
# Wrapper-side glue (cheap XLA ops: pad + optional phase split + row tiling).
# ---------------------------------------------------------------------------
def _prepare_input(x_nhwc, k, s, t, Ho, Wo, compute_dtype):
    """Pad + (stride>1) phase-split + row-tile with duplicated halo rows.

    Output (N*T, G*rows_blk, cols_all, Cin) so the kernel only does unit-stride
    static slices per tap.  Stride-1 layers skip the (identity) phase split,
    and T == 1 needs no halo duplication at all (pure reshape).
    """
    N, H, W, C = x_nhwc.shape
    maxd = (k - 1) // s
    rows_blk = t + maxd
    cols_all = Wo + maxd
    Hp = -(-(H + 2) // s) * s
    Wp = -(-(W + 2) // s) * s
    xp = jnp.pad(x_nhwc.astype(compute_dtype),
                 ((0, 0), (1, Hp - H - 1), (1, Wp - W - 1), (0, 0)))
    G = s * s
    if s == 1:
        xph = xp[:, None]                                    # (N, 1, Hp, Wp, C)
    else:
        xph = xp.reshape(N, Hp // s, s, Wp // s, s, C)
        xph = xph.transpose(0, 2, 4, 1, 3, 5).reshape(N, G, Hp // s, Wp // s, C)
    T = Ho // t
    if T == 1:
        P = xph[:, :, :rows_blk, :cols_all, :]
    else:
        P = jnp.stack([xph[:, :, i * t:i * t + rows_blk, :cols_all, :]
                       for i in range(T)], axis=1)
    return P.reshape(N * T, G * rows_blk, cols_all, C)


def conv_block(x_nhwc, w, b, *, stride, norm, act,
               compute_dtype=jnp.bfloat16, chain_dtype=jnp.bfloat16):
    """One discriminator block; NHWC in -> NHWC out (bf16 chain, f32 head)."""
    N, H, W, Cin = x_nhwc.shape
    k = w.shape[0]
    Co = w.shape[-1]
    s = stride
    Ho = (H + 2 - k) // s + 1
    Wo = (W + 2 - k) // s + 1
    maxd = (k - 1) // s
    G = s * s

    vmem_base, tile_budget = _vmem_budget()
    out_bytes = 4 if norm else jnp.dtype(chain_dtype).itemsize
    t, need = _choose_row_tile(Ho, Wo, maxd, G, Cin, Co, k, out_bytes,
                               tile_budget)
    T = Ho // t
    rows_blk = t + maxd
    cols_all = Wo + maxd
    vmem_limit = max(vmem_base, need + (8 << 20))

    taps = tuple(((kh % s) * s + (kw % s), kh // s, kw // s, kh * k + kw)
                 for kh in range(k) for kw in range(k))
    P = _prepare_input(x_nhwc, k, s, t, Ho, Wo, compute_dtype)
    p_spec = pl.BlockSpec((None, G * rows_blk, cols_all, Cin),
                          lambda n, i, T=T: (n * T + i, 0, 0, 0))
    cparams = pltpu.CompilerParams(
        dimension_semantics=("parallel", "parallel"),
        vmem_limit_bytes=vmem_limit)

    if Co == 1:
        # PatchGAN head: VPU/XLU path, lane-dense (t, Wo) blocks, f32 output.
        w_flat = w[..., 0].reshape(k * k, Cin).astype(compute_dtype)
        y = pl.pallas_call(
            functools.partial(_head_kernel, taps=taps, t=t, Wo=Wo,
                              rows_blk=rows_blk,
                              use_sigmoid=(act == "sigmoid")),
            out_shape=jax.ShapeDtypeStruct((N, Ho, Wo), jnp.float32),
            grid=(N, T),
            in_specs=[p_spec,
                      pl.BlockSpec((k * k, Cin), lambda n, i: (0, 0)),
                      pl.BlockSpec((1, 1), lambda n, i: (0, 0))],
            out_specs=pl.BlockSpec((None, t, Wo), lambda n, i: (n, i, 0)),
            compiler_params=cparams,
        )(P, w_flat, b)
        return y[..., None]                                  # (N, Ho, Wo, 1)

    fold = Cin < 128
    if fold:
        w_flat = w.reshape(k * k * Cin, Co).astype(compute_dtype)
        w_spec = pl.BlockSpec((k * k * Cin, Co), lambda n, i: (0, 0))
        scratch = [pltpu.VMEM((t, Wo, k * k * Cin), compute_dtype)]
    else:
        w_flat = w.reshape(k * k, Cin, Co).astype(compute_dtype)
        w_spec = pl.BlockSpec((k * k, Cin, Co), lambda n, i: (0, 0, 0))
        scratch = []

    y_dtype = jnp.float32 if norm else chain_dtype
    out_shape = [jax.ShapeDtypeStruct((N, Ho * Wo, Co), y_dtype)]
    out_specs = [pl.BlockSpec((None, t * Wo, Co), lambda n, i: (n, i, 0))]
    if norm:
        out_shape.append(jax.ShapeDtypeStruct((N, T, 2, Co), jnp.float32))
        out_specs.append(
            pl.BlockSpec((None, None, 2, Co), lambda n, i: (n, i, 0, 0)))

    res = pl.pallas_call(
        functools.partial(_conv_kernel, taps=taps, t=t, Wo=Wo,
                          rows_blk=rows_blk,
                          act=("none" if norm else act),
                          emit_stats=norm, fold_taps=fold),
        out_shape=out_shape,
        grid=(N, T),
        in_specs=[p_spec, w_spec,
                  pl.BlockSpec((1, Co), lambda n, i: (0, 0))],
        out_specs=out_specs,
        scratch_shapes=scratch,
        compiler_params=cparams,
    )(P, w_flat, b)

    if not norm:
        return res[0].reshape(N, Ho, Wo, Co)

    # Tiny XLA reduce of the per-tile partial stats, then a light 2nd pass.
    y_raw, stats = res
    ssum = jnp.sum(stats, axis=1)                            # (N, 2, Co) f32
    inv_m = 1.0 / float(Ho * Wo)
    mean = ssum[:, 0, :] * inv_m
    var = jnp.maximum(ssum[:, 1, :] * inv_m - mean * mean, 0.0)
    scale = lax.rsqrt(var + 1e-5)
    ms = jnp.stack([mean, scale], axis=1)                    # (N, 2, Co)

    out = pl.pallas_call(
        functools.partial(_norm_act_kernel, neg_slope=0.2),
        out_shape=jax.ShapeDtypeStruct((N, Ho * Wo, Co), chain_dtype),
        grid=(N, T),
        in_specs=[pl.BlockSpec((None, t * Wo, Co), lambda n, i: (n, i, 0)),
                  pl.BlockSpec((None, 2, Co), lambda n, i: (n, 0, 0))],
        out_specs=pl.BlockSpec((None, t * Wo, Co), lambda n, i: (n, i, 0)),
        compiler_params=cparams,
    )(y_raw, ms)
    return out.reshape(N, Ho, Wo, Co)


# ---------------------------------------------------------------------------
# PatchDiscriminator: configs, params, forward.
# ---------------------------------------------------------------------------
def build_block_configs(opt):
    nf = opt["nb_feature_init_D"]
    cfgs = [dict(cin=opt["ch_inp"] + opt["ch_tar"], cout=nf, stride=2,
                 norm=False, act="leaky")]
    for _ in range(1, opt["nb_layer_D"]):
        cfgs.append(dict(cin=nf, cout=nf * 2, stride=2, norm=True, act="leaky"))
        nf *= 2
    cfgs.append(dict(cin=nf, cout=nf * 2, stride=1, norm=True, act="leaky"))
    nf *= 2
    cfgs.append(dict(cin=nf, cout=1, stride=1, norm=False,
                     act="sigmoid" if opt["use_sigmoid"] else "none"))
    return cfgs


def init_params(key, cfgs, k=4):
    params = []
    for cfg in cfgs:
        key, kw_, kb_ = jax.random.split(key, 3)
        fan_in = cfg["cin"] * k * k
        bound = 1.0 / jnp.sqrt(fan_in)
        w = jax.random.uniform(kw_, (k, k, cfg["cin"], cfg["cout"]),
                               jnp.float32, -bound, bound)       # HWIO
        b = jax.random.uniform(kb_, (1, cfg["cout"]), jnp.float32, -bound, bound)
        params.append((w, b))
    return params


def patch_discriminator_forward(x_nchw, cfgs, params, compute_dtype=jnp.bfloat16):
    """Returns the list of block outputs in NCHW f32 (matching the module).

    The inter-layer chain stays NHWC bf16; NCHW transposes + f32 casts only
    feed the returned list (what the caller consumes).
    """
    x = jnp.transpose(x_nchw, (0, 2, 3, 1))                  # NHWC chain
    outs = []
    for cfg, (w, b) in zip(cfgs, params):
        y = conv_block(x, w, b, stride=cfg["stride"], norm=cfg["norm"],
                       act=cfg["act"], compute_dtype=compute_dtype)
        outs.append(jnp.transpose(y.astype(jnp.float32), (0, 3, 1, 2)))
        x = y
    return outs


# ---------------------------------------------------------------------------
# Pure-JAX reference (lax.conv) at matched precision (bf16 operands/chain,
# f32 accumulation and normalization).
# ---------------------------------------------------------------------------
def reference_forward(x_nchw, cfgs, params, compute_dtype=jnp.bfloat16):
    x = jnp.transpose(x_nchw, (0, 2, 3, 1))
    outs = []
    for cfg, (w, b) in zip(cfgs, params):
        dn = lax.conv_dimension_numbers(x.shape, w.shape, ("NHWC", "HWIO", "NHWC"))
        y = lax.conv_general_dilated(
            x.astype(compute_dtype), w.astype(compute_dtype),
            (cfg["stride"], cfg["stride"]), ((1, 1), (1, 1)),
            dimension_numbers=dn, preferred_element_type=jnp.float32)
        y = y + b.reshape(1, 1, 1, -1)
        if cfg["norm"]:
            mean = jnp.mean(y, axis=(1, 2), keepdims=True)
            var = jnp.mean(jnp.square(y - mean), axis=(1, 2), keepdims=True)
            y = (y - mean) * lax.rsqrt(var + 1e-5)
        if cfg["act"] == "leaky":
            y = jnp.where(y > 0, y, 0.2 * y)
        elif cfg["act"] == "sigmoid":
            y = jax.nn.sigmoid(y)
        if cfg["cout"] > 1:
            y = y.astype(compute_dtype)   # match kernel's bf16 inter-layer chain
        x = y
        outs.append(jnp.transpose(y.astype(jnp.float32), (0, 3, 1, 2)))
    return outs


if __name__ == "__main__":
    opt = dict(ch_inp=2, ch_tar=2, nb_feature_init_D=8, nb_layer_D=2,
               type_norm="instance", use_sigmoid=True)
    cfgs = build_block_configs(opt)

    key = jax.random.PRNGKey(0)
    key, kx = jax.random.split(key)
    params = init_params(key, cfgs)

    # Input is the channel-concatenated (input, target) pair: (N, ch_inp+ch_tar, H, W)
    x = jax.random.normal(kx, (2, opt["ch_inp"] + opt["ch_tar"], 16, 16),
                          jnp.float32)

    fwd = jax.jit(lambda xx, pp: patch_discriminator_forward(xx, cfgs, pp))
    outs = fwd(x, params)
    outs = [jax.block_until_ready(o) for o in outs]

    refs = reference_forward(x, cfgs, params)
    for i, (o, r) in enumerate(zip(outs, refs)):
        assert o.shape == r.shape, (i, o.shape, r.shape)
        assert jnp.allclose(o, r, rtol=2e-2, atol=2e-2), (
            f"block {i} mismatch, max abs diff "
            f"{float(jnp.max(jnp.abs(o - r))):.5f}")

    print("KERNEL_OK")
</pallas_src>

<mosaic_0001>
module attributes {stable_mosaic.version = 11 : i64} {
  func.func @_conv_kernel(%arg0: i32, %arg1: i32, %arg2: memref<1x36x9x4xbf16, #tpu.memory_space<vmem>>, %arg3: memref<64x8xbf16, #tpu.memory_space<vmem>>, %arg4: memref<1x8xf32, #tpu.memory_space<vmem>>, %arg5: memref<1x64x8xbf16, #tpu.memory_space<vmem>>, %arg6: memref<8x8x64xbf16, #tpu.memory_space<vmem>>) attributes {dimension_semantics = [#tpu.dimension_semantics<parallel>, #tpu.dimension_semantics<parallel>], iteration_bounds = array<i64: 2, 1>, scalar_prefetch = 0 : i64, scratch_operands = 1 : i64, tpu.core_type = #tpu.core_type<tc>, window_params = [{transform_indices = @transform_0, window_bounds = array<i64: 1, 36, 9, 4>}, {pipeline_mode = #tpu.pipeline_mode<synchronous>, transform_indices = @transform_1, window_bounds = array<i64: 64, 8>}, {pipeline_mode = #tpu.pipeline_mode<synchronous>, transform_indices = @transform_2, window_bounds = array<i64: 1, 8>}, {transform_indices = @transform_3, window_bounds = array<i64: 1, 64, 8>}]} {
    %c0 = arith.constant 0 : index
    %c0_0 = arith.constant 0 : index
    %c0_1 = arith.constant 0 : index
    %c0_2 = arith.constant 0 : index
    %0 = vector.load %arg2[%c0, %c0_0, %c0_1, %c0_2] : memref<1x36x9x4xbf16, #tpu.memory_space<vmem>>, vector<1x8x8x4xbf16>
    %1 = vector.shape_cast %0 : vector<1x8x8x4xbf16> to vector<8x8x4xbf16>
    %c0_3 = arith.constant 0 : index
    %c0_4 = arith.constant 0 : index
    %c0_5 = arith.constant 0 : index
    %2 = vector.load %arg6[%c0_3, %c0_4, %c0_5] : memref<8x8x64xbf16, #tpu.memory_space<vmem>>, vector<8x8x4xbf16>
    tpu.vector_store %arg6[%c0_3, %c0_4, %c0_5], %1 {strides = array<i32>} : memref<8x8x64xbf16, #tpu.memory_space<vmem>>, vector<8x8x4xbf16>,
    %c0_6 = arith.constant 0 : index
    %c9 = arith.constant 9 : index
    %c0_7 = arith.constant 0 : index
    %c0_8 = arith.constant 0 : index
    %3 = vector.load %arg2[%c0_6, %c9, %c0_7, %c0_8] : memref<1x36x9x4xbf16, #tpu.memory_space<vmem>>, vector<1x8x8x4xbf16>
    %4 = vector.shape_cast %3 : vector<1x8x8x4xbf16> to vector<8x8x4xbf16>
    %c0_9 = arith.constant 0 : index
    %c0_10 = arith.constant 0 : index
    %c4 = arith.constant 4 : index
    %5 = vector.load %arg6[%c0_9, %c0_10, %c4] : memref<8x8x64xbf16, #tpu.memory_space<vmem>>, vector<8x8x4xbf16>
    tpu.vector_store %arg6[%c0_9, %c0_10, %c4], %4 {strides = array<i32>} : memref<8x8x64xbf16, #tpu.memory_space<vmem>>, vector<8x8x4xbf16>,
    %c0_11 = arith.constant 0 : index
    %c0_12 = arith.constant 0 : index
    %c1 = arith.constant 1 : index
    %c0_13 = arith.constant 0 : index
    %6 = vector.load %arg2[%c0_11, %c0_12, %c1, %c0_13] : memref<1x36x9x4xbf16, #tpu.memory_space<vmem>>, vector<1x8x8x4xbf16>
    %7 = vector.shape_cast %6 : vector<1x8x8x4xbf16> to vector<8x8x4xbf16>
    %c0_14 = arith.constant 0 : index
    %c0_15 = arith.constant 0 : index
    %c8 = arith.constant 8 : index
    %8 = vector.load %arg6[%c0_14, %c0_15, %c8] : memref<8x8x64xbf16, #tpu.memory_space<vmem>>, vector<8x8x4xbf16>
    tpu.vector_store %arg6[%c0_14, %c0_15, %c8], %7 {strides = array<i32>} : memref<8x8x64xbf16, #tpu.memory_space<vmem>>, vector<8x8x4xbf16>,
    %c0_16 = arith.constant 0 : index
    %c9_17 = arith.constant 9 : index
    %c1_18 = arith.constant 1 : index
    %c0_19 = arith.constant 0 : index
    %9 = vector.load %arg2[%c0_16, %c9_17, %c1_18, %c0_19] : memref<1x36x9x4xbf16, #tpu.memory_space<vmem>>, vector<1x8x8x4xbf16>
    %10 = vector.shape_cast %9 : vector<1x8x8x4xbf16> to vector<8x8x4xbf16>
    %c0_20 = arith.constant 0 : index
    %c0_21 = arith.constant 0 : index
    %c12 = arith.constant 12 : index
    %11 = vector.load %arg6[%c0_20, %c0_21, %c12] : memref<8x8x64xbf16, #tpu.memory_space<vmem>>, vector<8x8x4xbf16>
    tpu.vector_store %arg6[%c0_20, %c0_21, %c12], %10 {strides = array<i32>} : memref<8x8x64xbf16, #tpu.memory_space<vmem>>, vector<8x8x4xbf16>,
    %c0_22 = arith.constant 0 : index
    %c18 = arith.constant 18 : index
    %c0_23 = arith.constant 0 : index
    %c0_24 = arith.constant 0 : index
    %12 = vector.load %arg2[%c0_22, %c18, %c0_23, %c0_24] : memref<1x36x9x4xbf16, #tpu.memory_space<vmem>>, vector<1x8x8x4xbf16>
    %13 = vector.shape_cast %12 : vector<1x8x8x4xbf16> to vector<8x8x4xbf16>
    %c0_25 = arith.constant 0 : index
    %c0_26 = arith.constant 0 : index
    %c16 = arith.constant 16 : index
    %14 = vector.load %arg6[%c0_25, %c0_26, %c16] : memref<8x8x64xbf16, #tpu.memory_space<vmem>>, vector<8x8x4xbf16>
    tpu.vector_store %arg6[%c0_25, %c0_26, %c16], %13 {strides = array<i32>} : memref<8x8x64xbf16, #tpu.memory_space<vmem>>, vector<8x8x4xbf16>,
    %c0_27 = arith.constant 0 : index
    %c27 = arith.constant 27 : index
    %c0_28 = arith.constant 0 : index
    %c0_29 = arith.constant 0 : index
    %15 = vector.load %arg2[%c0_27, %c27, %c0_28, %c0_29] : memref<1x36x9x4xbf16, #tpu.memory_space<vmem>>, vector<1x8x8x4xbf16>
    %16 = vector.shape_cast %15 : vector<1x8x8x4xbf16> to vector<8x8x4xbf16>
    %c0_30 = arith.constant 0 : index
    %c0_31 = arith.constant 0 : index
    %c20 = arith.constant 20 : index
    %17 = vector.load %arg6[%c0_30, %c0_31, %c20] : memref<8x8x64xbf16, #tpu.memory_space<vmem>>, vector<8x8x4xbf16>
    tpu.vector_store %arg6[%c0_30, %c0_31, %c20], %16 {strides = array<i32>} : memref<8x8x64xbf16, #tpu.memory_space<vmem>>, vector<8x8x4xbf16>,
    %c0_32 = arith.constant 0 : index
    %c18_33 = arith.constant 18 : index
    %c1_34 = arith.constant 1 : index
    %c0_35 = arith.constant 0 : index
    %18 = vector.load %arg2[%c0_32, %c18_33, %c1_34, %c0_35] : memref<1x36x9x4xbf16, #tpu.memory_space<vmem>>, vector<1x8x8x4xbf16>
    %19 = vector.shape_cast %18 : vector<1x8x8x4xbf16> to vector<8x8x4xbf16>
    %c0_36 = arith.constant 0 : index
    %c0_37 = arith.constant 0 : index
    %c24 = arith.constant 24 : index
    %20 = vector.load %arg6[%c0_36, %c0_37, %c24] : memref<8x8x64xbf16, #tpu.memory_space<vmem>>, vector<8x8x4xbf16>
    tpu.vector_store %arg6[%c0_36, %c0_37, %c24], %19 {strides = array<i32>} : memref<8x8x64xbf16, #tpu.memory_space<vmem>>, vector<8x8x4xbf16>,
    %c0_38 = arith.constant 0 : index
    %c27_39 = arith.constant 27 : index
    %c1_40 = arith.constant 1 : index
    %c0_41 = arith.constant 0 : index
    %21 = vector.load %arg2[%c0_38, %c27_39, %c1_40, %c0_41] : memref<1x36x9x4xbf16, #tpu.memory_space<vmem>>, vector<1x8x8x4xbf16>
    %22 = vector.shape_cast %21 : vector<1x8x8x4xbf16> to vector<8x8x4xbf16>
    %c0_42 = arith.constant 0 : index
    %c0_43 = arith.constant 0 : index
    %c28 = arith.constant 28 : index
    %23 = vector.load %arg6[%c0_42, %c0_43, %c28] : memref<8x8x64xbf16, #tpu.memory_space<vmem>>, vector<8x8x4xbf16>
    tpu.vector_store %arg6[%c0_42, %c0_43, %c28], %22 {strides = array<i32>} : memref<8x8x64xbf16, #tpu.memory_space<vmem>>, vector<8x8x4xbf16>,
    %c0_44 = arith.constant 0 : index
    %c1_45 = arith.constant 1 : index
    %c0_46 = arith.constant 0 : index
    %c0_47 = arith.constant 0 : index
    %24 = vector.load %arg2[%c0_44, %c1_45, %c0_46, %c0_47] : memref<1x36x9x4xbf16, #tpu.memory_space<vmem>>, vector<1x8x8x4xbf16>
    %25 = vector.shape_cast %24 : vector<1x8x8x4xbf16> to vector<8x8x4xbf16>
    %c0_48 = arith.constant 0 : index
    %c0_49 = arith.constant 0 : index
    %c32 = arith.constant 32 : index
    %26 = vector.load %arg6[%c0_48, %c0_49, %c32] : memref<8x8x64xbf16, #tpu.memory_space<vmem>>, vector<8x8x4xbf16>
    tpu.vector_store %arg6[%c0_48, %c0_49, %c32], %25 {strides = array<i32>} : memref<8x8x64xbf16, #tpu.memory_space<vmem>>, vector<8x8x4xbf16>,
    %c0_50 = arith.constant 0 : index
    %c10 = arith.constant 10 : index
    %c0_51 = arith.constant 0 : index
    %c0_52 = arith.constant 0 : index
    %27 = vector.load %arg2[%c0_50, %c10, %c0_51, %c0_52] : memref<1x36x9x4xbf16, #tpu.memory_space<vmem>>, vector<1x8x8x4xbf16>
    %28 = vector.shape_cast %27 : vector<1x8x8x4xbf16> to vector<8x8x4xbf16>
    %c0_53 = arith.constant 0 : index
    %c0_54 = arith.constant 0 : index
    %c36 = arith.constant 36 : index
    %29 = vector.load %arg6[%c0_53, %c0_54, %c36] : memref<8x8x64xbf16, #tpu.memory_space<vmem>>, vector<8x8x4xbf16>
    tpu.vector_store %arg6[%c0_53, %c0_54, %c36], %28 {strides = array<i32>} : memref<8x8x64xbf16, #tpu.memory_space<vmem>>, vector<8x8x4xbf16>,
    %c0_55 = arith.constant 0 : index
    %c1_56 = arith.constant 1 : index
    %c1_57 = arith.constant 1 : index
    %c0_58 = arith.constant 0 : index
    %30 = vector.load %arg2[%c0_55, %c1_56, %c1_57, %c0_58] : memref<1x36x9x4xbf16, #tpu.memory_space<vmem>>, vector<1x8x8x4xbf16>
    %31 = vector.shape_cast %30 : vector<1x8x8x4xbf16> to vector<8x8x4xbf16>
    %c0_59 = arith.constant 0 : index
    %c0_60 = arith.constant 0 : index
    %c40 = arith.constant 40 : index
    %32 = vector.load %arg6[%c0_59, %c0_60, %c40] : memref<8x8x64xbf16, #tpu.memory_space<vmem>>, vector<8x8x4xbf16>
    tpu.vector_store %arg6[%c0_59, %c0_60, %c40], %31 {strides = array<i32>} : memref<8x8x64xbf16, #tpu.memory_space<vmem>>, vector<8x8x4xbf16>,
    %c0_61 = arith.constant 0 : index
    %c10_62 = arith.constant 10 : index
    %c1_63 = arith.constant 1 : index
    %c0_64 = arith.constant 0 : index
    %33 = vector.load %arg2[%c0_61, %c10_62, %c1_63, %c0_64] : memref<1x36x9x4xbf16, #tpu.memory_space<vmem>>, vector<1x8x8x4xbf16>
    %34 = vector.shape_cast %33 : vector<1x8x8x4xbf16> to vector<8x8x4xbf16>
    %c0_65 = arith.constant 0 : index
    %c0_66 = arith.constant 0 : index
    %c44 = arith.constant 44 : index
    %35 = vector.load %arg6[%c0_65, %c0_66, %c44] : memref<8x8x64xbf16, #tpu.memory_space<vmem>>, vector<8x8x4xbf16>
    tpu.vector_store %arg6[%c0_65, %c0_66, %c44], %34 {strides = array<i32>} : memref<8x8x64xbf16, #tpu.memory_space<vmem>>, vector<8x8x4xbf16>,
    %c0_67 = arith.constant 0 : index
    %c19 = arith.constant 19 : index
    %c0_68 = arith.constant 0 : index
    %c0_69 = arith.constant 0 : index
    %36 = vector.load %arg2[%c0_67, %c19, %c0_68, %c0_69] : memref<1x36x9x4xbf16, #tpu.memory_space<vmem>>, vector<1x8x8x4xbf16>
    %37 = vector.shape_cast %36 : vector<1x8x8x4xbf16> to vector<8x8x4xbf16>
    %c0_70 = arith.constant 0 : index
    %c0_71 = arith.constant 0 : index
    %c48 = arith.constant 48 : index
    %38 = vector.load %arg6[%c0_70, %c0_71, %c48] : memref<8x8x64xbf16, #tpu.memory_space<vmem>>, vector<8x8x4xbf16>
    tpu.vector_store %arg6[%c0_70, %c0_71, %c48], %37 {strides = array<i32>} : memref<8x8x64xbf16, #tpu.memory_space<vmem>>, vector<8x8x4xbf16>,
    %c0_72 = arith.constant 0 : index
    %c28_73 = arith.constant 28 : index
    %c0_74 = arith.constant 0 : index
    %c0_75 = arith.constant 0 : index
    %39 = vector.load %arg2[%c0_72, %c28_73, %c0_74, %c0_75] : memref<1x36x9x4xbf16, #tpu.memory_space<vmem>>, vector<1x8x8x4xbf16>
    %40 = vector.shape_cast %39 : vector<1x8x8x4xbf16> to vector<8x8x4xbf16>
    %c0_76 = arith.constant 0 : index
    %c0_77 = arith.constant 0 : index
    %c52 = arith.constant 52 : index
    %41 = vector.load %arg6[%c0_76, %c0_77, %c52] : memref<8x8x64xbf16, #tpu.memory_space<vmem>>, vector<8x8x4xbf16>
    tpu.vector_store %arg6[%c0_76, %c0_77, %c52], %40 {strides = array<i32>} : memref<8x8x64xbf16, #tpu.memory_space<vmem>>, vector<8x8x4xbf16>,
    %c0_78 = arith.constant 0 : index
    %c19_79 = arith.constant 19 : index
    %c1_80 = arith.constant 1 : index
    %c0_81 = arith.constant 0 : index
    %42 = vector.load %arg2[%c0_78, %c19_79, %c1_80, %c0_81] : memref<1x36x9x4xbf16, #tpu.memory_space<vmem>>, vector<1x8x8x4xbf16>
    %43 = vector.shape_cast %42 : vector<1x8x8x4xbf16> to vector<8x8x4xbf16>
    %c0_82 = arith.constant 0 : index
    %c0_83 = arith.constant 0 : index
    %c56 = arith.constant 56 : index
    %44 = vector.load %arg6[%c0_82, %c0_83, %c56] : memref<8x8x64xbf16, #tpu.memory_space<vmem>>, vector<8x8x4xbf16>
    tpu.vector_store %arg6[%c0_82, %c0_83, %c56], %43 {strides = array<i32>} : memref<8x8x64xbf16, #tpu.memory_space<vmem>>, vector<8x8x4xbf16>,
    %c0_84 = arith.constant 0 : index
    %c28_85 = arith.constant 28 : index
    %c1_86 = arith.constant 1 : index
    %c0_87 = arith.constant 0 : index
    %45 = vector.load %arg2[%c0_84, %c28_85, %c1_86, %c0_87] : memref<1x36x9x4xbf16, #tpu.memory_space<vmem>>, vector<1x8x8x4xbf16>
    %46 = vector.shape_cast %45 : vector<1x8x8x4xbf16> to vector<8x8x4xbf16>
    %c0_88 = arith.constant 0 : index
    %c0_89 = arith.constant 0 : index
    %c60 = arith.constant 60 : index
    %47 = vector.load %arg6[%c0_88, %c0_89, %c60] : memref<8x8x64xbf16, #tpu.memory_space<vmem>>, vector<8x8x4xbf16>
    tpu.vector_store %arg6[%c0_88, %c0_89, %c60], %46 {strides = array<i32>} : memref<8x8x64xbf16, #tpu.memory_space<vmem>>, vector<8x8x4xbf16>,
    %c0_90 = arith.constant 0 : index
    %c0_91 = arith.constant 0 : index
    %c0_92 = arith.constant 0 : index
    %48 = vector.load %arg6[%c0_90, %c0_91, %c0_92] : memref<8x8x64xbf16, #tpu.memory_space<vmem>>, vector<8x8x64xbf16>
    %49 = vector.shape_cast %48 : vector<8x8x64xbf16> to vector<64x64xbf16>
    %c0_93 = arith.constant 0 : index
    %c0_94 = arith.constant 0 : index
    %50 = vector.load %arg3[%c0_93, %c0_94] : memref<64x8xbf16, #tpu.memory_space<vmem>>, vector<64x8xbf16>
    %cst = arith.constant dense<0.000000e+00> : vector<64x8xf32>
    %51 = tpu.matmul %49, %50, %cst {dimension_numbers = #tpu.dot_dimension_numbers<[1], [0], [0], [1], [0, 0, 1, 1], [], []>} : vector<64x64xbf16>, vector<64x8xbf16>, vector<64x8xf32> -> vector<64x8xf32>
    %c0_95 = arith.constant 0 : index
    %c0_96 = arith.constant 0 : index
    %52 = vector.load %arg4[%c0_95, %c0_96] : memref<1x8xf32, #tpu.memory_space<vmem>>, vector<1x8xf32>
    %53 = vector.broadcast %52 : vector<1x8xf32> to vector<64x8xf32>
    %54 = arith.addf %51, %53 : vector<64x8xf32>
    %cst_97 = arith.constant 0.000000e+00 : f32
    %55 = vector.broadcast %cst_97 : f32 to vector<64x8xf32>
    %56 = arith.cmpf ogt, %54, %55 : vector<64x8xf32>
    %cst_98 = arith.constant 2.000000e-01 : f32
    %57 = vector.broadcast %cst_98 : f32 to vector<64x8xf32>
    %58 = arith.mulf %57, %54 : vector<64x8xf32>
    %59 = arith.select %56, %54, %58 : vector<64x8xi1>, vector<64x8xf32>
    %60 = arith.truncf %59 : vector<64x8xf32> to vector<64x8xbf16>
    %c0_99 = arith.constant 0 : index
    %c0_100 = arith.constant 0 : index
    %c0_101 = arith.constant 0 : index
    %61 = vector.load %arg5[%c0_99, %c0_100, %c0_101] : memref<1x64x8xbf16, #tpu.memory_space<vmem>>, vector<1x64x8xbf16>
    %62 = vector.shape_cast %61 : vector<1x64x8xbf16> to vector<64x8xbf16>
    %63 = vector.shape_cast %60 : vector<64x8xbf16> to vector<1x64x8xbf16>
    tpu.vector_store %arg5[%c0_99, %c0_100, %c0_101], %63 {strides = array<i32>} : memref<1x64x8xbf16, #tpu.memory_space<vmem>>, vector<1x64x8xbf16>,
    return
  }
  func.func @transform_0(%arg0: i32, %arg1: i32) -> (i32, i32, i32, i32) {
    %c1_i32 = arith.constant 1 : i32
    %0 = arith.muli %arg0, %c1_i32 : i32
    %1 = arith.addi %0, %arg1 : i32
    %c0_i32 = arith.constant 0 : i32
    %c0_i32_0 = arith.constant 0 : i32
    %c0_i32_1 = arith.constant 0 : i32
    %c0_i32_2 = arith.constant 0 : i32
    return %1, %c0_i32, %c0_i32_0, %c0_i32_1 : i32, i32, i32, i32
  }
  func.func @transform_1(%arg0: i32, %arg1: i32) -> (i32, i32) {
    %c0_i32 = arith.constant 0 : i32
    %c0_i32_0 = arith.constant 0 : i32
    %c0_i32_1 = arith.constant 0 : i32
    return %c0_i32, %c0_i32_0 : i32, i32
  }
  func.func @transform_2(%arg0: i32, %arg1: i32) -> (i32, i32) {
    %c0_i32 = arith.constant 0 : i32
    %c0_i32_0 = arith.constant 0 : i32
    %c0_i32_1 = arith.constant 0 : i32
    return %c0_i32, %c0_i32_0 : i32, i32
  }
  func.func @transform_3(%arg0: i32, %arg1: i32) -> (i32, i32, i32) {
    %c0_i32 = arith.constant 0 : i32
    %c0_i32_0 = arith.constant 0 : i32
    return %arg0, %arg1, %c0_i32 : i32, i32, i32
  }
}

module attributes {stable_mosaic.version = 11 : i64} {
  func.func @_conv_kernel(%arg0: i32, %arg1: i32, %arg2: memref<1x20x5x8xbf16, #tpu.memory_space<vmem>>, %arg3: memref<128x16xbf16, #tpu.memory_space<vmem>>, %arg4: memref<1x16xf32, #tpu.memory_space<vmem>>, %arg5: memref<1x16x16xf32, #tpu.memory_space<vmem>>, %arg6: memref<1x1x2x16xf32, #tpu.memory_space<vmem>>, %arg7: memref<4x4x128xbf16, #tpu.memory_space<vmem>>) attributes {dimension_semantics = [#tpu.dimension_semantics<parallel>, #tpu.dimension_semantics<parallel>], iteration_bounds = array<i64: 2, 1>, scalar_prefetch = 0 : i64, scratch_operands = 1 : i64, tpu.core_type = #tpu.core_type<tc>, window_params = [{transform_indices = @transform_0, window_bounds = array<i64: 1, 20, 5, 8>}, {pipeline_mode = #tpu.pipeline_mode<synchronous>, transform_indices = @transform_1, window_bounds = array<i64: 128, 16>}, {pipeline_mode = #tpu.pipeline_mode<synchronous>, transform_indices = @transform_2, window_bounds = array<i64: 1, 16>}, {transform_indices = @transform_3, window_bounds = array<i64: 1, 16, 16>}, {transform_indices = @transform_4, window_bounds = array<i64: 1, 1, 2, 16>}]} {
    %c0 = arith.constant 0 : index
    %c0_0 = arith.constant 0 : index
    %c0_1 = arith.constant 0 : index
    %c0_2 = arith.constant 0 : index
    %0 = vector.load %arg2[%c0, %c0_0, %c0_1, %c0_2] : memref<1x20x5x8xbf16, #tpu.memory_space<vmem>>, vector<1x4x4x8xbf16>
    %1 = vector.shape_cast %0 : vector<1x4x4x8xbf16> to vector<4x4x8xbf16>
    %c0_3 = arith.constant 0 : index
    %c0_4 = arith.constant 0 : index
    %c0_5 = arith.constant 0 : index
    %2 = vector.load %arg7[%c0_3, %c0_4, %c0_5] : memref<4x4x128xbf16, #tpu.memory_space<vmem>>, vector<4x4x8xbf16>
    tpu.vector_store %arg7[%c0_3, %c0_4, %c0_5], %1 {strides = array<i32>} : memref<4x4x128xbf16, #tpu.memory_space<vmem>>, vector<4x4x8xbf16>,
    %c0_6 = arith.constant 0 : index
    %c5 = arith.constant 5 : index
    %c0_7 = arith.constant 0 : index
    %c0_8 = arith.constant 0 : index
    %3 = vector.load %arg2[%c0_6, %c5, %c0_7, %c0_8] : memref<1x20x5x8xbf16, #tpu.memory_space<vmem>>, vector<1x4x4x8xbf16>
    %4 = vector.shape_cast %3 : vector<1x4x4x8xbf16> to vector<4x4x8xbf16>
    %c0_9 = arith.constant 0 : index
    %c0_10 = arith.constant 0 : index
    %c8 = arith.constant 8 : index
    %5 = vector.load %arg7[%c0_9, %c0_10, %c8] : memref<4x4x128xbf16, #tpu.memory_space<vmem>>, vector<4x4x8xbf16>
    tpu.vector_store %arg7[%c0_9, %c0_10, %c8], %4 {strides = array<i32>} : memref<4x4x128xbf16, #tpu.memory_space<vmem>>, vector<4x4x8xbf16>,
    %c0_11 = arith.constant 0 : index
    %c0_12 = arith.constant 0 : index
    %c1 = arith.constant 1 : index
    %c0_13 = arith.constant 0 : index
    %6 = vector.load %arg2[%c0_11, %c0_12, %c1, %c0_13] : memref<1x20x5x8xbf16, #tpu.memory_space<vmem>>, vector<1x4x4x8xbf16>
    %7 = vector.shape_cast %6 : vector<1x4x4x8xbf16> to vector<4x4x8xbf16>
    %c0_14 = arith.constant 0 : index
    %c0_15 = arith.constant 0 : index
    %c16 = arith.constant 16 : index
    %8 = vector.load %arg7[%c0_14, %c0_15, %c16] : memref<4x4x128xbf16, #tpu.memory_space<vmem>>, vector<4x4x8xbf16>
    tpu.vector_store %arg7[%c0_14, %c0_15, %c16], %7 {strides = array<i32>} : memref<4x4x128xbf16, #tpu.memory_space<vmem>>, vector<4x4x8xbf16>,
    %c0_16 = arith.constant 0 : index
    %c5_17 = arith.constant 5 : index
    %c1_18 = arith.constant 1 : index
    %c0_19 = arith.constant 0 : index
    %9 = vector.load %arg2[%c0_16, %c5_17, %c1_18, %c0_19] : memref<1x20x5x8xbf16, #tpu.memory_space<vmem>>, vector<1x4x4x8xbf16>
    %10 = vector.shape_cast %9 : vector<1x4x4x8xbf16> to vector<4x4x8xbf16>
    %c0_20 = arith.constant 0 : index
    %c0_21 = arith.constant 0 : index
    %c24 = arith.constant 24 : index
    %11 = vector.load %arg7[%c0_20, %c0_21, %c24] : memref<4x4x128xbf16, #tpu.memory_space<vmem>>, vector<4x4x8xbf16>
    tpu.vector_store %arg7[%c0_20, %c0_21, %c24], %10 {strides = array<i32>} : memref<4x4x128xbf16, #tpu.memory_space<vmem>>, vector<4x4x8xbf16>,
    %c0_22 = arith.constant 0 : index
    %c10 = arith.constant 10 : index
    %c0_23 = arith.constant 0 : index
    %c0_24 = arith.constant 0 : index
    %12 = vector.load %arg2[%c0_22, %c10, %c0_23, %c0_24] : memref<1x20x5x8xbf16, #tpu.memory_space<vmem>>, vector<1x4x4x8xbf16>
    %13 = vector.shape_cast %12 : vector<1x4x4x8xbf16> to vector<4x4x8xbf16>
    %c0_25 = arith.constant 0 : index
    %c0_26 = arith.constant 0 : index
    %c32 = arith.constant 32 : index
    %14 = vector.load %arg7[%c0_25, %c0_26, %c32] : memref<4x4x128xbf16, #tpu.memory_space<vmem>>, vector<4x4x8xbf16>
    tpu.vector_store %arg7[%c0_25, %c0_26, %c32], %13 {strides = array<i32>} : memref<4x4x128xbf16, #tpu.memory_space<vmem>>, vector<4x4x8xbf16>,
    %c0_27 = arith.constant 0 : index
    %c15 = arith.constant 15 : index
    %c0_28 = arith.constant 0 : index
    %c0_29 = arith.constant 0 : index
    %15 = vector.load %arg2[%c0_27, %c15, %c0_28, %c0_29] : memref<1x20x5x8xbf16, #tpu.memory_space<vmem>>, vector<1x4x4x8xbf16>
    %16 = vector.shape_cast %15 : vector<1x4x4x8xbf16> to vector<4x4x8xbf16>
    %c0_30 = arith.constant 0 : index
    %c0_31 = arith.constant 0 : index
    %c40 = arith.constant 40 : index
    %17 = vector.load %arg7[%c0_30, %c0_31, %c40] : memref<4x4x128xbf16, #tpu.memory_space<vmem>>, vector<4x4x8xbf16>
    tpu.vector_store %arg7[%c0_30, %c0_31, %c40], %16 {strides = array<i32>} : memref<4x4x128xbf16, #tpu.memory_space<vmem>>, vector<4x4x8xbf16>,
    %c0_32 = arith.constant 0 : index
    %c10_33 = arith.constant 10 : index
    %c1_34 = arith.constant 1 : index
    %c0_35 = arith.constant 0 : index
    %18 = vector.load %arg2[%c0_32, %c10_33, %c1_34, %c0_35] : memref<1x20x5x8xbf16, #tpu.memory_space<vmem>>, vector<1x4x4x8xbf16>
    %19 = vector.shape_cast %18 : vector<1x4x4x8xbf16> to vector<4x4x8xbf16>
    %c0_36 = arith.constant 0 : index
    %c0_37 = arith.constant 0 : index
    %c48 = arith.constant 48 : index
    %20 = vector.load %arg7[%c0_36, %c0_37, %c48] : memref<4x4x128xbf16, #tpu.memory_space<vmem>>, vector<4x4x8xbf16>
    tpu.vector_store %arg7[%c0_36, %c0_37, %c48], %19 {strides = array<i32>} : memref<4x4x128xbf16, #tpu.memory_space<vmem>>, vector<4x4x8xbf16>,
    %c0_38 = arith.constant 0 : index
    %c15_39 = arith.constant 15 : index
    %c1_40 = arith.constant 1 : index
    %c0_41 = arith.constant 0 : index
    %21 = vector.load %arg2[%c0_38, %c15_39, %c1_40, %c0_41] : memref<1x20x5x8xbf16, #tpu.memory_space<vmem>>, vector<1x4x4x8xbf16>
    %22 = vector.shape_cast %21 : vector<1x4x4x8xbf16> to vector<4x4x8xbf16>
    %c0_42 = arith.constant 0 : index
    %c0_43 = arith.constant 0 : index
    %c56 = arith.constant 56 : index
    %23 = vector.load %arg7[%c0_42, %c0_43, %c56] : memref<4x4x128xbf16, #tpu.memory_space<vmem>>, vector<4x4x8xbf16>
    tpu.vector_store %arg7[%c0_42, %c0_43, %c56], %22 {strides = array<i32>} : memref<4x4x128xbf16, #tpu.memory_space<vmem>>, vector<4x4x8xbf16>,
    %c0_44 = arith.constant 0 : index
    %c1_45 = arith.constant 1 : index
    %c0_46 = arith.constant 0 : index
    %c0_47 = arith.constant 0 : index
    %24 = vector.load %arg2[%c0_44, %c1_45, %c0_46, %c0_47] : memref<1x20x5x8xbf16, #tpu.memory_space<vmem>>, vector<1x4x4x8xbf16>
    %25 = vector.shape_cast %24 : vector<1x4x4x8xbf16> to vector<4x4x8xbf16>
    %c0_48 = arith.constant 0 : index
    %c0_49 = arith.constant 0 : index
    %c64 = arith.constant 64 : index
    %26 = vector.load %arg7[%c0_48, %c0_49, %c64] : memref<4x4x128xbf16, #tpu.memory_space<vmem>>, vector<4x4x8xbf16>
    tpu.vector_store %arg7[%c0_48, %c0_49, %c64], %25 {strides = array<i32>} : memref<4x4x128xbf16, #tpu.memory_space<vmem>>, vector<4x4x8xbf16>,
    %c0_50 = arith.constant 0 : index
    %c6 = arith.constant 6 : index
    %c0_51 = arith.constant 0 : index
    %c0_52 = arith.constant 0 : index
    %27 = vector.load %arg2[%c0_50, %c6, %c0_51, %c0_52] : memref<1x20x5x8xbf16, #tpu.memory_space<vmem>>, vector<1x4x4x8xbf16>
    %28 = vector.shape_cast %27 : vector<1x4x4x8xbf16> to vector<4x4x8xbf16>
    %c0_53 = arith.constant 0 : index
    %c0_54 = arith.constant 0 : index
    %c72 = arith.constant 72 : index
    %29 = vector.load %arg7[%c0_53, %c0_54, %c72] : memref<4x4x128xbf16, #tpu.memory_space<vmem>>, vector<4x4x8xbf16>
    tpu.vector_store %arg7[%c0_53, %c0_54, %c72], %28 {strides = array<i32>} : memref<4x4x128xbf16, #tpu.memory_space<vmem>>, vector<4x4x8xbf16>,
    %c0_55 = arith.constant 0 : index
    %c1_56 = arith.constant 1 : index
    %c1_57 = arith.constant 1 : index
    %c0_58 = arith.constant 0 : index
    %30 = vector.load %arg2[%c0_55, %c1_56, %c1_57, %c0_58] : memref<1x20x5x8xbf16, #tpu.memory_space<vmem>>, vector<1x4x4x8xbf16>
    %31 = vector.shape_cast %30 : vector<1x4x4x8xbf16> to vector<4x4x8xbf16>
    %c0_59 = arith.constant 0 : index
    %c0_60 = arith.constant 0 : index
    %c80 = arith.constant 80 : index
    %32 = vector.load %arg7[%c0_59, %c0_60, %c80] : memref<4x4x128xbf16, #tpu.memory_space<vmem>>, vector<4x4x8xbf16>
    tpu.vector_store %arg7[%c0_59, %c0_60, %c80], %31 {strides = array<i32>} : memref<4x4x128xbf16, #tpu.memory_space<vmem>>, vector<4x4x8xbf16>,
    %c0_61 = arith.constant 0 : index
    %c6_62 = arith.constant 6 : index
    %c1_63 = arith.constant 1 : index
    %c0_64 = arith.constant 0 : index
    %33 = vector.load %arg2[%c0_61, %c6_62, %c1_63, %c0_64] : memref<1x20x5x8xbf16, #tpu.memory_space<vmem>>, vector<1x4x4x8xbf16>
    %34 = vector.shape_cast %33 : vector<1x4x4x8xbf16> to vector<4x4x8xbf16>
    %c0_65 = arith.constant 0 : index
    %c0_66 = arith.constant 0 : index
    %c88 = arith.constant 88 : index
    %35 = vector.load %arg7[%c0_65, %c0_66, %c88] : memref<4x4x128xbf16, #tpu.memory_space<vmem>>, vector<4x4x8xbf16>
    tpu.vector_store %arg7[%c0_65, %c0_66, %c88], %34 {strides = array<i32>} : memref<4x4x128xbf16, #tpu.memory_space<vmem>>, vector<4x4x8xbf16>,
    %c0_67 = arith.constant 0 : index
    %c11 = arith.constant 11 : index
    %c0_68 = arith.constant 0 : index
    %c0_69 = arith.constant 0 : index
    %36 = vector.load %arg2[%c0_67, %c11, %c0_68, %c0_69] : memref<1x20x5x8xbf16, #tpu.memory_space<vmem>>, vector<1x4x4x8xbf16>
    %37 = vector.shape_cast %36 : vector<1x4x4x8xbf16> to vector<4x4x8xbf16>
    %c0_70 = arith.constant 0 : index
    %c0_71 = arith.constant 0 : index
    %c96 = arith.constant 96 : index
    %38 = vector.load %arg7[%c0_70, %c0_71, %c96] : memref<4x4x128xbf16, #tpu.memory_space<vmem>>, vector<4x4x8xbf16>
    tpu.vector_store %arg7[%c0_70, %c0_71, %c96], %37 {strides = array<i32>} : memref<4x4x128xbf16, #tpu.memory_space<vmem>>, vector<4x4x8xbf16>,
    %c0_72 = arith.constant 0 : index
    %c16_73 = arith.constant 16 : index
    %c0_74 = arith.constant 0 : index
    %c0_75 = arith.constant 0 : index
    %39 = vector.load %arg2[%c0_72, %c16_73, %c0_74, %c0_75] : memref<1x20x5x8xbf16, #tpu.memory_space<vmem>>, vector<1x4x4x8xbf16>
    %40 = vector.shape_cast %39 : vector<1x4x4x8xbf16> to vector<4x4x8xbf16>
    %c0_76 = arith.constant 0 : index
    %c0_77 = arith.constant 0 : index
    %c104 = arith.constant 104 : index
    %41 = vector.load %arg7[%c0_76, %c0_77, %c104] : memref<4x4x128xbf16, #tpu.memory_space<vmem>>, vector<4x4x8xbf16>
    tpu.vector_store %arg7[%c0_76, %c0_77, %c104], %40 {strides = array<i32>} : memref<4x4x128xbf16, #tpu.memory_space<vmem>>, vector<4x4x8xbf16>,
    %c0_78 = arith.constant 0 : index
    %c11_79 = arith.constant 11 : index
    %c1_80 = arith.constant 1 : index
    %c0_81 = arith.constant 0 : index
    %42 = vector.load %arg2[%c0_78, %c11_79, %c1_80, %c0_81] : memref<1x20x5x8xbf16, #tpu.memory_space<vmem>>, vector<1x4x4x8xbf16>
    %43 = vector.shape_cast %42 : vector<1x4x4x8xbf16> to vector<4x4x8xbf16>
    %c0_82 = arith.constant 0 : index
    %c0_83 = arith.constant 0 : index
    %c112 = arith.constant 112 : index
    %44 = vector.load %arg7[%c0_82, %c0_83, %c112] : memref<4x4x128xbf16, #tpu.memory_space<vmem>>, vector<4x4x8xbf16>
    tpu.vector_store %arg7[%c0_82, %c0_83, %c112], %43 {strides = array<i32>} : memref<4x4x128xbf16, #tpu.memory_space<vmem>>, vector<4x4x8xbf16>,
    %c0_84 = arith.constant 0 : index
    %c16_85 = arith.constant 16 : index
    %c1_86 = arith.constant 1 : index
    %c0_87 = arith.constant 0 : index
    %45 = vector.load %arg2[%c0_84, %c16_85, %c1_86, %c0_87] : memref<1x20x5x8xbf16, #tpu.memory_space<vmem>>, vector<1x4x4x8xbf16>
    %46 = vector.shape_cast %45 : vector<1x4x4x8xbf16> to vector<4x4x8xbf16>
    %c0_88 = arith.constant 0 : index
    %c0_89 = arith.constant 0 : index
    %c120 = arith.constant 120 : index
    %47 = vector.load %arg7[%c0_88, %c0_89, %c120] : memref<4x4x128xbf16, #tpu.memory_space<vmem>>, vector<4x4x8xbf16>
    tpu.vector_store %arg7[%c0_88, %c0_89, %c120], %46 {strides = array<i32>} : memref<4x4x128xbf16, #tpu.memory_space<vmem>>, vector<4x4x8xbf16>,
    %c0_90 = arith.constant 0 : index
    %c0_91 = arith.constant 0 : index
    %c0_92 = arith.constant 0 : index
    %48 = vector.load %arg7[%c0_90, %c0_91, %c0_92] : memref<4x4x128xbf16, #tpu.memory_space<vmem>>, vector<4x4x128xbf16>
    %49 = vector.shape_cast %48 : vector<4x4x128xbf16> to vector<16x128xbf16>
    %c0_93 = arith.constant 0 : index
    %c0_94 = arith.constant 0 : index
    %50 = vector.load %arg3[%c0_93, %c0_94] : memref<128x16xbf16, #tpu.memory_space<vmem>>, vector<128x16xbf16>
    %cst = arith.constant dense<0.000000e+00> : vector<16x16xf32>
    %51 = tpu.matmul %49, %50, %cst {dimension_numbers = #tpu.dot_dimension_numbers<[1], [0], [0], [1], [0, 0, 1, 1], [], []>} : vector<16x128xbf16>, vector<128x16xbf16>, vector<16x16xf32> -> vector<16x16xf32>
    %c0_95 = arith.constant 0 : index
    %c0_96 = arith.constant 0 : index
    %52 = vector.load %arg4[%c0_95, %c0_96] : memref<1x16xf32, #tpu.memory_space<vmem>>, vector<1x16xf32>
    %53 = vector.broadcast %52 : vector<1x16xf32> to vector<16x16xf32>
    %54 = arith.addf %51, %53 : vector<16x16xf32>
    %cst_97 = arith.constant dense<0.000000e+00> : vector<16xf32>
    %55 = vector.multi_reduction <add>, %54, %cst_97 [0] : vector<16x16xf32> to vector<16xf32>
    %56 = vector.shape_cast %55 : vector<16xf32> to vector<1x16xf32>
    %c0_98 = arith.constant 0 : index
    %c0_99 = arith.constant 0 : index
    %c0_100 = arith.constant 0 : index
    %c0_101 = arith.constant 0 : index
    %57 = vector.load %arg6[%c0_98, %c0_99, %c0_100, %c0_101] : memref<1x1x2x16xf32, #tpu.memory_space<vmem>>, vector<1x1x1x16xf32>
    %58 = vector.shape_cast %57 : vector<1x1x1x16xf32> to vector<1x16xf32>
    %59 = vector.shape_cast %56 : vector<1x16xf32> to vector<1x1x1x16xf32>
    tpu.vector_store %arg6[%c0_98, %c0_99, %c0_100, %c0_101], %59 {strides = array<i32>} : memref<1x1x2x16xf32, #tpu.memory_space<vmem>>, vector<1x1x1x16xf32>,
    %60 = arith.mulf %54, %54 : vector<16x16xf32>
    %cst_102 = arith.constant dense<0.000000e+00> : vector<16xf32>
    %61 = vector.multi_reduction <add>, %60, %cst_102 [0] : vector<16x16xf32> to vector<16xf32>
    %62 = vector.shape_cast %61 : vector<16xf32> to vector<1x16xf32>
    %c0_103 = arith.constant 0 : index
    %c0_104 = arith.constant 0 : index
    %c1_105 = arith.constant 1 : index
    %c0_106 = arith.constant 0 : index
    %63 = vector.load %arg6[%c0_103, %c0_104, %c1_105, %c0_106] : memref<1x1x2x16xf32, #tpu.memory_space<vmem>>, vector<1x1x1x16xf32>
    %64 = vector.shape_cast %63 : vector<1x1x1x16xf32> to vector<1x16xf32>
    %65 = vector.shape_cast %62 : vector<1x16xf32> to vector<1x1x1x16xf32>
    tpu.vector_store %arg6[%c0_103, %c0_104, %c1_105, %c0_106], %65 {strides = array<i32>} : memref<1x1x2x16xf32, #tpu.memory_space<vmem>>, vector<1x1x1x16xf32>,
    %c0_107 = arith.constant 0 : index
    %c0_108 = arith.constant 0 : index
    %c0_109 = arith.constant 0 : index
    %66 = vector.load %arg5[%c0_107, %c0_108, %c0_109] : memref<1x16x16xf32, #tpu.memory_space<vmem>>, vector<1x16x16xf32>
    %67 = vector.shape_cast %66 : vector<1x16x16xf32> to vector<16x16xf32>
    %68 = vector.shape_cast %54 : vector<16x16xf32> to vector<1x16x16xf32>
    tpu.vector_store %arg5[%c0_107, %c0_108, %c0_109], %68 {strides = array<i32>} : memref<1x16x16xf32, #tpu.memory_space<vmem>>, vector<1x16x16xf32>,
    return
  }
  func.func @transform_0(%arg0: i32, %arg1: i32) -> (i32, i32, i32, i32) {
    %c1_i32 = arith.constant 1 : i32
    %0 = arith.muli %arg0, %c1_i32 : i32
    %1 = arith.addi %0, %arg1 : i32
    %c0_i32 = arith.constant 0 : i32
    %c0_i32_0 = arith.constant 0 : i32
    %c0_i32_1 = arith.constant 0 : i32
    %c0_i32_2 = arith.constant 0 : i32
    return %1, %c0_i32, %c0_i32_0, %c0_i32_1 : i32, i32, i32, i32
  }
  func.func @transform_1(%arg0: i32, %arg1: i32) -> (i32, i32) {
    %c0_i32 = arith.constant 0 : i32
    %c0_i32_0 = arith.constant 0 : i32
    %c0_i32_1 = arith.constant 0 : i32
    return %c0_i32, %c0_i32_0 : i32, i32
  }
  func.func @transform_2(%arg0: i32, %arg1: i32) -> (i32, i32) {
    %c0_i32 = arith.constant 0 : i32
    %c0_i32_0 = arith.constant 0 : i32
    %c0_i32_1 = arith.constant 0 : i32
    return %c0_i32, %c0_i32_0 : i32, i32
  }
  func.func @transform_3(%arg0: i32, %arg1: i32) -> (i32, i32, i32) {
    %c0_i32 = arith.constant 0 : i32
    %c0_i32_0 = arith.constant 0 : i32
    return %arg0, %arg1, %c0_i32 : i32, i32, i32
  }
  func.func @transform_4(%arg0: i32, %arg1: i32) -> (i32, i32, i32, i32) {
    %c0_i32 = arith.constant 0 : i32
    %c0_i32_0 = arith.constant 0 : i32
    %c0_i32_1 = arith.constant 0 : i32
    return %arg0, %arg1, %c0_i32, %c0_i32_0 : i32, i32, i32, i32
  }
}

module attributes {stable_mosaic.version = 11 : i64} {
  func.func @_norm_act_kernel(%arg0: i32, %arg1: i32, %arg2: memref<1x16x16xf32, #tpu.memory_space<vmem>>, %arg3: memref<1x2x16xf32, #tpu.memory_space<vmem>>, %arg4: memref<1x16x16xbf16, #tpu.memory_space<vmem>>) attributes {dimension_semantics = [#tpu.dimension_semantics<parallel>, #tpu.dimension_semantics<parallel>], iteration_bounds = array<i64: 2, 1>, scalar_prefetch = 0 : i64, scratch_operands = 0 : i64, tpu.core_type = #tpu.core_type<tc>, window_params = [{transform_indices = @transform_0, window_bounds = array<i64: 1, 16, 16>}, {transform_indices = @transform_1, window_bounds = array<i64: 1, 2, 16>}, {transform_indices = @transform_2, window_bounds = array<i64: 1, 16, 16>}]} {
    %c0 = arith.constant 0 : index
    %c0_0 = arith.constant 0 : index
    %c0_1 = arith.constant 0 : index
    %0 = vector.load %arg2[%c0, %c0_0, %c0_1] : memref<1x16x16xf32, #tpu.memory_space<vmem>>, vector<1x16x16xf32>
    %1 = vector.shape_cast %0 : vector<1x16x16xf32> to vector<16x16xf32>
    %c0_2 = arith.constant 0 : index
    %c0_3 = arith.constant 0 : index
    %c0_4 = arith.constant 0 : index
    %2 = vector.load %arg3[%c0_2, %c0_3, %c0_4] : memref<1x2x16xf32, #tpu.memory_space<vmem>>, vector<1x1x16xf32>
    %3 = vector.shape_cast %2 : vector<1x1x16xf32> to vector<1x16xf32>
    %4 = vector.broadcast %3 : vector<1x16xf32> to vector<16x16xf32>
    %5 = arith.subf %1, %4 : vector<16x16xf32>
    %c0_5 = arith.constant 0 : index
    %c1 = arith.constant 1 : index
    %c0_6 = arith.constant 0 : index
    %6 = vector.load %arg3[%c0_5, %c1, %c0_6] : memref<1x2x16xf32, #tpu.memory_space<vmem>>, vector<1x1x16xf32>
    %7 = vector.shape_cast %6 : vector<1x1x16xf32> to vector<1x16xf32>
    %8 = vector.broadcast %7 : vector<1x16xf32> to vector<16x16xf32>
    %9 = arith.mulf %5, %8 : vector<16x16xf32>
    %cst = arith.constant 0.000000e+00 : f32
    %10 = vector.broadcast %cst : f32 to vector<16x16xf32>
    %11 = arith.cmpf ogt, %9, %10 : vector<16x16xf32>
    %cst_7 = arith.constant 2.000000e-01 : f32
    %12 = vector.broadcast %cst_7 : f32 to vector<16x16xf32>
    %13 = arith.mulf %12, %9 : vector<16x16xf32>
    %14 = arith.select %11, %9, %13 : vector<16x16xi1>, vector<16x16xf32>
    %15 = arith.truncf %14 : vector<16x16xf32> to vector<16x16xbf16>
    %c0_8 = arith.constant 0 : index
    %c0_9 = arith.constant 0 : index
    %c0_10 = arith.constant 0 : index
    %16 = vector.load %arg4[%c0_8, %c0_9, %c0_10] : memref<1x16x16xbf16, #tpu.memory_space<vmem>>, vector<1x16x16xbf16>
    %17 = vector.shape_cast %16 : vector<1x16x16xbf16> to vector<16x16xbf16>
    %18 = vector.shape_cast %15 : vector<16x16xbf16> to vector<1x16x16xbf16>
    tpu.vector_store %arg4[%c0_8, %c0_9, %c0_10], %18 {strides = array<i32>} : memref<1x16x16xbf16, #tpu.memory_space<vmem>>, vector<1x16x16xbf16>,
    return
  }
  func.func @transform_0(%arg0: i32, %arg1: i32) -> (i32, i32, i32) {
    %c0_i32 = arith.constant 0 : i32
    %c0_i32_0 = arith.constant 0 : i32
    return %arg0, %arg1, %c0_i32 : i32, i32, i32
  }
  func.func @transform_1(%arg0: i32, %arg1: i32) -> (i32, i32, i32) {
    %c0_i32 = arith.constant 0 : i32
    %c0_i32_0 = arith.constant 0 : i32
    %c0_i32_1 = arith.constant 0 : i32
    return %arg0, %c0_i32, %c0_i32_0 : i32, i32, i32
  }
  func.func @transform_2(%arg0: i32, %arg1: i32) -> (i32, i32, i32) {
    %c0_i32 = arith.constant 0 : i32
    %c0_i32_0 = arith.constant 0 : i32
    return %arg0, %arg1, %c0_i32 : i32, i32, i32
  }
}

module attributes {stable_mosaic.version = 11 : i64} {
  func.func @_conv_kernel(%arg0: i32, %arg1: i32, %arg2: memref<1x6x6x16xbf16, #tpu.memory_space<vmem>>, %arg3: memref<256x32xbf16, #tpu.memory_space<vmem>>, %arg4: memref<1x32xf32, #tpu.memory_space<vmem>>, %arg5: memref<1x9x32xf32, #tpu.memory_space<vmem>>, %arg6: memref<1x1x2x32xf32, #tpu.memory_space<vmem>>, %arg7: memref<3x3x256xbf16, #tpu.memory_space<vmem>>) attributes {dimension_semantics = [#tpu.dimension_semantics<parallel>, #tpu.dimension_semantics<parallel>], iteration_bounds = array<i64: 2, 1>, scalar_prefetch = 0 : i64, scratch_operands = 1 : i64, tpu.core_type = #tpu.core_type<tc>, window_params = [{transform_indices = @transform_0, window_bounds = array<i64: 1, 6, 6, 16>}, {pipeline_mode = #tpu.pipeline_mode<synchronous>, transform_indices = @transform_1, window_bounds = array<i64: 256, 32>}, {pipeline_mode = #tpu.pipeline_mode<synchronous>, transform_indices = @transform_2, window_bounds = array<i64: 1, 32>}, {transform_indices = @transform_3, window_bounds = array<i64: 1, 9, 32>}, {transform_indices = @transform_4, window_bounds = array<i64: 1, 1, 2, 32>}]} {
    %c0 = arith.constant 0 : index
    %c0_0 = arith.constant 0 : index
    %c0_1 = arith.constant 0 : index
    %c0_2 = arith.constant 0 : index
    %0 = vector.load %arg2[%c0, %c0_0, %c0_1, %c0_2] : memref<1x6x6x16xbf16, #tpu.memory_space<vmem>>, vector<1x3x3x16xbf16>
    %1 = vector.shape_cast %0 : vector<1x3x3x16xbf16> to vector<3x3x16xbf16>
    %c0_3 = arith.constant 0 : index
    %c0_4 = arith.constant 0 : index
    %c0_5 = arith.constant 0 : index
    %2 = vector.load %arg7[%c0_3, %c0_4, %c0_5] : memref<3x3x256xbf16, #tpu.memory_space<vmem>>, vector<3x3x16xbf16>
    tpu.vector_store %arg7[%c0_3, %c0_4, %c0_5], %1 {strides = array<i32>} : memref<3x3x256xbf16, #tpu.memory_space<vmem>>, vector<3x3x16xbf16>,
    %c0_6 = arith.constant 0 : index
    %c0_7 = arith.constant 0 : index
    %c1 = arith.constant 1 : index
    %c0_8 = arith.constant 0 : index
    %3 = vector.load %arg2[%c0_6, %c0_7, %c1, %c0_8] : memref<1x6x6x16xbf16, #tpu.memory_space<vmem>>, vector<1x3x3x16xbf16>
    %4 = vector.shape_cast %3 : vector<1x3x3x16xbf16> to vector<3x3x16xbf16>
    %c0_9 = arith.constant 0 : index
    %c0_10 = arith.constant 0 : index
    %c16 = arith.constant 16 : index
    %5 = vector.load %arg7[%c0_9, %c0_10, %c16] : memref<3x3x256xbf16, #tpu.memory_space<vmem>>, vector<3x3x16xbf16>
    tpu.vector_store %arg7[%c0_9, %c0_10, %c16], %4 {strides = array<i32>} : memref<3x3x256xbf16, #tpu.memory_space<vmem>>, vector<3x3x16xbf16>,
    %c0_11 = arith.constant 0 : index
    %c0_12 = arith.constant 0 : index
    %c2 = arith.constant 2 : index
    %c0_13 = arith.constant 0 : index
    %6 = vector.load %arg2[%c0_11, %c0_12, %c2, %c0_13] : memref<1x6x6x16xbf16, #tpu.memory_space<vmem>>, vector<1x3x3x16xbf16>
    %7 = vector.shape_cast %6 : vector<1x3x3x16xbf16> to vector<3x3x16xbf16>
    %c0_14 = arith.constant 0 : index
    %c0_15 = arith.constant 0 : index
    %c32 = arith.constant 32 : index
    %8 = vector.load %arg7[%c0_14, %c0_15, %c32] : memref<3x3x256xbf16, #tpu.memory_space<vmem>>, vector<3x3x16xbf16>
    tpu.vector_store %arg7[%c0_14, %c0_15, %c32], %7 {strides = array<i32>} : memref<3x3x256xbf16, #tpu.memory_space<vmem>>, vector<3x3x16xbf16>,
    %c0_16 = arith.constant 0 : index
    %c0_17 = arith.constant 0 : index
    %c3 = arith.constant 3 : index
    %c0_18 = arith.constant 0 : index
    %9 = vector.load %arg2[%c0_16, %c0_17, %c3, %c0_18] : memref<1x6x6x16xbf16, #tpu.memory_space<vmem>>, vector<1x3x3x16xbf16>
    %10 = vector.shape_cast %9 : vector<1x3x3x16xbf16> to vector<3x3x16xbf16>
    %c0_19 = arith.constant 0 : index
    %c0_20 = arith.constant 0 : index
    %c48 = arith.constant 48 : index
    %11 = vector.load %arg7[%c0_19, %c0_20, %c48] : memref<3x3x256xbf16, #tpu.memory_space<vmem>>, vector<3x3x16xbf16>
    tpu.vector_store %arg7[%c0_19, %c0_20, %c48], %10 {strides = array<i32>} : memref<3x3x256xbf16, #tpu.memory_space<vmem>>, vector<3x3x16xbf16>,
    %c0_21 = arith.constant 0 : index
    %c1_22 = arith.constant 1 : index
    %c0_23 = arith.constant 0 : index
    %c0_24 = arith.constant 0 : index
    %12 = vector.load %arg2[%c0_21, %c1_22, %c0_23, %c0_24] : memref<1x6x6x16xbf16, #tpu.memory_space<vmem>>, vector<1x3x3x16xbf16>
    %13 = vector.shape_cast %12 : vector<1x3x3x16xbf16> to vector<3x3x16xbf16>
    %c0_25 = arith.constant 0 : index
    %c0_26 = arith.constant 0 : index
    %c64 = arith.constant 64 : index
    %14 = vector.load %arg7[%c0_25, %c0_26, %c64] : memref<3x3x256xbf16, #tpu.memory_space<vmem>>, vector<3x3x16xbf16>
    tpu.vector_store %arg7[%c0_25, %c0_26, %c64], %13 {strides = array<i32>} : memref<3x3x256xbf16, #tpu.memory_space<vmem>>, vector<3x3x16xbf16>,
    %c0_27 = arith.constant 0 : index
    %c1_28 = arith.constant 1 : index
    %c1_29 = arith.constant 1 : index
    %c0_30 = arith.constant 0 : index
    %15 = vector.load %arg2[%c0_27, %c1_28, %c1_29, %c0_30] : memref<1x6x6x16xbf16, #tpu.memory_space<vmem>>, vector<1x3x3x16xbf16>
    %16 = vector.shape_cast %15 : vector<1x3x3x16xbf16> to vector<3x3x16xbf16>
    %c0_31 = arith.constant 0 : index
    %c0_32 = arith.constant 0 : index
    %c80 = arith.constant 80 : index
    %17 = vector.load %arg7[%c0_31, %c0_32, %c80] : memref<3x3x256xbf16, #tpu.memory_space<vmem>>, vector<3x3x16xbf16>
    tpu.vector_store %arg7[%c0_31, %c0_32, %c80], %16 {strides = array<i32>} : memref<3x3x256xbf16, #tpu.memory_space<vmem>>, vector<3x3x16xbf16>,
    %c0_33 = arith.constant 0 : index
    %c1_34 = arith.constant 1 : index
    %c2_35 = arith.constant 2 : index
    %c0_36 = arith.constant 0 : index
    %18 = vector.load %arg2[%c0_33, %c1_34, %c2_35, %c0_36] : memref<1x6x6x16xbf16, #tpu.memory_space<vmem>>, vector<1x3x3x16xbf16>
    %19 = vector.shape_cast %18 : vector<1x3x3x16xbf16> to vector<3x3x16xbf16>
    %c0_37 = arith.constant 0 : index
    %c0_38 = arith.constant 0 : index
    %c96 = arith.constant 96 : index
    %20 = vector.load %arg7[%c0_37, %c0_38, %c96] : memref<3x3x256xbf16, #tpu.memory_space<vmem>>, vector<3x3x16xbf16>
    tpu.vector_store %arg7[%c0_37, %c0_38, %c96], %19 {strides = array<i32>} : memref<3x3x256xbf16, #tpu.memory_space<vmem>>, vector<3x3x16xbf16>,
    %c0_39 = arith.constant 0 : index
    %c1_40 = arith.constant 1 : index
    %c3_41 = arith.constant 3 : index
    %c0_42 = arith.constant 0 : index
    %21 = vector.load %arg2[%c0_39, %c1_40, %c3_41, %c0_42] : memref<1x6x6x16xbf16, #tpu.memory_space<vmem>>, vector<1x3x3x16xbf16>
    %22 = vector.shape_cast %21 : vector<1x3x3x16xbf16> to vector<3x3x16xbf16>
    %c0_43 = arith.constant 0 : index
    %c0_44 = arith.constant 0 : index
    %c112 = arith.constant 112 : index
    %23 = vector.load %arg7[%c0_43, %c0_44, %c112] : memref<3x3x256xbf16, #tpu.memory_space<vmem>>, vector<3x3x16xbf16>
    tpu.vector_store %arg7[%c0_43, %c0_44, %c112], %22 {strides = array<i32>} : memref<3x3x256xbf16, #tpu.memory_space<vmem>>, vector<3x3x16xbf16>,
    %c0_45 = arith.constant 0 : index
    %c2_46 = arith.constant 2 : index
    %c0_47 = arith.constant 0 : index
    %c0_48 = arith.constant 0 : index
    %24 = vector.load %arg2[%c0_45, %c2_46, %c0_47, %c0_48] : memref<1x6x6x16xbf16, #tpu.memory_space<vmem>>, vector<1x3x3x16xbf16>
    %25 = vector.shape_cast %24 : vector<1x3x3x16xbf16> to vector<3x3x16xbf16>
    %c0_49 = arith.constant 0 : index
    %c0_50 = arith.constant 0 : index
    %c128 = arith.constant 128 : index
    %26 = vector.load %arg7[%c0_49, %c0_50, %c128] : memref<3x3x256xbf16, #tpu.memory_space<vmem>>, vector<3x3x16xbf16>
    tpu.vector_store %arg7[%c0_49, %c0_50, %c128], %25 {strides = array<i32>} : memref<3x3x256xbf16, #tpu.memory_space<vmem>>, vector<3x3x16xbf16>,
    %c0_51 = arith.constant 0 : index
    %c2_52 = arith.constant 2 : index
    %c1_53 = arith.constant 1 : index
    %c0_54 = arith.constant 0 : index
    %27 = vector.load %arg2[%c0_51, %c2_52, %c1_53, %c0_54] : memref<1x6x6x16xbf16, #tpu.memory_space<vmem>>, vector<1x3x3x16xbf16>
    %28 = vector.shape_cast %27 : vector<1x3x3x16xbf16> to vector<3x3x16xbf16>
    %c0_55 = arith.constant 0 : index
    %c0_56 = arith.constant 0 : index
    %c144 = arith.constant 144 : index
    %29 = vector.load %arg7[%c0_55, %c0_56, %c144] : memref<3x3x256xbf16, #tpu.memory_space<vmem>>, vector<3x3x16xbf16>
    tpu.vector_store %arg7[%c0_55, %c0_56, %c144], %28 {strides = array<i32>} : memref<3x3x256xbf16, #tpu.memory_space<vmem>>, vector<3x3x16xbf16>,
    %c0_57 = arith.constant 0 : index
    %c2_58 = arith.constant 2 : index
    %c2_59 = arith.constant 2 : index
    %c0_60 = arith.constant 0 : index
    %30 = vector.load %arg2[%c0_57, %c2_58, %c2_59, %c0_60] : memref<1x6x6x16xbf16, #tpu.memory_space<vmem>>, vector<1x3x3x16xbf16>
    %31 = vector.shape_cast %30 : vector<1x3x3x16xbf16> to vector<3x3x16xbf16>
    %c0_61 = arith.constant 0 : index
    %c0_62 = arith.constant 0 : index
    %c160 = arith.constant 160 : index
    %32 = vector.load %arg7[%c0_61, %c0_62, %c160] : memref<3x3x256xbf16, #tpu.memory_space<vmem>>, vector<3x3x16xbf16>
    tpu.vector_store %arg7[%c0_61, %c0_62, %c160], %31 {strides = array<i32>} : memref<3x3x256xbf16, #tpu.memory_space<vmem>>, vector<3x3x16xbf16>,
    %c0_63 = arith.constant 0 : index
    %c2_64 = arith.constant 2 : index
    %c3_65 = arith.constant 3 : index
    %c0_66 = arith.constant 0 : index
    %33 = vector.load %arg2[%c0_63, %c2_64, %c3_65, %c0_66] : memref<1x6x6x16xbf16, #tpu.memory_space<vmem>>, vector<1x3x3x16xbf16>
    %34 = vector.shape_cast %33 : vector<1x3x3x16xbf16> to vector<3x3x16xbf16>
    %c0_67 = arith.constant 0 : index
    %c0_68 = arith.constant 0 : index
    %c176 = arith.constant 176 : index
    %35 = vector.load %arg7[%c0_67, %c0_68, %c176] : memref<3x3x256xbf16, #tpu.memory_space<vmem>>, vector<3x3x16xbf16>
    tpu.vector_store %arg7[%c0_67, %c0_68, %c176], %34 {strides = array<i32>} : memref<3x3x256xbf16, #tpu.memory_space<vmem>>, vector<3x3x16xbf16>,
    %c0_69 = arith.constant 0 : index
    %c3_70 = arith.constant 3 : index
    %c0_71 = arith.constant 0 : index
    %c0_72 = arith.constant 0 : index
    %36 = vector.load %arg2[%c0_69, %c3_70, %c0_71, %c0_72] : memref<1x6x6x16xbf16, #tpu.memory_space<vmem>>, vector<1x3x3x16xbf16>
    %37 = vector.shape_cast %36 : vector<1x3x3x16xbf16> to vector<3x3x16xbf16>
    %c0_73 = arith.constant 0 : index
    %c0_74 = arith.constant 0 : index
    %c192 = arith.constant 192 : index
    %38 = vector.load %arg7[%c0_73, %c0_74, %c192] : memref<3x3x256xbf16, #tpu.memory_space<vmem>>, vector<3x3x16xbf16>
    tpu.vector_store %arg7[%c0_73, %c0_74, %c192], %37 {strides = array<i32>} : memref<3x3x256xbf16, #tpu.memory_space<vmem>>, vector<3x3x16xbf16>,
    %c0_75 = arith.constant 0 : index
    %c3_76 = arith.constant 3 : index
    %c1_77 = arith.constant 1 : index
    %c0_78 = arith.constant 0 : index
    %39 = vector.load %arg2[%c0_75, %c3_76, %c1_77, %c0_78] : memref<1x6x6x16xbf16, #tpu.memory_space<vmem>>, vector<1x3x3x16xbf16>
    %40 = vector.shape_cast %39 : vector<1x3x3x16xbf16> to vector<3x3x16xbf16>
    %c0_79 = arith.constant 0 : index
    %c0_80 = arith.constant 0 : index
    %c208 = arith.constant 208 : index
    %41 = vector.load %arg7[%c0_79, %c0_80, %c208] : memref<3x3x256xbf16, #tpu.memory_space<vmem>>, vector<3x3x16xbf16>
    tpu.vector_store %arg7[%c0_79, %c0_80, %c208], %40 {strides = array<i32>} : memref<3x3x256xbf16, #tpu.memory_space<vmem>>, vector<3x3x16xbf16>,
    %c0_81 = arith.constant 0 : index
    %c3_82 = arith.constant 3 : index
    %c2_83 = arith.constant 2 : index
    %c0_84 = arith.constant 0 : index
    %42 = vector.load %arg2[%c0_81, %c3_82, %c2_83, %c0_84] : memref<1x6x6x16xbf16, #tpu.memory_space<vmem>>, vector<1x3x3x16xbf16>
    %43 = vector.shape_cast %42 : vector<1x3x3x16xbf16> to vector<3x3x16xbf16>
    %c0_85 = arith.constant 0 : index
    %c0_86 = arith.constant 0 : index
    %c224 = arith.constant 224 : index
    %44 = vector.load %arg7[%c0_85, %c0_86, %c224] : memref<3x3x256xbf16, #tpu.memory_space<vmem>>, vector<3x3x16xbf16>
    tpu.vector_store %arg7[%c0_85, %c0_86, %c224], %43 {strides = array<i32>} : memref<3x3x256xbf16, #tpu.memory_space<vmem>>, vector<3x3x16xbf16>,
    %c0_87 = arith.constant 0 : index
    %c3_88 = arith.constant 3 : index
    %c3_89 = arith.constant 3 : index
    %c0_90 = arith.constant 0 : index
    %45 = vector.load %arg2[%c0_87, %c3_88, %c3_89, %c0_90] : memref<1x6x6x16xbf16, #tpu.memory_space<vmem>>, vector<1x3x3x16xbf16>
    %46 = vector.shape_cast %45 : vector<1x3x3x16xbf16> to vector<3x3x16xbf16>
    %c0_91 = arith.constant 0 : index
    %c0_92 = arith.constant 0 : index
    %c240 = arith.constant 240 : index
    %47 = vector.load %arg7[%c0_91, %c0_92, %c240] : memref<3x3x256xbf16, #tpu.memory_space<vmem>>, vector<3x3x16xbf16>
    tpu.vector_store %arg7[%c0_91, %c0_92, %c240], %46 {strides = array<i32>} : memref<3x3x256xbf16, #tpu.memory_space<vmem>>, vector<3x3x16xbf16>,
    %c0_93 = arith.constant 0 : index
    %c0_94 = arith.constant 0 : index
    %c0_95 = arith.constant 0 : index
    %48 = vector.load %arg7[%c0_93, %c0_94, %c0_95] : memref<3x3x256xbf16, #tpu.memory_space<vmem>>, vector<3x3x256xbf16>
    %49 = vector.shape_cast %48 : vector<3x3x256xbf16> to vector<9x256xbf16>
    %c0_96 = arith.constant 0 : index
    %c0_97 = arith.constant 0 : index
    %50 = vector.load %arg3[%c0_96, %c0_97] : memref<256x32xbf16, #tpu.memory_space<vmem>>, vector<256x32xbf16>
    %cst = arith.constant dense<0.000000e+00> : vector<9x32xf32>
    %51 = tpu.matmul %49, %50, %cst {dimension_numbers = #tpu.dot_dimension_numbers<[1], [0], [0], [1], [0, 0, 1, 1], [], []>} : vector<9x256xbf16>, vector<256x32xbf16>, vector<9x32xf32> -> vector<9x32xf32>
    %c0_98 = arith.constant 0 : index
    %c0_99 = arith.constant 0 : index
    %52 = vector.load %arg4[%c0_98, %c0_99] : memref<1x32xf32, #tpu.memory_space<vmem>>, vector<1x32xf32>
    %53 = vector.broadcast %52 : vector<1x32xf32> to vector<9x32xf32>
    %54 = arith.addf %51, %53 : vector<9x32xf32>
    %cst_100 = arith.constant dense<0.000000e+00> : vector<32xf32>
    %55 = vector.multi_reduction <add>, %54, %cst_100 [0] : vector<9x32xf32> to vector<32xf32>
    %56 = vector.shape_cast %55 : vector<32xf32> to vector<1x32xf32>
    %c0_101 = arith.constant 0 : index
    %c0_102 = arith.constant 0 : index
    %c0_103 = arith.constant 0 : index
    %c0_104 = arith.constant 0 : index
    %57 = vector.load %arg6[%c0_101, %c0_102, %c0_103, %c0_104] : memref<1x1x2x32xf32, #tpu.memory_space<vmem>>, vector<1x1x1x32xf32>
    %58 = vector.shape_cast %57 : vector<1x1x1x32xf32> to vector<1x32xf32>
    %59 = vector.shape_cast %56 : vector<1x32xf32> to vector<1x1x1x32xf32>
    tpu.vector_store %arg6[%c0_101, %c0_102, %c0_103, %c0_104], %59 {strides = array<i32>} : memref<1x1x2x32xf32, #tpu.memory_space<vmem>>, vector<1x1x1x32xf32>,
    %60 = arith.mulf %54, %54 : vector<9x32xf32>
    %cst_105 = arith.constant dense<0.000000e+00> : vector<32xf32>
    %61 = vector.multi_reduction <add>, %60, %cst_105 [0] : vector<9x32xf32> to vector<32xf32>
    %62 = vector.shape_cast %61 : vector<32xf32> to vector<1x32xf32>
    %c0_106 = arith.constant 0 : index
    %c0_107 = arith.constant 0 : index
    %c1_108 = arith.constant 1 : index
    %c0_109 = arith.constant 0 : index
    %63 = vector.load %arg6[%c0_106, %c0_107, %c1_108, %c0_109] : memref<1x1x2x32xf32, #tpu.memory_space<vmem>>, vector<1x1x1x32xf32>
    %64 = vector.shape_cast %63 : vector<1x1x1x32xf32> to vector<1x32xf32>
    %65 = vector.shape_cast %62 : vector<1x32xf32> to vector<1x1x1x32xf32>
    tpu.vector_store %arg6[%c0_106, %c0_107, %c1_108, %c0_109], %65 {strides = array<i32>} : memref<1x1x2x32xf32, #tpu.memory_space<vmem>>, vector<1x1x1x32xf32>,
    %c0_110 = arith.constant 0 : index
    %c0_111 = arith.constant 0 : index
    %c0_112 = arith.constant 0 : index
    %66 = vector.load %arg5[%c0_110, %c0_111, %c0_112] : memref<1x9x32xf32, #tpu.memory_space<vmem>>, vector<1x9x32xf32>
    %67 = vector.shape_cast %66 : vector<1x9x32xf32> to vector<9x32xf32>
    %68 = vector.shape_cast %54 : vector<9x32xf32> to vector<1x9x32xf32>
    tpu.vector_store %arg5[%c0_110, %c0_111, %c0_112], %68 {strides = array<i32>} : memref<1x9x32xf32, #tpu.memory_space<vmem>>, vector<1x9x32xf32>,
    return
  }
  func.func @transform_0(%arg0: i32, %arg1: i32) -> (i32, i32, i32, i32) {
    %c1_i32 = arith.constant 1 : i32
    %0 = arith.muli %arg0, %c1_i32 : i32
    %1 = arith.addi %0, %arg1 : i32
    %c0_i32 = arith.constant 0 : i32
    %c0_i32_0 = arith.constant 0 : i32
    %c0_i32_1 = arith.constant 0 : i32
    %c0_i32_2 = arith.constant 0 : i32
    return %1, %c0_i32, %c0_i32_0, %c0_i32_1 : i32, i32, i32, i32
  }
  func.func @transform_1(%arg0: i32, %arg1: i32) -> (i32, i32) {
    %c0_i32 = arith.constant 0 : i32
    %c0_i32_0 = arith.constant 0 : i32
    %c0_i32_1 = arith.constant 0 : i32
    return %c0_i32, %c0_i32_0 : i32, i32
  }
  func.func @transform_2(%arg0: i32, %arg1: i32) -> (i32, i32) {
    %c0_i32 = arith.constant 0 : i32
    %c0_i32_0 = arith.constant 0 : i32
    %c0_i32_1 = arith.constant 0 : i32
    return %c0_i32, %c0_i32_0 : i32, i32
  }
  func.func @transform_3(%arg0: i32, %arg1: i32) -> (i32, i32, i32) {
    %c0_i32 = arith.constant 0 : i32
    %c0_i32_0 = arith.constant 0 : i32
    return %arg0, %arg1, %c0_i32 : i32, i32, i32
  }
  func.func @transform_4(%arg0: i32, %arg1: i32) -> (i32, i32, i32, i32) {
    %c0_i32 = arith.constant 0 : i32
    %c0_i32_0 = arith.constant 0 : i32
    %c0_i32_1 = arith.constant 0 : i32
    return %arg0, %arg1, %c0_i32, %c0_i32_0 : i32, i32, i32, i32
  }
}

module attributes {stable_mosaic.version = 11 : i64} {
  func.func @_norm_act_kernel(%arg0: i32, %arg1: i32, %arg2: memref<1x9x32xf32, #tpu.memory_space<vmem>>, %arg3: memref<1x2x32xf32, #tpu.memory_space<vmem>>, %arg4: memref<1x9x32xbf16, #tpu.memory_space<vmem>>) attributes {dimension_semantics = [#tpu.dimension_semantics<parallel>, #tpu.dimension_semantics<parallel>], iteration_bounds = array<i64: 2, 1>, scalar_prefetch = 0 : i64, scratch_operands = 0 : i64, tpu.core_type = #tpu.core_type<tc>, window_params = [{transform_indices = @transform_0, window_bounds = array<i64: 1, 9, 32>}, {transform_indices = @transform_1, window_bounds = array<i64: 1, 2, 32>}, {transform_indices = @transform_2, window_bounds = array<i64: 1, 9, 32>}]} {
    %c0 = arith.constant 0 : index
    %c0_0 = arith.constant 0 : index
    %c0_1 = arith.constant 0 : index
    %0 = vector.load %arg2[%c0, %c0_0, %c0_1] : memref<1x9x32xf32, #tpu.memory_space<vmem>>, vector<1x9x32xf32>
    %1 = vector.shape_cast %0 : vector<1x9x32xf32> to vector<9x32xf32>
    %c0_2 = arith.constant 0 : index
    %c0_3 = arith.constant 0 : index
    %c0_4 = arith.constant 0 : index
    %2 = vector.load %arg3[%c0_2, %c0_3, %c0_4] : memref<1x2x32xf32, #tpu.memory_space<vmem>>, vector<1x1x32xf32>
    %3 = vector.shape_cast %2 : vector<1x1x32xf32> to vector<1x32xf32>
    %4 = vector.broadcast %3 : vector<1x32xf32> to vector<9x32xf32>
    %5 = arith.subf %1, %4 : vector<9x32xf32>
    %c0_5 = arith.constant 0 : index
    %c1 = arith.constant 1 : index
    %c0_6 = arith.constant 0 : index
    %6 = vector.load %arg3[%c0_5, %c1, %c0_6] : memref<1x2x32xf32, #tpu.memory_space<vmem>>, vector<1x1x32xf32>
    %7 = vector.shape_cast %6 : vector<1x1x32xf32> to vector<1x32xf32>
    %8 = vector.broadcast %7 : vector<1x32xf32> to vector<9x32xf32>
    %9 = arith.mulf %5, %8 : vector<9x32xf32>
    %cst = arith.constant 0.000000e+00 : f32
    %10 = vector.broadcast %cst : f32 to vector<9x32xf32>
    %11 = arith.cmpf ogt, %9, %10 : vector<9x32xf32>
    %cst_7 = arith.constant 2.000000e-01 : f32
    %12 = vector.broadcast %cst_7 : f32 to vector<9x32xf32>
    %13 = arith.mulf %12, %9 : vector<9x32xf32>
    %14 = arith.select %11, %9, %13 : vector<9x32xi1>, vector<9x32xf32>
    %15 = arith.truncf %14 : vector<9x32xf32> to vector<9x32xbf16>
    %c0_8 = arith.constant 0 : index
    %c0_9 = arith.constant 0 : index
    %c0_10 = arith.constant 0 : index
    %16 = vector.load %arg4[%c0_8, %c0_9, %c0_10] : memref<1x9x32xbf16, #tpu.memory_space<vmem>>, vector<1x9x32xbf16>
    %17 = vector.shape_cast %16 : vector<1x9x32xbf16> to vector<9x32xbf16>
    %18 = vector.shape_cast %15 : vector<9x32xbf16> to vector<1x9x32xbf16>
    tpu.vector_store %arg4[%c0_8, %c0_9, %c0_10], %18 {strides = array<i32>} : memref<1x9x32xbf16, #tpu.memory_space<vmem>>, vector<1x9x32xbf16>,
    return
  }
  func.func @transform_0(%arg0: i32, %arg1: i32) -> (i32, i32, i32) {
    %c0_i32 = arith.constant 0 : i32
    %c0_i32_0 = arith.constant 0 : i32
    return %arg0, %arg1, %c0_i32 : i32, i32, i32
  }
  func.func @transform_1(%arg0: i32, %arg1: i32) -> (i32, i32, i32) {
    %c0_i32 = arith.constant 0 : i32
    %c0_i32_0 = arith.constant 0 : i32
    %c0_i32_1 = arith.constant 0 : i32
    return %arg0, %c0_i32, %c0_i32_0 : i32, i32, i32
  }
  func.func @transform_2(%arg0: i32, %arg1: i32) -> (i32, i32, i32) {
    %c0_i32 = arith.constant 0 : i32
    %c0_i32_0 = arith.constant 0 : i32
    return %arg0, %arg1, %c0_i32 : i32, i32, i32
  }
}

module attributes {stable_mosaic.version = 11 : i64} {
  func.func @_head_kernel(%arg0: i32, %arg1: i32, %arg2: memref<1x5x5x32xbf16, #tpu.memory_space<vmem>>, %arg3: memref<16x32xbf16, #tpu.memory_space<vmem>>, %arg4: memref<1x1xf32, #tpu.memory_space<vmem>>, %arg5: memref<1x2x2xf32, #tpu.memory_space<vmem>>) attributes {dimension_semantics = [#tpu.dimension_semantics<parallel>, #tpu.dimension_semantics<parallel>], iteration_bounds = array<i64: 2, 1>, scalar_prefetch = 0 : i64, scratch_operands = 0 : i64, tpu.core_type = #tpu.core_type<tc>, window_params = [{transform_indices = @transform_0, window_bounds = array<i64: 1, 5, 5, 32>}, {pipeline_mode = #tpu.pipeline_mode<synchronous>, transform_indices = @transform_1, window_bounds = array<i64: 16, 32>}, {pipeline_mode = #tpu.pipeline_mode<synchronous>, transform_indices = @transform_2, window_bounds = array<i64: 1, 1>}, {transform_indices = @transform_3, window_bounds = array<i64: 1, 2, 2>}]} {
    %cst = arith.constant 0.000000e+00 : f32
    %0 = vector.broadcast %cst : f32 to vector<2x2x32xf32>
    %c0 = arith.constant 0 : index
    %c0_0 = arith.constant 0 : index
    %c0_1 = arith.constant 0 : index
    %c0_2 = arith.constant 0 : index
    %1 = vector.load %arg2[%c0, %c0_0, %c0_1, %c0_2] : memref<1x5x5x32xbf16, #tpu.memory_space<vmem>>, vector<1x2x2x32xbf16>
    %2 = vector.shape_cast %1 : vector<1x2x2x32xbf16> to vector<2x2x32xbf16>
    %c0_3 = arith.constant 0 : index
    %c0_4 = arith.constant 0 : index
    %3 = vector.load %arg3[%c0_3, %c0_4] : memref<16x32xbf16, #tpu.memory_space<vmem>>, vector<1x32xbf16>
    %4 = vector.shape_cast %3 : vector<1x32xbf16> to vector<1x1x32xbf16>
    %5 = vector.broadcast %4 : vector<1x1x32xbf16> to vector<2x2x32xbf16>
    %6 = arith.mulf %2, %5 : vector<2x2x32xbf16>
    %7 = arith.extf %6 : vector<2x2x32xbf16> to vector<2x2x32xf32>
    %8 = arith.addf %0, %7 : vector<2x2x32xf32>
    %c0_5 = arith.constant 0 : index
    %c0_6 = arith.constant 0 : index
    %c1 = arith.constant 1 : index
    %c0_7 = arith.constant 0 : index
    %9 = vector.load %arg2[%c0_5, %c0_6, %c1, %c0_7] : memref<1x5x5x32xbf16, #tpu.memory_space<vmem>>, vector<1x2x2x32xbf16>
    %10 = vector.shape_cast %9 : vector<1x2x2x32xbf16> to vector<2x2x32xbf16>
    %c1_8 = arith.constant 1 : index
    %c0_9 = arith.constant 0 : index
    %11 = vector.load %arg3[%c1_8, %c0_9] : memref<16x32xbf16, #tpu.memory_space<vmem>>, vector<1x32xbf16>
    %12 = vector.shape_cast %11 : vector<1x32xbf16> to vector<1x1x32xbf16>
    %13 = vector.broadcast %12 : vector<1x1x32xbf16> to vector<2x2x32xbf16>
    %14 = arith.mulf %10, %13 : vector<2x2x32xbf16>
    %15 = arith.extf %14 : vector<2x2x32xbf16> to vector<2x2x32xf32>
    %16 = arith.addf %8, %15 : vector<2x2x32xf32>
    %c0_10 = arith.constant 0 : index
    %c0_11 = arith.constant 0 : index
    %c2 = arith.constant 2 : index
    %c0_12 = arith.constant 0 : index
    %17 = vector.load %arg2[%c0_10, %c0_11, %c2, %c0_12] : memref<1x5x5x32xbf16, #tpu.memory_space<vmem>>, vector<1x2x2x32xbf16>
    %18 = vector.shape_cast %17 : vector<1x2x2x32xbf16> to vector<2x2x32xbf16>
    %c2_13 = arith.constant 2 : index
    %c0_14 = arith.constant 0 : index
    %19 = vector.load %arg3[%c2_13, %c0_14] : memref<16x32xbf16, #tpu.memory_space<vmem>>, vector<1x32xbf16>
    %20 = vector.shape_cast %19 : vector<1x32xbf16> to vector<1x1x32xbf16>
    %21 = vector.broadcast %20 : vector<1x1x32xbf16> to vector<2x2x32xbf16>
    %22 = arith.mulf %18, %21 : vector<2x2x32xbf16>
    %23 = arith.extf %22 : vector<2x2x32xbf16> to vector<2x2x32xf32>
    %24 = arith.addf %16, %23 : vector<2x2x32xf32>
    %c0_15 = arith.constant 0 : index
    %c0_16 = arith.constant 0 : index
    %c3 = arith.constant 3 : index
    %c0_17 = arith.constant 0 : index
    %25 = vector.load %arg2[%c0_15, %c0_16, %c3, %c0_17] : memref<1x5x5x32xbf16, #tpu.memory_space<vmem>>, vector<1x2x2x32xbf16>
    %26 = vector.shape_cast %25 : vector<1x2x2x32xbf16> to vector<2x2x32xbf16>
    %c3_18 = arith.constant 3 : index
    %c0_19 = arith.constant 0 : index
    %27 = vector.load %arg3[%c3_18, %c0_19] : memref<16x32xbf16, #tpu.memory_space<vmem>>, vector<1x32xbf16>
    %28 = vector.shape_cast %27 : vector<1x32xbf16> to vector<1x1x32xbf16>
    %29 = vector.broadcast %28 : vector<1x1x32xbf16> to vector<2x2x32xbf16>
    %30 = arith.mulf %26, %29 : vector<2x2x32xbf16>
    %31 = arith.extf %30 : vector<2x2x32xbf16> to vector<2x2x32xf32>
    %32 = arith.addf %24, %31 : vector<2x2x32xf32>
    %c0_20 = arith.constant 0 : index
    %c1_21 = arith.constant 1 : index
    %c0_22 = arith.constant 0 : index
    %c0_23 = arith.constant 0 : index
    %33 = vector.load %arg2[%c0_20, %c1_21, %c0_22, %c0_23] : memref<1x5x5x32xbf16, #tpu.memory_space<vmem>>, vector<1x2x2x32xbf16>
    %34 = vector.shape_cast %33 : vector<1x2x2x32xbf16> to vector<2x2x32xbf16>
    %c4 = arith.constant 4 : index
    %c0_24 = arith.constant 0 : index
    %35 = vector.load %arg3[%c4, %c0_24] : memref<16x32xbf16, #tpu.memory_space<vmem>>, vector<1x32xbf16>
    %36 = vector.shape_cast %35 : vector<1x32xbf16> to vector<1x1x32xbf16>
    %37 = vector.broadcast %36 : vector<1x1x32xbf16> to vector<2x2x32xbf16>
    %38 = arith.mulf %34, %37 : vector<2x2x32xbf16>
    %39 = arith.extf %38 : vector<2x2x32xbf16> to vector<2x2x32xf32>
    %40 = arith.addf %32, %39 : vector<2x2x32xf32>
    %c0_25 = arith.constant 0 : index
    %c1_26 = arith.constant 1 : index
    %c1_27 = arith.constant 1 : index
    %c0_28 = arith.constant 0 : index
    %41 = vector.load %arg2[%c0_25, %c1_26, %c1_27, %c0_28] : memref<1x5x5x32xbf16, #tpu.memory_space<vmem>>, vector<1x2x2x32xbf16>
    %42 = vector.shape_cast %41 : vector<1x2x2x32xbf16> to vector<2x2x32xbf16>
    %c5 = arith.constant 5 : index
    %c0_29 = arith.constant 0 : index
    %43 = vector.load %arg3[%c5, %c0_29] : memref<16x32xbf16, #tpu.memory_space<vmem>>, vector<1x32xbf16>
    %44 = vector.shape_cast %43 : vector<1x32xbf16> to vector<1x1x32xbf16>
    %45 = vector.broadcast %44 : vector<1x1x32xbf16> to vector<2x2x32xbf16>
    %46 = arith.mulf %42, %45 : vector<2x2x32xbf16>
    %47 = arith.extf %46 : vector<2x2x32xbf16> to vector<2x2x32xf32>
    %48 = arith.addf %40, %47 : vector<2x2x32xf32>
    %c0_30 = arith.constant 0 : index
    %c1_31 = arith.constant 1 : index
    %c2_32 = arith.constant 2 : index
    %c0_33 = arith.constant 0 : index
    %49 = vector.load %arg2[%c0_30, %c1_31, %c2_32, %c0_33] : memref<1x5x5x32xbf16, #tpu.memory_space<vmem>>, vector<1x2x2x32xbf16>
    %50 = vector.shape_cast %49 : vector<1x2x2x32xbf16> to vector<2x2x32xbf16>
    %c6 = arith.constant 6 : index
    %c0_34 = arith.constant 0 : index
    %51 = vector.load %arg3[%c6, %c0_34] : memref<16x32xbf16, #tpu.memory_space<vmem>>, vector<1x32xbf16>
    %52 = vector.shape_cast %51 : vector<1x32xbf16> to vector<1x1x32xbf16>
    %53 = vector.broadcast %52 : vector<1x1x32xbf16> to vector<2x2x32xbf16>
    %54 = arith.mulf %50, %53 : vector<2x2x32xbf16>
    %55 = arith.extf %54 : vector<2x2x32xbf16> to vector<2x2x32xf32>
    %56 = arith.addf %48, %55 : vector<2x2x32xf32>
    %c0_35 = arith.constant 0 : index
    %c1_36 = arith.constant 1 : index
    %c3_37 = arith.constant 3 : index
    %c0_38 = arith.constant 0 : index
    %57 = vector.load %arg2[%c0_35, %c1_36, %c3_37, %c0_38] : memref<1x5x5x32xbf16, #tpu.memory_space<vmem>>, vector<1x2x2x32xbf16>
    %58 = vector.shape_cast %57 : vector<1x2x2x32xbf16> to vector<2x2x32xbf16>
    %c7 = arith.constant 7 : index
    %c0_39 = arith.constant 0 : index
    %59 = vector.load %arg3[%c7, %c0_39] : memref<16x32xbf16, #tpu.memory_space<vmem>>, vector<1x32xbf16>
    %60 = vector.shape_cast %59 : vector<1x32xbf16> to vector<1x1x32xbf16>
    %61 = vector.broadcast %60 : vector<1x1x32xbf16> to vector<2x2x32xbf16>
    %62 = arith.mulf %58, %61 : vector<2x2x32xbf16>
    %63 = arith.extf %62 : vector<2x2x32xbf16> to vector<2x2x32xf32>
    %64 = arith.addf %56, %63 : vector<2x2x32xf32>
    %c0_40 = arith.constant 0 : index
    %c2_41 = arith.constant 2 : index
    %c0_42 = arith.constant 0 : index
    %c0_43 = arith.constant 0 : index
    %65 = vector.load %arg2[%c0_40, %c2_41, %c0_42, %c0_43] : memref<1x5x5x32xbf16, #tpu.memory_space<vmem>>, vector<1x2x2x32xbf16>
    %66 = vector.shape_cast %65 : vector<1x2x2x32xbf16> to vector<2x2x32xbf16>
    %c8 = arith.constant 8 : index
    %c0_44 = arith.constant 0 : index
    %67 = vector.load %arg3[%c8, %c0_44] : memref<16x32xbf16, #tpu.memory_space<vmem>>, vector<1x32xbf16>
    %68 = vector.shape_cast %67 : vector<1x32xbf16> to vector<1x1x32xbf16>
    %69 = vector.broadcast %68 : vector<1x1x32xbf16> to vector<2x2x32xbf16>
    %70 = arith.mulf %66, %69 : vector<2x2x32xbf16>
    %71 = arith.extf %70 : vector<2x2x32xbf16> to vector<2x2x32xf32>
    %72 = arith.addf %64, %71 : vector<2x2x32xf32>
    %c0_45 = arith.constant 0 : index
    %c2_46 = arith.constant 2 : index
    %c1_47 = arith.constant 1 : index
    %c0_48 = arith.constant 0 : index
    %73 = vector.load %arg2[%c0_45, %c2_46, %c1_47, %c0_48] : memref<1x5x5x32xbf16, #tpu.memory_space<vmem>>, vector<1x2x2x32xbf16>
    %74 = vector.shape_cast %73 : vector<1x2x2x32xbf16> to vector<2x2x32xbf16>
    %c9 = arith.constant 9 : index
    %c0_49 = arith.constant 0 : index
    %75 = vector.load %arg3[%c9, %c0_49] : memref<16x32xbf16, #tpu.memory_space<vmem>>, vector<1x32xbf16>
    %76 = vector.shape_cast %75 : vector<1x32xbf16> to vector<1x1x32xbf16>
    %77 = vector.broadcast %76 : vector<1x1x32xbf16> to vector<2x2x32xbf16>
    %78 = arith.mulf %74, %77 : vector<2x2x32xbf16>
    %79 = arith.extf %78 : vector<2x2x32xbf16> to vector<2x2x32xf32>
    %80 = arith.addf %72, %79 : vector<2x2x32xf32>
    %c0_50 = arith.constant 0 : index
    %c2_51 = arith.constant 2 : index
    %c2_52 = arith.constant 2 : index
    %c0_53 = arith.constant 0 : index
    %81 = vector.load %arg2[%c0_50, %c2_51, %c2_52, %c0_53] : memref<1x5x5x32xbf16, #tpu.memory_space<vmem>>, vector<1x2x2x32xbf16>
    %82 = vector.shape_cast %81 : vector<1x2x2x32xbf16> to vector<2x2x32xbf16>
    %c10 = arith.constant 10 : index
    %c0_54 = arith.constant 0 : index
    %83 = vector.load %arg3[%c10, %c0_54] : memref<16x32xbf16, #tpu.memory_space<vmem>>, vector<1x32xbf16>
    %84 = vector.shape_cast %83 : vector<1x32xbf16> to vector<1x1x32xbf16>
    %85 = vector.broadcast %84 : vector<1x1x32xbf16> to vector<2x2x32xbf16>
    %86 = arith.mulf %82, %85 : vector<2x2x32xbf16>
    %87 = arith.extf %86 : vector<2x2x32xbf16> to vector<2x2x32xf32>
    %88 = arith.addf %80, %87 : vector<2x2x32xf32>
    %c0_55 = arith.constant 0 : index
    %c2_56 = arith.constant 2 : index
    %c3_57 = arith.constant 3 : index
    %c0_58 = arith.constant 0 : index
    %89 = vector.load %arg2[%c0_55, %c2_56, %c3_57, %c0_58] : memref<1x5x5x32xbf16, #tpu.memory_space<vmem>>, vector<1x2x2x32xbf16>
    %90 = vector.shape_cast %89 : vector<1x2x2x32xbf16> to vector<2x2x32xbf16>
    %c11 = arith.constant 11 : index
    %c0_59 = arith.constant 0 : index
    %91 = vector.load %arg3[%c11, %c0_59] : memref<16x32xbf16, #tpu.memory_space<vmem>>, vector<1x32xbf16>
    %92 = vector.shape_cast %91 : vector<1x32xbf16> to vector<1x1x32xbf16>
    %93 = vector.broadcast %92 : vector<1x1x32xbf16> to vector<2x2x32xbf16>
    %94 = arith.mulf %90, %93 : vector<2x2x32xbf16>
    %95 = arith.extf %94 : vector<2x2x32xbf16> to vector<2x2x32xf32>
    %96 = arith.addf %88, %95 : vector<2x2x32xf32>
    %c0_60 = arith.constant 0 : index
    %c3_61 = arith.constant 3 : index
    %c0_62 = arith.constant 0 : index
    %c0_63 = arith.constant 0 : index
    %97 = vector.load %arg2[%c0_60, %c3_61, %c0_62, %c0_63] : memref<1x5x5x32xbf16, #tpu.memory_space<vmem>>, vector<1x2x2x32xbf16>
    %98 = vector.shape_cast %97 : vector<1x2x2x32xbf16> to vector<2x2x32xbf16>
    %c12 = arith.constant 12 : index
    %c0_64 = arith.constant 0 : index
    %99 = vector.load %arg3[%c12, %c0_64] : memref<16x32xbf16, #tpu.memory_space<vmem>>, vector<1x32xbf16>
    %100 = vector.shape_cast %99 : vector<1x32xbf16> to vector<1x1x32xbf16>
    %101 = vector.broadcast %100 : vector<1x1x32xbf16> to vector<2x2x32xbf16>
    %102 = arith.mulf %98, %101 : vector<2x2x32xbf16>
    %103 = arith.extf %102 : vector<2x2x32xbf16> to vector<2x2x32xf32>
    %104 = arith.addf %96, %103 : vector<2x2x32xf32>
    %c0_65 = arith.constant 0 : index
    %c3_66 = arith.constant 3 : index
    %c1_67 = arith.constant 1 : index
    %c0_68 = arith.constant 0 : index
    %105 = vector.load %arg2[%c0_65, %c3_66, %c1_67, %c0_68] : memref<1x5x5x32xbf16, #tpu.memory_space<vmem>>, vector<1x2x2x32xbf16>
    %106 = vector.shape_cast %105 : vector<1x2x2x32xbf16> to vector<2x2x32xbf16>
    %c13 = arith.constant 13 : index
    %c0_69 = arith.constant 0 : index
    %107 = vector.load %arg3[%c13, %c0_69] : memref<16x32xbf16, #tpu.memory_space<vmem>>, vector<1x32xbf16>
    %108 = vector.shape_cast %107 : vector<1x32xbf16> to vector<1x1x32xbf16>
    %109 = vector.broadcast %108 : vector<1x1x32xbf16> to vector<2x2x32xbf16>
    %110 = arith.mulf %106, %109 : vector<2x2x32xbf16>
    %111 = arith.extf %110 : vector<2x2x32xbf16> to vector<2x2x32xf32>
    %112 = arith.addf %104, %111 : vector<2x2x32xf32>
    %c0_70 = arith.constant 0 : index
    %c3_71 = arith.constant 3 : index
    %c2_72 = arith.constant 2 : index
    %c0_73 = arith.constant 0 : index
    %113 = vector.load %arg2[%c0_70, %c3_71, %c2_72, %c0_73] : memref<1x5x5x32xbf16, #tpu.memory_space<vmem>>, vector<1x2x2x32xbf16>
    %114 = vector.shape_cast %113 : vector<1x2x2x32xbf16> to vector<2x2x32xbf16>
    %c14 = arith.constant 14 : index
    %c0_74 = arith.constant 0 : index
    %115 = vector.load %arg3[%c14, %c0_74] : memref<16x32xbf16, #tpu.memory_space<vmem>>, vector<1x32xbf16>
    %116 = vector.shape_cast %115 : vector<1x32xbf16> to vector<1x1x32xbf16>
    %117 = vector.broadcast %116 : vector<1x1x32xbf16> to vector<2x2x32xbf16>
    %118 = arith.mulf %114, %117 : vector<2x2x32xbf16>
    %119 = arith.extf %118 : vector<2x2x32xbf16> to vector<2x2x32xf32>
    %120 = arith.addf %112, %119 : vector<2x2x32xf32>
    %c0_75 = arith.constant 0 : index
    %c3_76 = arith.constant 3 : index
    %c3_77 = arith.constant 3 : index
    %c0_78 = arith.constant 0 : index
    %121 = vector.load %arg2[%c0_75, %c3_76, %c3_77, %c0_78] : memref<1x5x5x32xbf16, #tpu.memory_space<vmem>>, vector<1x2x2x32xbf16>
    %122 = vector.shape_cast %121 : vector<1x2x2x32xbf16> to vector<2x2x32xbf16>
    %c15 = arith.constant 15 : index
    %c0_79 = arith.constant 0 : index
    %123 = vector.load %arg3[%c15, %c0_79] : memref<16x32xbf16, #tpu.memory_space<vmem>>, vector<1x32xbf16>
    %124 = vector.shape_cast %123 : vector<1x32xbf16> to vector<1x1x32xbf16>
    %125 = vector.broadcast %124 : vector<1x1x32xbf16> to vector<2x2x32xbf16>
    %126 = arith.mulf %122, %125 : vector<2x2x32xbf16>
    %127 = arith.extf %126 : vector<2x2x32xbf16> to vector<2x2x32xf32>
    %128 = arith.addf %120, %127 : vector<2x2x32xf32>
    %cst_80 = arith.constant dense<0.000000e+00> : vector<2x2xf32>
    %129 = vector.multi_reduction <add>, %128, %cst_80 [2] : vector<2x2x32xf32> to vector<2x2xf32>
    %c0_81 = arith.constant 0 : index
    %c0_82 = arith.constant 0 : index
    %130 = vector.load %arg4[%c0_81, %c0_82] : memref<1x1xf32, #tpu.memory_space<vmem>>, vector<1x1xf32>
    %131 = vector.broadcast %130 : vector<1x1xf32> to vector<2x2xf32>
    %132 = arith.addf %129, %131 : vector<2x2xf32>
    %133 = arith.negf %132 : vector<2x2xf32>
    %134 = math.exp %133 : vector<2x2xf32>
    %cst_83 = arith.constant 1.000000e+00 : f32
    %135 = vector.broadcast %cst_83 : f32 to vector<2x2xf32>
    %136 = arith.addf %135, %134 : vector<2x2xf32>
    %137 = arith.divf %135, %136 : vector<2x2xf32>
    %c0_84 = arith.constant 0 : index
    %c0_85 = arith.constant 0 : index
    %c0_86 = arith.constant 0 : index
    %138 = vector.load %arg5[%c0_84, %c0_85, %c0_86] : memref<1x2x2xf32, #tpu.memory_space<vmem>>, vector<1x2x2xf32>
    %139 = vector.shape_cast %138 : vector<1x2x2xf32> to vector<2x2xf32>
    %140 = vector.shape_cast %137 : vector<2x2xf32> to vector<1x2x2xf32>
    tpu.vector_store %arg5[%c0_84, %c0_85, %c0_86], %140 {strides = array<i32>} : memref<1x2x2xf32, #tpu.memory_space<vmem>>, vector<1x2x2xf32>,
    return
  }
  func.func @transform_0(%arg0: i32, %arg1: i32) -> (i32, i32, i32, i32) {
    %c1_i32 = arith.constant 1 : i32
    %0 = arith.muli %arg0, %c1_i32 : i32
    %1 = arith.addi %0, %arg1 : i32
    %c0_i32 = arith.constant 0 : i32
    %c0_i32_0 = arith.constant 0 : i32
    %c0_i32_1 = arith.constant 0 : i32
    %c0_i32_2 = arith.constant 0 : i32
    return %1, %c0_i32, %c0_i32_0, %c0_i32_1 : i32, i32, i32, i32
  }
  func.func @transform_1(%arg0: i32, %arg1: i32) -> (i32, i32) {
    %c0_i32 = arith.constant 0 : i32
    %c0_i32_0 = arith.constant 0 : i32
    %c0_i32_1 = arith.constant 0 : i32
    return %c0_i32, %c0_i32_0 : i32, i32
  }
  func.func @transform_2(%arg0: i32, %arg1: i32) -> (i32, i32) {
    %c0_i32 = arith.constant 0 : i32
    %c0_i32_0 = arith.constant 0 : i32
    %c0_i32_1 = arith.constant 0 : i32
    return %c0_i32, %c0_i32_0 : i32, i32
  }
  func.func @transform_3(%arg0: i32, %arg1: i32) -> (i32, i32, i32) {
    %c0_i32 = arith.constant 0 : i32
    %c0_i32_0 = arith.constant 0 : i32
    return %arg0, %arg1, %c0_i32 : i32, i32, i32
  }
}

</mosaic_0001>

<bundles_post_ra>
// kernel: _lambda_.8
= control target key start
LH: loop header
LB: loop body
LE: loop exit
PB: predicated region body
PF: predicated region fallthrough
CT: control target
= control target key end

     0   :  { %s399_s9 = smov 0   ;;  %s401_s10 = smov 0   ;;  %s435_s0 = inlined_call_operand.vmem [shape: f32[2,16,16], index: 0, kind: input, shape index: {}]   ;;  %s436_s1 = inlined_call_operand.vmem [shape: f32[2,2,16], index: 1, kind: input, shape index: {}]   ;;  %s437_s2 = inlined_call_operand.vmem [shape: bf16[2,16,16], index: 2, kind: output, shape index: {}]  }
   0x1   :  { %s403_s11 = smov 0  }
   0x2 LB: > { %s24_s12 = sadd.s32 1, %s378_s10  ;;  %p324_p0 = scmp.ge.s32.totalorder %s382_s11, 1  ;;  %s382_s11 = sphi %s403_s11, %s12_s11   ;;  %s378_s10 = sphi %s401_s10, %s439_s10   ;;  %s374_s9 = sphi %s399_s9, %s438_s9  }
   0x3   : > { %p26_p1 = scmp.ge.s32.totalorder %s24_s12, 2  ;;  %p142_p2 = scmp.lt.s32.totalorder %s382_s11, 3 }
   0x5   : > { %s441_s12 = smov (%p26_p1, %s24_s12), 0  ;;  %p143_p3 = pnand %p324_p0, %p142_p2 }
   0x6   : > { %p177_p4 = scmp.lt.s32.totalorder (!%p143_p3), %s374_s9, 1 }
   0x7   : > { %146 = sbr.rel (%p143_p3) target bundleno = 28 (0x1c), region = 28 }
   0xc   : > { %s443_s9 = smov (!%p177_p4, %s374_s9), 1  ;;  %vm218_vm2 = vcmask 125952  }
   0xd   : > { %s332_s13 = sshll.u32 %s443_s9, 4  ;;  %s327_s14 = sshll.u32 %s443_s9, 1 }
   0xe   : > { %s184_s17 = scalar_lea.vmem %s435_s0, %s332_s13  ;;  %s189_s20 = scalar_lea.vmem %s436_s1, %s327_s14 }
   0xf   : > { %v200_v0 = vld [vmem:[%s184_s17] sm:$0xff]  ;;  %v201_v3 = vld [vmem:[%s184_s17 + $0x8] sm:$0xff]  ;;  %s333_s21 = sshll.u32 %s443_s9, 3 }
  0x10   : > { %v358_v1 = vld [vmem:[%s189_s20] ss:$0 sm:$0xff]  ;;  %v359_v2 = vld [vmem:[%s189_s20 + $0x1] ss:$0 sm:$0xff]  ;;  %s198_s24 = scalar_lea.vmem %s437_s2, %s333_s21 }
  0x11   : > { %v204_v4 = vsub.f32 %v200_v0, %v358_v1  ;;  %v205_v5 = vsub.f32 %v201_v3, %v358_v1 }
  0x13   : > { %v208_v6 = vmul.f32 %v359_v2, %v204_v4  ;;  %v209_v7 = vmul.f32 %v359_v2, %v205_v5 }
  0x15   : > { %vm210_vm0 = vcmp.gt.f32.partialorder %v208_v6, 0.0  ;;  %v212_v8 = vmul.f32 0.2, %v208_v6  ;;  %vm211_vm1 = vcmp.gt.f32.partialorder %v209_v7, 0.0  ;;  %v213_v9 = vmul.f32 0.2, %v209_v7 }
  0x17   : > { %v214_v10 = vsel %vm210_vm0, %v208_v6, %v212_v8  ;;  %v215_v11 = vsel %vm211_vm1, %v209_v7, %v213_v9 }
  0x18   : > { %v216_v12 = vpack.c.bf16 %v214_v10, %v214_v10  ;;  %v217_v13 = vpack.c.bf16 %v215_v11, %v215_v11 }
  0x1a   : > { %219 = vst.msk [vmem:[%s198_s24] sm:$0xf] %vm218_vm2, %v216_v12 }
  0x1b   : > { %220 = vst.msk [vmem:[%s198_s24 + $0x4] sm:$0xf] %vm218_vm2, %v217_v13 }
  0x1c PF: > { %s12_s11 = sadd.s32 1, %s382_s11   ;;  %s438_s9 = smov %s378_s10 }
  0x1d   : > { %p9_p5 = scmp.ge.s32.totalorder %s12_s11, 4   ;;  %s439_s10 = smov %s441_s12 }
  0x1f   :  { %11 = sbr.rel (!%p9_p5) target bundleno = 2 (0x2), region = 61 }

// kernel: _lambda_.7
= control target key start
LH: loop header
LB: loop body
LE: loop exit
PB: predicated region body
PF: predicated region fallthrough
CT: control target
= control target key end

     0   :  { %s1887_s15 = smov 0   ;;  %s1889_s16 = smov 0   ;;  %s2301_s0 = inlined_call_operand.vmem [shape: bf16[2,20,5,8], index: 0, kind: input, shape index: {}]   ;;  %s2302_s1 = inlined_call_operand.vmem [shape: bf16[128,16], index: 1, kind: input, shape index: {}]   ;;  %s2303_s2 = inlined_call_operand.vmem [shape: f32[1,16], index: 2, kind: input, shape index: {}]   ;;  %s2304_s3 = inlined_call_operand.vmem [shape: f32[2,16,16], index: 3, kind: output, shape index: {0}]   ;;  %s2305_s4 = inlined_call_operand.vmem [shape: f32[2,1,2,16], index: 4, kind: output, shape index: {1}]  }
   0x1   :  { %s1891_s17 = smov 0  }
   0x2 LB: > { %s27_s18 = sadd.s32 1, %s1841_s16  ;;  %p1678_p0 = scmp.ge.s32.totalorder %s1845_s17, 1  ;;  %s1845_s17 = sphi %s1891_s17, %s15_s17   ;;  %s1841_s16 = sphi %s1889_s16, %s2309_s16   ;;  %s1837_s15 = sphi %s1887_s15, %s2308_s15  }
   0x3   : > { %p29_p1 = scmp.ge.s32.totalorder %s27_s18, 2  ;;  %p185_p2 = scmp.lt.s32.totalorder %s1845_s17, 3 }
   0x5   : > { %s2311_s18 = smov (%p29_p1, %s27_s18), 0  ;;  %p186_p3 = pnand %p1678_p0, %p185_p2 }
   0x6   : > { %p224_p4 = scmp.lt.s32.totalorder (!%p186_p3), %s1837_s15, 1  ;;  %s1847_s23 = smov (!%p186_p3), 8  }
   0x7   : > { %189 = sbr.rel (%p186_p3) target bundleno = 458 (0x1ca), region = 32  ;;  %s1848_s24 = smov (!%p186_p3), 16  }
   0x8   : > { %s1849_s25 = smov (!%p186_p3), 24   ;;  %s1850_s26 = smov (!%p186_p3), 32  }
   0x9   : > { %s1851_s27 = smov (!%p186_p3), 40   ;;  %s1852_s28 = smov (!%p186_p3), 48  }
   0xa   : > { %s1853_s29 = smov (!%p186_p3), 56   ;;  %s1854_s30 = smov (!%p186_p3), 64  }
   0xb   : > { %s1855_s5 = smov (!%p186_p3), 72   ;;  %s1856_s6 = smov (!%p186_p3), 80  }
   0xc   : > { %s2313_s15 = smov (!%p224_p4, %s1837_s15), 1  ;;  %vm269_vm0 = vcmask 1041408   ;;  %vm340_vm1 = vsmask.f32 1280  ;;  %vm341_vm2 = vsmask.f32 3336 }
   0xd   : > { %s1782_s19 = smul.u32 80, %s2313_s15  ;;  %vm343_vm3 = vsmask.f32 5392  ;;  %vm345_vm4 = vsmask.f32 7448  ;;  %vm318_vm5 = vcmask 1043458   ;;  %vm342_vm6 = vmor %vm340_vm1, %vm341_vm2 }
   0xe   : > { %vm344_vm7 = vmor %vm342_vm6, %vm343_vm3  ;;  %vm251_vm9 = vcmask 58368   ;;  %s1857_s7 = smov 88   ;;  %vm298_vm10 = vcmask 123968   ;;  %vm411_vm11 = vcmask 189568   ;;  %s1858_s8 = smov 96   ;;  %vm516_vm12 = vcmask 255168  }
   0xf   : > { %s1911_s22 = scalar_lea.vmem %s2301_s0, %s1782_s19  ;;  %vm1938_vm8 = vmor %vm344_vm7, %vm345_vm4  ;;  %s1859_s9 = smov 104   ;;  %vm562_vm13 = vcmask 320768   ;;  %vm608_vm14 = vcmask 386368   ;;  %vm713_vm15 = vcmask 451968   ;;  %vm864_vm1 = vcmask 583168  }
  0x10   : > { %v1685_v0 = vld [vmem:[%s1911_s22 + $0x1c] sm:$0x3]  ;;  %v1683_v1 = vld [vmem:[%s1911_s22 + $0x14] sm:$0x3]  ;;  %v1686_v2 = vld [vmem:[%s1911_s22 + $0x20] sm:$0x3] }
  0x11   : > { %v267_v3 = vrot.slane %v1685_v0, 2  ;;  %v265_v4 = vrot.slane %v1683_v1, 2  ;;  %v268_v5 = vrot.slane %v1686_v2, 2  ;;  %v1684_v6 = vld [vmem:[%s1911_s22 + $0x18] sm:$0x3]  ;;  %s1860_s10 = smov 112  }
  0x12   : > { %v266_v7 = vrot.slane %v1684_v6, 2  ;;  %v306_v8 = vld [vmem:[%s1911_s22 + $0xc] sm:$0x7]  ;;  %v305_v9 = vld [vmem:[%s1911_s22 + $0x8] sm:$0x7]  ;;  %s1861_s11 = smov 120  }
  0x13   : > { %v280_v10 = vsel %vm269_vm0, %v1685_v0, %v267_v3  ;;  %v272_v11 = vsel %vm269_vm0, %v1683_v1, %v265_v4  ;;  %v314_v12 = vrot.slane %v306_v8, 2  ;;  %v303_v13 = vld [vmem:[%s1911_s22] sm:$0x7]  ;;  %v1689_v14 = vld [vmem:[%s1911_s22 + $0x1c] sm:$0x7]  ;;  %v284_v15 = vsel %vm269_vm0, %v1686_v2, %v268_v5  ;;  %s1682_s12 = sshll.u32 %s2313_s15, 1 }
  0x14   : > { %290 = vrot.lane.b32.xlu1 %v280_v10, %s1847_s23  ;;  %286 = vrot.lane.b32.xlu0 %v272_v11, %s1847_s23  ;;  %v276_v16 = vsel %vm269_vm0, %v1684_v6, %v266_v7  ;;  %v313_v17 = vrot.slane %v305_v9, 2  ;;  %v311_v18 = vrot.slane %v303_v13, 2  ;;  %v1688_v19 = vld [vmem:[%s1911_s22 + $0x18] sm:$0x7]  ;;  %v426_v22 = vrot.slane %v1689_v14, 2  ;;  %s246_s19 = scalar_lea.vmem %s2305_s4, %s1682_s12 }
  0x15   : > { %v336_v20 = vsel %vm269_vm0, %v306_v8, %v314_v12  ;;  %v337_v21 = vsel %vm318_vm5, %v306_v8, %v314_v12  ;;  %v425_v23 = vrot.slane %v1688_v19, 2  ;;  %v304_v60 = vld [vmem:[%s1911_s22 + $0x4] sm:$0x7]  ;;  %vm910_vm2 = vcmask 648768  }
  0x16   : > { %v339_v24 = vrot.slane %v337_v21, 2  ;;  %v386_v25 = vshrl.u32 %v336_v20, 16  ;;  %v389_v26 = vshll.u32 %v336_v20, 16  ;;  %v330_v27 = vsel %vm269_vm0, %v305_v9, %v313_v17  ;;  %v1687_v21 = vld [vmem:[%s1911_s22 + $0x14] sm:$0x7] }
  0x17   : > { %v331_v28 = vsel %vm318_vm5, %v305_v9, %v313_v17  ;;  %v373_v29 = vshrl.u32 %v330_v27, 16  ;;  %v376_v30 = vshll.u32 %v330_v27, 16  ;;  %v317_v31 = vsel %vm269_vm0, %v303_v13, %v311_v18 }
  0x18   : > { %v388_v32 = vrot.slane %v386_v25, 6  ;;  %v391_v33 = vrot.slane %v389_v26, 7  ;;  %v395_v34 = vshll.u32 %v339_v24, 16  ;;  %v333_v35 = vrot.slane %v331_v28, 2  ;;  %v1690_v24 = vld [vmem:[%s1911_s22 + $0x20] sm:$0x7] }
  0x19   : > { %v375_v36 = vrot.slane %v373_v29, 6  ;;  %v378_v37 = vrot.slane %v376_v30, 7  ;;  %v319_v38 = vsel %vm318_vm5, %v303_v13, %v311_v18  ;;  %v347_v39 = vshrl.u32 %v317_v31, 16 }
  0x1a   : > { %v392_v40 = vor.u32 %v391_v33, %v388_v32  ;;  %v397_v41 = vrot.slane %v395_v34, 7  ;;  %v382_v42 = vshll.u32 %v333_v35, 16  ;;  %v321_v43 = vrot.slane %v319_v38, 2  ;;  %v1692_v35 = vld [vmem:[%s1911_s22 + $0x2c] sm:$0x3] }
  0x1b   : > { %v379_v45 = vor.u32 %v378_v37, %v375_v36  ;;  %v349_v46 = vrot.slane %v347_v39, 6  ;;  %v350_v47 = vshll.u32 %v317_v31, 16  ;;  %v442_v48 = vsel %vm269_vm0, %v1689_v14, %v426_v22  ;;  %v1691_v38 = vld [vmem:[%s1911_s22 + $0x28] sm:$0x3] }
  0x1c   : > { %292 = vrot.lane.b32.xlu1 %v284_v15, %s1847_s23  ;;  %288 = vrot.lane.b32.xlu0 %v276_v16, %s1847_s23  ;;  %v393_v49 = vrot.slane %v392_v40, 2  ;;  %v384_v50 = vrot.slane %v382_v42, 7  ;;  %v356_v51 = vshll.u32 %v321_v43, 16  ;;  %v443_v52 = vsel %vm318_vm5, %v1689_v14, %v426_v22 }
  0x1d   : > { %v380_v53 = vrot.slane %v379_v45, 2  ;;  %v352_v54 = vrot.slane %v350_v47, 7  ;;  %v445_v55 = vrot.slane %v443_v52, 2  ;;  %v478_v56 = vshrl.u32 %v442_v48, 16 }
  0x1e   : > { %v398_v57 = vsel %vm1938_vm8, %v393_v49, %v397_v41  ;;  %v481_v58 = vshll.u32 %v442_v48, 16  ;;  %v436_v59 = vsel %vm269_vm0, %v1688_v19, %v425_v23  ;;  %v358_v62 = vrot.slane %v356_v51, 7 }
  0x1f   : > { %v353_v61 = vor.u32 %v352_v54, %v349_v46  ;;  %v480_v63 = vrot.slane %v478_v56, 6  ;;  %v487_v0 = vshll.u32 %v445_v55, 16  ;;  %v437_v2 = vsel %vm318_vm5, %v1688_v19, %v425_v23  ;;  %v1701_v54 = vld [vmem:[%s1911_s22 + $0x30] sm:$0x7] }
  0x20   : > { %v483_v1 = vrot.slane %v481_v58, 7  ;;  %v465_v3 = vshrl.u32 %v436_v59, 16  ;;  %v468_v4 = vshll.u32 %v436_v59, 16  ;;  %v385_v5 = vsel %vm1938_vm8, %v380_v53, %v384_v50 }
  0x21   : > { %v354_v6 = vrot.slane %v353_v61, 2  ;;  %v439_v7 = vrot.slane %v437_v2, 2  ;;  %v312_v8 = vrot.slane %v304_v60, 2  ;;  %v489_v10 = vrot.slane %v487_v0, 7  ;;  %v1694_v2 = vld [vmem:[%s1911_s22 + $0x34] sm:$0x3] }
  0x22   : > { %v484_v9 = vor.u32 %v483_v1, %v480_v63  ;;  %v467_v11 = vrot.slane %v465_v3, 6  ;;  %v470_v12 = vrot.slane %v468_v4, 7  ;;  %v424_v29 = vrot.slane %v1687_v21, 2  ;;  %v1695_v1 = vld [vmem:[%s1911_s22 + $0x3c] sm:$0x3] }
  0x23   : > { %v359_v13 = vsel %vm1938_vm8, %v354_v6, %v358_v62  ;;  %v474_v14 = vshll.u32 %v439_v7, 16  ;;  %v324_v15 = vsel %vm269_vm0, %v304_v60, %v312_v8  ;;  %v325_v16 = vsel %vm318_vm5, %v304_v60, %v312_v8  ;;  %v1700_v60 = vld [vmem:[%s1911_s22 + $0x2c] sm:$0x7] }
  0x24   : > { %405 = vrot.lane.b32.xlu1 %v398_v57, %s1848_s24  ;;  %403 = vrot.lane.b32.xlu0 %v385_v5, %s1848_s24  ;;  %v485_v17 = vrot.slane %v484_v9, 2  ;;  %v471_v18 = vor.u32 %v470_v12, %v467_v11  ;;  %v327_v19 = vrot.slane %v325_v16, 2  ;;  %v360_v20 = vshrl.u32 %v324_v15, 16  ;;  %v1697_v12 = vld [vmem:[%s1911_s22 + $0x44] sm:$0x3] }
  0x25   : > { %399 = vrot.lane.b32.xlu2 %v359_v13, %s1848_s24  ;;  %v476_v22 = vrot.slane %v474_v14, 7  ;;  %v363_v23 = vshll.u32 %v324_v15, 16  ;;  %v427_v32 = vrot.slane %v1690_v24, 2  ;;  %v430_v36 = vsel %vm269_vm0, %v1687_v21, %v424_v29  ;;  %v1704_v14 = vld [vmem:[%s1911_s22 + $0x40] sm:$0x7] }
  0x26   : > { %v472_v25 = vrot.slane %v471_v18, 2  ;;  %v362_v26 = vrot.slane %v360_v20, 6  ;;  %v369_v27 = vshll.u32 %v327_v19, 16  ;;  %v490_v30 = vsel %vm1938_vm8, %v485_v17, %v489_v10  ;;  %v1698_v10 = vld [vmem:[%s1911_s22 + $0x48] sm:$0x3] }
  0x27   : > { %v365_v28 = vrot.slane %v363_v23, 7  ;;  %v431_v37 = vsel %vm318_vm5, %v1687_v21, %v424_v29  ;;  %v452_v40 = vshrl.u32 %v430_v36, 16  ;;  %v455_v41 = vshll.u32 %v430_v36, 16  ;;  %v1703_v19 = vld [vmem:[%s1911_s22 + $0x3c] sm:$0x7] }
  0x28   : > { %v477_v31 = vsel %vm1938_vm8, %v472_v25, %v476_v22  ;;  %v371_v34 = vrot.slane %v369_v27, 7  ;;  %v433_v39 = vrot.slane %v431_v37, 2  ;;  %v448_v43 = vsel %vm269_vm0, %v1690_v24, %v427_v32  ;;  %v1699_v22 = vld [vmem:[%s1911_s22 + $0x28] sm:$0x7] }
  0x29   : > { %v366_v33 = vor.u32 %v365_v28, %v362_v26  ;;  %v449_v45 = vsel %vm318_vm5, %v1690_v24, %v427_v32  ;;  %v531_v46 = vrot.slane %v1692_v35, 2  ;;  %v454_v47 = vrot.slane %v452_v40, 6  ;;  %v1693_v32 = vld [vmem:[%s1911_s22 + $0x30] sm:$0x3] }
  0x2a   : > { %v457_v48 = vrot.slane %v455_v41, 7  ;;  %v461_v49 = vshll.u32 %v433_v39, 16  ;;  %v530_v51 = vrot.slane %v1691_v38, 2  ;;  %v491_v52 = vshrl.u32 %v448_v43, 16 }
  0x2b   : > { %v367_v42 = vrot.slane %v366_v33, 2  ;;  %v494_v53 = vshll.u32 %v448_v43, 16  ;;  %v451_v56 = vrot.slane %v449_v45, 2  ;;  %v623_v62 = vrot.slane %v1701_v54, 2 }
  0x2c   : > { %508 = vrot.lane.b32.xlu1 %v490_v30, %s1849_s25  ;;  %506 = vrot.lane.b32.xlu0 %v477_v31, %s1849_s25  ;;  %v458_v55 = vor.u32 %v457_v48, %v454_v47  ;;  %v463_v57 = vrot.slane %v461_v49, 7  ;;  %v493_v58 = vrot.slane %v491_v52, 6  ;;  %v540_v63 = vsel %vm269_vm0, %v1692_v35, %v531_v46  ;;  %v1706_v48 = vld [vmem:[%s1911_s22 + $0x48] sm:$0x7] }
  0x2d   : > { %v372_v50 = vsel %vm1938_vm8, %v367_v42, %v371_v34  ;;  %v496_v59 = vrot.slane %v494_v53, 7  ;;  %v536_v0 = vsel %vm269_vm0, %v1691_v38, %v530_v51  ;;  %v500_v3 = vshll.u32 %v451_v56, 16 }
  0x2e   : > { %401 = vrot.lane.b32.xlu2 %v372_v50, %s1848_s24  ;;  %v459_v61 = vrot.slane %v458_v55, 2  ;;  %v622_v4 = vrot.slane %v1700_v60, 2  ;;  %v576_v7 = vrot.slane %v1695_v1, 2  ;;  %v533_v8 = vrot.slane %v1694_v2, 2 }
  0x2f   : > { %v497_v6 = vor.u32 %v496_v59, %v493_v58  ;;  %v639_v9 = vsel %vm269_vm0, %v1701_v54, %v623_v62  ;;  %v502_v11 = vrot.slane %v500_v3, 7  ;;  %v640_v16 = vsel %vm318_vm5, %v1701_v54, %v623_v62 }
  0x30   : > { %v464_v5 = vsel %vm1938_vm8, %v459_v61, %v463_v57  ;;  %v633_v13 = vsel %vm269_vm0, %v1700_v60, %v622_v4  ;;  %v675_v17 = vshrl.u32 %v639_v9, 16  ;;  %v678_v18 = vshll.u32 %v639_v9, 16  ;;  %v1702_v57 = vld [vmem:[%s1911_s22 + $0x34] sm:$0x7] }
  0x31   : > { %v498_v15 = vrot.slane %v497_v6, 2  ;;  %v582_v20 = vsel %vm269_vm0, %v1695_v1, %v576_v7  ;;  %v548_v21 = vsel %vm269_vm0, %v1694_v2, %v533_v8  ;;  %v634_v23 = vsel %vm318_vm5, %v1700_v60, %v622_v4  ;;  %v1696_v2 = vld [vmem:[%s1911_s22 + $0x40] sm:$0x3] }
  0x32   : > { %v662_v24 = vshrl.u32 %v633_v13, 16  ;;  %v665_v25 = vshll.u32 %v633_v13, 16  ;;  %v727_v26 = vrot.slane %v1704_v14, 2  ;;  %v579_v27 = vrot.slane %v1698_v10, 2 }
  0x33   : > { %v578_v28 = vrot.slane %v1697_v12, 2  ;;  %v642_v29 = vrot.slane %v640_v16, 2  ;;  %v726_v30 = vrot.slane %v1703_v19, 2  ;;  %v503_v31 = vsel %vm1938_vm8, %v498_v15, %v502_v11 }
  0x34   : > { %552 = vrot.lane.b32.xlu1 %v540_v63, %s1850_s26  ;;  %550 = vrot.lane.b32.xlu0 %v536_v0, %s1850_s26  ;;  %v677_v33 = vrot.slane %v675_v17, 6  ;;  %v680_v34 = vrot.slane %v678_v18, 7  ;;  %v621_v35 = vrot.slane %v1699_v22, 2  ;;  %v636_v36 = vrot.slane %v634_v23, 2 }
  0x35   : > { %v664_v37 = vrot.slane %v662_v24, 6  ;;  %v667_v38 = vrot.slane %v665_v25, 7  ;;  %v738_v39 = vsel %vm269_vm0, %v1704_v14, %v727_v26  ;;  %v594_v40 = vsel %vm269_vm0, %v1698_v10, %v579_v27  ;;  %v1705_v25 = vld [vmem:[%s1911_s22 + $0x44] sm:$0x7] }
  0x36   : > { %504 = vrot.lane.b32.xlu2 %v464_v5, %s1849_s25  ;;  %v532_v41 = vrot.slane %v1693_v32, 2  ;;  %v732_v42 = vsel %vm269_vm0, %v1703_v19, %v726_v30  ;;  %v590_v43 = vsel %vm269_vm0, %v1697_v12, %v578_v28  ;;  %v681_v45 = vor.u32 %v680_v34, %v677_v33 }
  0x37   : > { %v684_v46 = vshll.u32 %v642_v29, 16  ;;  %v627_v47 = vsel %vm269_vm0, %v1699_v22, %v621_v35  ;;  %v671_v49 = vshll.u32 %v636_v36, 16  ;;  %v739_v50 = vsel %vm318_vm5, %v1704_v14, %v727_v26 }
  0x38   : > { %v767_v51 = vshrl.u32 %v738_v39, 16  ;;  %v770_v52 = vshll.u32 %v738_v39, 16  ;;  %v668_v53 = vor.u32 %v667_v38, %v664_v37  ;;  %v733_v54 = vsel %vm318_vm5, %v1703_v19, %v726_v30 }
  0x39   : > { %v754_v55 = vshrl.u32 %v732_v42, 16  ;;  %v757_v56 = vshll.u32 %v732_v42, 16  ;;  %v544_v58 = vsel %vm269_vm0, %v1693_v32, %v532_v41  ;;  %v649_v59 = vshrl.u32 %v627_v47, 16 }
  0x3a   : > { %v652_v60 = vshll.u32 %v627_v47, 16  ;;  %v729_v61 = vrot.slane %v1706_v48, 2  ;;  %v682_v62 = vrot.slane %v681_v45, 2  ;;  %v686_v63 = vrot.slane %v684_v46, 7 }
  0x3b   : > { %v741_v0 = vrot.slane %v739_v50, 2  ;;  %v628_v1 = vsel %vm318_vm5, %v1699_v22, %v621_v35  ;;  %v769_v3 = vrot.slane %v767_v51, 6  ;;  %v772_v4 = vrot.slane %v770_v52, 7 }
  0x3c   : > { %596 = vrot.lane.b32.xlu1 %v582_v20, %s1851_s27  ;;  %556 = vrot.lane.b32.xlu0 %v548_v21, %s1850_s26  ;;  %v735_v5 = vrot.slane %v733_v54, 2  ;;  %v624_v6 = vrot.slane %v1702_v57, 2  ;;  %v669_v7 = vrot.slane %v668_v53, 2  ;;  %v673_v8 = vrot.slane %v671_v49, 7  ;;  %v1707_v53 = vld [vmem:[%s1911_s22 + $0x4] sm:$0x3] }
  0x3d   : > { %v756_v9 = vrot.slane %v754_v55, 6  ;;  %v759_v10 = vrot.slane %v757_v56, 7  ;;  %v630_v11 = vrot.slane %v628_v1, 2  ;;  %v651_v12 = vrot.slane %v649_v59, 6 }
  0x3e   : > { %510 = vrot.lane.b32.xlu2 %v503_v31, %s1849_s25  ;;  %v654_v13 = vrot.slane %v652_v60, 7  ;;  %v750_v14 = vsel %vm269_vm0, %v1706_v48, %v729_v61  ;;  %v687_v15 = vsel %vm1938_vm8, %v682_v62, %v686_v63  ;;  %v577_v16 = vrot.slane %v1696_v2, 2  ;;  %v1716_v62 = vld [vmem:[%s1911_s22 + $0x8] sm:$0x7] }
  0x3f   : > { %v773_v17 = vor.u32 %v772_v4, %v769_v3  ;;  %v776_v18 = vshll.u32 %v741_v0, 16  ;;  %v763_v19 = vshll.u32 %v735_v5, 16  ;;  %v645_v20 = vsel %vm269_vm0, %v1702_v57, %v624_v6  ;;  %v1715_v4 = vld [vmem:[%s1911_s22 + $0x4] sm:$0x7] }
  0x40   : > { %v674_v21 = vsel %vm1938_vm8, %v669_v7, %v673_v8  ;;  %v760_v22 = vor.u32 %v759_v10, %v756_v9  ;;  %v793_v23 = vshrl.u32 %v750_v14, 16  ;;  %v796_v24 = vshll.u32 %v750_v14, 16  ;;  %v1710_v8 = vld [vmem:[%s1911_s22 + $0x10] sm:$0x3]  ;;  %v1709_v9 = vld [vmem:[%s1911_s22 + $0xc] sm:$0x3] }
  0x41   : > { %v655_v26 = vor.u32 %v654_v13, %v651_v12  ;;  %v658_v27 = vshll.u32 %v630_v11, 16  ;;  %v751_v28 = vsel %vm318_vm5, %v1706_v48, %v729_v61  ;;  %v586_v29 = vsel %vm269_vm0, %v1696_v2, %v577_v16 }
  0x42   : > { %v646_v30 = vsel %vm318_vm5, %v1702_v57, %v624_v6  ;;  %v688_v31 = vshrl.u32 %v645_v20, 16  ;;  %v691_v32 = vshll.u32 %v645_v20, 16  ;;  %v774_v33 = vrot.slane %v773_v17, 2  ;;  %v1719_v17 = vld [vmem:[%s1911_s22 + $0x18] sm:$0x7] }
  0x43   : > { %v778_v34 = vrot.slane %v776_v18, 7  ;;  %v765_v35 = vrot.slane %v763_v19, 7  ;;  %v728_v36 = vrot.slane %v1705_v25, 2  ;;  %v761_v37 = vrot.slane %v760_v22, 2 }
  0x44   : > { %602 = vrot.lane.b32.xlu1 %v594_v40, %s1851_s27  ;;  %600 = vrot.lane.b32.xlu0 %v590_v43, %s1851_s27  ;;  %v753_v38 = vrot.slane %v751_v28, 2  ;;  %v795_v39 = vrot.slane %v793_v23, 6  ;;  %v798_v40 = vrot.slane %v796_v24, 7  ;;  %v656_v41 = vrot.slane %v655_v26, 2  ;;  %v1713_v28 = vld [vmem:[%s1911_s22 + $0x20] sm:$0x3] }
  0x45   : > { %v660_v42 = vrot.slane %v658_v27, 7  ;;  %v648_v43 = vrot.slane %v646_v30, 2  ;;  %v690_v45 = vrot.slane %v688_v31, 6  ;;  %v693_v46 = vrot.slane %v691_v32, 7 }
  0x46   : > { %554 = vrot.lane.b32.xlu2 %v544_v58, %s1850_s26  ;;  %v744_v47 = vsel %vm269_vm0, %v1705_v25, %v728_v36  ;;  %v779_v48 = vsel %vm1938_vm8, %v774_v33, %v778_v34  ;;  %v766_v49 = vsel %vm1938_vm8, %v761_v37, %v765_v35  ;;  %v799_v50 = vor.u32 %v798_v40, %v795_v39 }
  0x47   : > { %v802_v51 = vshll.u32 %v753_v38, 16  ;;  %v661_v52 = vsel %vm1938_vm8, %v656_v41, %v660_v42  ;;  %v697_v54 = vshll.u32 %v648_v43, 16  ;;  %v694_v55 = vor.u32 %v693_v46, %v690_v45  ;;  %v1708_v41 = vld [vmem:[%s1911_s22 + $0x8] sm:$0x3] }
  0x48   : > { %v745_v56 = vsel %vm318_vm5, %v1705_v25, %v728_v36  ;;  %v780_v57 = vshrl.u32 %v744_v47, 16  ;;  %v783_v58 = vshll.u32 %v744_v47, 16  ;;  %v832_v59 = vrot.slane %v1707_v53, 2  ;;  %v249_v47 = vld [vmem:[%s1911_s22 + $0x8] sm:$0x3] }
  0x49   : > { %v800_v60 = vrot.slane %v799_v50, 2  ;;  %v804_v61 = vrot.slane %v802_v51, 7  ;;  %v747_v63 = vrot.slane %v745_v56, 2  ;;  %v695_v0 = vrot.slane %v694_v55, 2  ;;  %v1722_v51 = vld [vmem:[%s1911_s22 + $0x24] sm:$0x7] }
  0x4a   : > { %v699_v1 = vrot.slane %v697_v54, 7  ;;  %v782_v2 = vrot.slane %v780_v57, 6  ;;  %v785_v3 = vrot.slane %v783_v58, 7  ;;  %v924_v5 = vrot.slane %v1716_v62, 2  ;;  %254 = vst.msk [vmem:[#allocation2 + $0x4] sm:$0x3] %vm251_vm9, %v249_v47 }
  0x4b   : > { %v838_v6 = vsel %vm269_vm0, %v1707_v53, %v832_v59  ;;  %v805_v7 = vsel %vm1938_vm8, %v800_v60, %v804_v61  ;;  %v789_v10 = vshll.u32 %v747_v63, 16  ;;  %v923_v11 = vrot.slane %v1715_v4, 2  ;;  %v1721_v56 = vld [vmem:[%s1911_s22 + $0x20] sm:$0x7] }
  0x4c   : > { %705 = vrot.lane.b32.xlu1 %v687_v15, %s1852_s28  ;;  %703 = vrot.lane.b32.xlu0 %v674_v21, %s1852_s28  ;;  %v700_v12 = vsel %vm1938_vm8, %v695_v0, %v699_v1  ;;  %v786_v13 = vor.u32 %v785_v3, %v782_v2  ;;  %v835_v14 = vrot.slane %v1710_v8, 2  ;;  %v834_v15 = vrot.slane %v1709_v9, 2  ;;  %v1718_v21 = vld [vmem:[%s1911_s22 + $0x10] sm:$0x7]  ;;  %v1717_v1 = vld [vmem:[%s1911_s22 + $0xc] sm:$0x7] }
  0x4d   : > { %v935_v16 = vsel %vm269_vm0, %v1716_v62, %v924_v5  ;;  %v791_v18 = vrot.slane %v789_v10, 7  ;;  %v936_v19 = vsel %vm318_vm5, %v1716_v62, %v924_v5  ;;  %v929_v20 = vsel %vm269_vm0, %v1715_v4, %v923_v11 }
  0x4e   : > { %598 = vrot.lane.b32.xlu2 %v586_v29, %s1851_s27  ;;  %v787_v22 = vrot.slane %v786_v13, 2  ;;  %v964_v23 = vshrl.u32 %v935_v16, 16  ;;  %v967_v24 = vshll.u32 %v935_v16, 16  ;;  %v1028_v25 = vrot.slane %v1719_v17, 2  ;;  %v1712_v29 = vld [vmem:[%s1911_s22 + $0x1c] sm:$0x3] }
  0x4f   : > { %v850_v26 = vsel %vm269_vm0, %v1710_v8, %v835_v14  ;;  %v846_v27 = vsel %vm269_vm0, %v1709_v9, %v834_v15  ;;  %v930_v30 = vsel %vm318_vm5, %v1715_v4, %v923_v11  ;;  %v951_v31 = vshrl.u32 %v929_v20, 16  ;;  %v1711_v9 = vld [vmem:[%s1911_s22 + $0x18] sm:$0x3] }
  0x50   : > { %v954_v32 = vshll.u32 %v929_v20, 16  ;;  %v926_v33 = vrot.slane %v1718_v21, 2  ;;  %v938_v34 = vrot.slane %v936_v19, 2  ;;  %v792_v35 = vsel %vm1938_vm8, %v787_v22, %v791_v18  ;;  %v248_v22 = vld [vmem:[%s1911_s22 + $0x4] sm:$0x3] }
  0x51   : > { %v966_v36 = vrot.slane %v964_v23, 6  ;;  %v969_v37 = vrot.slane %v967_v24, 7  ;;  %v1034_v38 = vsel %vm269_vm0, %v1719_v17, %v1028_v25  ;;  %v880_v39 = vrot.slane %v1713_v28, 2  ;;  %253 = vst.msk [vmem:[#allocation2 + $0x2] sm:$0x3] %vm251_vm9, %v248_v22 }
  0x52   : > { %v879_v40 = vrot.slane %v1712_v29, 2  ;;  %v932_v42 = vrot.slane %v930_v30, 2  ;;  %v953_v43 = vrot.slane %v951_v31, 6  ;;  %v956_v45 = vrot.slane %v954_v32, 7 }
  0x53   : > { %v947_v46 = vsel %vm269_vm0, %v1718_v21, %v926_v33  ;;  %v1059_v50 = vshll.u32 %v1034_v38, 16  ;;  %v970_v53 = vor.u32 %v969_v37, %v966_v36  ;;  %v973_v54 = vshll.u32 %v938_v34, 16 }
  0x54   : > { %808 = vrot.lane.b32.xlu1 %v779_v48, %s1853_s29  ;;  %806 = vrot.lane.b32.xlu0 %v766_v49, %s1853_s29  ;;  %v247_v48 = vld [vmem:[%s1911_s22] sm:$0x3]  ;;  %v1056_v49 = vshrl.u32 %v1034_v38, 16  ;;  %v1035_v55 = vsel %vm318_vm5, %v1719_v17, %v1028_v25  ;;  %v892_v57 = vsel %vm269_vm0, %v1713_v28, %v880_v39  ;;  %v948_v58 = vsel %vm318_vm5, %v1718_v21, %v926_v33  ;;  %v250_v21 = vld [vmem:[%s1911_s22 + $0xc] sm:$0x3] }
  0x55   : > { %252 = vst.msk [vmem:[#allocation2] sm:$0x3] %vm251_vm9, %v247_v48  ;;  %v990_v59 = vshrl.u32 %v947_v46, 16  ;;  %v993_v60 = vshll.u32 %v947_v46, 16  ;;  %v888_v61 = vsel %vm269_vm0, %v1712_v29, %v879_v40  ;;  %v957_v62 = vor.u32 %v956_v45, %v953_v43  ;;  %v1720_v29 = vld [vmem:[%s1911_s22 + $0x1c] sm:$0x7] }
  0x56   : > { %701 = vrot.lane.b32.xlu2 %v661_v52, %s1852_s28  ;;  %v833_v52 = vrot.slane %v1708_v41, 2  ;;  %v960_v63 = vshll.u32 %v932_v42, 16  ;;  %v1031_v0 = vrot.slane %v1722_v51, 2  ;;  %v1037_v2 = vrot.slane %v1035_v55, 2  ;;  %255 = vst.msk [vmem:[#allocation2 + $0x6] sm:$0x3] %vm251_vm9, %v250_v21 }
  0x57   : > { %v1058_v3 = vrot.slane %v1056_v49, 6  ;;  %v1061_v4 = vrot.slane %v1059_v50, 7  ;;  %v1030_v5 = vrot.slane %v1721_v56, 2  ;;  %v975_v8 = vrot.slane %v973_v54, 7  ;;  %v1714_v38 = vld [vmem:[%s1911_s22 + $0x24] sm:$0x3] }
  0x58   : > { %v950_v10 = vrot.slane %v948_v58, 2  ;;  %v992_v11 = vrot.slane %v990_v59, 6  ;;  %v925_v13 = vrot.slane %v1717_v1, 2  ;;  %v958_v14 = vrot.slane %v957_v62, 2 }
  0x59   : > { %v962_v15 = vrot.slane %v960_v63, 7  ;;  %v1052_v16 = vsel %vm269_vm0, %v1722_v51, %v1031_v0  ;;  %v878_v17 = vrot.slane %v1711_v9, 2  ;;  %v1062_v18 = vor.u32 %v1061_v4, %v1058_v3 }
  0x5a   : > { %v1065_v19 = vshll.u32 %v1037_v2, 16  ;;  %v1046_v20 = vsel %vm269_vm0, %v1721_v56, %v1030_v5  ;;  %v999_v24 = vshll.u32 %v950_v10, 16  ;;  %v941_v28 = vsel %vm269_vm0, %v1717_v1, %v925_v13 }
  0x5b   : > { %v963_v30 = vsel %vm1938_vm8, %v958_v14, %v962_v15  ;;  %v1098_v31 = vshll.u32 %v1052_v16, 16  ;;  %v1082_v32 = vshrl.u32 %v1046_v20, 16  ;;  %v1085_v33 = vshll.u32 %v1046_v20, 16  ;;  %v1724_v20 = vld [vmem:[%s1911_s22 + $0x30] sm:$0x3] }
  0x5c   : > { %852 = vrot.lane.b32.xlu1 %v838_v6, %s1854_s30  ;;  %812 = vrot.lane.b32.xlu0 %v805_v7, %s1853_s29  ;;  %v842_v6 = vsel %vm269_vm0, %v1708_v41, %v833_v52  ;;  %v971_v7 = vrot.slane %v970_v53, 2  ;;  %v884_v34 = vsel %vm269_vm0, %v1711_v9, %v878_v17  ;;  %v1067_v36 = vrot.slane %v1065_v19, 7  ;;  %v1731_v9 = vld [vmem:[%s1911_s22 + $0x2c] sm:$0x7]  ;;  %v1725_v19 = vld [vmem:[%s1911_s22 + $0x34] sm:$0x3] }
  0x5d   : > { %v1047_v37 = vsel %vm318_vm5, %v1721_v56, %v1030_v5  ;;  %v977_v40 = vshrl.u32 %v941_v28, 16  ;;  %v980_v41 = vshll.u32 %v941_v28, 16  ;;  %v1029_v42 = vrot.slane %v1720_v29, 2 }
  0x5e   : > { %707 = vrot.lane.b32.xlu2 %v700_v12, %s1852_s28  ;;  %v995_v12 = vrot.slane %v993_v60, 7  ;;  %v976_v23 = vsel %vm1938_vm8, %v971_v7, %v975_v8  ;;  %v1001_v45 = vrot.slane %v999_v24, 7  ;;  %v942_v47 = vsel %vm318_vm5, %v1717_v1, %v925_v13 }
  0x5f   : > { %v1100_v48 = vrot.slane %v1098_v31, 7  ;;  %v1049_v49 = vrot.slane %v1047_v37, 2  ;;  %v1084_v50 = vrot.slane %v1082_v32, 6  ;;  %v881_v52 = vrot.slane %v1714_v38, 2  ;;  %v1733_v32 = vld [vmem:[%s1911_s22 + $0x34] sm:$0x7] }
  0x60   : > { %v996_v25 = vor.u32 %v995_v12, %v992_v11  ;;  %v944_v53 = vrot.slane %v942_v47, 2  ;;  %v979_v54 = vrot.slane %v977_v40, 6  ;;  %v982_v55 = vrot.slane %v980_v41, 7 }
  0x61   : > { %v1040_v56 = vsel %vm269_vm0, %v1720_v29, %v1029_v42  ;;  %v1091_v62 = vshll.u32 %v1049_v49, 16  ;;  %v896_v1 = vsel %vm269_vm0, %v1714_v38, %v881_v52  ;;  %v1041_v4 = vsel %vm318_vm5, %v1720_v29, %v1029_v42  ;;  %v1728_v42 = vld [vmem:[%s1911_s22 + $0x44] sm:$0x3]  ;;  %v1723_v49 = vld [vmem:[%s1911_s22 + $0x2c] sm:$0x3] }
  0x62   : > { %v997_v43 = vrot.slane %v996_v25, 2  ;;  %v1069_v63 = vshrl.u32 %v1040_v56, 16  ;;  %v983_v2 = vor.u32 %v982_v55, %v979_v54  ;;  %v986_v3 = vshll.u32 %v944_v53, 16  ;;  %v1734_v25 = vld [vmem:[%s1911_s22 + $0x38] sm:$0x7] }
  0x63   : > { %v1093_v8 = vrot.slane %v1091_v62, 7  ;;  %v1043_v10 = vrot.slane %v1041_v4, 2  ;;  %v1227_v40 = vrot.slane %v1733_v32, 2  ;;  %v1736_v62 = vld [vmem:[%s1911_s22 + $0x44] sm:$0x7]  ;;  %vm1015_vm3 = vcmask 714368  }
  0x64   : > { %858 = vrot.lane.b32.xlu1 %v850_v26, %s1854_s30  ;;  %856 = vrot.lane.b32.xlu0 %v846_v27, %s1854_s30  ;;  %v1053_v26 = vsel %vm318_vm5, %v1722_v51, %v1031_v0  ;;  %v1095_v27 = vshrl.u32 %v1052_v16, 16  ;;  %v1087_v51 = vrot.slane %v1085_v33, 7  ;;  %v1002_v59 = vsel %vm1938_vm8, %v997_v43, %v1001_v45  ;;  %v1727_v43 = vld [vmem:[%s1911_s22 + $0x40] sm:$0x3] }
  0x65   : > { %v1055_v39 = vrot.slane %v1053_v26, 2  ;;  %v1072_v0 = vshll.u32 %v1040_v56, 16  ;;  %v1071_v11 = vrot.slane %v1069_v63, 6  ;;  %v984_v14 = vrot.slane %v983_v2, 2 }
  0x66   : > { %810 = vrot.lane.b32.xlu2 %v792_v35, %s1853_s29  ;;  %v1063_v35 = vrot.slane %v1062_v18, 2  ;;  %v1097_v46 = vrot.slane %v1095_v27, 6  ;;  %v988_v15 = vrot.slane %v986_v3, 7  ;;  %v1225_v16 = vrot.slane %v1731_v9, 2 }
  0x67   : > { %v1104_v58 = vshll.u32 %v1055_v39, 16  ;;  %v1074_v12 = vrot.slane %v1072_v0, 7  ;;  %v1078_v22 = vshll.u32 %v1043_v10, 16  ;;  %v1136_v26 = vrot.slane %v1725_v19, 2  ;;  %v1730_v0 = vld [vmem:[%s1911_s22 + $0x4c] sm:$0x3] }
  0x68   : > { %v1101_v60 = vor.u32 %v1100_v48, %v1097_v46  ;;  %v1231_v24 = vsel %vm269_vm0, %v1731_v9, %v1225_v16  ;;  %v1135_v27 = vrot.slane %v1724_v20, 2  ;;  %v1232_v37 = vsel %vm318_vm5, %v1731_v9, %v1225_v16 }
  0x69   : > { %v1075_v21 = vor.u32 %v1074_v12, %v1071_v11  ;;  %v1080_v31 = vrot.slane %v1078_v22, 7  ;;  %v1253_v33 = vshrl.u32 %v1231_v24, 16  ;;  %v1148_v38 = vsel %vm269_vm0, %v1725_v19, %v1136_v26 }
  0x6a   : > { %v1102_v5 = vrot.slane %v1101_v60, 2  ;;  %v1144_v39 = vsel %vm269_vm0, %v1724_v20, %v1135_v27  ;;  %v1234_v45 = vrot.slane %v1232_v37, 2  ;;  %v1243_v52 = vsel %vm269_vm0, %v1733_v32, %v1227_v40 }
  0x6b   : > { %v1255_v46 = vrot.slane %v1253_v33, 6  ;;  %v1279_v2 = vshrl.u32 %v1243_v52, 16  ;;  %v1282_v3 = vshll.u32 %v1243_v52, 16  ;;  %v1331_v11 = vrot.slane %v1736_v62, 2 }
  0x6c   : > { %902 = vrot.lane.b32.xlu1 %v892_v57, %s1855_s5  ;;  %900 = vrot.lane.b32.xlu0 %v888_v61, %s1855_s5  ;;  %v1068_v57 = vsel %vm1938_vm8, %v1063_v35, %v1067_v36  ;;  %v1088_v61 = vor.u32 %v1087_v51, %v1084_v50  ;;  %v1228_v35 = vrot.slane %v1734_v25, 2  ;;  %v1181_v50 = vrot.slane %v1728_v42, 2 }
  0x6d   : > { %v1180_v51 = vrot.slane %v1727_v43, 2  ;;  %v1262_v60 = vshll.u32 %v1234_v45, 16  ;;  %v1183_v20 = vrot.slane %v1730_v0, 2  ;;  %v1342_v27 = vsel %vm269_vm0, %v1736_v62, %v1331_v11 }
  0x6e   : > { %854 = vrot.lane.b32.xlu2 %v842_v6, %s1854_s30  ;;  %v1106_v6 = vrot.slane %v1104_v58, 7  ;;  %v1089_v7 = vrot.slane %v1088_v61, 2  ;;  %v1249_v48 = vsel %vm269_vm0, %v1734_v25, %v1228_v35  ;;  %v1134_v58 = vrot.slane %v1723_v49, 2 }
  0x6f   : > { %v1292_v55 = vshrl.u32 %v1249_v48, 16  ;;  %v1295_v56 = vshll.u32 %v1249_v48, 16  ;;  %v1250_v61 = vsel %vm318_vm5, %v1734_v25, %v1228_v35  ;;  %v1190_v4 = vsel %vm269_vm0, %v1728_v42, %v1181_v50 }
  0x70   : > { %v1107_v17 = vsel %vm1938_vm8, %v1102_v5, %v1106_v6  ;;  %v1094_v18 = vsel %vm1938_vm8, %v1089_v7, %v1093_v8  ;;  %v1186_v5 = vsel %vm269_vm0, %v1727_v43, %v1180_v51  ;;  %v1732_v7 = vld [vmem:[%s1911_s22 + $0x30] sm:$0x7]  ;;  %v1252_v8 = vrot.slane %v1250_v61, 2 }
  0x71   : > { %v1294_v9 = vrot.slane %v1292_v55, 6  ;;  %v1297_v10 = vrot.slane %v1295_v56, 7  ;;  %v1140_v12 = vsel %vm269_vm0, %v1723_v49, %v1134_v58  ;;  %v1226_v19 = vrot.slane %v1732_v7, 2 }
  0x72   : > { %v1301_v26 = vshll.u32 %v1252_v8, 16  ;;  %v1198_v35 = vsel %vm269_vm0, %v1730_v0, %v1183_v20  ;;  %v1371_v37 = vshrl.u32 %v1342_v27, 16  ;;  %v1343_v43 = vsel %vm318_vm5, %v1736_v62, %v1331_v11  ;;  %v1738_v8 = vld [vmem:[%s1911_s22 + $0x4c] sm:$0x7] }
  0x73   : > { %v1298_v25 = vor.u32 %v1297_v10, %v1294_v9  ;;  %v1345_v55 = vrot.slane %v1343_v43, 2  ;;  %vm1120_vm4 = vcmask 779968   ;;  %vm1212_vm6 = vcmask 911168  }
  0x74   : > { %1005 = vrot.lane.b32.xlu1 %v976_v23, %s1856_s6  ;;  %1003 = vrot.lane.b32.xlu0 %v963_v30, %s1856_s6  ;;  %v989_v23 = vsel %vm1938_vm8, %v984_v14, %v988_v15  ;;  %v1076_v30 = vrot.slane %v1075_v21, 2  ;;  %v1264_v14 = vrot.slane %v1262_v60, 7  ;;  %v1726_v15 = vld [vmem:[%s1911_s22 + $0x38] sm:$0x3]  ;;  %v1303_v42 = vrot.slane %v1301_v26, 7 }
  0x75   : > { %v1373_v56 = vrot.slane %v1371_v37, 6  ;;  %vm1317_vm7 = vcmask 976768   ;;  %vm1526_vm9 = vcmask 130048  }
  0x76   : > { %898 = vrot.lane.b32.xlu2 %v884_v34, %s1855_s5  ;;  %v1256_v34 = vshll.u32 %v1231_v24, 16  ;;  %v1081_v41 = vsel %vm1938_vm8, %v1076_v30, %v1080_v31  ;;  %v1137_v24 = vrot.slane %v1726_v15, 2 }
  0x78   : > { %v1258_v47 = vrot.slane %v1256_v34, 7  ;;  %v1237_v34 = vsel %vm269_vm0, %v1732_v7, %v1226_v19 }
  0x79   : > { %v1266_v48 = vshrl.u32 %v1237_v34, 16  ;;  %v1269_v49 = vshll.u32 %v1237_v34, 16 }
  0x7b   : > { %v1268_v62 = vrot.slane %v1266_v48, 6 }
  0x7c   : > { %1108 = vrot.lane.b32.xlu1 %v1068_v57, %s1857_s7  ;;  %1009 = vrot.lane.b32.xlu0 %v1002_v59, %s1856_s6  ;;  %v1737_v57 = vld [vmem:[%s1911_s22 + $0x48] sm:$0x7]  ;;  %v1259_v59 = vor.u32 %v1258_v47, %v1255_v46  ;;  %v1238_v47 = vsel %vm318_vm5, %v1732_v7, %v1226_v19  ;;  %v1380_v7 = vshll.u32 %v1345_v55, 16 }
  0x7d   : > { %v1332_v6 = vrot.slane %v1737_v57, 2  ;;  %v1729_v46 = vld [vmem:[%s1911_s22 + $0x48] sm:$0x3]  ;;  %v1240_v61 = vrot.slane %v1238_v47, 2 }
  0x7e   : > { %904 = vrot.lane.b32.xlu2 %v896_v1, %s1855_s5  ;;  %v1244_v1 = vsel %vm318_vm5, %v1733_v32, %v1227_v40  ;;  %v1152_v40 = vsel %vm269_vm0, %v1726_v15, %v1137_v24  ;;  %v1182_v60 = vrot.slane %v1729_v46, 2  ;;  %v1333_v15 = vrot.slane %v1738_v8, 2 }
  0x7f   : > { %v400_v13 = vpop.permute.xlu2 %399  ;;  %v1246_v16 = vrot.slane %v1244_v1, 2  ;;  %v1348_v21 = vsel %vm269_vm0, %v1737_v57, %v1332_v6  ;;  %v1275_v10 = vshll.u32 %v1240_v61, 16  ;;  %v1382_v19 = vrot.slane %v1380_v7, 7 }
  0x80   : > { %v1384_v32 = vshrl.u32 %v1348_v21, 16  ;;  %v1387_v33 = vshll.u32 %v1348_v21, 16  ;;  %v1194_v9 = vsel %vm269_vm0, %v1729_v46, %v1182_v60 }
  0x81   : > { %v1277_v24 = vrot.slane %v1275_v10, 7 }
  0x82   : > { %v1386_v52 = vrot.slane %v1384_v32, 6 }
  0x84   : > { %1114 = vrot.lane.b32.xlu1 %v1107_v17, %s1857_s7  ;;  %1112 = vrot.lane.b32.xlu0 %v1094_v18, %s1857_s7  ;;  %v1281_v17 = vrot.slane %v1279_v2, 6  ;;  %v1284_v18 = vrot.slane %v1282_v3, 7 }
  0x86   : > { %v291_v28 = vpop.permute.xlu1 %290  ;;  %v287_v29 = vpop.permute.xlu0 %286  ;;  %1007 = vrot.lane.b32.xlu2 %v989_v23, %s1856_s6  ;;  %v1285_v31 = vor.u32 %v1284_v18, %v1281_v17  ;;  %s1773_s6 = sshll.u32 %s2313_s15, 4 }
  0x87   : > { %301 = vst.msk [vmem:[#allocation2 + $0x4] sm:$0x3] %vm298_vm10, %v291_v28 }
  0x88   : > { %299 = vst.msk [vmem:[#allocation2] sm:$0x3] %vm298_vm10, %v287_v29  ;;  %v402_v36 = vpop.permute.xlu2 %401  ;;  %v1288_v29 = vshll.u32 %v1246_v16, 16  ;;  %v1286_v50 = vrot.slane %v1285_v31, 2 }
  0x89   : > { %412 = vst.msk [vmem:[#allocation2] sm:$0x3] %vm411_vm11, %v400_v13  ;;  %v1260_v13 = vrot.slane %v1259_v59, 2 }
  0x8a   : > { %v1290_v45 = vrot.slane %v1288_v29, 7 }
  0x8b   : > { %v1265_v28 = vsel %vm1938_vm8, %v1260_v13, %v1264_v14 }
  0x8c   : > { %1158 = vrot.lane.b32.xlu1 %v1148_v38, %s1858_s8  ;;  %1156 = vrot.lane.b32.xlu0 %v1144_v39, %s1858_s8  ;;  %v1374_v38 = vshll.u32 %v1342_v27, 16  ;;  %v1735_v39 = vld [vmem:[%s1911_s22 + $0x40] sm:$0x7]  ;;  %v1291_v1 = vsel %vm1938_vm8, %v1286_v50, %v1290_v45 }
  0x8e   : > { %v293_v53 = vpop.permute.xlu1 %292  ;;  %v289_v54 = vpop.permute.xlu0 %288  ;;  %1110 = vrot.lane.b32.xlu2 %v1081_v41, %s1857_s7  ;;  %v1299_v41 = vrot.slane %v1298_v25, 2 }
  0x8f   : > { %302 = vst.msk [vmem:[#allocation2 + $0x6] sm:$0x3] %vm298_vm10, %v293_v53  ;;  %v1330_v53 = vrot.slane %v1735_v39, 2 }
  0x90   : > { %300 = vst.msk [vmem:[#allocation2 + $0x2] sm:$0x3] %vm298_vm10, %v289_v54  ;;  %v505_v63 = vpop.permute.xlu2 %504  ;;  %v1389_v54 = vrot.slane %v1387_v33, 7  ;;  %v1304_v0 = vsel %vm1938_vm8, %v1299_v41, %v1303_v42  ;;  %vm1536_vm10 = vcmask 122880  }
  0x91   : > { %517 = vst.msk [vmem:[#allocation2] sm:$0x3] %vm516_vm12, %v505_v63  ;;  %v1271_v63 = vrot.slane %v1269_v49, 7  ;;  %v1336_v3 = vsel %vm269_vm0, %v1735_v39, %v1330_v53 }
  0x92   : > { %413 = vst.msk [vmem:[#allocation2 + $0x2] sm:$0x3] %vm411_vm11, %v402_v36  ;;  %v1349_v36 = vsel %vm318_vm5, %v1737_v57, %v1332_v6  ;;  %v1376_v57 = vrot.slane %v1374_v38, 7  ;;  %v1358_v13 = vshrl.u32 %v1336_v3, 16  ;;  %v1361_v14 = vshll.u32 %v1336_v3, 16 }
  0x93   : > { %v1351_v51 = vrot.slane %v1349_v36, 2  ;;  %v1272_v11 = vor.u32 %v1271_v63, %v1268_v62  ;;  %v1355_v36 = vsel %vm318_vm5, %v1738_v8, %v1333_v15 }
  0x94   : > { %1202 = vrot.lane.b32.xlu1 %v1190_v4, %s1859_s9  ;;  %1200 = vrot.lane.b32.xlu0 %v1186_v5, %s1859_s9  ;;  %v1390_v4 = vor.u32 %v1389_v54, %v1386_v52  ;;  %v1377_v6 = vor.u32 %v1376_v57, %v1373_v56  ;;  %v1360_v25 = vrot.slane %v1358_v13, 6  ;;  %v1363_v26 = vrot.slane %v1361_v14, 7 }
  0x95   : > { %v1393_v5 = vshll.u32 %v1351_v51, 16  ;;  %v1357_v41 = vrot.slane %v1355_v36, 2 }
  0x96   : > { %v406_v22 = vpop.permute.xlu1 %405  ;;  %v404_v23 = vpop.permute.xlu0 %403  ;;  %1154 = vrot.lane.b32.xlu2 %v1140_v12, %s1858_s8  ;;  %v1337_v12 = vsel %vm318_vm5, %v1735_v39, %v1330_v53  ;;  %v1391_v16 = vrot.slane %v1390_v4, 2  ;;  %v1378_v18 = vrot.slane %v1377_v6, 2  ;;  %v1364_v33 = vor.u32 %v1363_v26, %v1360_v25  ;;  %v1775_v25 = vld [vmem:[%s2302_s1 + $0x8] sm:$0xff] }
  0x97   : > { %415 = vst.msk [vmem:[#allocation2 + $0x6] sm:$0x3] %vm411_vm11, %v406_v22  ;;  %v1395_v17 = vrot.slane %v1393_v5, 7  ;;  %v1339_v22 = vrot.slane %v1337_v12, 2  ;;  %v1406_v48 = vshll.u32 %v1357_v41, 16  ;;  %vm1166_vm5 = vcmask 845568  }
  0x98   : > { %414 = vst.msk [vmem:[#allocation2 + $0x4] sm:$0x3] %vm411_vm11, %v404_v23  ;;  %v511_v30 = vpop.permute.xlu2 %510  ;;  %v1273_v23 = vrot.slane %v1272_v11, 2  ;;  %v1781_v11 = vld [vmem:[%s2302_s1 + $0x38] sm:$0xff]  ;;  %v1780_v12 = vld [vmem:[%s2302_s1 + $0x30] sm:$0xff] }
  0x99   : > { %520 = vst.msk [vmem:[#allocation2 + $0x6] sm:$0x3] %vm516_vm12, %v511_v30  ;;  %v1396_v29 = vsel %vm1938_vm8, %v1391_v16, %v1395_v17  ;;  %v1383_v30 = vsel %vm1938_vm8, %v1378_v18, %v1382_v19  ;;  %v1367_v31 = vshll.u32 %v1339_v22, 16  ;;  %v1408_v52 = vrot.slane %v1406_v48, 7  ;;  %1512 = vmatpush.bf16.msra.mxu0 %v1781_v11  ;;  %v1779_v16 = vld [vmem:[%s2302_s1 + $0x28] sm:$0xff]  ;;  %v1778_v17 = vld [vmem:[%s2302_s1 + $0x20] sm:$0xff] }
  0x9a   : > { %v1278_v32 = vsel %vm1938_vm8, %v1273_v23, %v1277_v24  ;;  %v1776_v22 = vld [vmem:[%s2302_s1 + $0x10] sm:$0xff]  ;;  %v1822_v41 = vld [vmem:[%s2303_s2] ss:$0 sm:$0xff] }
  0x9b   : > { %v1369_v39 = vrot.slane %v1367_v31, 7 }
  0x9c   : > { %1305 = vrot.lane.b32.xlu1 %v1265_v28, %s1860_s10  ;;  %1206 = vrot.lane.b32.xlu0 %v1198_v35, %s1859_s9  ;;  %v1354_v28 = vsel %vm269_vm0, %v1738_v8, %v1333_v15  ;;  %vm818_vm0 = vcmask 517568  }
  0x9d   : > { %v1397_v34 = vshrl.u32 %v1354_v28, 16  ;;  %v1400_v35 = vshll.u32 %v1354_v28, 16  ;;  %1513 = vmatpush.bf16.msra.mxu0 %v1780_v12 }
  0x9e   : > { %v509_v58 = vpop.permute.xlu1 %508  ;;  %v507_v59 = vpop.permute.xlu0 %506  ;;  %1160 = vrot.lane.b32.xlu2 %v1152_v40, %s1858_s8  ;;  %v1365_v40 = vrot.slane %v1364_v33, 2 }
  0x9f   : > { %519 = vst.msk [vmem:[#allocation2 + $0x4] sm:$0x3] %vm516_vm12, %v509_v58  ;;  %v1399_v42 = vrot.slane %v1397_v34, 6  ;;  %v1402_v43 = vrot.slane %v1400_v35, 7 }
  0xa0   : > { %518 = vst.msk [vmem:[#allocation2 + $0x2] sm:$0x3] %vm516_vm12, %v507_v59  ;;  %v555_v2 = vpop.permute.xlu2 %554  ;;  %v1370_v46 = vsel %vm1938_vm8, %v1365_v40, %v1369_v39 }
  0xa1   : > { %565 = vst.msk [vmem:[#allocation2 + $0x4] sm:$0x3] %vm562_vm13, %v555_v2  ;;  %v1403_v47 = vor.u32 %v1402_v43, %v1399_v42  ;;  %1514 = vmatpush.bf16.msra.mxu0 %v1779_v16 }
  0xa3   : > { %v1404_v51 = vrot.slane %v1403_v47, 2 }
  0xa4   : > { %1311 = vrot.lane.b32.xlu1 %v1304_v0, %s1860_s10  ;;  %1309 = vrot.lane.b32.xlu0 %v1291_v1, %s1860_s10 }
  0xa5   : > { %v1409_v54 = vsel %vm1938_vm8, %v1404_v51, %v1408_v52  ;;  %1515 = vmatpush.bf16.msra.mxu0 %v1778_v17  ;;  %vm1422_vm8 = vcmask 1042368  }
  0xa6   : > { %v553_v20 = vpop.permute.xlu1 %552  ;;  %v551_v21 = vpop.permute.xlu0 %550  ;;  %1204 = vrot.lane.b32.xlu2 %v1194_v9, %s1859_s9 }
  0xa7   : > { %564 = vst.msk [vmem:[#allocation2 + $0x2] sm:$0x3] %vm562_vm13, %v553_v20 }
  0xa8   : > { %563 = vst.msk [vmem:[#allocation2] sm:$0x3] %vm562_vm13, %v551_v21  ;;  %v599_v27 = vpop.permute.xlu2 %598  ;;  %v1777_v21 = vld [vmem:[%s2302_s1 + $0x18] sm:$0xff] }
  0xa9   : > { %610 = vst.msk [vmem:[#allocation2 + $0x2] sm:$0x3] %vm608_vm14, %v599_v27  ;;  %1516 = vmatpush.bf16.msra.mxu0 %v1777_v21  ;;  %v1774_v27 = vld [vmem:[%s2302_s1] sm:$0xff] }
  0xac   : > { %1414 = vrot.lane.b32.xlu1 %v1396_v29, %s1861_s11  ;;  %1412 = vrot.lane.b32.xlu0 %v1383_v30, %s1861_s11 }
  0xad   : > { %1517 = vmatpush.bf16.msra.mxu0 %v1776_v22 }
  0xae   : > { %v597_v37 = vpop.permute.xlu1 %596  ;;  %v557_v38 = vpop.permute.xlu0 %556  ;;  %1307 = vrot.lane.b32.xlu2 %v1278_v32, %s1860_s10 }
  0xaf   : > { %609 = vst.msk [vmem:[#allocation2] sm:$0x3] %vm608_vm14, %v597_v37 }
  0xb0   : > { %566 = vst.msk [vmem:[#allocation2 + $0x6] sm:$0x3] %vm562_vm13, %v557_v38  ;;  %v702_v45 = vpop.permute.xlu2 %701 }
  0xb1   : > { %714 = vst.msk [vmem:[#allocation2] sm:$0x3] %vm713_vm15, %v702_v45  ;;  %1518 = vmatpush.bf16.msra.mxu0 %v1775_v25 }
  0xb5   : > { %1519 = vmatpush.bf16.msra.mxu0 %v1774_v27 }
  0xb6   : > { %v603_v49 = vpop.permute.xlu1 %602  ;;  %v601_v50 = vpop.permute.xlu0 %600  ;;  %1410 = vrot.lane.b32.xlu2 %v1370_v46, %s1861_s11 }
  0xb7   : > { %612 = vst.msk [vmem:[#allocation2 + $0x6] sm:$0x3] %vm608_vm14, %v603_v49 }
  0xb8   : > { %611 = vst.msk [vmem:[#allocation2 + $0x4] sm:$0x3] %vm608_vm14, %v601_v50  ;;  %v708_v53 = vpop.permute.xlu2 %707 }
  0xb9   : > { %717 = vst.msk [vmem:[#allocation2 + $0x6] sm:$0x3] %vm713_vm15, %v708_v53 }
  0xbe   : > { %v706_v55 = vpop.permute.xlu1 %705  ;;  %v704_v56 = vpop.permute.xlu0 %703  ;;  %1416 = vrot.lane.b32.xlu2 %v1409_v54, %s1861_s11  ;;  %s238_s11 = scalar_lea.vmem %s2304_s3, %s1773_s6 }
  0xbf   : > { %716 = vst.msk [vmem:[#allocation2 + $0x4] sm:$0x3] %vm713_vm15, %v706_v55 }
  0xc0   : > { %715 = vst.msk [vmem:[#allocation2 + $0x2] sm:$0x3] %vm713_vm15, %v704_v56  ;;  %v811_v57 = vpop.permute.xlu2 %810 }
  0xc1   : > { %821 = vst.msk [vmem:[#allocation2 + $0x4] sm:$0x3] %vm818_vm0, %v811_v57 }
  0xc6   : > { %v809_v58 = vpop.permute.xlu1 %808  ;;  %v807_v59 = vpop.permute.xlu0 %806 }
  0xc7   : > { %820 = vst.msk [vmem:[#allocation2 + $0x2] sm:$0x3] %vm818_vm0, %v809_v58 }
  0xc8   : > { %819 = vst.msk [vmem:[#allocation2] sm:$0x3] %vm818_vm0, %v807_v59  ;;  %v855_v44 = vpop.permute.xlu2 %854 }
  0xc9   : > { %866 = vst.msk [vmem:[#allocation2 + $0x2] sm:$0x3] %vm864_vm1, %v855_v44 }
  0xce   : > { %v853_v60 = vpop.permute.xlu1 %852  ;;  %v813_v61 = vpop.permute.xlu0 %812 }
  0xcf   : > { %865 = vst.msk [vmem:[#allocation2] sm:$0x3] %vm864_vm1, %v853_v60 }
  0xd0   : > { %822 = vst.msk [vmem:[#allocation2 + $0x6] sm:$0x3] %vm818_vm0, %v813_v61  ;;  %v899_v62 = vpop.permute.xlu2 %898 }
  0xd1   : > { %911 = vst.msk [vmem:[#allocation2] sm:$0x3] %vm910_vm2, %v899_v62 }
  0xd6   : > { %v859_v63 = vpop.permute.xlu1 %858  ;;  %v857_v0 = vpop.permute.xlu0 %856 }
  0xd7   : > { %868 = vst.msk [vmem:[#allocation2 + $0x6] sm:$0x3] %vm864_vm1, %v859_v63 }
  0xd8   : > { %867 = vst.msk [vmem:[#allocation2 + $0x4] sm:$0x3] %vm864_vm1, %v857_v0  ;;  %v905_v1 = vpop.permute.xlu2 %904 }
  0xd9   : > { %914 = vst.msk [vmem:[#allocation2 + $0x6] sm:$0x3] %vm910_vm2, %v905_v1 }
  0xde   : > { %v903_v2 = vpop.permute.xlu1 %902  ;;  %v901_v3 = vpop.permute.xlu0 %900 }
  0xdf   : > { %913 = vst.msk [vmem:[#allocation2 + $0x4] sm:$0x3] %vm910_vm2, %v903_v2 }
  0xe0   : > { %912 = vst.msk [vmem:[#allocation2 + $0x2] sm:$0x3] %vm910_vm2, %v901_v3  ;;  %v1008_v4 = vpop.permute.xlu2 %1007 }
  0xe1   : > { %1018 = vst.msk [vmem:[#allocation2 + $0x4] sm:$0x3] %vm1015_vm3, %v1008_v4 }
  0xe6   : > { %v1006_v5 = vpop.permute.xlu1 %1005  ;;  %v1004_v6 = vpop.permute.xlu0 %1003 }
  0xe7   : > { %1017 = vst.msk [vmem:[#allocation2 + $0x2] sm:$0x3] %vm1015_vm3, %v1006_v5 }
  0xe8   : > { %1016 = vst.msk [vmem:[#allocation2] sm:$0x3] %vm1015_vm3, %v1004_v6  ;;  %v1111_v7 = vpop.permute.xlu2 %1110 }
  0xe9   : > { %1122 = vst.msk [vmem:[#allocation2 + $0x2] sm:$0x3] %vm1120_vm4, %v1111_v7 }
  0xee   : > { %v1109_v8 = vpop.permute.xlu1 %1108  ;;  %v1010_v9 = vpop.permute.xlu0 %1009 }
  0xef   : > { %1121 = vst.msk [vmem:[#allocation2] sm:$0x3] %vm1120_vm4, %v1109_v8 }
  0xf0   : > { %1019 = vst.msk [vmem:[#allocation2 + $0x6] sm:$0x3] %vm1015_vm3, %v1010_v9  ;;  %v1155_v10 = vpop.permute.xlu2 %1154 }
  0xf1   : > { %1167 = vst.msk [vmem:[#allocation2] sm:$0x3] %vm1166_vm5, %v1155_v10 }
  0xf6   : > { %v1115_v13 = vpop.permute.xlu1 %1114  ;;  %v1113_v14 = vpop.permute.xlu0 %1112 }
  0xf7   : > { %1124 = vst.msk [vmem:[#allocation2 + $0x6] sm:$0x3] %vm1120_vm4, %v1115_v13 }
  0xf8   : > { %1123 = vst.msk [vmem:[#allocation2 + $0x4] sm:$0x3] %vm1120_vm4, %v1113_v14  ;;  %v1161_v15 = vpop.permute.xlu2 %1160 }
  0xf9   : > { %1170 = vst.msk [vmem:[#allocation2 + $0x6] sm:$0x3] %vm1166_vm5, %v1161_v15 }
  0xfe   : > { %v1159_v18 = vpop.permute.xlu1 %1158  ;;  %v1157_v19 = vpop.permute.xlu0 %1156 }
  0xff   : > { %1169 = vst.msk [vmem:[#allocation2 + $0x4] sm:$0x3] %vm1166_vm5, %v1159_v18 }
 0x100   : > { %1168 = vst.msk [vmem:[#allocation2 + $0x2] sm:$0x3] %vm1166_vm5, %v1157_v19  ;;  %v1205_v20 = vpop.permute.xlu2 %1204 }
 0x101   : > { %1215 = vst.msk [vmem:[#allocation2 + $0x4] sm:$0x3] %vm1212_vm6, %v1205_v20 }
 0x106   : > { %v1203_v23 = vpop.permute.xlu1 %1202  ;;  %v1201_v24 = vpop.permute.xlu0 %1200 }
 0x107   : > { %1214 = vst.msk [vmem:[#allocation2 + $0x2] sm:$0x3] %vm1212_vm6, %v1203_v23 }
 0x108   : > { %1213 = vst.msk [vmem:[#allocation2] sm:$0x3] %vm1212_vm6, %v1201_v24  ;;  %v1308_v26 = vpop.permute.xlu2 %1307 }
 0x109   : > { %1319 = vst.msk [vmem:[#allocation2 + $0x2] sm:$0x3] %vm1317_vm7, %v1308_v26 }
 0x10e   : > { %v1306_v28 = vpop.permute.xlu1 %1305  ;;  %v1207_v29 = vpop.permute.xlu0 %1206 }
 0x10f   : > { %1318 = vst.msk [vmem:[#allocation2] sm:$0x3] %vm1317_vm7, %v1306_v28 }
 0x110   : > { %1216 = vst.msk [vmem:[#allocation2 + $0x6] sm:$0x3] %vm1212_vm6, %v1207_v29  ;;  %v1411_v30 = vpop.permute.xlu2 %1410 }
 0x111   : > { %1423 = vst.msk [vmem:[#allocation2] sm:$0x3] %vm1422_vm8, %v1411_v30 }
 0x116   : > { %v1312_v31 = vpop.permute.xlu1 %1311  ;;  %v1310_v32 = vpop.permute.xlu0 %1309 }
 0x117   : > { %1321 = vst.msk [vmem:[#allocation2 + $0x6] sm:$0x3] %vm1317_vm7, %v1312_v31 }
 0x118   : > { %1320 = vst.msk [vmem:[#allocation2 + $0x4] sm:$0x3] %vm1317_vm7, %v1310_v32  ;;  %v1417_v33 = vpop.permute.xlu2 %1416  ;;  %v1427_v34 = vld [vmem:[#allocation2] sm:$0x3] }
 0x119   : > { %1426 = vst.msk [vmem:[#allocation2 + $0x6] sm:$0x3] %vm1422_vm8, %v1417_v33 }
 0x11a   : > { %1452 = vst [vmem:[#allocation1] ss:$4 sm:$0xff] %v1427_v34 }
 0x11e   : > { %v1415_v35 = vpop.permute.xlu1 %1414  ;;  %v1413_v36 = vpop.permute.xlu0 %1412 }
 0x11f   : > { %1425 = vst.msk [vmem:[#allocation2 + $0x4] sm:$0x3] %vm1422_vm8, %v1415_v35 }
 0x120   : > { %1424 = vst.msk [vmem:[#allocation2 + $0x2] sm:$0x3] %vm1422_vm8, %v1413_v36  ;;  %v1430_v37 = vld [vmem:[#allocation2 + $0x6] sm:$0x3] }
 0x121   : > { %1461 = vst [vmem:[#allocation1 + $0x3] ss:$4 sm:$0xff] %v1430_v37 }
 0x126   : > { %v1429_v38 = vld [vmem:[#allocation2 + $0x4] sm:$0x3] }
 0x127   : > { %v1428_v39 = vld [vmem:[#allocation2 + $0x2] sm:$0x3]  ;;  %1458 = vst [vmem:[#allocation1 + $0x2] ss:$4 sm:$0xff] %v1429_v38 }
 0x128   : > { %1455 = vst [vmem:[#allocation1 + $0x1] ss:$4 sm:$0xff] %v1428_v39 }
 0x12f   : > { %v1462_v40 = vld.sshfl [vmem:[#allocation1] sm:$0xff pattern:$0x73625140] }
 0x130   : > { %1520 = vmatmul.bf16.vlgmr.msra.gmra.mxu0 %v1462_v40 }
 0x1ad   : > { %v1521_v42 = vpop.f32.mrf.mxu0 }
 0x1ae   : > { %v1522_v43 = vadd.f32 %v1822_v41, %v1521_v42 }
 0x1b0   : > { %1550 = vst.msk [vmem:[%s238_s11] sm:$0xff] %vm1526_vm9, %v1522_v43  ;;  %v1538_v46 = vmul.f32 %v1522_v43, %v1522_v43  ;;  %v1527_v48 = vsel %vm1526_vm9, %v1522_v43, 0.0 }
 0x1b2   : > { %v1540_v52 = vsel %vm1526_vm9, %v1538_v46, 0.0 }
 0x1b5   : > { %v1523_v45 = vpop.f32.mrf.mxu0 }
 0x1b6   : > { %v1524_v47 = vadd.f32 %v1822_v41, %v1523_v45 }
 0x1b8   : > { %v1528_v49 = vsel %vm1526_vm9, %v1524_v47, 0.0  ;;  %v1539_v50 = vmul.f32 %v1524_v47, %v1524_v47  ;;  %1551 = vst.msk [vmem:[%s238_s11 + $0x8] sm:$0xff] %vm1526_vm9, %v1524_v47 }
 0x1b9   : > { %v1529_v51 = vadd.f32 %v1528_v49, %v1527_v48 }
 0x1ba   : > { %v1541_v53 = vsel %vm1526_vm9, %v1539_v50, 0.0 }
 0x1bb   : > { %v1530_v54 = vrot.slane %v1529_v51, 4  ;;  %v1542_v55 = vadd.f32 %v1541_v53, %v1540_v52 }
 0x1bd   : > { %v1531_v56 = vadd.f32 %v1530_v54, %v1529_v51  ;;  %v1543_v57 = vrot.slane %v1542_v55, 4 }
 0x1bf   : > { %v1532_v58 = vrot.slane %v1531_v56, 2  ;;  %v1544_v59 = vadd.f32 %v1543_v57, %v1542_v55 }
 0x1c1   : > { %v1533_v44 = vadd.f32 %v1532_v58, %v1531_v56  ;;  %v1545_v60 = vrot.slane %v1544_v59, 2 }
 0x1c3   : > { %v1534_v61 = vrot.slane %v1533_v44, 1  ;;  %v1546_v62 = vadd.f32 %v1545_v60, %v1544_v59 }
 0x1c5   : > { %v1535_v63 = vadd.f32 %v1534_v61, %v1533_v44  ;;  %v1547_v0 = vrot.slane %v1546_v62, 1 }
 0x1c7   : > { %1537 = vst.msk [vmem:[%s246_s19] sm:$0x1] %vm1536_vm10, %v1535_v63  ;;  %v1548_v1 = vadd.f32 %v1547_v0, %v1546_v62 }
 0x1c9   : > { %1549 = vst.msk [vmem:[%s246_s19 + $0x1] sm:$0x1] %vm1536_vm10, %v1548_v1 }
 0x1ca PF: > { %s15_s17 = sadd.s32 1, %s1845_s17   ;;  %s2308_s15 = smov %s1841_s16 }
 0x1cb   : > { %p12_p5 = scmp.ge.s32.totalorder %s15_s17, 4   ;;  %s2309_s16 = smov %s2311_s18 }
 0x1cd   :  { %14 = sbr.rel (!%p12_p5) target bundleno = 2 (0x2), region = 84 }

// kernel: _lambda_.10
= control target key start
LH: loop header
LB: loop body
LE: loop exit
PB: predicated region body
PF: predicated region fallthrough
CT: control target
= control target key end

     0   :  { %s404_s9 = smov 0   ;;  %s406_s10 = smov 0   ;;  %s440_s0 = inlined_call_operand.vmem [shape: f32[2,9,32], index: 0, kind: input, shape index: {}]   ;;  %s441_s1 = inlined_call_operand.vmem [shape: f32[2,2,32], index: 1, kind: input, shape index: {}]   ;;  %s442_s2 = inlined_call_operand.vmem [shape: bf16[2,9,32], index: 2, kind: output, shape index: {}]  }
   0x1   :  { %s408_s11 = smov 0  }
   0x2 LB: > { %s24_s12 = sadd.s32 1, %s383_s10  ;;  %p329_p0 = scmp.ge.s32.totalorder %s387_s11, 1  ;;  %s387_s11 = sphi %s408_s11, %s12_s11   ;;  %s383_s10 = sphi %s406_s10, %s444_s10   ;;  %s379_s9 = sphi %s404_s9, %s443_s9  }
   0x3   : > { %p26_p1 = scmp.ge.s32.totalorder %s24_s12, 2  ;;  %p142_p2 = scmp.lt.s32.totalorder %s387_s11, 3 }
   0x5   : > { %s446_s12 = smov (%p26_p1, %s24_s12), 0  ;;  %p143_p3 = pnand %p329_p0, %p142_p2 }
   0x6   : > { %p177_p4 = scmp.lt.s32.totalorder (!%p143_p3), %s379_s9, 1 }
   0x7   : > { %146 = sbr.rel (%p143_p3) target bundleno = 28 (0x1c), region = 28 }
   0xc   : > { %s448_s9 = smov (!%p177_p4, %s379_s9), 1  ;;  %vm220_vm0 = vcmask 253952   ;;  %vm221_vm1 = vsmask.f32 256  ;;  %vm218_vm4 = vcmask 257024  }
   0xd   : > { %s337_s13 = sshll.u32 %s448_s9, 4  ;;  %s332_s14 = sshll.u32 %s448_s9, 1  ;;  %vm222_vm5 = vmand %vm220_vm0, %vm221_vm1 }
   0xe   : > { %s184_s17 = scalar_lea.vmem %s440_s0, %s337_s13  ;;  %s189_s20 = scalar_lea.vmem %s441_s1, %s332_s14 }
   0xf   : > { %v200_v0 = vld [vmem:[%s184_s17] sm:$0xff]  ;;  %v201_v1 = vld [vmem:[%s184_s17 + $0x8] sm:$0x1]  ;;  %s338_s21 = sshll.u32 %s448_s9, 3 }
  0x10   : > { %v363_v2 = vld [vmem:[%s189_s20] ss:$0 sm:$0xff]  ;;  %v364_v3 = vld [vmem:[%s189_s20 + $0x1] ss:$0 sm:$0xff]  ;;  %s198_s24 = scalar_lea.vmem %s442_s2, %s338_s21 }
  0x11   : > { %v204_v4 = vsub.f32 %v200_v0, %v363_v2  ;;  %v205_v5 = vsub.f32 %v201_v1, %v363_v2  ;;  %v223_v12 = vld [vmem:[%s198_s24 + $0x4] sm:$0x1] }
  0x13   : > { %v208_v6 = vmul.f32 %v364_v3, %v204_v4  ;;  %v209_v7 = vmul.f32 %v364_v3, %v205_v5 }
  0x15   : > { %vm210_vm2 = vcmp.gt.f32.partialorder %v208_v6, 0.0  ;;  %v212_v8 = vmul.f32 0.2, %v208_v6  ;;  %vm211_vm3 = vcmp.gt.f32.partialorder %v209_v7, 0.0  ;;  %v213_v9 = vmul.f32 0.2, %v209_v7 }
  0x17   : > { %v214_v10 = vsel %vm210_vm2, %v208_v6, %v212_v8  ;;  %v215_v11 = vsel %vm211_vm3, %v209_v7, %v213_v9 }
  0x18   : > { %v216_v13 = vpack.c.bf16 %v214_v10, %v214_v10  ;;  %v217_v14 = vpack.c.bf16 %v215_v11, %v215_v11 }
  0x1a   : > { %219 = vst.msk [vmem:[%s198_s24] sm:$0xf] %vm218_vm4, %v216_v13  ;;  %v224_v15 = vsel %vm222_vm5, %v217_v14, %v223_v12 }
  0x1b   : > { %225 = vst [vmem:[%s198_s24 + $0x4] sm:$0x1] %v224_v15 }
  0x1c PF: > { %s12_s11 = sadd.s32 1, %s387_s11   ;;  %s443_s9 = smov %s383_s10 }
  0x1d   : > { %p9_p5 = scmp.ge.s32.totalorder %s12_s11, 4   ;;  %s444_s10 = smov %s446_s12 }
  0x1f   :  { %11 = sbr.rel (!%p9_p5) target bundleno = 2 (0x2), region = 61 }

// kernel: _lambda_.9
= control target key start
LH: loop header
LB: loop body
LE: loop exit
PB: predicated region body
PF: predicated region fallthrough
CT: control target
= control target key end

     0   :  { %s1843_s15 = smov 0   ;;  %s1845_s16 = smov 0   ;;  %s2326_s0 = inlined_call_operand.vmem [shape: bf16[2,6,6,16], index: 0, kind: input, shape index: {}]   ;;  %s2327_s1 = inlined_call_operand.vmem [shape: bf16[256,32], index: 1, kind: input, shape index: {}]   ;;  %s2328_s2 = inlined_call_operand.vmem [shape: f32[1,32], index: 2, kind: input, shape index: {}]   ;;  %s2329_s3 = inlined_call_operand.vmem [shape: f32[2,9,32], index: 3, kind: output, shape index: {0}]   ;;  %s2330_s4 = inlined_call_operand.vmem [shape: f32[2,1,2,32], index: 4, kind: output, shape index: {1}]  }
   0x1   :  { %s1847_s17 = smov 0  }
   0x2 LB: > { %s27_s18 = sadd.s32 1, %s1805_s16  ;;  %p1592_p0 = scmp.ge.s32.totalorder %s1809_s17, 1  ;;  %s1809_s17 = sphi %s1847_s17, %s15_s17   ;;  %s1805_s16 = sphi %s1845_s16, %s2354_s16   ;;  %s1801_s15 = sphi %s1843_s15, %s2353_s15  }
   0x3   : > { %p29_p1 = scmp.ge.s32.totalorder %s27_s18, 2  ;;  %p185_p2 = scmp.lt.s32.totalorder %s1809_s17, 3 }
   0x5   : > { %s2356_s18 = smov (%p29_p1, %s27_s18), 0  ;;  %p186_p3 = pnand %p1592_p0, %p185_p2 }
   0x6   : > { %p224_p4 = scmp.lt.s32.totalorder (!%p186_p3), %s1801_s15, 1  ;;  %s1811_s23 = smov (!%p186_p3), 32  }
   0x7   : > { %189 = sbr.rel (%p186_p3) target bundleno = 427 (0x1ab), region = 32  ;;  %s1812_s24 = smov (!%p186_p3), 16  }
   0x8   : > { %s1813_s25 = smov (!%p186_p3), 48   ;;  %s1814_s26 = smov (!%p186_p3), 64  }
   0x9   : > { %s1815_s27 = smov (!%p186_p3), 80   ;;  %s1816_s28 = smov (!%p186_p3), 96  }
   0xa   : > { %s1817_s29 = smov (!%p186_p3), 112  }
   0xc   : > { %vm356_vm0 = vcmask 1040384   ;;  %vm357_vm1 = vcmask 1042434   ;;  %s2358_s15 = smov (!%p224_p4, %s1801_s15), 1  ;;  %vm359_vm3 = vcmask 1044484   ;;  %vm271_vm4 = vcmask 1041408  }
   0xd   : > { %vm358_vm2 = vmor %vm356_vm0, %vm357_vm1  ;;  %s1754_s19 = smul.u32 24, %s2358_s15  ;;  %vm338_vm5 = vcmask 1043458   ;;  %vm361_vm7 = vcmask 1046534   ;;  %vm422_vm9 = vsmask.f32 256  ;;  %s1737_s20 = sshll.u32 %s2358_s15, 4 }
   0xe   : > { %vm360_vm6 = vmor %vm358_vm2, %vm359_vm3  ;;  %vm423_vm10 = vsmask.f32 2312  ;;  %vm425_vm11 = vsmask.f32 4368  ;;  %vm427_vm12 = vsmask.f32 6424 }
   0xf   : > { %s1869_s22 = scalar_lea.vmem %s2326_s0, %s1754_s19  ;;  %vm1878_vm8 = vmor %vm360_vm6, %vm361_vm7  ;;  %vm250_vm2 = vcmask 123904   ;;  %vm251_vm3 = vsmask.f32 1280 }
  0x10   : > { %v327_v0 = vld [vmem:[%s1869_s22 + $0x8] sm:$0x6]  ;;  %v326_v1 = vld [vmem:[%s1869_s22 + $0x4] sm:$0x6]  ;;  %v325_v2 = vld [vmem:[%s1869_s22] sm:$0x6] }
  0x11   : > { %v333_v3 = vrot.slane %v327_v0, 2  ;;  %v332_v4 = vrot.slane %v326_v1, 2  ;;  %v331_v5 = vrot.slane %v325_v2, 2  ;;  %v1631_v6 = vld [vmem:[%s1869_s22 + $0xc] sm:$0x3]  ;;  %vm424_vm13 = vmor %vm422_vm9, %vm423_vm10  ;;  %vm474_vm10 = vcmask 517504  }
  0x12   : > { %v754_v7 = vrot.slane %v1631_v6, 2  ;;  %v264_v8 = vld [vmem:[%s1869_s22 + $0x8] sm:$0x3]  ;;  %v262_v18 = vld [vmem:[%s1869_s22] sm:$0x3]  ;;  %vm1940_vm14 = vmor %vm424_vm13, %vm425_vm11 }
  0x13   : > { %v351_v9 = vsel %vm271_vm4, %v327_v0, %v333_v3  ;;  %v353_v10 = vsel %vm338_vm5, %v327_v0, %v333_v3  ;;  %v344_v12 = vsel %vm271_vm4, %v326_v1, %v332_v4  ;;  %v346_v13 = vsel %vm338_vm5, %v326_v1, %v332_v4  ;;  %v1632_v23 = vld [vmem:[%s1869_s22 + $0x10] sm:$0x3]  ;;  %v1630_v28 = vld [vmem:[%s1869_s22 + $0x8] sm:$0x3]  ;;  %v263_v37 = vld [vmem:[%s1869_s22 + $0x4] sm:$0x3] }
  0x14   : > { %v1601_v14 = vrot.slane %v351_v9, 9  ;;  %v1602_v15 = vrot.slane %v353_v10, 9  ;;  %v1599_v16 = vrot.slane %v344_v12, 9  ;;  %v1600_v17 = vrot.slane %v346_v13, 9  ;;  %v1635_v54 = vld [vmem:[%s1869_s22 + $0x10] sm:$0x6]  ;;  %vm1951_vm15 = vmor %vm1940_vm14, %vm427_vm12 }
  0x15   : > { %v336_v19 = vsel %vm271_vm4, %v325_v2, %v331_v5  ;;  %v339_v20 = vsel %vm338_vm5, %v325_v2, %v331_v5  ;;  %v761_v21 = vsel %vm271_vm4, %v1631_v6, %v754_v7  ;;  %v270_v22 = vrot.slane %v264_v8, 2  ;;  %v1634_v59 = vld [vmem:[%s1869_s22 + $0xc] sm:$0x6]  ;;  %v1633_v0 = vld [vmem:[%s1869_s22 + $0x8] sm:$0x6]  ;;  %vm2019_vm6 = vmand %vm250_vm2, %vm251_vm3 }
  0x16   : > { %v374_v24 = vsel %vm1878_vm8, %v1601_v14, %v1602_v15  ;;  %v370_v25 = vsel %vm1878_vm8, %v1599_v16, %v1600_v17  ;;  %v1597_v26 = vrot.slane %v336_v19, 9  ;;  %v1598_v27 = vrot.slane %v339_v20, 9  ;;  %vm2136_vm11 = vmand %vm474_vm10, %vm251_vm3 }
  0x17   : > { %379 = vrot.lane.b32.xlu2 %v374_v24, %s1811_s23  ;;  %377 = vrot.lane.b32.xlu1 %v370_v25, %s1811_s23  ;;  %v773_v29 = vshrl.u32 %v761_v21, 16  ;;  %v776_v30 = vshll.u32 %v761_v21, 16  ;;  %v280_v31 = vsel %vm271_vm4, %v264_v8, %v270_v22  ;;  %v268_v32 = vrot.slane %v262_v18, 2  ;;  %v397_v22 = vld [vmem:[%s1869_s22 + $0x8] sm:$0x6] }
  0x18   : > { %v366_v33 = vsel %vm1878_vm8, %v1597_v26, %v1598_v27  ;;  %v297_v34 = vshrl.u32 %v280_v31, 16  ;;  %v300_v35 = vshll.u32 %v280_v31, 16  ;;  %v755_v36 = vrot.slane %v1632_v23, 2 }
  0x19   : > { %375 = vrot.lane.b32.xlu0 %v366_v33, %s1811_s23  ;;  %v775_v38 = vrot.slane %v773_v29, 6  ;;  %v778_v39 = vrot.slane %v776_v30, 7  ;;  %v274_v40 = vsel %vm271_vm4, %v262_v18, %v268_v32  ;;  %v753_v41 = vrot.slane %v1630_v28, 2  ;;  %v396_v30 = vld [vmem:[%s1869_s22 + $0x4] sm:$0x6] }
  0x1a   : > { %v299_v42 = vrot.slane %v297_v34, 6  ;;  %v302_v43 = vrot.slane %v300_v35, 7  ;;  %v281_v44 = vshrl.u32 %v274_v40, 16  ;;  %v284_v45 = vshll.u32 %v274_v40, 16  ;;  %v395_v34 = vld [vmem:[%s1869_s22] sm:$0x6] }
  0x1b   : > { %v779_v46 = vor.u32 %v778_v39, %v775_v38  ;;  %v764_v47 = vsel %vm271_vm4, %v1632_v23, %v755_v36  ;;  %v758_v48 = vsel %vm271_vm4, %v1630_v28, %v753_v41  ;;  %v269_v49 = vrot.slane %v263_v37, 2  ;;  %v1643_v41 = vld [vmem:[%s1869_s22 + $0xc] sm:$0x6] }
  0x1c   : > { %v303_v50 = vor.u32 %v302_v43, %v299_v42  ;;  %v283_v51 = vrot.slane %v281_v44, 6  ;;  %v286_v52 = vrot.slane %v284_v45, 7  ;;  %v781_v53 = vshrl.u32 %v764_v47, 16  ;;  %v1642_v45 = vld [vmem:[%s1869_s22 + $0x8] sm:$0x6] }
  0x1d   : > { %v780_v55 = vrot.slane %v779_v46, 2  ;;  %v784_v56 = vshll.u32 %v764_v47, 16  ;;  %v765_v57 = vshrl.u32 %v758_v48, 16  ;;  %v768_v58 = vshll.u32 %v758_v48, 16 }
  0x1e   : > { %v304_v60 = vrot.slane %v303_v50, 2  ;;  %v287_v61 = vor.u32 %v286_v52, %v283_v51  ;;  %v783_v62 = vrot.slane %v781_v53, 6  ;;  %v277_v63 = vsel %vm271_vm4, %v263_v37, %v269_v49  ;;  %v1644_v37 = vld [vmem:[%s1869_s22 + $0x10] sm:$0x6] }
  0x1f   : > { %791 = vrot.lane.b32.xlu2 %v780_v55, %s1812_s24  ;;  %v786_v1 = vrot.slane %v784_v56, 7  ;;  %v767_v2 = vrot.slane %v765_v57, 6  ;;  %v770_v3 = vrot.slane %v768_v58, 7  ;;  %v289_v4 = vshrl.u32 %v277_v63, 16 }
  0x20   : > { %309 = vrot.lane.b32.xlu1 %v304_v60, %s1812_s24  ;;  %v288_v5 = vrot.slane %v287_v61, 2  ;;  %v292_v6 = vshll.u32 %v277_v63, 16  ;;  %v815_v7 = vrot.slane %v1635_v54, 2  ;;  %v814_v8 = vrot.slane %v1634_v59, 2 }
  0x21   : > { %v787_v9 = vor.u32 %v786_v1, %v783_v62  ;;  %v771_v10 = vor.u32 %v770_v3, %v767_v2  ;;  %v291_v12 = vrot.slane %v289_v4, 6  ;;  %v813_v13 = vrot.slane %v1633_v0, 2 }
  0x22   : > { %305 = vrot.lane.b32.xlu0 %v288_v5, %s1812_s24  ;;  %v294_v14 = vrot.slane %v292_v6, 7  ;;  %v832_v15 = vsel %vm271_vm4, %v1635_v54, %v815_v7  ;;  %v834_v16 = vsel %vm338_vm5, %v1635_v54, %v815_v7  ;;  %v825_v17 = vsel %vm271_vm4, %v1634_v59, %v814_v8 }
  0x23   : > { %v788_v18 = vrot.slane %v787_v9, 2  ;;  %v772_v19 = vrot.slane %v771_v10, 2  ;;  %v1640_v20 = vrot.slane %v832_v15, 9  ;;  %v1641_v21 = vrot.slane %v834_v16, 9 }
  0x24   : > { %v295_v23 = vor.u32 %v294_v14, %v291_v12  ;;  %v827_v24 = vsel %vm338_vm5, %v1634_v59, %v814_v8  ;;  %v1638_v25 = vrot.slane %v825_v17, 9  ;;  %v818_v26 = vsel %vm271_vm4, %v1633_v0, %v813_v13 }
  0x25   : > { %v1639_v27 = vrot.slane %v827_v24, 9  ;;  %v820_v28 = vsel %vm338_vm5, %v1633_v0, %v813_v13  ;;  %v1636_v29 = vrot.slane %v818_v26, 9  ;;  %v403_v33 = vrot.slane %v397_v22, 2 }
  0x26   : > { %v296_v31 = vrot.slane %v295_v23, 2  ;;  %v1637_v32 = vrot.slane %v820_v28, 9  ;;  %v848_v35 = vsel %vm1878_vm8, %v1640_v20, %v1641_v21  ;;  %v402_v40 = vrot.slane %v396_v30, 2 }
  0x27   : > { %793 = vrot.lane.b32.xlu2 %v788_v18, %s1812_s24  ;;  %v844_v36 = vsel %vm1878_vm8, %v1638_v25, %v1639_v27  ;;  %v418_v38 = vsel %vm271_vm4, %v397_v22, %v403_v33  ;;  %v419_v39 = vsel %vm338_vm5, %v397_v22, %v403_v33  ;;  %v401_v44 = vrot.slane %v395_v34, 2 }
  0x28   : > { %789 = vrot.lane.b32.xlu1 %v772_v19, %s1812_s24  ;;  %v840_v42 = vsel %vm1878_vm8, %v1636_v29, %v1637_v32  ;;  %v421_v43 = vrot.slane %v419_v39, 2  ;;  %v453_v46 = vshrl.u32 %v418_v38, 16  ;;  %v412_v47 = vsel %vm271_vm4, %v396_v30, %v402_v40 }
  0x29   : > { %v413_v48 = vsel %vm338_vm5, %v396_v30, %v402_v40  ;;  %v875_v49 = vrot.slane %v1644_v37, 2  ;;  %v874_v53 = vrot.slane %v1643_v41, 2  ;;  %v441_v54 = vshrl.u32 %v412_v47, 16  ;;  %v1610_v47 = vld [vmem:[%s1869_s22 + $0x8] sm:$0x3] }
  0x2a   : > { %307 = vrot.lane.b32.xlu0 %v296_v31, %s1812_s24  ;;  %v458_v50 = vshrl.u32 %v421_v43, 16  ;;  %v461_v51 = vshll.u32 %v421_v43, 16  ;;  %v415_v52 = vrot.slane %v413_v48, 2  ;;  %v406_v55 = vsel %vm271_vm4, %v395_v34, %v401_v44  ;;  %s1596_s24 = sshll.u32 %s2358_s15, 1 }
  0x2b   : > { %v407_v56 = vsel %vm338_vm5, %v395_v34, %v401_v44  ;;  %v873_v57 = vrot.slane %v1642_v45, 2  ;;  %v1605_v63 = vrot.slane %v453_v46, 9  ;;  %v429_v0 = vshrl.u32 %v406_v55, 16  ;;  %v1608_v44 = vld [vmem:[%s1869_s22 + $0xc] sm:$0x3] }
  0x2c   : > { %v460_v59 = vrot.slane %v458_v50, 7  ;;  %v446_v60 = vshrl.u32 %v415_v52, 16  ;;  %v449_v61 = vshll.u32 %v415_v52, 16  ;;  %v409_v62 = vrot.slane %v407_v56, 2  ;;  %v1607_v46 = vld [vmem:[%s1869_s22 + $0x8] sm:$0x3] }
  0x2d   : > { %v890_v1 = vsel %vm271_vm4, %v1644_v37, %v875_v49  ;;  %v891_v2 = vsel %vm338_vm5, %v1644_v37, %v875_v49  ;;  %v1604_v9 = vrot.slane %v441_v54, 9  ;;  %v885_v13 = vsel %vm338_vm5, %v1643_v41, %v874_v53  ;;  %v1606_v50 = vld [vmem:[%s1869_s22 + $0x4] sm:$0x3] }
  0x2e   : > { %v463_v3 = vor.u32 %v461_v51, %v460_v59  ;;  %v448_v4 = vrot.slane %v446_v60, 7  ;;  %v434_v5 = vshrl.u32 %v409_v62, 16  ;;  %v437_v6 = vshll.u32 %v409_v62, 16  ;;  %v1609_v52 = vld [vmem:[%s1869_s22 + $0x4] sm:$0x3] }
  0x2f   : > { %853 = vrot.lane.b32.xlu2 %v848_v35, %s1811_s23  ;;  %v893_v8 = vrot.slane %v891_v2, 2  ;;  %v918_v14 = vshrl.u32 %v890_v1, 16  ;;  %v884_v16 = vsel %vm271_vm4, %v1643_v41, %v874_v53  ;;  %v887_v17 = vrot.slane %v885_v13, 2  ;;  %v1652_v1 = vld [vmem:[%s1869_s22 + $0x10] sm:$0x3] }
  0x30   : > { %851 = vrot.lane.b32.xlu1 %v844_v36, %s1811_s23  ;;  %v451_v10 = vor.u32 %v449_v61, %v448_v4  ;;  %v436_v12 = vrot.slane %v434_v5, 7  ;;  %v464_v18 = vsel %vm1951_vm15, %v1605_v63, %v463_v3  ;;  %v1603_v19 = vrot.slane %v429_v0, 9  ;;  %v1650_v61 = vld [vmem:[%s1869_s22 + $0x14] sm:$0x3]  ;;  %v1649_v63 = vld [vmem:[%s1869_s22 + $0x10] sm:$0x3] }
  0x31   : > { %v923_v15 = vshrl.u32 %v893_v8, 16  ;;  %v879_v21 = vsel %vm338_vm5, %v1642_v45, %v873_v57  ;;  %v926_v23 = vshll.u32 %v893_v8, 16  ;;  %v911_v24 = vshrl.u32 %v887_v17, 16 }
  0x32   : > { %849 = vrot.lane.b32.xlu0 %v840_v42, %s1811_s23  ;;  %v439_v20 = vor.u32 %v437_v6, %v436_v12  ;;  %v878_v25 = vsel %vm271_vm4, %v1642_v45, %v873_v57  ;;  %v452_v26 = vsel %vm1951_vm15, %v1604_v9, %v451_v10  ;;  %v906_v27 = vshrl.u32 %v884_v16, 16  ;;  %v1611_v45 = vld [vmem:[%s1869_s22 + $0xc] sm:$0x3]  ;;  %v1653_v57 = vld [vmem:[%s1869_s22 + $0x14] sm:$0x3]  ;;  %s238_s23 = scalar_lea.vmem %s2329_s3, %s1737_s20 }
  0x33   : > { %v925_v22 = vrot.slane %v923_v15, 7  ;;  %v914_v28 = vshll.u32 %v887_v17, 16  ;;  %v881_v29 = vrot.slane %v879_v21, 2  ;;  %v913_v30 = vrot.slane %v911_v24, 7  ;;  %v1651_v6 = vld [vmem:[%s1869_s22 + $0xc] sm:$0x3] }
  0x34   : > { %v440_v31 = vsel %vm1951_vm15, %v1603_v19, %v439_v20  ;;  %v894_v32 = vshrl.u32 %v878_v25, 16  ;;  %v1647_v35 = vrot.slane %v918_v14, 9  ;;  %v1646_v37 = vrot.slane %v906_v27, 9  ;;  %v1648_v9 = vld [vmem:[%s1869_s22 + $0xc] sm:$0x3] }
  0x35   : > { %v899_v33 = vshrl.u32 %v881_v29, 16  ;;  %v902_v34 = vshll.u32 %v881_v29, 16  ;;  %v928_v36 = vor.u32 %v926_v23, %v925_v22  ;;  %v916_v38 = vor.u32 %v914_v28, %v913_v30 }
  0x36   : > { %v1645_v40 = vrot.slane %v894_v32, 9  ;;  %v494_v49 = vrot.slane %v1608_v44, 2  ;;  %v535_v51 = vrot.slane %v1611_v45, 2  ;;  %v493_v53 = vrot.slane %v1607_v46, 2 }
  0x37   : > { %469 = vrot.lane.b32.xlu2 %v464_v18, %s1813_s25  ;;  %v901_v39 = vrot.slane %v899_v33, 7  ;;  %v929_v42 = vsel %vm1951_vm15, %v1647_v35, %v928_v36  ;;  %v917_v43 = vsel %vm1951_vm15, %v1646_v37, %v916_v38  ;;  %v534_v54 = vrot.slane %v1610_v47, 2 }
  0x38   : > { %467 = vrot.lane.b32.xlu1 %v452_v26, %s1813_s25  ;;  %v492_v55 = vrot.slane %v1606_v50, 2  ;;  %v533_v56 = vrot.slane %v1609_v52, 2  ;;  %v505_v58 = vsel %vm271_vm4, %v1608_v44, %v494_v49  ;;  %v544_v59 = vsel %vm271_vm4, %v1611_v45, %v535_v51  ;;  %v1613_v45 = vld [vmem:[%s1869_s22 + $0x8] sm:$0x6]  ;;  %v1612_v49 = vld [vmem:[%s1869_s22 + $0x4] sm:$0x6] }
  0x39   : > { %v904_v41 = vor.u32 %v902_v34, %v901_v39  ;;  %v501_v60 = vsel %vm271_vm4, %v1607_v46, %v493_v53  ;;  %v541_v62 = vsel %vm271_vm4, %v1610_v47, %v534_v54  ;;  %v996_v0 = vrot.slane %v1653_v57, 2  ;;  %v1614_v34 = vld [vmem:[%s1869_s22 + $0xc] sm:$0x6] }
  0x3a   : > { %465 = vrot.lane.b32.xlu0 %v440_v31, %s1813_s25  ;;  %v497_v2 = vsel %vm271_vm4, %v1606_v50, %v492_v55  ;;  %v561_v3 = vshrl.u32 %v544_v59, 16  ;;  %v564_v4 = vshll.u32 %v544_v59, 16  ;;  %v538_v5 = vsel %vm271_vm4, %v1609_v52, %v533_v56  ;;  %v1622_v59 = vld [vmem:[%s1869_s22 + $0x8] sm:$0x6] }
  0x3b   : > { %v905_v48 = vsel %vm1951_vm15, %v1645_v40, %v904_v41  ;;  %v957_v8 = vrot.slane %v1650_v61, 2  ;;  %v553_v10 = vshrl.u32 %v541_v62, 16  ;;  %v556_v12 = vshll.u32 %v541_v62, 16 }
  0x3c   : > { %v956_v13 = vrot.slane %v1649_v63, 2  ;;  %v995_v14 = vrot.slane %v1652_v1, 2  ;;  %v545_v15 = vshrl.u32 %v538_v5, 16  ;;  %v548_v16 = vshll.u32 %v538_v5, 16 }
  0x3d   : > { %v1005_v17 = vsel %vm271_vm4, %v1653_v57, %v996_v0  ;;  %v994_v18 = vrot.slane %v1651_v6, 2  ;;  %v955_v19 = vrot.slane %v1648_v9, 2  ;;  %v563_v20 = vrot.slane %v561_v3, 6  ;;  %v1656_v0 = vld [vmem:[%s1869_s22 + $0x14] sm:$0x6] }
  0x3e   : > { %v566_v21 = vrot.slane %v564_v4, 7  ;;  %v968_v22 = vsel %vm271_vm4, %v1650_v61, %v957_v8  ;;  %v555_v23 = vrot.slane %v553_v10, 6  ;;  %v558_v24 = vrot.slane %v556_v12, 7  ;;  %v1628_v3 = vld [vmem:[%s1869_s22 + $0xc] sm:$0x3] }
  0x3f   : > { %934 = vrot.lane.b32.xlu2 %v929_v42, %s1813_s25  ;;  %v964_v25 = vsel %vm271_vm4, %v1649_v63, %v956_v13  ;;  %v1022_v26 = vshrl.u32 %v1005_v17, 16  ;;  %v1025_v27 = vshll.u32 %v1005_v17, 16  ;;  %v1002_v28 = vsel %vm271_vm4, %v1652_v1, %v995_v14  ;;  %v741_v10 = vld [vmem:[#allocation2 + $0x6] sm:$0x3]  ;;  %v1655_v14 = vld [vmem:[%s1869_s22 + $0x10] sm:$0x6] }
  0x40   : > { %932 = vrot.lane.b32.xlu1 %v917_v43, %s1813_s25  ;;  %v547_v29 = vrot.slane %v545_v15, 6  ;;  %v550_v30 = vrot.slane %v548_v16, 7  ;;  %v999_v31 = vsel %vm271_vm4, %v1651_v6, %v994_v18  ;;  %v960_v32 = vsel %vm271_vm4, %v1648_v9, %v955_v19  ;;  %v1621_v15 = vld [vmem:[%s1869_s22 + $0x4] sm:$0x6]  ;;  %v1654_v19 = vld [vmem:[%s1869_s22 + $0xc] sm:$0x6] }
  0x41   : > { %v567_v33 = vor.u32 %v566_v21, %v563_v20  ;;  %v559_v35 = vor.u32 %v558_v24, %v555_v23  ;;  %v1014_v36 = vshrl.u32 %v1002_v28, 16  ;;  %v1017_v37 = vshll.u32 %v1002_v28, 16 }
  0x42   : > { %930 = vrot.lane.b32.xlu0 %v905_v48, %s1813_s25  ;;  %v1024_v38 = vrot.slane %v1022_v26, 6  ;;  %v1027_v39 = vrot.slane %v1025_v27, 7  ;;  %v1006_v40 = vshrl.u32 %v999_v31, 16  ;;  %v1009_v41 = vshll.u32 %v999_v31, 16 }
  0x43   : > { %v551_v42 = vor.u32 %v550_v30, %v547_v29  ;;  %v597_v43 = vrot.slane %v1614_v34, 2  ;;  %v568_v44 = vrot.slane %v567_v33, 2  ;;  %v560_v46 = vrot.slane %v559_v35, 2  ;;  %v1629_v35 = vld [vmem:[%s1869_s22 + $0x10] sm:$0x3] }
  0x44   : > { %v1016_v47 = vrot.slane %v1014_v36, 6  ;;  %v1019_v48 = vrot.slane %v1017_v37, 7  ;;  %v1028_v50 = vor.u32 %v1027_v39, %v1024_v38  ;;  %v1008_v51 = vrot.slane %v1006_v40, 6  ;;  %v2048_v40 = vld [vmem:[%s1869_s22 + $0x10] sm:$0x6] }
  0x45   : > { %v1011_v52 = vrot.slane %v1009_v41, 7  ;;  %v552_v53 = vrot.slane %v551_v42, 2  ;;  %v614_v54 = vsel %vm271_vm4, %v1614_v34, %v597_v43  ;;  %v596_v55 = vrot.slane %v1613_v45, 2  ;;  %v744_v41 = vld [vmem:[#allocation2 + $0xa] sm:$0x3] }
  0x46   : > { %v595_v56 = vrot.slane %v1612_v49, 2  ;;  %v1020_v57 = vor.u32 %v1019_v48, %v1016_v47  ;;  %v616_v62 = vsel %vm338_vm5, %v1614_v34, %v597_v43  ;;  %v1619_v63 = vrot.slane %v614_v54, 9  ;;  %v2039_v34 = vld [vmem:[%s1869_s22 + $0x14] sm:$0x6] }
  0x47   : > { %511 = vrot.lane.b32.xlu2 %v505_v58, %s1814_s26  ;;  %v1623_v58 = vld [vmem:[%s1869_s22 + $0xc] sm:$0x6]  ;;  %v1012_v61 = vor.u32 %v1011_v52, %v1008_v51  ;;  %v607_v1 = vsel %vm271_vm4, %v1613_v45, %v596_v55  ;;  %v658_v8 = vrot.slane %v1622_v59, 2  ;;  %v1620_v13 = vrot.slane %v616_v62, 9 }
  0x48   : > { %509 = vrot.lane.b32.xlu1 %v501_v60, %s1814_s26  ;;  %v1029_v60 = vrot.slane %v1028_v50, 2  ;;  %v600_v4 = vsel %vm271_vm4, %v1612_v49, %v595_v56  ;;  %v602_v5 = vsel %vm338_vm5, %v1612_v49, %v595_v56  ;;  %v659_v6 = vrot.slane %v1623_v58, 2 }
  0x49   : > { %v1021_v12 = vrot.slane %v1020_v57, 2  ;;  %v742_v16 = vsel %vm2019_vm6, %v1628_v3, %v741_v10  ;;  %v1013_v17 = vrot.slane %v1012_v61, 2  ;;  %v1056_v18 = vrot.slane %v1656_v0, 2  ;;  %v259_v10 = vld [vmem:[#allocation2 + $0x8] sm:$0x3] }
  0x4a   : > { %507 = vrot.lane.b32.xlu0 %v497_v2, %s1814_s26  ;;  %v609_v2 = vsel %vm338_vm5, %v1613_v45, %v596_v55  ;;  %743 = vst [vmem:[#allocation2 + $0x6] sm:$0x3] %v742_v16  ;;  %v1617_v20 = vrot.slane %v607_v1, 9  ;;  %v1616_v23 = vrot.slane %v602_v5, 9  ;;  %v1055_v24 = vrot.slane %v1655_v14, 2 }
  0x4b   : > { %v1618_v21 = vrot.slane %v609_v2, 9  ;;  %v669_v26 = vsel %vm338_vm5, %v1622_v59, %v658_v8  ;;  %v657_v27 = vrot.slane %v1621_v15, 2  ;;  %v1054_v28 = vrot.slane %v1654_v19, 2  ;;  %v2053_v45 = vld [vmem:[%s1869_s22 + $0xc] sm:$0x6] }
  0x4c   : > { %v1073_v29 = vsel %vm271_vm4, %v1656_v0, %v1056_v18  ;;  %v630_v30 = vsel %vm1878_vm8, %v1619_v63, %v1620_v13  ;;  %v671_v33 = vrot.slane %v669_v26, 2  ;;  %v1075_v37 = vsel %vm338_vm5, %v1656_v0, %v1056_v18  ;;  %v253_v13 = vld [vmem:[#allocation2] sm:$0x3]  ;;  %v247_v18 = vld [vmem:[%s1869_s22] sm:$0x3] }
  0x4d   : > { %v626_v31 = vsel %vm1878_vm8, %v1617_v20, %v1618_v21  ;;  %v1066_v38 = vsel %vm271_vm4, %v1655_v14, %v1055_v24  ;;  %v663_v39 = vsel %vm338_vm5, %v1621_v15, %v657_v27  ;;  %v1661_v42 = vrot.slane %v1073_v29, 9 }
  0x4e   : > { %v1068_v43 = vsel %vm338_vm5, %v1655_v14, %v1055_v24  ;;  %v1061_v47 = vsel %vm338_vm5, %v1654_v19, %v1054_v28  ;;  %v674_v48 = vsel %vm271_vm4, %v1623_v58, %v659_v6  ;;  %v668_v49 = vsel %vm271_vm4, %v1622_v59, %v658_v8 }
  0x4f   : > { %974 = vrot.lane.b32.xlu2 %v968_v22, %s1814_s26  ;;  %v1615_v22 = vrot.slane %v600_v4, 9  ;;  %v1116_v50 = vrot.slane %v2039_v34, 2  ;;  %v695_v52 = vshrl.u32 %v671_v33, 16  ;;  %v1115_v54 = vrot.slane %v2048_v40, 2 }
  0x50   : > { %972 = vrot.lane.b32.xlu1 %v964_v25, %s1814_s26  ;;  %v675_v25 = vsel %vm338_vm5, %v1623_v58, %v659_v6  ;;  %v1662_v55 = vrot.slane %v1075_v37, 9  ;;  %v1659_v56 = vrot.slane %v1066_v38, 9  ;;  %v1660_v57 = vrot.slane %v1068_v43, 9  ;;  %v256_v43 = vld [vmem:[#allocation2 + $0x4] sm:$0x3] }
  0x51   : > { %v622_v36 = vsel %vm1878_vm8, %v1615_v22, %v1616_v23  ;;  %v1658_v59 = vrot.slane %v1061_v47, 9  ;;  %v702_v61 = vshrl.u32 %v674_v48, 16  ;;  %v662_v62 = vsel %vm271_vm4, %v1621_v15, %v657_v27 }
  0x52   : > { %970 = vrot.lane.b32.xlu0 %v960_v32, %s1814_s26  ;;  %v677_v32 = vrot.slane %v675_v25, 2  ;;  %v690_v0 = vshrl.u32 %v668_v49, 16  ;;  %v698_v1 = vshll.u32 %v671_v33, 16  ;;  %v1132_v2 = vsel %vm338_vm5, %v2039_v34, %v1116_v50 }
  0x53   : > { %v697_v4 = vrot.slane %v695_v52, 7  ;;  %v1126_v6 = vsel %vm338_vm5, %v2048_v40, %v1115_v54  ;;  %v1089_v14 = vsel %vm1878_vm8, %v1661_v42, %v1662_v55  ;;  %v1085_v15 = vsel %vm1878_vm8, %v1659_v56, %v1660_v57  ;;  %v738_v42 = vld [vmem:[#allocation2 + $0x2] sm:$0x3] }
  0x54   : > { %v707_v51 = vshrl.u32 %v677_v32, 16  ;;  %v710_v63 = vshll.u32 %v677_v32, 16  ;;  %v1134_v16 = vrot.slane %v1132_v2, 2  ;;  %v678_v20 = vshrl.u32 %v662_v62, 16 }
  0x55   : > { %v1128_v21 = vrot.slane %v1126_v6, 2  ;;  %v254_v22 = vsel %vm2019_vm6, %v247_v18, %v253_v13  ;;  %v1626_v23 = vrot.slane %v702_v61, 9  ;;  %v1625_v24 = vrot.slane %v690_v0, 9 }
  0x56   : > { %v709_v3 = vrot.slane %v707_v51, 7  ;;  %255 = vst [vmem:[#allocation2] sm:$0x3] %v254_v22  ;;  %v1131_v11 = vsel %vm271_vm4, %v2039_v34, %v1116_v50  ;;  %v1624_v32 = vrot.slane %v678_v20, 9  ;;  %vm516_vm12 = vcmask 648704  }
  0x57   : > { %573 = vrot.lane.b32.xlu2 %v568_v44, %s1815_s27  ;;  %v1059_v44 = vsel %vm271_vm4, %v1654_v19, %v1054_v28  ;;  %v700_v28 = vor.u32 %v698_v1, %v697_v4  ;;  %v1152_v33 = vshrl.u32 %v1128_v21, 16  ;;  %v1155_v51 = vshll.u32 %v1128_v21, 16  ;;  %vm2160_vm13 = vmand %vm516_vm12, %vm251_vm3 }
  0x58   : > { %571 = vrot.lane.b32.xlu1 %v560_v46, %s1815_s27  ;;  %v745_v46 = vsel %vm2019_vm6, %v1629_v35, %v744_v41  ;;  %v1657_v58 = vrot.slane %v1059_v44, 9  ;;  %v712_v27 = vor.u32 %v710_v63, %v709_v3  ;;  %v1159_v35 = vshrl.u32 %v1131_v11, 16  ;;  %v1627_v41 = vld [vmem:[%s1869_s22 + $0x8] sm:$0x3] }
  0x59   : > { %746 = vst [vmem:[#allocation2 + $0xa] sm:$0x3] %v745_v46  ;;  %v701_v34 = vsel %vm1951_vm15, %v1625_v24, %v700_v28  ;;  %v1167_v46 = vshll.u32 %v1134_v16, 16  ;;  %v739_v48 = vsel %vm2019_vm6, %v1627_v41, %v738_v42  ;;  %v1154_v50 = vrot.slane %v1152_v33, 7 }
  0x5a   : > { %569 = vrot.lane.b32.xlu0 %v552_v53, %s1815_s27  ;;  %v665_v53 = vrot.slane %v663_v39, 2  ;;  %v1081_v19 = vsel %vm1878_vm8, %v1657_v58, %v1658_v59  ;;  %v713_v38 = vsel %vm1951_vm15, %v1626_v23, %v712_v27  ;;  %740 = vst [vmem:[#allocation2 + $0x2] sm:$0x3] %v739_v48  ;;  %vm384_vm8 = vcmask 386304  }
  0x5b   : > { %v1157_v61 = vor.u32 %v1155_v51, %v1154_v50  ;;  %vm2125_vm9 = vmand %vm384_vm8, %vm251_vm3  ;;  %vm578_vm14 = vcmask 779904   ;;  %vm640_vm2 = vcmask 911104   ;;  %vm1216_vm8 = vcmask 1043459  }
  0x5c   : > { %v683_v5 = vshrl.u32 %v665_v53, 16  ;;  %v686_v25 = vshll.u32 %v665_v53, 16 }
  0x5d   : > { %v316_v18 = vld [vmem:[#allocation2] sm:$0x3] }
  0x5e   : > { %v685_v29 = vrot.slane %v683_v5, 7 }
  0x5f   : > { %1034 = vrot.lane.b32.xlu2 %v1029_v60, %s1815_s27  ;;  %v1114_v60 = vrot.slane %v2053_v45, 2 }
  0x60   : > { %1032 = vrot.lane.b32.xlu1 %v1021_v12, %s1815_s27  ;;  %v249_v12 = vld [vmem:[%s1869_s22 + $0x8] sm:$0x3]  ;;  %v688_v39 = vor.u32 %v686_v25, %v685_v29  ;;  %v804_v4 = vld [vmem:[#allocation2 + $0xa] sm:$0x3] }
  0x61   : > { %v1120_v8 = vsel %vm338_vm5, %v2053_v45, %v1114_v60  ;;  %vm314_vm5 = vcmask 255104   ;;  %v1119_v47 = vsel %vm271_vm4, %v2053_v45, %v1114_v60  ;;  %v1668_v60 = vrot.slane %v1159_v35, 9  ;;  %v798_v23 = vld [vmem:[#allocation2 + $0x2] sm:$0x3] }
  0x62   : > { %1030 = vrot.lane.b32.xlu0 %v1013_v17, %s1815_s27  ;;  %v260_v17 = vsel %vm2019_vm6, %v249_v12, %v259_v10  ;;  %v1122_v26 = vrot.slane %v1120_v8, 2  ;;  %v689_v53 = vsel %vm1951_vm15, %v1624_v32, %v688_v39  ;;  %vm2110_vm7 = vmand %vm314_vm5, %vm251_vm3  ;;  %v1135_v55 = vshrl.u32 %v1119_v47, 16  ;;  %s246_s27 = scalar_lea.vmem %s2330_s4, %s1596_s24 }
  0x63   : > { %261 = vst [vmem:[#allocation2 + $0x8] sm:$0x3] %v260_v17  ;;  %vm723_vm5 = vcmask 1042304  }
  0x64   : > { %v1140_v37 = vshrl.u32 %v1122_v26, 16  ;;  %v1143_v57 = vshll.u32 %v1122_v26, 16  ;;  %v1666_v63 = vrot.slane %v1135_v55, 9 }
  0x66   : > { %v1142_v56 = vrot.slane %v1140_v37, 7 }
  0x67   : > { %635 = vrot.lane.b32.xlu2 %v630_v30, %s1816_s28  ;;  %v1164_v30 = vshrl.u32 %v1134_v16, 16 }
  0x68   : > { %633 = vrot.lane.b32.xlu1 %v626_v31, %s1816_s28  ;;  %v1145_v0 = vor.u32 %v1143_v57, %v1142_v56 }
  0x69   : > { %v1166_v44 = vrot.slane %v1164_v30, 7 }
  0x6a   : > { %631 = vrot.lane.b32.xlu0 %v622_v36, %s1816_s28  ;;  %v1125_v36 = vsel %vm271_vm4, %v2048_v40, %v1115_v54  ;;  %v248_v40 = vld [vmem:[%s1869_s22 + $0x4] sm:$0x3]  ;;  %v801_v54 = vld [vmem:[#allocation2 + $0x6] sm:$0x3]  ;;  %v1146_v3 = vsel %vm1951_vm15, %v1666_v63, %v1145_v0 }
  0x6b   : > { %v1147_v49 = vshrl.u32 %v1125_v36, 16  ;;  %v257_v52 = vsel %vm2019_vm6, %v248_v40, %v256_v43  ;;  %v1169_v9 = vor.u32 %v1167_v46, %v1166_v44  ;;  %vm2190_vm6 = vmand %vm640_vm2, %vm251_vm3  ;;  %v1751_v40 = vld [vmem:[%s2327_s1 + $0x68] sm:$0xff] }
  0x6c   : > { %258 = vst [vmem:[#allocation2 + $0x4] sm:$0x3] %v257_v52 }
  0x6d   : > { %v1667_v59 = vrot.slane %v1147_v49, 9  ;;  %v1170_v1 = vsel %vm1951_vm15, %v1668_v60, %v1169_v9 }
  0x6f   : > { %1094 = vrot.lane.b32.xlu2 %v1089_v14, %s1816_s28  ;;  %v1158_v2 = vsel %vm1951_vm15, %v1667_v59, %v1157_v61  ;;  %vm2175_vm15 = vmand %vm578_vm14, %vm251_vm3  ;;  %v1748_v61 = vld [vmem:[%s2327_s1 + $0x50] sm:$0xff] }
  0x70   : > { %1092 = vrot.lane.b32.xlu1 %v1085_v15, %s1816_s28  ;;  %v322_v15 = vld [vmem:[#allocation2 + $0x8] sm:$0x3] }
  0x71   : > { %v2089_v31 = vpop.permute.xlu2 %379 }
  0x72   : > { %1090 = vrot.lane.b32.xlu0 %v1081_v19, %s1816_s28 }
  0x73   : > { %v319_v28 = vld [vmem:[#allocation2 + $0x4] sm:$0x3] }
  0x77   : > { %718 = vrot.lane.b32.xlu2 %v713_v38, %s1817_s29 }
  0x78   : > { %716 = vrot.lane.b32.xlu1 %v701_v34, %s1817_s29 }
  0x79   : > { %v792_v58 = vpop.permute.xlu2 %791 }
  0x7a   : > { %714 = vrot.lane.b32.xlu0 %v689_v53, %s1817_s29  ;;  %v802_v62 = vsel %vm2110_vm7, %v792_v58, %v801_v54 }
  0x7b   : > { %803 = vst [vmem:[#allocation2 + $0x6] sm:$0x3] %v802_v62 }
  0x7f   : > { %1175 = vrot.lane.b32.xlu2 %v1170_v1, %s1817_s29 }
  0x80   : > { %1173 = vrot.lane.b32.xlu1 %v1158_v2, %s1817_s29 }
  0x81   : > { %v794_v5 = vpop.permute.xlu2 %793 }
  0x82   : > { %1171 = vrot.lane.b32.xlu0 %v1146_v3, %s1817_s29  ;;  %v805_v6 = vsel %vm2110_vm7, %v794_v5, %v804_v4  ;;  %v861_v38 = vld [vmem:[#allocation2 + $0x6] sm:$0x3] }
  0x83   : > { %806 = vst [vmem:[#allocation2 + $0xa] sm:$0x3] %v805_v6 }
  0x89   : > { %v854_v8 = vpop.permute.xlu2 %853  ;;  %v378_v10 = vpop.permute.xlu1 %377 }
  0x8a   : > { %v864_v13 = vld [vmem:[#allocation2 + $0xa] sm:$0x3] }
  0x8b   : > { %v865_v7 = vsel %vm2125_vm9, %v854_v8, %v864_v13  ;;  %v376_v14 = vpop.permute.xlu0 %375 }
  0x8c   : > { %866 = vst [vmem:[#allocation2 + $0xa] sm:$0x3] %v865_v7 }
  0x91   : > { %v470_v16 = vpop.permute.xlu2 %469 }
  0x92   : > { %v310_v17 = vpop.permute.xlu1 %309 }
  0x93   : > { %v323_v19 = vsel %vm2110_vm7, %v310_v17, %v322_v15  ;;  %v945_v22 = vld [vmem:[#allocation2 + $0xa] sm:$0x3] }
  0x94   : > { %324 = vst [vmem:[#allocation2 + $0x8] sm:$0x3] %v323_v19  ;;  %v306_v20 = vpop.permute.xlu0 %305 }
  0x95   : > { %v317_v21 = vsel %vm2110_vm7, %v306_v20, %v316_v18 }
  0x96   : > { %318 = vst [vmem:[#allocation2] sm:$0x3] %v317_v21 }
  0x99   : > { %v935_v25 = vpop.permute.xlu2 %934 }
  0x9a   : > { %v946_v26 = vsel %vm2136_vm11, %v935_v25, %v945_v22  ;;  %v790_v27 = vpop.permute.xlu1 %789 }
  0x9b   : > { %v392_v29 = vld [vmem:[#allocation2 + $0x8] sm:$0x3]  ;;  %947 = vst [vmem:[#allocation2 + $0xa] sm:$0x3] %v946_v26  ;;  %v799_v11 = vsel %vm2110_vm7, %v790_v27, %v798_v23 }
  0x9c   : > { %v393_v30 = vsel %vm2125_vm9, %v2089_v31, %v392_v29  ;;  %800 = vst [vmem:[#allocation2 + $0x2] sm:$0x3] %v799_v11  ;;  %v308_v32 = vpop.permute.xlu0 %307 }
  0x9d   : > { %394 = vst [vmem:[#allocation2 + $0x8] sm:$0x3] %v393_v30  ;;  %v386_v33 = vld [vmem:[#allocation2] sm:$0x3]  ;;  %v320_v35 = vsel %vm2110_vm7, %v308_v32, %v319_v28  ;;  %vm2213_vm7 = vmand %vm723_vm5, %vm251_vm3  ;;  %vm1214_vm3 = vcmask 1041409  }
  0x9e   : > { %v387_v36 = vsel %vm2125_vm9, %v376_v14, %v386_v33  ;;  %321 = vst [vmem:[#allocation2 + $0x4] sm:$0x3] %v320_v35  ;;  %v1745_v33 = vld [vmem:[%s2327_s1 + $0x38] sm:$0xff]  ;;  %v1738_v14 = vld [vmem:[%s2327_s1] sm:$0xff] }
  0x9f   : > { %388 = vst [vmem:[#allocation2] sm:$0x3] %v387_v36  ;;  %v1753_v35 = vld [vmem:[%s2327_s1 + $0x78] sm:$0xff]  ;;  %1412 = vmatpush.bf16.msra.mxu0 %v1745_v33 }
  0xa0   : > { %1426 = vmatpush.bf16.msra.mxu1 %v1753_v35 }
  0xa1   : > { %v512_v37 = vpop.permute.xlu2 %511 }
  0xa2   : > { %v852_v34 = vpop.permute.xlu1 %851  ;;  %v985_v48 = vld [vmem:[#allocation2 + $0xa] sm:$0x3] }
  0xa3   : > { %v862_v39 = vsel %vm2125_vm9, %v852_v34, %v861_v38  ;;  %v858_v41 = vld [vmem:[#allocation2 + $0x2] sm:$0x3]  ;;  %v1752_v38 = vld [vmem:[%s2327_s1 + $0x70] sm:$0xff] }
  0xa4   : > { %v482_v31 = vld [vmem:[#allocation2 + $0x8] sm:$0x3]  ;;  %863 = vst [vmem:[#allocation2 + $0x6] sm:$0x3] %v862_v39  ;;  %v850_v42 = vpop.permute.xlu0 %849  ;;  %1427 = vmatpush.bf16.msra.mxu1 %v1752_v38 }
  0xa5   : > { %v483_v43 = vsel %vm2136_vm11, %v470_v16, %v482_v31  ;;  %v389_v44 = vld [vmem:[#allocation2 + $0x4] sm:$0x3]  ;;  %v859_v46 = vsel %vm2125_vm9, %v850_v42, %v858_v41 }
  0xa6   : > { %484 = vst [vmem:[#allocation2 + $0x8] sm:$0x3] %v483_v43  ;;  %v390_v47 = vsel %vm2125_vm9, %v378_v10, %v389_v44  ;;  %v476_v53 = vld [vmem:[#allocation2] sm:$0x3]  ;;  %vm1218_vm9 = vcmask 1042433  }
  0xa7   : > { %391 = vst [vmem:[#allocation2 + $0x4] sm:$0x3] %v390_v47 }
  0xa8   : > { %860 = vst [vmem:[#allocation2 + $0x2] sm:$0x3] %v859_v46  ;;  %1428 = vmatpush.bf16.msra.mxu1 %v1751_v40 }
  0xa9   : > { %v975_v49 = vpop.permute.xlu2 %974 }
  0xaa   : > { %v986_v50 = vsel %vm2160_vm13, %v975_v49, %v985_v48  ;;  %v468_v51 = vpop.permute.xlu1 %467  ;;  %v1743_v48 = vld [vmem:[%s2327_s1 + $0x28] sm:$0xff]  ;;  %v1742_v49 = vld [vmem:[%s2327_s1 + $0x20] sm:$0xff] }
  0xab   : > { %987 = vst [vmem:[#allocation2 + $0xa] sm:$0x3] %v986_v50  ;;  %v942_v9 = vld [vmem:[#allocation2 + $0x6] sm:$0x3]  ;;  %v1750_v50 = vld [vmem:[%s2327_s1 + $0x60] sm:$0xff] }
  0xac   : > { %v466_v52 = vpop.permute.xlu0 %465  ;;  %1429 = vmatpush.bf16.msra.mxu1 %v1750_v50 }
  0xad   : > { %v524_v45 = vld [vmem:[#allocation2 + $0x8] sm:$0x3]  ;;  %v477_v54 = vsel %vm2136_vm11, %v466_v52, %v476_v53 }
  0xae   : > { %v525_v55 = vsel %vm2160_vm13, %v512_v37, %v524_v45  ;;  %v479_v56 = vld [vmem:[#allocation2 + $0x4] sm:$0x3]  ;;  %478 = vst [vmem:[#allocation2] sm:$0x3] %v477_v54  ;;  %v1744_v37 = vld [vmem:[%s2327_s1 + $0x30] sm:$0xff] }
  0xaf   : > { %526 = vst [vmem:[#allocation2 + $0x8] sm:$0x3] %v525_v55  ;;  %v480_v57 = vsel %vm2136_vm11, %v468_v51, %v479_v56  ;;  %v939_v62 = vld [vmem:[#allocation2 + $0x2] sm:$0x3]  ;;  %1413 = vmatpush.bf16.msra.mxu0 %v1744_v37 }
  0xb0   : > { %481 = vst [vmem:[#allocation2 + $0x4] sm:$0x3] %v480_v57 }
  0xb1   : > { %v574_v60 = vpop.permute.xlu2 %573 }
  0xb2   : > { %v933_v58 = vpop.permute.xlu1 %932  ;;  %v1045_v3 = vld [vmem:[#allocation2 + $0xa] sm:$0x3] }
  0xb3   : > { %v943_v59 = vsel %vm2136_vm11, %v933_v58, %v942_v9  ;;  %1414 = vmatpush.bf16.msra.mxu0 %v1743_v48  ;;  %v1749_v9 = vld [vmem:[%s2327_s1 + $0x58] sm:$0xff] }
  0xb4   : > { %944 = vst [vmem:[#allocation2 + $0x6] sm:$0x3] %v943_v59  ;;  %v931_v63 = vpop.permute.xlu0 %930  ;;  %1430 = vmatpush.bf16.msra.mxu1 %v1749_v9  ;;  %v1740_v59 = vld [vmem:[%s2327_s1 + $0x10] sm:$0xff] }
  0xb5   : > { %v940_v0 = vsel %vm2136_vm11, %v931_v63, %v939_v62  ;;  %v518_v13 = vld [vmem:[#allocation2] sm:$0x3] }
  0xb6   : > { %v586_v1 = vld [vmem:[#allocation2 + $0x8] sm:$0x3]  ;;  %941 = vst [vmem:[#allocation2 + $0x2] sm:$0x3] %v940_v0 }
  0xb7   : > { %v587_v2 = vsel %vm2175_vm15, %v574_v60, %v586_v1  ;;  %v521_v8 = vld [vmem:[#allocation2 + $0x4] sm:$0x3]  ;;  %1415 = vmatpush.bf16.msra.mxu0 %v1742_v49  ;;  %v1741_v60 = vld [vmem:[%s2327_s1 + $0x18] sm:$0xff] }
  0xb8   : > { %588 = vst [vmem:[#allocation2 + $0x8] sm:$0x3] %v587_v2  ;;  %1431 = vmatpush.bf16.msra.mxu1 %v1748_v61 }
  0xb9   : > { %v1035_v4 = vpop.permute.xlu2 %1034 }
  0xba   : > { %v1046_v5 = vsel %vm2175_vm15, %v1035_v4, %v1045_v3  ;;  %v510_v6 = vpop.permute.xlu1 %509 }
  0xbb   : > { %1047 = vst [vmem:[#allocation2 + $0xa] sm:$0x3] %v1046_v5  ;;  %v522_v10 = vsel %vm2160_vm13, %v510_v6, %v521_v8  ;;  %v982_v18 = vld [vmem:[#allocation2 + $0x6] sm:$0x3]  ;;  %1416 = vmatpush.bf16.msra.mxu0 %v1741_v60 }
  0xbc   : > { %523 = vst [vmem:[#allocation2 + $0x4] sm:$0x3] %v522_v10  ;;  %v508_v12 = vpop.permute.xlu0 %507  ;;  %v1739_v8 = vld [vmem:[%s2327_s1 + $0x8] sm:$0xff] }
  0xbd   : > { %v519_v7 = vsel %vm2160_vm13, %v508_v12, %v518_v13  ;;  %v979_v21 = vld [vmem:[#allocation2 + $0x2] sm:$0x3] }
  0xbe   : > { %520 = vst [vmem:[#allocation2] sm:$0x3] %v519_v7  ;;  %v1747_v10 = vld [vmem:[%s2327_s1 + $0x48] sm:$0xff] }
  0xbf   : > { %v648_v16 = vld [vmem:[#allocation2 + $0x8] sm:$0x3]  ;;  %1417 = vmatpush.bf16.msra.mxu0 %v1740_v59  ;;  %1432 = vmatpush.bf16.msra.mxu1 %v1747_v10 }
  0xc1   : > { %v636_v15 = vpop.permute.xlu2 %635 }
  0xc2   : > { %v649_v17 = vsel %vm2190_vm6, %v636_v15, %v648_v16  ;;  %v973_v19 = vpop.permute.xlu1 %972  ;;  %v1105_v24 = vld [vmem:[#allocation2 + $0xa] sm:$0x3] }
  0xc3   : > { %650 = vst [vmem:[#allocation2 + $0x8] sm:$0x3] %v649_v17  ;;  %v983_v20 = vsel %vm2160_vm13, %v973_v19, %v982_v18  ;;  %v583_v28 = vld [vmem:[#allocation2 + $0x4] sm:$0x3]  ;;  %1418 = vmatpush.bf16.msra.mxu0 %v1739_v8  ;;  %v1746_v19 = vld [vmem:[%s2327_s1 + $0x40] sm:$0xff] }
  0xc4   : > { %984 = vst [vmem:[#allocation2 + $0x6] sm:$0x3] %v983_v20  ;;  %v971_v22 = vpop.permute.xlu0 %970  ;;  %1433 = vmatpush.bf16.msra.mxu1 %v1746_v19 }
  0xc5   : > { %v980_v23 = vsel %vm2160_vm13, %v971_v22, %v979_v21  ;;  %v580_v30 = vld [vmem:[#allocation2] sm:$0x3] }
  0xc6   : > { %981 = vst [vmem:[#allocation2 + $0x2] sm:$0x3] %v980_v23 }
  0xc7   : > { %1419 = vmatpush.bf16.msra.mxu0 %v1738_v14 }
  0xc9   : > { %v1095_v25 = vpop.permute.xlu2 %1094 }
  0xca   : > { %v1106_v26 = vsel %vm2190_vm6, %v1095_v25, %v1105_v24  ;;  %v572_v27 = vpop.permute.xlu1 %571  ;;  %v731_v39 = vld [vmem:[#allocation2 + $0x8] sm:$0x3] }
  0xcb   : > { %1107 = vst [vmem:[#allocation2 + $0xa] sm:$0x3] %v1106_v26  ;;  %v584_v29 = vsel %vm2175_vm15, %v572_v27, %v583_v28  ;;  %v1042_v31 = vld [vmem:[#allocation2 + $0x6] sm:$0x3] }
  0xcc   : > { %585 = vst [vmem:[#allocation2 + $0x4] sm:$0x3] %v584_v29  ;;  %v570_v11 = vpop.permute.xlu0 %569 }
  0xcd   : > { %v581_v32 = vsel %vm2175_vm15, %v570_v11, %v580_v30  ;;  %v1039_v44 = vld [vmem:[#allocation2 + $0x2] sm:$0x3] }
  0xce   : > { %582 = vst [vmem:[#allocation2] sm:$0x3] %v581_v32 }
  0xd1   : > { %v719_v34 = vpop.permute.xlu2 %718 }
  0xd2   : > { %v732_v41 = vsel %vm2213_vm7, %v719_v34, %v731_v39  ;;  %v1033_v42 = vpop.permute.xlu1 %1032  ;;  %v1186_v51 = vld [vmem:[#allocation2 + $0xa] sm:$0x3] }
  0xd3   : > { %733 = vst [vmem:[#allocation2 + $0x8] sm:$0x3] %v732_v41  ;;  %v1043_v43 = vsel %vm2175_vm15, %v1033_v42, %v1042_v31  ;;  %v645_v54 = vld [vmem:[#allocation2 + $0x4] sm:$0x3] }
  0xd4   : > { %1044 = vst [vmem:[#allocation2 + $0x6] sm:$0x3] %v1043_v43  ;;  %v1031_v46 = vpop.permute.xlu0 %1030 }
  0xd5   : > { %v1040_v47 = vsel %vm2175_vm15, %v1031_v46, %v1039_v44  ;;  %v642_v57 = vld [vmem:[#allocation2] sm:$0x3] }
  0xd6   : > { %1041 = vst [vmem:[#allocation2 + $0x2] sm:$0x3] %v1040_v47 }
  0xd9   : > { %v1176_v52 = vpop.permute.xlu2 %1175 }
  0xda   : > { %v1187_v53 = vsel %vm2213_vm7, %v1176_v52, %v1186_v51  ;;  %v634_v45 = vpop.permute.xlu1 %633 }
  0xdb   : > { %1188 = vst [vmem:[#allocation2 + $0xa] sm:$0x3] %v1187_v53  ;;  %v646_v55 = vsel %vm2190_vm6, %v634_v45, %v645_v54  ;;  %v1102_v62 = vld [vmem:[#allocation2 + $0x6] sm:$0x3] }
  0xdc   : > { %647 = vst [vmem:[#allocation2 + $0x4] sm:$0x3] %v646_v55  ;;  %v632_v56 = vpop.permute.xlu0 %631 }
  0xdd   : > { %v643_v58 = vsel %vm2190_vm6, %v632_v56, %v642_v57  ;;  %v1099_v5 = vld [vmem:[#allocation2 + $0x2] sm:$0x3] }
  0xde   : > { %644 = vst [vmem:[#allocation2] sm:$0x3] %v643_v58  ;;  %v1786_v58 = vld [vmem:[%s2328_s2] ss:$0 sm:$0xff] }
  0xe2   : > { %v1093_v63 = vpop.permute.xlu1 %1092  ;;  %v1191_v0 = vld [vmem:[#allocation2 + $0x8] sm:$0xf] }
  0xe3   : > { %v1103_v1 = vsel %vm2190_vm6, %v1093_v63, %v1102_v62  ;;  %v1201_v2 = vrot.slane %v1191_v0, 1  ;;  %v1202_v3 = vrot.slane %v1191_v0, 2  ;;  %v1203_v4 = vrot.slane %v1191_v0, 3  ;;  %v728_v22 = vld [vmem:[#allocation2 + $0x4] sm:$0x3] }
  0xe4   : > { %1104 = vst [vmem:[#allocation2 + $0x6] sm:$0x3] %v1103_v1  ;;  %v1091_v6 = vpop.permute.xlu0 %1090 }
  0xe5   : > { %v1100_v12 = vsel %vm2190_vm6, %v1091_v6, %v1099_v5  ;;  %v1237_v13 = vsel %vm356_vm0, %v1191_v0, %v1201_v2  ;;  %v1240_v7 = vsel %vm357_vm1, %v1202_v3, %v1203_v4  ;;  %v1243_v15 = vsel %vm1214_vm3, %v1191_v0, %v1201_v2  ;;  %v725_v26 = vld [vmem:[#allocation2] sm:$0x3] }
  0xe6   : > { %1101 = vst [vmem:[#allocation2 + $0x2] sm:$0x3] %v1100_v12  ;;  %v1241_v16 = vsel %vm271_vm4, %v1237_v13, %v1240_v7  ;;  %v1244_v17 = vsel %vm1216_vm8, %v1202_v3, %v1203_v4 }
  0xe7   : > { %v1245_v18 = vsel %vm1218_vm9, %v1243_v15, %v1244_v17  ;;  %1308 = vst [vmem:[#allocation1 + $0x3] ss:$9 sm:$0xff] %v1241_v16 }
  0xe8   : > { %v1247_v20 = vrot.slane %v1245_v18, 1 }
  0xea   : > { %v717_v21 = vpop.permute.xlu1 %716  ;;  %v1256_v23 = vunpack.i.l.s16 %v1247_v20 }
  0xeb   : > { %v729_v24 = vsel %vm2213_vm7, %v717_v21, %v728_v22  ;;  %v1183_v28 = vld [vmem:[#allocation2 + $0x6] sm:$0x3] }
  0xec   : > { %730 = vst [vmem:[#allocation2 + $0x4] sm:$0x3] %v729_v24  ;;  %v715_v25 = vpop.permute.xlu0 %714 }
  0xed   : > { %v726_v27 = vsel %vm2213_vm7, %v715_v25, %v725_v26  ;;  %1311 = vst [vmem:[#allocation1 + $0x4] ss:$9 sm:$0xff] %v1256_v23  ;;  %v1180_v30 = vld [vmem:[#allocation2 + $0x2] sm:$0x3] }
  0xee   : > { %727 = vst [vmem:[#allocation2] sm:$0x3] %v726_v27 }
  0xf2   : > { %v1174_v29 = vpop.permute.xlu1 %1173 }
  0xf3   : > { %v1184_v11 = vsel %vm2213_vm7, %v1174_v29, %v1183_v28 }
  0xf4   : > { %1185 = vst [vmem:[#allocation2 + $0x6] sm:$0x3] %v1184_v11  ;;  %v1172_v32 = vpop.permute.xlu0 %1171 }
  0xf5   : > { %v1181_v33 = vsel %vm2213_vm7, %v1172_v32, %v1180_v30 }
  0xf6   : > { %1182 = vst [vmem:[#allocation2 + $0x2] sm:$0x3] %v1181_v33 }
  0xfb   : > { %v1190_v35 = vld [vmem:[#allocation2 + $0x4] sm:$0xf] }
  0xfc   : > { %v1198_v37 = vrot.slane %v1190_v35, 1  ;;  %v1199_v38 = vrot.slane %v1190_v35, 2  ;;  %v1200_v34 = vrot.slane %v1190_v35, 3 }
  0xfd   : > { %v1189_v39 = vld [vmem:[#allocation2] sm:$0xf] }
  0xfe   : > { %v1195_v41 = vrot.slane %v1189_v39, 1  ;;  %v1196_v31 = vrot.slane %v1189_v39, 2  ;;  %v1197_v42 = vrot.slane %v1189_v39, 3  ;;  %v1224_v43 = vsel %vm356_vm0, %v1190_v35, %v1198_v37 }
  0xff   : > { %v1227_v44 = vsel %vm357_vm1, %v1199_v38, %v1200_v34  ;;  %v1230_v46 = vsel %vm1214_vm3, %v1190_v35, %v1198_v37  ;;  %v1231_v47 = vsel %vm1216_vm8, %v1199_v38, %v1200_v34 }
 0x100   : > { %v1207_v36 = vsel %vm356_vm0, %v1189_v39, %v1195_v41  ;;  %v1211_v48 = vsel %vm357_vm1, %v1196_v31, %v1197_v42  ;;  %v1215_v40 = vsel %vm1214_vm3, %v1189_v39, %v1195_v41  ;;  %v1217_v49 = vsel %vm1216_vm8, %v1196_v31, %v1197_v42 }
 0x101   : > { %v1212_v50 = vsel %vm271_vm4, %v1207_v36, %v1211_v48  ;;  %v1219_v51 = vsel %vm1218_vm9, %v1215_v40, %v1217_v49  ;;  %v1228_v52 = vsel %vm271_vm4, %v1224_v43, %v1227_v44  ;;  %v1232_v53 = vsel %vm1218_vm9, %v1230_v46, %v1231_v47 }
 0x102   : > { %v1221_v45 = vrot.slane %v1219_v51, 1  ;;  %v1234_v54 = vrot.slane %v1232_v53, 1  ;;  %v1252_v55 = vunpack.i.h.s16 %v1228_v52  ;;  %1299 = vst [vmem:[#allocation1] ss:$9 sm:$0xff] %v1212_v50  ;;  %vm1440_vm0 = vcmask 261120  }
 0x103   : > { %vm1442_vm1 = vcmask 253952  }
 0x104   : > { %v1669_v56 = vpack.i.b16 %v1228_v52, %v1221_v45  ;;  %v1670_v57 = vpack.i.b16 %v1234_v54, %v1252_v55 }
 0x106   : > { %1302 = vst [vmem:[#allocation1 + $0x1] ss:$9 sm:$0xff] %v1669_v56 }
 0x107   : > { %1305 = vst [vmem:[#allocation1 + $0x2] ss:$9 sm:$0xff] %v1670_v57 }
 0x10e   : > { %v1312_v60 = vld [vmem:[#allocation1] sm:$0xff]  ;;  %v1313_v9 = vld [vmem:[#allocation1 + $0x9] sm:$0xff] }
 0x10f   : > { %1420 = vmatmul.bf16.vlgmr.msra.gmra.mxu0 %v1312_v60  ;;  %1434 = vmatmul.bf16.vlgmr.msra.gmra.mxu1 %v1313_v9 }
 0x18c   : > { %v1421_v59 = vpop.f32.mrf.mxu0  ;;  %v1435_v61 = vpop.f32.mrf.mxu1 }
 0x18d   : > { %v1422_v62 = vadd.f32 %v1786_v58, %v1421_v59 }
 0x18f   : > { %v1436_v63 = vadd.f32 %v1435_v61, %v1422_v62 }
 0x191   : > { %1464 = vst.msk [vmem:[%s238_s23] sm:$0xff] %vm1440_vm0, %v1436_v63  ;;  %v1452_v3 = vmul.f32 %v1436_v63, %v1436_v63  ;;  %v1441_v5 = vsel %vm1440_vm0, %v1436_v63, 0.0 }
 0x193   : > { %v1454_v12 = vsel %vm1440_vm0, %v1452_v3, 0.0 }
 0x194   : > { %v1423_v0 = vpop.f32.mrf.mxu0  ;;  %v1437_v2 = vpop.f32.mrf.mxu1 }
 0x195   : > { %v1424_v1 = vadd.f32 %v1786_v58, %v1423_v0 }
 0x197   : > { %v1438_v4 = vadd.f32 %v1437_v2, %v1424_v1 }
 0x199   : > { %v1443_v6 = vsel %vm1442_vm1, %v1438_v4, 0.0  ;;  %v1453_v8 = vmul.f32 %v1438_v4, %v1438_v4  ;;  %1465 = vst.msk [vmem:[%s238_s23 + $0x8] sm:$0x1] %vm1442_vm1, %v1438_v4 }
 0x19a   : > { %v1444_v10 = vadd.f32 %v1443_v6, %v1441_v5 }
 0x19b   : > { %v1455_v13 = vsel %vm1442_vm1, %v1453_v8, 0.0 }
 0x19c   : > { %v1445_v7 = vrot.slane %v1444_v10, 4  ;;  %v1456_v15 = vadd.f32 %v1455_v13, %v1454_v12 }
 0x19e   : > { %v1446_v16 = vadd.f32 %v1445_v7, %v1444_v10  ;;  %v1457_v17 = vrot.slane %v1456_v15, 4 }
 0x1a0   : > { %v1447_v18 = vrot.slane %v1446_v16, 2  ;;  %v1458_v14 = vadd.f32 %v1457_v17, %v1456_v15 }
 0x1a2   : > { %v1448_v19 = vadd.f32 %v1447_v18, %v1446_v16  ;;  %v1459_v20 = vrot.slane %v1458_v14, 2 }
 0x1a4   : > { %v1449_v21 = vrot.slane %v1448_v19, 1  ;;  %v1460_v22 = vadd.f32 %v1459_v20, %v1458_v14 }
 0x1a6   : > { %v1450_v23 = vadd.f32 %v1449_v21, %v1448_v19  ;;  %v1461_v24 = vrot.slane %v1460_v22, 1 }
 0x1a8   : > { %1451 = vst.msk [vmem:[%s246_s27] sm:$0x1] %vm1442_vm1, %v1450_v23  ;;  %v1462_v25 = vadd.f32 %v1461_v24, %v1460_v22 }
 0x1aa   : > { %1463 = vst.msk [vmem:[%s246_s27 + $0x1] sm:$0x1] %vm1442_vm1, %v1462_v25 }
 0x1ab PF: > { %s15_s17 = sadd.s32 1, %s1809_s17   ;;  %s2353_s15 = smov %s1805_s16 }
 0x1ac   : > { %p12_p5 = scmp.ge.s32.totalorder %s15_s17, 4   ;;  %s2354_s16 = smov %s2356_s18 }
 0x1ae   :  { %14 = sbr.rel (!%p12_p5) target bundleno = 2 (0x2), region = 81 }

// kernel: _lambda_.6
= control target key start
LH: loop header
LB: loop body
LE: loop exit
PB: predicated region body
PF: predicated region fallthrough
CT: control target
= control target key end

     0   :  { %s2423_s12 = smov 0   ;;  %s2425_s13 = smov 0   ;;  %s3077_s0 = inlined_call_operand.vmem [shape: bf16[2,36,9,4], index: 0, kind: input, shape index: {}]   ;;  %s3078_s1 = inlined_call_operand.vmem [shape: bf16[64,8], index: 1, kind: input, shape index: {}]   ;;  %s3079_s2 = inlined_call_operand.vmem [shape: f32[1,8], index: 2, kind: input, shape index: {}]   ;;  %s3080_s3 = inlined_call_operand.vmem [shape: bf16[2,64,8], index: 3, kind: output, shape index: {}]  }
   0x1   :  { %s2427_s14 = smov 0  }
   0x2 LB: > { %s25_s15 = sadd.s32 1, %s2382_s13  ;;  %p2092_p0 = scmp.ge.s32.totalorder %s2386_s14, 1  ;;  %s2386_s14 = sphi %s2427_s14, %s13_s14   ;;  %s2382_s13 = sphi %s2425_s13, %s3084_s13   ;;  %s2378_s12 = sphi %s2423_s12, %s3083_s12  }
   0x3   : > { %p27_p1 = scmp.ge.s32.totalorder %s25_s15, 2  ;;  %p155_p2 = scmp.lt.s32.totalorder %s2386_s14, 3 }
   0x5   : > { %s3086_s15 = smov (%p27_p1, %s25_s15), 0  ;;  %p156_p3 = pnand %p2092_p0, %p155_p2 }
   0x6   : > { %p185_p4 = scmp.lt.s32.totalorder (!%p156_p3), %s2378_s12, 1  ;;  %s2388_s20 = smov (!%p156_p3), 4  }
   0x7   : > { %159 = sbr.rel (%p156_p3) target bundleno = 595 (0x253), region = 32  ;;  %s2389_s21 = smov (!%p156_p3), 8  }
   0x8   : > { %s2390_s22 = smov (!%p156_p3), 12   ;;  %s2391_s23 = smov (!%p156_p3), 16  }
   0x9   : > { %s2392_s24 = smov (!%p156_p3), 20   ;;  %s2393_s25 = smov (!%p156_p3), 24  }
   0xa   : > { %s2394_s26 = smov (!%p156_p3), 28   ;;  %s2395_s27 = smov (!%p156_p3), 32  }
   0xb   : > { %s2396_s28 = smov (!%p156_p3), 36   ;;  %s2397_s29 = smov (!%p156_p3), 40  }
   0xc   : > { %s3088_s12 = smov (!%p185_p4, %s2378_s12), 1  ;;  %vm285_vm0 = vsmask.f32 3328  ;;  %vm286_vm1 = vsmask.f32 7440  ;;  %vm210_vm3 = vcmask 27648  }
   0xd   : > { %s2323_s16 = smul.u32 288, %s3088_s12  ;;  %vm2481_vm2 = vmor %vm285_vm0, %vm286_vm1  ;;  %vm260_vm4 = vcmask 60448   ;;  %vm424_vm5 = vcmask 93248   ;;  %vm585_vm6 = vcmask 126048   ;;  %vm635_vm7 = vcmask 158848   ;;  %s2398_s30 = smov 44  }
   0xe   : > { %vm685_vm8 = vcmask 191648   ;;  %s2399_s4 = smov 48   ;;  %s2400_s5 = smov 52   ;;  %vm846_vm9 = vcmask 224448   ;;  %vm1007_vm10 = vcmask 257248   ;;  %vm1057_vm11 = vcmask 290048  }
   0xf   : > { %s2447_s19 = scalar_lea.vmem %s3077_s0, %s2323_s16  ;;  %s2401_s6 = smov 56   ;;  %vm1107_vm12 = vcmask 322848   ;;  %vm1268_vm13 = vcmask 355648   ;;  %vm1429_vm14 = vcmask 388448   ;;  %vm1479_vm15 = vcmask 421248   ;;  %v2310_v59 = vld [vmem:[%s3078_s1 + $0x18] sm:$0xff] }
  0x10   : > { %v2098_v0 = vld [vmem:[%s2447_s19 + $0x58] sm:$0xf]  ;;  %v2096_v1 = vld [vmem:[%s2447_s19 + $0x48] sm:$0xf]  ;;  %v273_v3 = vld [vmem:[%s2447_s19 + $0x10] sm:$0xf]  ;;  %2312 = vmatpush.bf16.msra.mxu2 %v2310_v59  ;;  %2313 = vmatpush.bf16.msra.mxu3 %v2310_v59 }
  0x11   : > { %240 = vrot.lane.b32.xlu1 %v2098_v0, %s2388_s20  ;;  %236 = vrot.lane.b32.xlu0 %v2096_v1, %s2388_s20  ;;  %v2100_v2 = vld [vmem:[%s2447_s19 + $0x68] sm:$0xf]  ;;  %v2099_v5 = vld [vmem:[%s2447_s19 + $0x60] sm:$0xf]  ;;  %v317_v7 = vshrl.u32 %v273_v3, 16  ;;  %v320_v8 = vshll.u32 %v273_v3, 16 }
  0x12   : > { %244 = vrot.lane.b32.xlu2 %v2100_v2, %s2388_s20  ;;  %v271_v4 = vld [vmem:[%s2447_s19 + $0x8] sm:$0xf]  ;;  %v2097_v6 = vld [vmem:[%s2447_s19 + $0x50] sm:$0xf]  ;;  %v274_v11 = vld [vmem:[%s2447_s19 + $0x14] sm:$0x1]  ;;  %1941 = vmatpush.bf16.msra.mxu0 %v2310_v59 }
  0x13   : > { %v303_v9 = vshrl.u32 %v271_v4, 16  ;;  %v306_v10 = vshll.u32 %v271_v4, 16  ;;  %v272_v12 = vld [vmem:[%s2447_s19 + $0xc] sm:$0x1]  ;;  %v2101_v13 = vld [vmem:[%s2447_s19 + $0x70] sm:$0xf]  ;;  %2311 = vmatpush.bf16.msra.mxu1 %v2310_v59 }
  0x14   : > { %v279_v14 = vld [vmem:[%s2447_s19 + $0x28] sm:$0xf]  ;;  %v277_v15 = vld [vmem:[%s2447_s19 + $0x20] sm:$0xf]  ;;  %v319_v17 = vrot.slane %v317_v7, 4  ;;  %v322_v18 = vrot.slane %v320_v8, 5 }
  0x15   : > { %v269_v16 = vld [vmem:[%s2447_s19] sm:$0xf]  ;;  %v305_v19 = vrot.slane %v303_v9, 4  ;;  %v308_v20 = vrot.slane %v306_v10, 5  ;;  %v270_v21 = vld [vmem:[%s2447_s19 + $0x4] sm:$0x1] }
  0x16   : > { %v326_v22 = vshll.u32 %v274_v11, 16  ;;  %v359_v23 = vshrl.u32 %v279_v14, 16  ;;  %v362_v24 = vshll.u32 %v279_v14, 16  ;;  %v289_v25 = vshrl.u32 %v269_v16, 16  ;;  %v2103_v26 = vld [vmem:[%s2447_s19 + $0x80] sm:$0xf] }
  0x17   : > { %v280_v27 = vld [vmem:[%s2447_s19 + $0x2c] sm:$0x1]  ;;  %v345_v28 = vshrl.u32 %v277_v15, 16  ;;  %v348_v29 = vshll.u32 %v277_v15, 16  ;;  %v292_v30 = vshll.u32 %v269_v16, 16  ;;  %v312_v32 = vshll.u32 %v272_v12, 16 }
  0x18   : > { %v2102_v31 = vld [vmem:[%s2447_s19 + $0x78] sm:$0xf]  ;;  %v291_v33 = vrot.slane %v289_v25, 4  ;;  %v298_v34 = vshll.u32 %v270_v21, 16  ;;  %v323_v35 = vor.u32 %v322_v18, %v319_v17  ;;  %v309_v36 = vor.u32 %v308_v20, %v305_v19  ;;  %v2104_v38 = vld [vmem:[%s2447_s19 + $0x48] sm:$0xf] }
  0x19   : > { %242 = vrot.lane.b32.xlu1 %v2099_v5, %s2388_s20  ;;  %238 = vrot.lane.b32.xlu0 %v2097_v6, %s2388_s20  ;;  %v294_v37 = vrot.slane %v292_v30, 5  ;;  %v275_v39 = vld [vmem:[%s2447_s19 + $0x18] sm:$0xf]  ;;  %v328_v40 = vrot.slane %v326_v22, 5  ;;  %v361_v41 = vrot.slane %v359_v23, 4  ;;  %v364_v42 = vrot.slane %v362_v24, 5 }
  0x1a   : > { %246 = vrot.lane.b32.xlu2 %v2101_v13, %s2388_s20  ;;  %v368_v43 = vshll.u32 %v280_v27, 16  ;;  %v278_v44 = vld [vmem:[%s2447_s19 + $0x24] sm:$0x1]  ;;  %v347_v45 = vrot.slane %v345_v28, 4  ;;  %v350_v46 = vrot.slane %v348_v29, 5  ;;  %v300_v48 = vrot.slane %v298_v34, 5 }
  0x1b   : > { %v295_v47 = vor.u32 %v294_v37, %v291_v33  ;;  %v276_v49 = vld [vmem:[%s2447_s19 + $0x1c] sm:$0x1]  ;;  %v314_v50 = vrot.slane %v312_v32, 5  ;;  %v450_v51 = vshrl.u32 %v2104_v38, 16  ;;  %v453_v52 = vshll.u32 %v2104_v38, 16  ;;  %s2402_s7 = smov 60  }
  0x1c   : > { %v331_v53 = vshrl.u32 %v275_v39, 16  ;;  %v324_v54 = vrot.slane %v323_v35, 4  ;;  %v310_v55 = vrot.slane %v309_v36, 4  ;;  %v283_v57 = vld [vmem:[%s2447_s19 + $0x38] sm:$0xf]  ;;  %v334_v58 = vshll.u32 %v275_v39, 16 }
  0x1d   : > { %v296_v56 = vrot.slane %v295_v47, 4  ;;  %v365_v60 = vor.u32 %v364_v42, %v361_v41  ;;  %v354_v61 = vshll.u32 %v278_v44, 16  ;;  %v340_v63 = vshll.u32 %v276_v49, 16  ;;  %v2105_v3 = vld [vmem:[%s2447_s19 + $0x4c] sm:$0x1] }
  0x1e   : > { %v333_v62 = vrot.slane %v331_v53, 4  ;;  %v370_v0 = vrot.slane %v368_v43, 5  ;;  %v351_v1 = vor.u32 %v350_v46, %v347_v45  ;;  %v336_v4 = vrot.slane %v334_v58, 5  ;;  %v281_v9 = vld [vmem:[%s2447_s19 + $0x30] sm:$0xf] }
  0x1f   : > { %v301_v2 = vsel %vm2481_vm2, %v296_v56, %v300_v48  ;;  %v452_v5 = vrot.slane %v450_v51, 4  ;;  %v455_v6 = vrot.slane %v453_v52, 5  ;;  %v387_v7 = vshrl.u32 %v283_v57, 16  ;;  %v2110_v16 = vld [vmem:[%s2447_s19 + $0x60] sm:$0xf] }
  0x20   : > { %v390_v8 = vshll.u32 %v283_v57, 16  ;;  %v329_v10 = vsel %vm2481_vm2, %v324_v54, %v328_v40  ;;  %v315_v11 = vsel %vm2481_vm2, %v310_v55, %v314_v50  ;;  %v337_v12 = vor.u32 %v336_v4, %v333_v62  ;;  %v282_v17 = vld [vmem:[%s2447_s19 + $0x34] sm:$0x1]  ;;  %v2108_v25 = vld [vmem:[%s2447_s19 + $0x58] sm:$0xf] }
  0x21   : > { %250 = vrot.lane.b32.xlu1 %v2103_v26, %s2388_s20  ;;  %248 = vrot.lane.b32.xlu0 %v2102_v31, %s2388_s20  ;;  %v342_v13 = vrot.slane %v340_v63, 5  ;;  %v366_v14 = vrot.slane %v365_v60, 4  ;;  %v356_v15 = vrot.slane %v354_v61, 5  ;;  %v352_v18 = vrot.slane %v351_v1, 4  ;;  %v284_v27 = vld [vmem:[%s2447_s19 + $0x3c] sm:$0x1] }
  0x22   : > { %400 = vrot.lane.b32.xlu2 %v301_v2, %s2389_s21  ;;  %v459_v19 = vshll.u32 %v2105_v3, 16  ;;  %v338_v20 = vrot.slane %v337_v12, 4  ;;  %v373_v21 = vshrl.u32 %v281_v9, 16  ;;  %v456_v22 = vor.u32 %v455_v6, %v452_v5  ;;  %v2106_v37 = vld [vmem:[%s2447_s19 + $0x50] sm:$0xf] }
  0x23   : > { %v389_v23 = vrot.slane %v387_v7, 4  ;;  %v392_v24 = vrot.slane %v390_v8, 5  ;;  %v376_v26 = vshll.u32 %v281_v9, 16  ;;  %v492_v29 = vshrl.u32 %v2110_v16, 16  ;;  %v2111_v44 = vld [vmem:[%s2447_s19 + $0x64] sm:$0x1] }
  0x24   : > { %v343_v28 = vsel %vm2481_vm2, %v338_v20, %v342_v13  ;;  %v375_v30 = vrot.slane %v373_v21, 4  ;;  %v382_v31 = vshll.u32 %v282_v17, 16  ;;  %v371_v33 = vsel %vm2481_vm2, %v366_v14, %v370_v0  ;;  %v2107_v48 = vld [vmem:[%s2447_s19 + $0x54] sm:$0x1]  ;;  %v2112_v50 = vld [vmem:[%s2447_s19 + $0x68] sm:$0xf] }
  0x25   : > { %v378_v32 = vrot.slane %v376_v26, 5  ;;  %v495_v34 = vshll.u32 %v2110_v16, 16  ;;  %v478_v35 = vshrl.u32 %v2108_v25, 16  ;;  %v481_v36 = vshll.u32 %v2108_v25, 16  ;;  %v2109_v52 = vld [vmem:[%s2447_s19 + $0x5c] sm:$0x1] }
  0x26   : > { %v461_v38 = vrot.slane %v459_v19, 5  ;;  %v393_v39 = vor.u32 %v392_v24, %v389_v23  ;;  %v396_v40 = vshll.u32 %v284_v27, 16  ;;  %v357_v42 = vsel %vm2481_vm2, %v352_v18, %v356_v15  ;;  %v2116_v58 = vld [vmem:[%s2447_s19 + $0x78] sm:$0xf]  ;;  %v2114_v62 = vld [vmem:[%s2447_s19 + $0x70] sm:$0xf] }
  0x27   : > { %v379_v41 = vor.u32 %v378_v32, %v375_v30  ;;  %v457_v43 = vrot.slane %v456_v22, 4  ;;  %v494_v45 = vrot.slane %v492_v29, 4  ;;  %v384_v46 = vrot.slane %v382_v31, 5  ;;  %v2113_v16 = vld [vmem:[%s2447_s19 + $0x6c] sm:$0x1] }
  0x28   : > { %v464_v49 = vshrl.u32 %v2106_v37, 16  ;;  %v497_v51 = vrot.slane %v495_v34, 5  ;;  %v480_v53 = vrot.slane %v478_v35, 4  ;;  %v483_v54 = vrot.slane %v481_v36, 5  ;;  %v2118_v20 = vld [vmem:[%s2447_s19 + $0x80] sm:$0xf] }
  0x29   : > { %404 = vrot.lane.b32.xlu1 %v329_v10, %s2389_s21  ;;  %402 = vrot.lane.b32.xlu0 %v315_v11, %s2389_s21  ;;  %v380_v47 = vrot.slane %v379_v41, 4  ;;  %v467_v55 = vshll.u32 %v2106_v37, 16  ;;  %v394_v56 = vrot.slane %v393_v39, 4  ;;  %v398_v57 = vrot.slane %v396_v40, 5  ;;  %v2117_v25 = vld [vmem:[%s2447_s19 + $0x7c] sm:$0x1] }
  0x2a   : > { %406 = vrot.lane.b32.xlu2 %v343_v28, %s2389_s21  ;;  %v466_v60 = vrot.slane %v464_v49, 4  ;;  %v473_v0 = vshll.u32 %v2107_v48, 16  ;;  %v506_v1 = vshrl.u32 %v2112_v50, 16  ;;  %v462_v2 = vsel %vm2481_vm2, %v457_v43, %v461_v38  ;;  %v2115_v30 = vld [vmem:[%s2447_s19 + $0x74] sm:$0x1] }
  0x2b   : > { %v385_v61 = vsel %vm2481_vm2, %v380_v47, %v384_v46  ;;  %v469_v63 = vrot.slane %v467_v55, 5  ;;  %v501_v3 = vshll.u32 %v2111_v44, 16  ;;  %v487_v4 = vshll.u32 %v2109_v52, 16 }
  0x2c   : > { %v509_v5 = vshll.u32 %v2112_v50, 16  ;;  %v498_v6 = vor.u32 %v497_v51, %v494_v45  ;;  %v484_v7 = vor.u32 %v483_v54, %v480_v53  ;;  %v534_v8 = vshrl.u32 %v2116_v58, 16  ;;  %v2119_v45 = vld [vmem:[%s2447_s19 + $0x84] sm:$0x1] }
  0x2d   : > { %v470_v9 = vor.u32 %v469_v63, %v466_v60  ;;  %v399_v10 = vsel %vm2481_vm2, %v394_v56, %v398_v57  ;;  %v537_v11 = vshll.u32 %v2116_v58, 16  ;;  %v520_v12 = vshrl.u32 %v2114_v62, 16  ;;  %v2121_v58 = vld [vmem:[%s2447_s19 + $0x98] sm:$0xf]  ;;  %v2120_v60 = vld [vmem:[%s2447_s19 + $0x90] sm:$0xf] }
  0x2e   : > { %v523_v13 = vshll.u32 %v2114_v62, 16  ;;  %v475_v15 = vrot.slane %v473_v0, 5  ;;  %v508_v17 = vrot.slane %v506_v1, 4  ;;  %v511_v18 = vrot.slane %v509_v5, 5  ;;  %v2124_v62 = vld [vmem:[%s2447_s19 + $0xb0] sm:$0xf] }
  0x2f   : > { %v471_v14 = vrot.slane %v470_v9, 4  ;;  %v503_v19 = vrot.slane %v501_v3, 5  ;;  %v499_v21 = vrot.slane %v498_v6, 4  ;;  %v485_v22 = vrot.slane %v484_v7, 4  ;;  %v2123_v63 = vld [vmem:[%s2447_s19 + $0xa8] sm:$0xf] }
  0x30   : > { %v489_v23 = vrot.slane %v487_v4, 5  ;;  %v536_v24 = vrot.slane %v534_v8, 4  ;;  %v539_v26 = vrot.slane %v537_v11, 5  ;;  %v522_v27 = vrot.slane %v520_v12, 4  ;;  %v2125_v0 = vld [vmem:[%s2447_s19 + $0xb8] sm:$0xf] }
  0x31   : > { %410 = vrot.lane.b32.xlu1 %v371_v33, %s2389_s21  ;;  %408 = vrot.lane.b32.xlu0 %v357_v42, %s2389_s21  ;;  %v525_v28 = vrot.slane %v523_v13, 5  ;;  %v515_v29 = vshll.u32 %v2113_v16, 16  ;;  %v476_v31 = vsel %vm2481_vm2, %v471_v14, %v475_v15  ;;  %v512_v32 = vor.u32 %v511_v18, %v508_v17  ;;  %v2127_v1 = vld [vmem:[%s2447_s19 + $0xc8] sm:$0xf]  ;;  %v2136_v3 = vld [vmem:[%s2447_s19 + $0x90] sm:$0xf] }
  0x32   : > { %412 = vrot.lane.b32.xlu2 %v385_v61, %s2389_s21  ;;  %v548_v33 = vshrl.u32 %v2118_v20, 16  ;;  %v551_v34 = vshll.u32 %v2118_v20, 16  ;;  %v504_v35 = vsel %vm2481_vm2, %v499_v21, %v503_v19  ;;  %v543_v36 = vshll.u32 %v2117_v25, 16  ;;  %v2122_v61 = vld [vmem:[%s2447_s19 + $0xa0] sm:$0xf] }
  0x33   : > { %v490_v37 = vsel %vm2481_vm2, %v485_v22, %v489_v23  ;;  %v540_v38 = vor.u32 %v539_v26, %v536_v24  ;;  %v526_v39 = vor.u32 %v525_v28, %v522_v27  ;;  %v529_v40 = vshll.u32 %v2115_v30, 16  ;;  %v2128_v4 = vld [vmem:[%s2447_s19 + $0xd8] sm:$0xf]  ;;  %v206_v5 = vld [vmem:[%s2447_s19 + $0x20] sm:$0xf] }
  0x34   : > { %v513_v41 = vrot.slane %v512_v32, 4  ;;  %v517_v42 = vrot.slane %v515_v29, 5  ;;  %v550_v43 = vrot.slane %v548_v33, 4  ;;  %v553_v44 = vrot.slane %v551_v34, 5  ;;  %215 = vst.msk [vmem:[#allocation2 + $0x10] sm:$0xf] %vm210_vm3, %v206_v5 }
  0x35   : > { %v541_v46 = vrot.slane %v540_v38, 4  ;;  %v545_v47 = vrot.slane %v543_v36, 5  ;;  %v531_v48 = vrot.slane %v529_v40, 5  ;;  %v527_v49 = vrot.slane %v526_v39, 4  ;;  %v204_v6 = vld [vmem:[%s2447_s19 + $0x10] sm:$0xf] }
  0x36   : > { %v518_v50 = vsel %vm2481_vm2, %v513_v41, %v517_v42  ;;  %v554_v51 = vor.u32 %v553_v44, %v550_v43  ;;  %v557_v52 = vshll.u32 %v2119_v45, 16  ;;  %v202_v7 = vld [vmem:[%s2447_s19] sm:$0xf]  ;;  %v711_v8 = vshrl.u32 %v2136_v3, 16  ;;  %213 = vst.msk [vmem:[#allocation2 + $0x8] sm:$0xf] %vm210_vm3, %v204_v6 }
  0x37   : > { %v546_v53 = vsel %vm2481_vm2, %v541_v46, %v545_v47  ;;  %v532_v54 = vsel %vm2481_vm2, %v527_v49, %v531_v48  ;;  %v714_v9 = vshll.u32 %v2136_v3, 16  ;;  %211 = vst.msk [vmem:[#allocation2] sm:$0xf] %vm210_vm3, %v202_v7  ;;  %v2129_v11 = vld [vmem:[%s2447_s19 + $0xe0] sm:$0xf]  ;;  %vm1529_vm0 = vcmask 454048  }
  0x38   : > { %v555_v55 = vrot.slane %v554_v51, 4  ;;  %v559_v56 = vrot.slane %v557_v52, 5  ;;  %v2142_v12 = vld [vmem:[%s2447_s19 + $0xa8] sm:$0xf]  ;;  %v713_v13 = vrot.slane %v711_v8, 4  ;;  %vm1690_vm1 = vcmask 486848  }
  0x39   : > { %561 = vrot.lane.b32.xlu1 %v462_v2, %s2390_s22  ;;  %414 = vrot.lane.b32.xlu0 %v399_v10, %s2389_s21  ;;  %v2126_v2 = vld [vmem:[%s2447_s19 + $0xc0] sm:$0xf]  ;;  %v2130_v10 = vld [vmem:[%s2447_s19 + $0xe8] sm:$0xf]  ;;  %v716_v14 = vrot.slane %v714_v9, 5  ;;  %v753_v17 = vshrl.u32 %v2142_v12, 16 }
  0x3a   : > { %563 = vrot.lane.b32.xlu2 %v476_v31, %s2390_s22  ;;  %v560_v57 = vsel %vm2481_vm2, %v555_v55, %v559_v56  ;;  %v2137_v15 = vld [vmem:[%s2447_s19 + $0x94] sm:$0x1]  ;;  %v2138_v16 = vld [vmem:[%s2447_s19 + $0x98] sm:$0xf]  ;;  %v756_v18 = vshll.u32 %v2142_v12, 16 }
  0x3b   : > { %v2140_v19 = vld [vmem:[%s2447_s19 + $0xa0] sm:$0xf]  ;;  %v207_v20 = vld [vmem:[%s2447_s19 + $0x28] sm:$0xf]  ;;  %v2131_v21 = vld [vmem:[%s2447_s19 + $0xf0] sm:$0xf]  ;;  %v717_v24 = vor.u32 %v716_v14, %v713_v13 }
  0x3c   : > { %216 = vst.msk [vmem:[#allocation2 + $0x14] sm:$0xf] %vm210_vm3, %v207_v20  ;;  %v725_v22 = vshrl.u32 %v2138_v16, 16  ;;  %v728_v23 = vshll.u32 %v2138_v16, 16  ;;  %v720_v25 = vshll.u32 %v2137_v15, 16  ;;  %v739_v30 = vshrl.u32 %v2140_v19, 16 }
  0x3d   : > { %v205_v26 = vld [vmem:[%s2447_s19 + $0x18] sm:$0xf]  ;;  %v203_v27 = vld [vmem:[%s2447_s19 + $0x8] sm:$0xf]  ;;  %v2133_v28 = vld [vmem:[%s2447_s19 + $0x100] sm:$0xf] }
  0x3e   : > { %v2143_v29 = vld [vmem:[%s2447_s19 + $0xac] sm:$0x1]  ;;  %v742_v31 = vshll.u32 %v2140_v19, 16  ;;  %214 = vst.msk [vmem:[#allocation2 + $0xc] sm:$0xf] %vm210_vm3, %v205_v26  ;;  %v755_v33 = vrot.slane %v753_v17, 4 }
  0x3f   : > { %v2132_v32 = vld [vmem:[%s2447_s19 + $0xf8] sm:$0xf]  ;;  %v758_v34 = vrot.slane %v756_v18, 5  ;;  %212 = vst.msk [vmem:[#allocation2 + $0x4] sm:$0xf] %vm210_vm3, %v203_v27  ;;  %v730_v38 = vrot.slane %v728_v23, 5 }
  0x40   : > { %v2141_v36 = vld [vmem:[%s2447_s19 + $0xa4] sm:$0x1]  ;;  %v718_v39 = vrot.slane %v717_v24, 4  ;;  %v722_v40 = vrot.slane %v720_v25, 5  ;;  %v762_v41 = vshll.u32 %v2143_v29, 16  ;;  %v741_v43 = vrot.slane %v739_v30, 4 }
  0x41   : > { %567 = vrot.lane.b32.xlu1 %v504_v35, %s2390_s22  ;;  %565 = vrot.lane.b32.xlu0 %v490_v37, %s2390_s22  ;;  %v727_v37 = vrot.slane %v725_v22, 4  ;;  %v2139_v42 = vld [vmem:[%s2447_s19 + $0x9c] sm:$0x1]  ;;  %v744_v44 = vrot.slane %v742_v31, 5  ;;  %v2148_v45 = vld [vmem:[%s2447_s19 + $0xc0] sm:$0xf]  ;;  %v759_v47 = vor.u32 %v758_v34, %v755_v33 }
  0x42   : > { %569 = vrot.lane.b32.xlu2 %v518_v50, %s2390_s22  ;;  %v2144_v46 = vld [vmem:[%s2447_s19 + $0xb0] sm:$0xf]  ;;  %v748_v48 = vshll.u32 %v2141_v36, 16  ;;  %v2146_v49 = vld [vmem:[%s2447_s19 + $0xb8] sm:$0xf]  ;;  %v734_v52 = vshll.u32 %v2139_v42, 16 }
  0x43   : > { %v2134_v50 = vld [vmem:[%s2447_s19 + $0x108] sm:$0xf]  ;;  %v731_v51 = vor.u32 %v730_v38, %v727_v37  ;;  %v795_v55 = vshrl.u32 %v2148_v45, 16  ;;  %v798_v56 = vshll.u32 %v2148_v45, 16  ;;  %v784_v3 = vshll.u32 %v2146_v49, 16 }
  0x44   : > { %v736_v6 = vrot.slane %v734_v52, 5  ;;  %v2149_v9 = vld [vmem:[%s2447_s19 + $0xc4] sm:$0x1]  ;;  %v2145_v12 = vld [vmem:[%s2447_s19 + $0xb4] sm:$0x1] }
  0x45   : > { %v732_v5 = vrot.slane %v731_v51, 4  ;;  %v2154_v13 = vld [vmem:[%s2447_s19 + $0xe0] sm:$0xf]  ;;  %v2152_v14 = vld [vmem:[%s2447_s19 + $0xd8] sm:$0xf]  ;;  %v786_v18 = vrot.slane %v784_v3, 5 }
  0x46   : > { %v2150_v15 = vld [vmem:[%s2447_s19 + $0xc8] sm:$0xf]  ;;  %v2147_v16 = vld [vmem:[%s2447_s19 + $0xbc] sm:$0x1]  ;;  %v776_v24 = vshll.u32 %v2145_v12, 16  ;;  %v886_v25 = vshrl.u32 %v2154_v13, 16 }
  0x47   : > { %v809_v19 = vshrl.u32 %v2150_v15, 16  ;;  %v812_v20 = vshll.u32 %v2150_v15, 16  ;;  %v737_v22 = vsel %vm2481_vm2, %v732_v5, %v736_v6  ;;  %v889_v26 = vshll.u32 %v2154_v13, 16  ;;  %v2160_v52 = vld [vmem:[%s2447_s19 + $0xf8] sm:$0xf] }
  0x48   : > { %v872_v27 = vshrl.u32 %v2152_v14, 16  ;;  %v804_v29 = vshll.u32 %v2149_v9, 16  ;;  %v790_v30 = vshll.u32 %v2147_v16, 16  ;;  %v778_v38 = vrot.slane %v776_v24, 5 }
  0x49   : > { %573 = vrot.lane.b32.xlu1 %v546_v53, %s2390_s22  ;;  %571 = vrot.lane.b32.xlu0 %v532_v54, %s2390_s22  ;;  %v767_v53 = vshrl.u32 %v2144_v46, 16  ;;  %v770_v54 = vshll.u32 %v2144_v46, 16  ;;  %v811_v33 = vrot.slane %v809_v19, 4  ;;  %v814_v34 = vrot.slane %v812_v20, 5 }
  0x4a   : > { %575 = vrot.lane.b32.xlu2 %v560_v57, %s2390_s22  ;;  %v209_v57 = vld [vmem:[%s2447_s19 + $0x38] sm:$0xf]  ;;  %v891_v42 = vrot.slane %v889_v26, 5  ;;  %v806_v46 = vrot.slane %v804_v29, 5  ;;  %v931_v3 = vshll.u32 %v2160_v52, 16  ;;  %s2302_s22 = sshll.u32 %s3088_s12, 5 }
  0x4b   : > { %218 = vst.msk [vmem:[#allocation2 + $0x1c] sm:$0xf] %vm210_vm3, %v209_v57  ;;  %v769_v7 = vrot.slane %v767_v53, 4  ;;  %v772_v8 = vrot.slane %v770_v54, 5  ;;  %v815_v53 = vor.u32 %v814_v34, %v811_v33  ;;  %v2158_v57 = vld [vmem:[%s2447_s19 + $0xf0] sm:$0xf] }
  0x4c   : > { %v917_v5 = vshll.u32 %v2158_v57, 16  ;;  %v933_v20 = vrot.slane %v931_v3, 5  ;;  %v2166_v26 = vld [vmem:[%s2447_s19 + $0x110] sm:$0xf] }
  0x4d   : > { %v773_v23 = vor.u32 %v772_v8, %v769_v7  ;;  %v816_v6 = vrot.slane %v815_v53, 4 }
  0x4e   : > { %v919_v24 = vrot.slane %v917_v5, 5 }
  0x4f   : > { %v774_v37 = vrot.slane %v773_v23, 4 }
  0x51   : > { %613 = vrot.lane.b32.xlu1 %v2121_v58, %s2391_s23  ;;  %611 = vrot.lane.b32.xlu0 %v2120_v60, %s2391_s23  ;;  %v208_v58 = vld [vmem:[%s2447_s19 + $0x30] sm:$0xf]  ;;  %v723_v60 = vsel %vm2481_vm2, %v718_v39, %v722_v40  ;;  %v2151_v39 = vld [vmem:[%s2447_s19 + $0xcc] sm:$0x1] }
  0x52   : > { %615 = vrot.lane.b32.xlu2 %v2122_v61, %s2391_s23  ;;  %v2135_v61 = vld [vmem:[%s2447_s19 + $0x110] sm:$0xf]  ;;  %217 = vst.msk [vmem:[#allocation2 + $0x18] sm:$0xf] %vm210_vm3, %v208_v58  ;;  %v2155_v40 = vld [vmem:[%s2447_s19 + $0xe4] sm:$0x1] }
  0x53   : > { %v818_v54 = vshll.u32 %v2151_v39, 16  ;;  %v970_v39 = vshrl.u32 %v2166_v26, 16  ;;  %vm1924_vm3 = vcmask 523264  }
  0x55   : > { %v820_v7 = vrot.slane %v818_v54, 5  ;;  %v972_v54 = vrot.slane %v970_v39, 4 }
  0x59   : > { %619 = vrot.lane.b32.xlu1 %v2124_v62, %s2391_s23  ;;  %617 = vrot.lane.b32.xlu0 %v2123_v63, %s2391_s23  ;;  %v764_v62 = vrot.slane %v762_v41, 5  ;;  %v745_v63 = vor.u32 %v744_v44, %v741_v43  ;;  %v888_v41 = vrot.slane %v886_v25, 4  ;;  %v874_v43 = vrot.slane %v872_v27, 4  ;;  %v2164_v27 = vld [vmem:[%s2447_s19 + $0x108] sm:$0xf] }
  0x5a   : > { %621 = vrot.lane.b32.xlu2 %v2125_v0, %s2391_s23  ;;  %v760_v0 = vrot.slane %v759_v47, 4  ;;  %v792_v47 = vrot.slane %v790_v30, 5  ;;  %v821_v25 = vsel %vm2481_vm2, %v816_v6, %v820_v7 }
  0x61   : > { %625 = vrot.lane.b32.xlu1 %v2127_v1, %s2391_s23  ;;  %623 = vrot.lane.b32.xlu0 %v2126_v2, %s2391_s23  ;;  %v750_v1 = vrot.slane %v748_v48, 5  ;;  %v781_v2 = vshrl.u32 %v2146_v49, 16  ;;  %v2153_v48 = vld [vmem:[%s2447_s19 + $0xdc] sm:$0x1]  ;;  %v2156_v49 = vld [vmem:[%s2447_s19 + $0xe8] sm:$0xf] }
  0x62   : > { %661 = vrot.lane.b32.xlu2 %v2128_v4, %s2392_s24  ;;  %v900_v58 = vshrl.u32 %v2156_v49, 16 }
  0x63   : > { %v783_v17 = vrot.slane %v781_v2, 4  ;;  %v928_v2 = vshrl.u32 %v2160_v52, 16 }
  0x65   : > { %v930_v19 = vrot.slane %v928_v2, 4 }
  0x69   : > { %665 = vrot.lane.b32.xlu1 %v2130_v10, %s2392_s24  ;;  %663 = vrot.lane.b32.xlu0 %v2129_v11, %s2392_s24  ;;  %v797_v10 = vrot.slane %v795_v55, 4  ;;  %v800_v11 = vrot.slane %v798_v56, 5  ;;  %v895_v55 = vshll.u32 %v2155_v40, 16  ;;  %v779_v56 = vsel %vm2481_vm2, %v774_v37, %v778_v38 }
  0x6a   : > { %667 = vrot.lane.b32.xlu2 %v2131_v21, %s2392_s24  ;;  %v746_v21 = vrot.slane %v745_v63, 4  ;;  %v892_v63 = vor.u32 %v891_v42, %v888_v41  ;;  %v934_v37 = vor.u32 %v933_v20, %v930_v19  ;;  %v973_v41 = vshll.u32 %v2166_v26, 16 }
  0x6b   : > { %v801_v31 = vor.u32 %v800_v11, %v797_v10  ;;  %v902_v10 = vrot.slane %v900_v58, 4  ;;  %v897_v13 = vrot.slane %v895_v55, 5  ;;  %v956_v42 = vshrl.u32 %v2164_v27, 16  ;;  %v2165_v58 = vld [vmem:[%s2447_s19 + $0x10c] sm:$0x1] }
  0x6c   : > { %v245_v35 = vpop.permute.xlu2 %244  ;;  %v751_v36 = vsel %vm2481_vm2, %v746_v21, %v750_v1  ;;  %v881_v1 = vshll.u32 %v2153_v48, 16  ;;  %v893_v12 = vrot.slane %v892_v63, 4  ;;  %v2162_v21 = vld [vmem:[%s2447_s19 + $0x100] sm:$0xf]  ;;  %v975_v55 = vrot.slane %v973_v41, 5 }
  0x6d   : > { %265 = vst.msk [vmem:[#allocation2 + $0x10] sm:$0xf] %vm260_vm4, %v245_v35  ;;  %v765_v35 = vsel %vm2481_vm2, %v760_v0, %v764_v62  ;;  %v942_v30 = vshrl.u32 %v2162_v21, 16  ;;  %v965_v5 = vshll.u32 %v2165_v58, 16 }
  0x6e   : > { %v883_v15 = vrot.slane %v881_v1, 5  ;;  %v898_v34 = vsel %vm2481_vm2, %v893_v12, %v897_v13  ;;  %v976_v6 = vor.u32 %v975_v55, %v972_v54 }
  0x70   : > { %v977_v12 = vrot.slane %v976_v6, 4 }
  0x71   : > { %671 = vrot.lane.b32.xlu1 %v2133_v28, %s2392_s24  ;;  %669 = vrot.lane.b32.xlu0 %v2132_v32, %s2392_s24  ;;  %v875_v28 = vshll.u32 %v2152_v14, 16  ;;  %v787_v32 = vor.u32 %v786_v18, %v783_v17  ;;  %v2157_v17 = vld [vmem:[%s2447_s19 + $0xec] sm:$0x1]  ;;  %v2161_v18 = vld [vmem:[%s2447_s19 + $0xfc] sm:$0x1] }
  0x72   : > { %673 = vrot.lane.b32.xlu2 %v2134_v50, %s2392_s24  ;;  %v802_v50 = vrot.slane %v801_v31, 4  ;;  %v909_v29 = vshll.u32 %v2157_v17, 16  ;;  %v945_v31 = vshll.u32 %v2162_v21, 16  ;;  %v2192_v21 = vld [vmem:[%s2447_s19 + $0x28] sm:$0xf] }
  0x73   : > { %v877_v44 = vrot.slane %v875_v28, 5  ;;  %v788_v51 = vrot.slane %v787_v32, 4  ;;  %v1192_v26 = vshll.u32 %v2192_v21, 16 }
  0x74   : > { %v247_v4 = vpop.permute.xlu2 %246  ;;  %v807_v8 = vsel %vm2481_vm2, %v802_v50, %v806_v46  ;;  %v944_v46 = vrot.slane %v942_v30, 4  ;;  %v935_v50 = vrot.slane %v934_v37, 4  ;;  %v2193_v37 = vld [vmem:[%s2447_s19 + $0x2c] sm:$0x1] }
  0x75   : > { %266 = vst.msk [vmem:[#allocation2 + $0x14] sm:$0xf] %vm260_vm4, %v247_v4  ;;  %v878_v0 = vor.u32 %v877_v44, %v874_v43  ;;  %v914_v4 = vshrl.u32 %v2158_v57, 16  ;;  %v793_v9 = vsel %vm2481_vm2, %v788_v51, %v792_v47  ;;  %v959_v43 = vshll.u32 %v2164_v27, 16  ;;  %v2167_v57 = vld [vmem:[%s2447_s19 + $0x114] sm:$0x1] }
  0x76   : > { %v947_v47 = vrot.slane %v945_v31, 5  ;;  %v2174_v27 = vld [vmem:[%s2447_s19 + $0x38] sm:$0xf]  ;;  %v1194_v30 = vrot.slane %v1192_v26, 5 }
  0x77   : > { %v879_v14 = vrot.slane %v878_v0, 4  ;;  %v916_v23 = vrot.slane %v914_v4, 4  ;;  %v979_v4 = vshll.u32 %v2167_v57, 16 }
  0x79   : > { %822 = vrot.lane.b32.xlu1 %v723_v60, %s2393_s25  ;;  %675 = vrot.lane.b32.xlu0 %v2135_v61, %s2392_s24  ;;  %v903_v60 = vshll.u32 %v2156_v49, 16  ;;  %v920_v40 = vor.u32 %v919_v24, %v916_v23  ;;  %v2163_v49 = vld [vmem:[%s2447_s19 + $0x104] sm:$0x1] }
  0x7a   : > { %824 = vrot.lane.b32.xlu2 %v737_v22, %s2393_s25  ;;  %v2159_v22 = vld [vmem:[%s2447_s19 + $0xf4] sm:$0x1]  ;;  %v951_v63 = vshll.u32 %v2163_v49, 16 }
  0x7b   : > { %v905_v11 = vrot.slane %v903_v60, 5  ;;  %v923_v38 = vshll.u32 %v2159_v22, 16  ;;  %v921_v53 = vrot.slane %v920_v40, 4  ;;  %v961_v60 = vrot.slane %v959_v43, 5  ;;  %v2172_v22 = vld [vmem:[%s2447_s19 + $0x28] sm:$0xf] }
  0x7c   : > { %v401_v45 = vpop.permute.xlu2 %400 }
  0x7d   : > { %v906_v28 = vor.u32 %v905_v11, %v902_v10  ;;  %v925_v52 = vrot.slane %v923_v38, 5  ;;  %v981_v11 = vrot.slane %v979_v4, 5  ;;  %v2175_v38 = vld [vmem:[%s2447_s19 + $0x40] sm:$0xf] }
  0x7f   : > { %v907_v44 = vrot.slane %v906_v28, 4  ;;  %v926_v3 = vsel %vm2481_vm2, %v921_v53, %v925_v52  ;;  %v2173_v28 = vld [vmem:[%s2447_s19 + $0x30] sm:$0xf] }
  0x81   : > { %828 = vrot.lane.b32.xlu1 %v765_v35, %s2393_s25  ;;  %826 = vrot.lane.b32.xlu0 %v751_v36, %s2393_s25  ;;  %v937_v35 = vshll.u32 %v2161_v18, 16  ;;  %v884_v36 = vsel %vm2481_vm2, %v879_v14, %v883_v15  ;;  %v967_v14 = vrot.slane %v965_v5, 5  ;;  %v982_v18 = vsel %vm2481_vm2, %v977_v12, %v981_v11 }
  0x82   : > { %830 = vrot.lane.b32.xlu2 %v779_v56, %s2393_s25  ;;  %v958_v56 = vrot.slane %v956_v42, 4 }
  0x83   : > { %v241_v61 = vpop.permute.xlu1 %240  ;;  %v237_v62 = vpop.permute.xlu0 %236  ;;  %v939_v51 = vrot.slane %v937_v35, 5 }
  0x84   : > { %263 = vst.msk [vmem:[#allocation2 + $0x8] sm:$0xf] %vm260_vm4, %v241_v61  ;;  %v407_v16 = vpop.permute.xlu2 %406  ;;  %v962_v7 = vor.u32 %v961_v60, %v958_v56  ;;  %v2199_v56 = vld [vmem:[%s2447_s19 + $0x44] sm:$0x1]  ;;  %v2208_v60 = vld [vmem:[%s2447_s19 + $0x70] sm:$0xf] }
  0x85   : > { %261 = vst.msk [vmem:[#allocation2] sm:$0xf] %vm260_vm4, %v237_v62  ;;  %v948_v62 = vor.u32 %v947_v47, %v944_v46  ;;  %v940_v2 = vsel %vm2481_vm2, %v935_v50, %v939_v51  ;;  %v1198_v47 = vshll.u32 %v2193_v37, 16  ;;  %v2180_v50 = vld [vmem:[%s2447_s19 + $0x70] sm:$0xf]  ;;  %v1350_v4 = vshrl.u32 %v2208_v60, 16 }
  0x86   : > { %425 = vst.msk [vmem:[#allocation2] sm:$0xf] %vm424_vm5, %v401_v45  ;;  %v911_v45 = vrot.slane %v909_v29, 5  ;;  %v963_v13 = vrot.slane %v962_v7, 4  ;;  %v2195_v51 = vld [vmem:[%s2447_s19 + $0x34] sm:$0x1] }
  0x87   : > { %v1353_v5 = vshll.u32 %v2208_v60, 16 }
  0x88   : > { %v912_v61 = vsel %vm2481_vm2, %v907_v44, %v911_v45  ;;  %v968_v19 = vsel %vm2481_vm2, %v963_v13, %v967_v14  ;;  %v2181_v44 = vld [vmem:[%s2447_s19 + $0x78] sm:$0xf] }
  0x89   : > { %834 = vrot.lane.b32.xlu1 %v807_v8, %s2393_s25  ;;  %832 = vrot.lane.b32.xlu0 %v793_v9, %s2393_s25  ;;  %v949_v8 = vrot.slane %v948_v62, 4  ;;  %v953_v9 = vrot.slane %v951_v63, 5  ;;  %v2197_v62 = vld [vmem:[%s2447_s19 + $0x3c] sm:$0x1]  ;;  %v2212_v63 = vld [vmem:[%s2447_s19 + $0x80] sm:$0xf] }
  0x8a   : > { %836 = vrot.lane.b32.xlu2 %v821_v25, %s2393_s25  ;;  %v1189_v25 = vshrl.u32 %v2192_v21, 16  ;;  %v1226_v11 = vshll.u32 %v2197_v62, 16  ;;  %v1378_v12 = vshrl.u32 %v2212_v63, 16  ;;  %v1381_v13 = vshll.u32 %v2212_v63, 16  ;;  %s3050_s25 = scalar_lea.vmem %s3080_s3, %s2302_s22 }
  0x8b   : > { %v243_v32 = vpop.permute.xlu1 %242  ;;  %v239_v33 = vpop.permute.xlu0 %238  ;;  %v954_v15 = vsel %vm2481_vm2, %v949_v8, %v953_v9  ;;  %v1240_v9 = vshll.u32 %v2199_v56, 16  ;;  %v1355_v21 = vrot.slane %v1353_v5, 5 }
  0x8c   : > { %264 = vst.msk [vmem:[#allocation2 + $0xc] sm:$0xf] %vm260_vm4, %v243_v32  ;;  %v413_v48 = vpop.permute.xlu2 %412  ;;  %v1191_v29 = vrot.slane %v1189_v25, 4  ;;  %v2198_v32 = vld [vmem:[%s2447_s19 + $0x40] sm:$0xf] }
  0x8d   : > { %262 = vst.msk [vmem:[#allocation2 + $0x4] sm:$0xf] %vm260_vm4, %v239_v33  ;;  %v2194_v33 = vld [vmem:[%s2447_s19 + $0x30] sm:$0xf]  ;;  %v1231_v42 = vshrl.u32 %v2198_v32, 16  ;;  %v1234_v43 = vshll.u32 %v2198_v32, 16 }
  0x8e   : > { %428 = vst.msk [vmem:[#allocation2 + $0xc] sm:$0xf] %vm424_vm5, %v407_v16  ;;  %v1203_v35 = vshrl.u32 %v2194_v33, 16  ;;  %v1195_v41 = vor.u32 %v1194_v30, %v1191_v29  ;;  %v1242_v25 = vrot.slane %v1240_v9, 5  ;;  %v2214_v29 = vld [vmem:[%s2447_s19 + $0x88] sm:$0xf] }
  0x8f   : > { %v1233_v53 = vrot.slane %v1231_v42, 4  ;;  %v1236_v54 = vrot.slane %v1234_v43, 5  ;;  %v2213_v30 = vld [vmem:[%s2447_s19 + $0x84] sm:$0x1]  ;;  %v2220_v9 = vld [vmem:[%s2447_s19 + $0xb8] sm:$0xf] }
  0x90   : > { %v1196_v52 = vrot.slane %v1195_v41, 4 }
  0x91   : > { %985 = vrot.lane.b32.xlu1 %v898_v34, %s2394_s26  ;;  %983 = vrot.lane.b32.xlu0 %v884_v36, %s2394_s26  ;;  %v2196_v34 = vld [vmem:[%s2447_s19 + $0x38] sm:$0xf]  ;;  %v1206_v36 = vshll.u32 %v2194_v33, 16  ;;  %v1237_v8 = vor.u32 %v1236_v54, %v1233_v53  ;;  %v2215_v53 = vld [vmem:[%s2447_s19 + $0x8c] sm:$0x1] }
  0x92   : > { %987 = vrot.lane.b32.xlu2 %v912_v61, %s2394_s26  ;;  %v1217_v45 = vshrl.u32 %v2196_v34, 16  ;;  %v1220_v46 = vshll.u32 %v2196_v34, 16  ;;  %v1200_v61 = vrot.slane %v1198_v47, 5 }
  0x93   : > { %v251_v0 = vpop.permute.xlu1 %250  ;;  %v249_v1 = vpop.permute.xlu0 %248  ;;  %v1208_v49 = vrot.slane %v1206_v36, 5 }
  0x94   : > { %268 = vst.msk [vmem:[#allocation2 + $0x1c] sm:$0xf] %vm260_vm4, %v251_v0  ;;  %v564_v10 = vpop.permute.xlu2 %563  ;;  %v1219_v57 = vrot.slane %v1217_v45, 4  ;;  %v1222_v58 = vrot.slane %v1220_v46, 5  ;;  %v1387_v45 = vshll.u32 %v2213_v30, 16 }
  0x95   : > { %267 = vst.msk [vmem:[#allocation2 + $0x18] sm:$0xf] %vm260_vm4, %v249_v1  ;;  %v1212_v1 = vshll.u32 %v2195_v51, 16  ;;  %v2243_v30 = vld [vmem:[%s2447_s19 + $0xc4] sm:$0x1] }
  0x96   : > { %431 = vst.msk [vmem:[#allocation2 + $0x18] sm:$0xf] %vm424_vm5, %v413_v48  ;;  %v1205_v48 = vrot.slane %v1203_v35, 4  ;;  %v2211_v35 = vld [vmem:[%s2447_s19 + $0x7c] sm:$0x1] }
  0x97   : > { %v1373_v47 = vshll.u32 %v2211_v35, 16  ;;  %v2168_v35 = vld [vmem:[%s2447_s19 + $0x8] sm:$0xf] }
  0x98   : > { %v1209_v0 = vor.u32 %v1208_v49, %v1205_v48 }
  0x99   : > { %991 = vrot.lane.b32.xlu1 %v940_v2, %s2394_s26  ;;  %989 = vrot.lane.b32.xlu0 %v926_v3, %s2394_s26  ;;  %v2182_v2 = vld [vmem:[%s2447_s19 + $0x80] sm:$0xf]  ;;  %v2210_v3 = vld [vmem:[%s2447_s19 + $0x78] sm:$0xf] }
  0x9a   : > { %993 = vrot.lane.b32.xlu2 %v954_v15, %s2394_s26  ;;  %v1364_v14 = vshrl.u32 %v2210_v3, 16  ;;  %v1367_v15 = vshll.u32 %v2210_v3, 16 }
  0x9b   : > { %v405_v16 = vpop.permute.xlu1 %404  ;;  %v403_v17 = vpop.permute.xlu0 %402 }
  0x9c   : > { %427 = vst.msk [vmem:[#allocation2 + $0x8] sm:$0xf] %vm424_vm5, %v405_v16  ;;  %v570_v20 = vpop.permute.xlu2 %569  ;;  %v1210_v16 = vrot.slane %v1209_v0, 4  ;;  %v1366_v32 = vrot.slane %v1364_v14, 4  ;;  %v1369_v33 = vrot.slane %v1367_v15, 5 }
  0x9d   : > { %426 = vst.msk [vmem:[#allocation2 + $0x4] sm:$0xf] %vm424_vm5, %v403_v17  ;;  %v1214_v17 = vrot.slane %v1212_v1, 5  ;;  %v2228_v14 = vld [vmem:[%s2447_s19 + $0x100] sm:$0xf] }
  0x9e   : > { %587 = vst.msk [vmem:[#allocation2 + $0x4] sm:$0xf] %vm585_vm6, %v564_v10  ;;  %v1223_v10 = vor.u32 %v1222_v58, %v1219_v57  ;;  %v1370_v46 = vor.u32 %v1369_v33, %v1366_v32  ;;  %v1375_v57 = vrot.slane %v1373_v47, 5  ;;  %v2223_v15 = vld [vmem:[%s2447_s19 + $0xd0] sm:$0xf] }
  0x9f   : > { %v1215_v34 = vsel %vm2481_vm2, %v1210_v16, %v1214_v17  ;;  %v2229_v17 = vld [vmem:[%s2447_s19 + $0x108] sm:$0xf] }
  0xa0   : > { %v1224_v26 = vrot.slane %v1223_v10, 4  ;;  %v1371_v56 = vrot.slane %v1370_v46, 4 }
  0xa1   : > { %997 = vrot.lane.b32.xlu1 %v982_v18, %s2394_s26  ;;  %995 = vrot.lane.b32.xlu0 %v968_v19, %s2394_s26  ;;  %v1201_v18 = vsel %vm2481_vm2, %v1196_v52, %v1200_v61  ;;  %v2183_v19 = vld [vmem:[%s2447_s19 + $0x88] sm:$0xf]  ;;  %v1401_v61 = vshll.u32 %v2215_v53, 16  ;;  %v2245_v53 = vld [vmem:[%s2447_s19 + $0xcc] sm:$0x1] }
  0xa2   : > { %1041 = vrot.lane.b32.xlu2 %v2172_v22, %s2395_s27  ;;  %v1238_v22 = vrot.slane %v1237_v8, 4  ;;  %v1376_v1 = vsel %vm2481_vm2, %v1371_v56, %v1375_v57  ;;  %v2221_v8 = vld [vmem:[%s2447_s19 + $0xc0] sm:$0xf] }
  0xa3   : > { %v411_v23 = vpop.permute.xlu1 %410  ;;  %v409_v24 = vpop.permute.xlu0 %408  ;;  %v1403_v3 = vrot.slane %v1401_v61, 5  ;;  %v2171_v61 = vld [vmem:[%s2447_s19 + $0x20] sm:$0xf] }
  0xa4   : > { %430 = vst.msk [vmem:[#allocation2 + $0x14] sm:$0xf] %vm424_vm5, %v411_v23  ;;  %v576_v31 = vpop.permute.xlu2 %575  ;;  %v1243_v42 = vsel %vm2481_vm2, %v1238_v22, %v1242_v25 }
  0xa5   : > { %429 = vst.msk [vmem:[#allocation2 + $0x10] sm:$0xf] %vm424_vm5, %v409_v24  ;;  %v2209_v24 = vld [vmem:[%s2447_s19 + $0x74] sm:$0x1] }
  0xa6   : > { %590 = vst.msk [vmem:[#allocation2 + $0x10] sm:$0xf] %vm585_vm6, %v570_v20  ;;  %v1352_v20 = vrot.slane %v1350_v4, 4  ;;  %v1359_v37 = vshll.u32 %v2209_v24, 16 }
  0xa8   : > { %v1356_v36 = vor.u32 %v1355_v21, %v1352_v20  ;;  %v1361_v49 = vrot.slane %v1359_v37, 5 }
  0xa9   : > { %1045 = vrot.lane.b32.xlu1 %v2174_v27, %s2395_s27  ;;  %1043 = vrot.lane.b32.xlu0 %v2173_v28, %s2395_s27  ;;  %v1228_v27 = vrot.slane %v1226_v11, 5  ;;  %v1380_v28 = vrot.slane %v1378_v12, 4  ;;  %v2222_v11 = vld [vmem:[%s2447_s19 + $0xc8] sm:$0xf] }
  0xaa   : > { %1047 = vrot.lane.b32.xlu2 %v2175_v38, %s2395_s27  ;;  %v1392_v38 = vshrl.u32 %v2214_v29, 16  ;;  %v1357_v48 = vrot.slane %v1356_v36, 4  ;;  %v2246_v36 = vld [vmem:[%s2447_s19 + $0xd0] sm:$0xf] }
  0xab   : > { %v562_v39 = vpop.permute.xlu1 %561  ;;  %v415_v40 = vpop.permute.xlu0 %414  ;;  %v1229_v43 = vsel %vm2481_vm2, %v1224_v26, %v1228_v27  ;;  %v2231_v26 = vld [vmem:[%s2447_s19 + $0x118] sm:$0xf]  ;;  %v2230_v27 = vld [vmem:[%s2447_s19 + $0x110] sm:$0xf]  ;;  %v1653_v46 = vshrl.u32 %v2246_v36, 16  ;;  %v1656_v47 = vshll.u32 %v2246_v36, 16 }
  0xac   : > { %586 = vst.msk [vmem:[#allocation2] sm:$0xf] %vm585_vm6, %v562_v39  ;;  %v616_v55 = vpop.permute.xlu2 %615  ;;  %v1395_v39 = vshll.u32 %v2214_v29, 16  ;;  %v1362_v58 = vsel %vm2481_vm2, %v1357_v48, %v1361_v49  ;;  %v2244_v29 = vld [vmem:[%s2447_s19 + $0xc8] sm:$0xf] }
  0xad   : > { %432 = vst.msk [vmem:[#allocation2 + $0x1c] sm:$0xf] %vm424_vm5, %v415_v40  ;;  %v1639_v37 = vshrl.u32 %v2244_v29, 16  ;;  %v1655_v56 = vrot.slane %v1653_v46, 4  ;;  %v1658_v57 = vrot.slane %v1656_v47, 5 }
  0xae   : > { %593 = vst.msk [vmem:[#allocation2 + $0x1c] sm:$0xf] %vm585_vm6, %v576_v31  ;;  %v1383_v31 = vrot.slane %v1381_v13, 5  ;;  %v1397_v51 = vrot.slane %v1395_v39, 5  ;;  %v2184_v36 = vld [vmem:[%s2447_s19 + $0x8] sm:$0xf] }
  0xb1   : > { %1093 = vrot.lane.b32.xlu1 %v2181_v44, %s2396_s28  ;;  %1091 = vrot.lane.b32.xlu0 %v2180_v50, %s2396_s28  ;;  %v1384_v44 = vor.u32 %v1383_v31, %v1380_v28  ;;  %v1394_v50 = vrot.slane %v1392_v38, 4  ;;  %v1642_v38 = vshll.u32 %v2244_v29, 16  ;;  %v2261_v29 = vld [vmem:[%s2447_s19 + $0x114] sm:$0x1] }
  0xb2   : > { %1095 = vrot.lane.b32.xlu2 %v2182_v2, %s2396_s28 }
  0xb3   : > { %v568_v6 = vpop.permute.xlu1 %567  ;;  %v566_v7 = vpop.permute.xlu0 %565  ;;  %v1385_v54 = vrot.slane %v1384_v44, 4  ;;  %v1398_v60 = vor.u32 %v1397_v51, %v1394_v50  ;;  %v1641_v50 = vrot.slane %v1639_v37, 4  ;;  %v1644_v51 = vrot.slane %v1642_v38, 5  ;;  %v2262_v37 = vld [vmem:[%s2447_s19 + $0x118] sm:$0xf] }
  0xb4   : > { %589 = vst.msk [vmem:[#allocation2 + $0xc] sm:$0xf] %vm585_vm6, %v568_v6  ;;  %v622_v23 = vpop.permute.xlu2 %621  ;;  %v2259_v38 = vld [vmem:[%s2447_s19 + $0x10c] sm:$0x1] }
  0xb5   : > { %588 = vst.msk [vmem:[#allocation2 + $0x8] sm:$0xf] %vm585_vm6, %v566_v7  ;;  %v1399_v2 = vrot.slane %v1398_v60, 4 }
  0xb6   : > { %638 = vst.msk [vmem:[#allocation2 + $0x8] sm:$0xf] %vm635_vm7, %v616_v55  ;;  %v1389_v55 = vrot.slane %v1387_v45, 5  ;;  %v1634_v45 = vshll.u32 %v2243_v30, 16 }
  0xb7   : > { %v1404_v5 = vsel %vm2481_vm2, %v1399_v2, %v1403_v3  ;;  %v2247_v2 = vld [vmem:[%s2447_s19 + $0xd4] sm:$0x1] }
  0xb8   : > { %v1390_v0 = vsel %vm2481_vm2, %v1385_v54, %v1389_v55  ;;  %v1636_v55 = vrot.slane %v1634_v45, 5  ;;  %v1817_v45 = vshll.u32 %v2262_v37, 16 }
  0xb9   : > { %1252 = vrot.lane.b32.xlu1 %v1201_v18, %s2397_s29  ;;  %1097 = vrot.lane.b32.xlu0 %v2183_v19, %s2396_s28  ;;  %v2242_v18 = vld [vmem:[%s2447_s19 + $0xc0] sm:$0xf]  ;;  %v2240_v19 = vld [vmem:[%s2447_s19 + $0xb8] sm:$0xf] }
  0xba   : > { %1254 = vrot.lane.b32.xlu2 %v1215_v34, %s2397_s29  ;;  %v1625_v22 = vshrl.u32 %v2242_v18, 16  ;;  %v1611_v24 = vshrl.u32 %v2240_v19, 16  ;;  %v1614_v25 = vshll.u32 %v2240_v19, 16 }
  0xbb   : > { %v574_v40 = vpop.permute.xlu1 %573  ;;  %v572_v41 = vpop.permute.xlu0 %571 }
  0xbc   : > { %592 = vst.msk [vmem:[#allocation2 + $0x18] sm:$0xf] %vm585_vm6, %v574_v40  ;;  %v662_v52 = vpop.permute.xlu2 %661  ;;  %v1627_v31 = vrot.slane %v1625_v22, 4  ;;  %v1613_v33 = vrot.slane %v1611_v24, 4  ;;  %v1616_v34 = vrot.slane %v1614_v25, 5 }
  0xbd   : > { %591 = vst.msk [vmem:[#allocation2 + $0x14] sm:$0xf] %vm585_vm6, %v572_v41  ;;  %v2241_v41 = vld [vmem:[%s2447_s19 + $0xbc] sm:$0x1]  ;;  %v2176_v24 = vld [vmem:[%s2447_s19 + $0x50] sm:$0xf] }
  0xbe   : > { %641 = vst.msk [vmem:[#allocation2 + $0x14] sm:$0xf] %vm635_vm7, %v622_v23  ;;  %v1628_v23 = vshll.u32 %v2242_v18, 16  ;;  %v1617_v48 = vor.u32 %v1616_v34, %v1613_v33  ;;  %v1620_v49 = vshll.u32 %v2241_v41, 16  ;;  %v2257_v33 = vld [vmem:[%s2447_s19 + $0x104] sm:$0x1] }
  0xbf   : > { %v1814_v41 = vshrl.u32 %v2262_v37, 16  ;;  %v2201_v37 = vld [vmem:[%s2447_s19 + $0x54] sm:$0x1]  ;;  %vm1998_vm6 = vcmask 60416  }
  0xc0   : > { %v1630_v32 = vrot.slane %v1628_v23, 5  ;;  %v1622_v60 = vrot.slane %v1620_v49, 5  ;;  %v1133_v49 = vshrl.u32 %v2184_v36, 16 }
  0xc1   : > { %1258 = vrot.lane.b32.xlu1 %v1243_v42, %s2397_s29  ;;  %1256 = vrot.lane.b32.xlu0 %v1229_v43, %s2397_s29  ;;  %v2170_v42 = vld [vmem:[%s2447_s19 + $0x18] sm:$0xf]  ;;  %v2169_v43 = vld [vmem:[%s2447_s19 + $0x10] sm:$0xf] }
  0xc2   : > { %1413 = vrot.lane.b32.xlu2 %v1362_v58, %s2398_s30  ;;  %v1631_v44 = vor.u32 %v1630_v32, %v1627_v31  ;;  %v1618_v58 = vrot.slane %v1617_v48, 4  ;;  %v1809_v48 = vshll.u32 %v2261_v29, 16 }
  0xc3   : > { %v614_v62 = vpop.permute.xlu1 %613  ;;  %v612_v63 = vpop.permute.xlu0 %611 }
  0xc4   : > { %637 = vst.msk [vmem:[#allocation2 + $0x4] sm:$0xf] %vm635_vm7, %v614_v62  ;;  %v668_v4 = vpop.permute.xlu2 %667  ;;  %v1632_v54 = vrot.slane %v1631_v44, 4  ;;  %v1645_v62 = vor.u32 %v1644_v51, %v1641_v50  ;;  %v1781_v44 = vshll.u32 %v2257_v33, 16  ;;  %v1136_v50 = vshll.u32 %v2184_v36, 16 }
  0xc5   : > { %636 = vst.msk [vmem:[#allocation2] sm:$0xf] %vm635_vm7, %v612_v63  ;;  %v1648_v63 = vshll.u32 %v2245_v53, 16  ;;  %v2179_v51 = vld [vmem:[%s2447_s19 + $0x68] sm:$0xf] }
  0xc6   : > { %686 = vst.msk [vmem:[#allocation2] sm:$0xf] %vm685_vm8, %v662_v52  ;;  %v1637_v3 = vsel %vm2481_vm2, %v1632_v54, %v1636_v55  ;;  %v1795_v55 = vshll.u32 %v2259_v38, 16 }
  0xc9   : > { %1417 = vrot.lane.b32.xlu1 %v1390_v0, %s2398_s30  ;;  %1415 = vrot.lane.b32.xlu0 %v1376_v1, %s2398_s30 }
  0xca   : > { %1419 = vrot.lane.b32.xlu2 %v1404_v5, %s2398_s30  ;;  %v1623_v5 = vsel %vm2481_vm2, %v1618_v58, %v1622_v60  ;;  %v1816_v58 = vrot.slane %v1814_v41, 4  ;;  %v1819_v60 = vrot.slane %v1817_v45, 5  ;;  %v2191_v45 = vld [vmem:[%s2447_s19 + $0x24] sm:$0x1] }
  0xcb   : > { %v620_v6 = vpop.permute.xlu1 %619  ;;  %v618_v7 = vpop.permute.xlu0 %617 }
  0xcc   : > { %640 = vst.msk [vmem:[#allocation2 + $0x10] sm:$0xf] %vm635_vm7, %v620_v6  ;;  %v674_v10 = vpop.permute.xlu2 %673  ;;  %v1662_v6 = vshll.u32 %v2247_v2, 16  ;;  %v1135_v2 = vrot.slane %v1133_v49, 4 }
  0xcd   : > { %639 = vst.msk [vmem:[#allocation2 + $0xc] sm:$0xf] %vm635_vm7, %v618_v7  ;;  %v1646_v7 = vrot.slane %v1645_v62, 4  ;;  %v1783_v62 = vrot.slane %v1781_v44, 5  ;;  %v2202_v44 = vld [vmem:[%s2447_s19 + $0x58] sm:$0xf] }
  0xce   : > { %689 = vst.msk [vmem:[#allocation2 + $0xc] sm:$0xf] %vm685_vm8, %v668_v4  ;;  %v1659_v4 = vor.u32 %v1658_v57, %v1655_v56 }
  0xd1   : > { %1465 = vrot.lane.b32.xlu1 %v2221_v8, %s2399_s4  ;;  %1463 = vrot.lane.b32.xlu0 %v2220_v9, %s2399_s4  ;;  %v1650_v8 = vrot.slane %v1648_v63, 5  ;;  %v2263_v63 = vld [vmem:[%s2447_s19 + $0x11c] sm:$0x1] }
  0xd2   : > { %1467 = vrot.lane.b32.xlu2 %v2222_v11, %s2399_s4  ;;  %v2256_v11 = vld [vmem:[%s2447_s19 + $0x100] sm:$0xf] }
  0xd3   : > { %v626_v12 = vpop.permute.xlu1 %625  ;;  %v624_v13 = vpop.permute.xlu0 %623 }
  0xd4   : > { %643 = vst.msk [vmem:[#allocation2 + $0x1c] sm:$0xf] %vm635_vm7, %v626_v12  ;;  %v825_v16 = vpop.permute.xlu2 %824  ;;  %v1660_v12 = vrot.slane %v1659_v4, 4 }
  0xd5   : > { %642 = vst.msk [vmem:[#allocation2 + $0x18] sm:$0xf] %vm635_vm7, %v624_v13  ;;  %v2258_v13 = vld [vmem:[%s2447_s19 + $0x108] sm:$0xf] }
  0xd6   : > { %692 = vst.msk [vmem:[#allocation2 + $0x18] sm:$0xf] %vm685_vm8, %v674_v10  ;;  %v2260_v10 = vld [vmem:[%s2447_s19 + $0x110] sm:$0xf]  ;;  %v1786_v22 = vshrl.u32 %v2258_v13, 16  ;;  %v1789_v23 = vshll.u32 %v2258_v13, 16  ;;  %v1820_v13 = vor.u32 %v1819_v60, %v1816_v58 }
  0xd7   : > { %v1303_v58 = vshll.u32 %v2201_v37, 16 }
  0xd8   : > { %v1788_v34 = vrot.slane %v1786_v22, 4  ;;  %v1821_v29 = vrot.slane %v1820_v13, 4 }
  0xd9   : > { %1513 = vrot.lane.b32.xlu1 %v2228_v14, %s2400_s5  ;;  %1469 = vrot.lane.b32.xlu0 %v2223_v15, %s2399_s4  ;;  %v1664_v14 = vrot.slane %v1662_v6, 5  ;;  %v1651_v15 = vsel %vm2481_vm2, %v1646_v7, %v1650_v8  ;;  %v2185_v7 = vld [vmem:[%s2447_s19 + $0xc] sm:$0x1]  ;;  %v2188_v8 = vld [vmem:[%s2447_s19 + $0x18] sm:$0xf] }
  0xda   : > { %1515 = vrot.lane.b32.xlu2 %v2229_v17, %s2400_s5  ;;  %v1775_v17 = vshll.u32 %v2256_v11, 16  ;;  %v1142_v22 = vshll.u32 %v2185_v7, 16 }
  0xdb   : > { %v666_v20 = vpop.permute.xlu1 %665  ;;  %v664_v21 = vpop.permute.xlu0 %663  ;;  %v1665_v25 = vsel %vm2481_vm2, %v1660_v12, %v1664_v14  ;;  %v2190_v12 = vld [vmem:[%s2447_s19 + $0x20] sm:$0xf]  ;;  %v1823_v14 = vshll.u32 %v2263_v63, 16 }
  0xdc   : > { %688 = vst.msk [vmem:[#allocation2 + $0x8] sm:$0xf] %vm685_vm8, %v666_v20  ;;  %v831_v28 = vpop.permute.xlu2 %830  ;;  %v1800_v20 = vshrl.u32 %v2260_v10, 16  ;;  %v1144_v36 = vrot.slane %v1142_v22, 5  ;;  %v2205_v22 = vld [vmem:[%s2447_s19 + $0x64] sm:$0x1] }
  0xdd   : > { %687 = vst.msk [vmem:[#allocation2 + $0x4] sm:$0xf] %vm685_vm8, %v664_v21  ;;  %v1803_v21 = vshll.u32 %v2260_v10, 16 }
  0xde   : > { %848 = vst.msk [vmem:[#allocation2 + $0x4] sm:$0xf] %vm846_vm9, %v825_v16  ;;  %v1772_v16 = vshrl.u32 %v2256_v11, 16  ;;  %v1802_v30 = vrot.slane %v1800_v20, 4  ;;  %v2200_v11 = vld [vmem:[%s2447_s19 + $0x50] sm:$0xf] }
  0xdf   : > { %v1805_v31 = vrot.slane %v1803_v21, 5 }
  0xe1   : > { %1519 = vrot.lane.b32.xlu1 %v2231_v26, %s2400_s5  ;;  %1517 = vrot.lane.b32.xlu0 %v2230_v27, %s2400_s5  ;;  %v2186_v26 = vld [vmem:[%s2447_s19 + $0x10] sm:$0xf]  ;;  %v1774_v27 = vrot.slane %v1772_v16, 4  ;;  %v1806_v53 = vor.u32 %v1805_v31, %v1802_v30  ;;  %v1825_v30 = vrot.slane %v1823_v14, 5 }
  0xe2   : > { %1033 = vrot.lane.b32.xlu2 %v2168_v35, %s2395_s27  ;;  %v1791_v35 = vrot.slane %v1789_v23, 5  ;;  %v1294_v23 = vshrl.u32 %v2200_v11, 16 }
  0xe3   : > { %v672_v39 = vpop.permute.xlu1 %671  ;;  %v670_v40 = vpop.permute.xlu0 %669 }
  0xe4   : > { %691 = vst.msk [vmem:[#allocation2 + $0x14] sm:$0xf] %vm685_vm8, %v672_v39  ;;  %v837_v52 = vpop.permute.xlu2 %836  ;;  %v1147_v39 = vshrl.u32 %v2186_v26, 16  ;;  %v1792_v54 = vor.u32 %v1791_v35, %v1788_v34 }
  0xe5   : > { %690 = vst.msk [vmem:[#allocation2 + $0x10] sm:$0xf] %vm685_vm8, %v670_v40  ;;  %v1150_v40 = vshll.u32 %v2186_v26, 16  ;;  %v1178_v26 = vshll.u32 %v2190_v12, 16 }
  0xe6   : > { %851 = vst.msk [vmem:[#allocation2 + $0x10] sm:$0xf] %vm846_vm9, %v831_v28  ;;  %v1777_v28 = vrot.slane %v1775_v17, 5  ;;  %v1149_v56 = vrot.slane %v1147_v39, 4  ;;  %v1793_v6 = vrot.slane %v1792_v54, 4  ;;  %v1161_v17 = vshrl.u32 %v2188_v8, 16 }
  0xe7   : > { %v1152_v57 = vrot.slane %v1150_v40, 5  ;;  %v2189_v39 = vld [vmem:[%s2447_s19 + $0x1c] sm:$0x1]  ;;  %v1296_v40 = vrot.slane %v1294_v23, 4 }
  0xe8   : > { %v1163_v33 = vrot.slane %v1161_v17, 4 }
  0xe9   : > { %1037 = vrot.lane.b32.xlu1 %v2170_v42, %s2395_s27  ;;  %1035 = vrot.lane.b32.xlu0 %v2169_v43, %s2395_s27  ;;  %v2177_v42 = vld [vmem:[%s2447_s19 + $0x58] sm:$0xf]  ;;  %v1778_v43 = vor.u32 %v1777_v28, %v1774_v27  ;;  %v1153_v10 = vor.u32 %v1152_v57, %v1149_v56 }
  0xea   : > { %1039 = vrot.lane.b32.xlu2 %v2171_v61, %s2395_s27 }
  0xeb   : > { %v823_v0 = vpop.permute.xlu1 %822  ;;  %v676_v1 = vpop.permute.xlu0 %675  ;;  %v1779_v61 = vrot.slane %v1778_v43, 4  ;;  %v1154_v31 = vrot.slane %v1153_v10, 4  ;;  %v1180_v43 = vrot.slane %v1178_v26, 5  ;;  %v1305_v10 = vrot.slane %v1303_v58, 5  ;;  %v2219_v58 = vld [vmem:[%s2447_s19 + $0xb0] sm:$0xf] }
  0xec   : > { %847 = vst.msk [vmem:[#allocation2] sm:$0xf] %vm846_vm9, %v823_v0  ;;  %v988_v9 = vpop.permute.xlu2 %987  ;;  %v1811_v0 = vrot.slane %v1809_v48, 5  ;;  %v2204_v48 = vld [vmem:[%s2447_s19 + $0x60] sm:$0xf] }
  0xed   : > { %693 = vst.msk [vmem:[#allocation2 + $0x1c] sm:$0xf] %vm685_vm8, %v676_v1  ;;  %v2187_v1 = vld [vmem:[%s2447_s19 + $0x14] sm:$0x1]  ;;  %v1784_v16 = vsel %vm2481_vm2, %v1779_v61, %v1783_v62  ;;  %v1184_v61 = vshll.u32 %v2191_v45, 16 }
  0xee   : > { %854 = vst.msk [vmem:[#allocation2 + $0x1c] sm:$0xf] %vm846_vm9, %v837_v52  ;;  %v2178_v52 = vld [vmem:[%s2447_s19 + $0x60] sm:$0xf] }
  0xf1   : > { %1676 = vrot.lane.b32.xlu1 %v1637_v3, %s2401_s6  ;;  %1674 = vrot.lane.b32.xlu0 %v1623_v5, %s2401_s6  ;;  %v1138_v3 = vrot.slane %v1136_v50, 5  ;;  %v1807_v5 = vrot.slane %v1806_v53, 4  ;;  %v1170_v50 = vshll.u32 %v2189_v39, 16 }
  0xf2   : > { %1678 = vrot.lane.b32.xlu2 %v1651_v15, %s2401_s6  ;;  %v1156_v15 = vshll.u32 %v2187_v1, 16  ;;  %v1325_v1 = vshll.u32 %v2204_v48, 16 }
  0xf3   : > { %v829_v18 = vpop.permute.xlu1 %828  ;;  %v827_v19 = vpop.permute.xlu0 %826  ;;  %v1139_v21 = vor.u32 %v1138_v3, %v1135_v2  ;;  %v1812_v27 = vsel %vm2481_vm2, %v1807_v5, %v1811_v0  ;;  %v1322_v0 = vshrl.u32 %v2204_v48, 16  ;;  %v1172_v3 = vrot.slane %v1170_v50, 5  ;;  %v2218_v48 = vld [vmem:[%s2447_s19 + $0xa8] sm:$0xf] }
  0xf4   : > { %850 = vst.msk [vmem:[#allocation2 + $0xc] sm:$0xf] %vm846_vm9, %v829_v18  ;;  %v994_v32 = vpop.permute.xlu2 %993  ;;  %v1164_v18 = vshll.u32 %v2188_v8, 16  ;;  %v2203_v8 = vld [vmem:[%s2447_s19 + $0x5c] sm:$0x1] }
  0xf5   : > { %849 = vst.msk [vmem:[#allocation2 + $0x8] sm:$0xf] %vm846_vm9, %v827_v19  ;;  %v1140_v35 = vrot.slane %v1139_v21, 4 }
  0xf6   : > { %1010 = vst.msk [vmem:[#allocation2 + $0x8] sm:$0xf] %vm1007_vm10, %v988_v9  ;;  %v1797_v9 = vrot.slane %v1795_v55, 5  ;;  %v1166_v34 = vrot.slane %v1164_v18, 5 }
  0xf7   : > { %v1145_v56 = vsel %vm2481_vm2, %v1140_v35, %v1144_v36 }
  0xf8   : > { %v1798_v28 = vsel %vm2481_vm2, %v1793_v6, %v1797_v9  ;;  %v1167_v49 = vor.u32 %v1166_v34, %v1163_v33 }
  0xf9   : > { %1083 = vrot.lane.b32.xlu1 %v2176_v24, %s2396_s28  ;;  %1680 = vrot.lane.b32.xlu0 %v1665_v25, %s2401_s6  ;;  %v1297_v24 = vshll.u32 %v2200_v11, 16  ;;  %v1175_v25 = vshrl.u32 %v2190_v12, 16  ;;  %v1186_v11 = vrot.slane %v1184_v61, 5 }
  0xfa   : > { %1085 = vrot.lane.b32.xlu2 %v2177_v42, %s2396_s28  ;;  %v1168_v2 = vrot.slane %v1167_v49, 4  ;;  %v2217_v49 = vld [vmem:[%s2447_s19 + $0xa0] sm:$0xf] }
  0xfb   : > { %v835_v46 = vpop.permute.xlu1 %834  ;;  %v833_v47 = vpop.permute.xlu0 %832  ;;  %v1299_v41 = vrot.slane %v1297_v24, 5  ;;  %v1177_v42 = vrot.slane %v1175_v25, 4 }
  0xfc   : > { %853 = vst.msk [vmem:[#allocation2 + $0x18] sm:$0xf] %vm846_vm9, %v835_v46  ;;  %v2838_v4 = vpop.permute.xlu2 %1041  ;;  %v1826_v46 = vsel %vm2481_vm2, %v1821_v29, %v1825_v30  ;;  %v1173_v17 = vsel %vm2481_vm2, %v1168_v2, %v1172_v3  ;;  %v2225_v2 = vld [vmem:[%s2447_s19 + $0xe8] sm:$0xf] }
  0xfd   : > { %852 = vst.msk [vmem:[#allocation2 + $0x14] sm:$0xf] %vm846_vm9, %v833_v47  ;;  %v2206_v47 = vld [vmem:[%s2447_s19 + $0x68] sm:$0xf]  ;;  %v1300_v57 = vor.u32 %v1299_v41, %v1296_v40  ;;  %v1181_v60 = vor.u32 %v1180_v43, %v1177_v42  ;;  %v2232_v42 = vld [vmem:[%s2447_s19 + $0x98] sm:$0xf] }
  0xfe   : > { %1013 = vst.msk [vmem:[#allocation2 + $0x14] sm:$0xf] %vm1007_vm10, %v994_v32  ;;  %v1158_v32 = vrot.slane %v1156_v15, 5  ;;  %v1336_v62 = vshrl.u32 %v2206_v47, 16  ;;  %v1339_v63 = vshll.u32 %v2206_v47, 16  ;;  %v1324_v15 = vrot.slane %v1322_v0, 4 }
  0xff   : > { %v1301_v9 = vrot.slane %v1300_v57, 4  ;;  %v1182_v12 = vrot.slane %v1181_v60, 4  ;;  %v2216_v43 = vld [vmem:[%s2447_s19 + $0x98] sm:$0xf]  ;;  %v1558_v47 = vshll.u32 %v2232_v42, 16 }
 0x100   : > { %v1159_v55 = vsel %vm2481_vm2, %v1154_v31, %v1158_v32  ;;  %v1338_v13 = vrot.slane %v1336_v62, 4  ;;  %v1341_v14 = vrot.slane %v1339_v63, 5  ;;  %v2233_v57 = vld [vmem:[%s2447_s19 + $0x9c] sm:$0x1] }
 0x101   : > { %1089 = vrot.lane.b32.xlu1 %v2179_v51, %s2396_s28  ;;  %1087 = vrot.lane.b32.xlu0 %v2178_v52, %s2396_s28  ;;  %v1308_v51 = vshrl.u32 %v2202_v44, 16  ;;  %v1311_v52 = vshll.u32 %v2202_v44, 16  ;;  %v1306_v23 = vsel %vm2481_vm2, %v1301_v9, %v1305_v10  ;;  %v1187_v24 = vsel %vm2481_vm2, %v1182_v12, %v1186_v11  ;;  %v2224_v9 = vld [vmem:[%s2447_s19 + $0xe0] sm:$0xf]  ;;  %v2235_v10 = vld [vmem:[%s2447_s19 + $0xa4] sm:$0x1] }
 0x102   : > { %1835 = vrot.lane.b32.xlu2 %v1784_v16, %s2402_s7  ;;  %v1327_v16 = vrot.slane %v1325_v1, 5  ;;  %v1342_v25 = vor.u32 %v1341_v14, %v1338_v13 }
 0x103   : > { %v986_v19 = vpop.permute.xlu1 %985  ;;  %v984_v20 = vpop.permute.xlu0 %983  ;;  %v1310_v5 = vrot.slane %v1308_v51, 4  ;;  %v1313_v6 = vrot.slane %v1311_v52, 5  ;;  %v1560_v51 = vrot.slane %v1558_v47, 5 }
 0x104   : > { %1009 = vst.msk [vmem:[#allocation2 + $0x4] sm:$0xf] %vm1007_vm10, %v986_v19  ;;  %v2856_v38 = vpop.permute.xlu2 %1047  ;;  %v1317_v19 = vshll.u32 %v2203_v8, 16  ;;  %v1343_v33 = vrot.slane %v1342_v25, 4 }
 0x105   : > { %1008 = vst.msk [vmem:[#allocation2] sm:$0xf] %vm1007_vm10, %v984_v20  ;;  %v1314_v18 = vor.u32 %v1313_v6, %v1310_v5  ;;  %v1564_v6 = vshll.u32 %v2233_v57, 16 }
 0x106   : > { %v1319_v30 = vrot.slane %v1317_v19, 5  ;;  %v2237_v19 = vld [vmem:[%s2447_s19 + $0xac] sm:$0x1] }
 0x107   : > { %v1315_v29 = vrot.slane %v1314_v18, 4  ;;  %v1566_v18 = vrot.slane %v1564_v6, 5 }
 0x109   : > { %1839 = vrot.lane.b32.xlu1 %v1812_v27, %s2402_s7  ;;  %1837 = vrot.lane.b32.xlu0 %v1798_v28, %s2402_s7  ;;  %v1328_v27 = vor.u32 %v1327_v16, %v1324_v15  ;;  %v1331_v28 = vshll.u32 %v2205_v22, 16  ;;  %v1320_v36 = vsel %vm2481_vm2, %v1315_v29, %v1319_v30  ;;  %v2239_v15 = vld [vmem:[%s2447_s19 + $0xb4] sm:$0x1]  ;;  %v1578_v22 = vshll.u32 %v2235_v10, 16 }
 0x10a   : > { %1841 = vrot.lane.b32.xlu2 %v1826_v46, %s2402_s7  ;;  %v1555_v46 = vshrl.u32 %v2232_v42, 16  ;;  %v1606_v30 = vshll.u32 %v2239_v15, 16 }
 0x10b   : > { %v992_v53 = vpop.permute.xlu1 %991  ;;  %v990_v54 = vpop.permute.xlu0 %989  ;;  %v1329_v34 = vrot.slane %v1328_v27, 4  ;;  %v1333_v35 = vrot.slane %v1331_v28, 5 }
 0x10c   : > { %1012 = vst.msk [vmem:[#allocation2 + $0x10] sm:$0xf] %vm1007_vm10, %v992_v53  ;;  %v1096_v7 = vpop.permute.xlu2 %1095  ;;  %v1557_v50 = vrot.slane %v1555_v46, 4  ;;  %v2238_v53 = vld [vmem:[%s2447_s19 + $0xb0] sm:$0xf]  ;;  %v1608_v46 = vrot.slane %v1606_v30, 5 }
 0x10d   : > { %1011 = vst.msk [vmem:[#allocation2 + $0xc] sm:$0xf] %vm1007_vm10, %v990_v54  ;;  %v1334_v40 = vsel %vm2481_vm2, %v1329_v34, %v1333_v35  ;;  %v2234_v54 = vld [vmem:[%s2447_s19 + $0xa0] sm:$0xf]  ;;  %v1597_v0 = vshrl.u32 %v2238_v53, 16  ;;  %v1600_v1 = vshll.u32 %v2238_v53, 16 }
 0x10e   : > { %1062 = vst.msk [vmem:[#allocation2 + $0x10] sm:$0xf] %vm1057_vm11, %v2838_v4  ;;  %v2207_v4 = vld [vmem:[%s2447_s19 + $0x6c] sm:$0x1]  ;;  %v1572_v60 = vshll.u32 %v2234_v54, 16  ;;  %v1561_v63 = vor.u32 %v1560_v51, %v1557_v50 }
 0x10f   : > { %v1345_v26 = vshll.u32 %v2207_v4, 16  ;;  %v1599_v12 = vrot.slane %v1597_v0, 4  ;;  %v1602_v13 = vrot.slane %v1600_v1, 5  ;;  %v2254_v50 = vld [vmem:[%s2447_s19 + $0xf8] sm:$0xf] }
 0x110   : > { %v1574_v8 = vrot.slane %v1572_v60, 5  ;;  %v1562_v11 = vrot.slane %v1561_v63, 4  ;;  %v2253_v51 = vld [vmem:[%s2447_s19 + $0xf4] sm:$0x1]  ;;  %v1758_v60 = vshrl.u32 %v2254_v50, 16 }
 0x111   : > { %1246 = vrot.lane.b32.xlu1 %v1159_v55, %s2397_s29  ;;  %1244 = vrot.lane.b32.xlu0 %v1145_v56, %s2397_s29  ;;  %v1347_v32 = vrot.slane %v1345_v26, 5  ;;  %v2236_v55 = vld [vmem:[%s2447_s19 + $0xa8] sm:$0xf]  ;;  %v1569_v56 = vshrl.u32 %v2234_v54, 16  ;;  %v1603_v29 = vor.u32 %v1602_v13, %v1599_v12  ;;  %v2255_v12 = vld [vmem:[%s2447_s19 + $0xfc] sm:$0x1] }
 0x112   : > { %1248 = vrot.lane.b32.xlu2 %v1173_v17, %s2397_s29  ;;  %v1583_v3 = vshrl.u32 %v2236_v55, 16  ;;  %v1586_v5 = vshll.u32 %v2236_v55, 16  ;;  %v2248_v17 = vld [vmem:[%s2447_s19 + $0xe0] sm:$0xf] }
 0x113   : > { %v998_v20 = vpop.permute.xlu1 %997  ;;  %v996_v21 = vpop.permute.xlu0 %995  ;;  %v1348_v39 = vsel %vm2481_vm2, %v1343_v33, %v1347_v32  ;;  %v1716_v25 = vshrl.u32 %v2248_v17, 16  ;;  %v1719_v26 = vshll.u32 %v2248_v17, 16  ;;  %v1592_v32 = vshll.u32 %v2237_v19, 16 }
 0x114   : > { %1015 = vst.msk [vmem:[#allocation2 + $0x1c] sm:$0xf] %vm1007_vm10, %v998_v20  ;;  %v1255_v31 = vpop.permute.xlu2 %1254  ;;  %v1585_v4 = vrot.slane %v1583_v3, 4  ;;  %v1588_v16 = vrot.slane %v1586_v5, 5  ;;  %v2252_v20 = vld [vmem:[%s2447_s19 + $0xf0] sm:$0xf] }
 0x115   : > { %1014 = vst.msk [vmem:[#allocation2 + $0x18] sm:$0xf] %vm1007_vm10, %v996_v21  ;;  %v1744_v33 = vshrl.u32 %v2252_v20, 16  ;;  %v1747_v34 = vshll.u32 %v2252_v20, 16  ;;  %v1721_v42 = vrot.slane %v1719_v26, 5  ;;  %v1753_v3 = vshll.u32 %v2253_v51, 16 }
 0x116   : > { %1065 = vst.msk [vmem:[#allocation2 + $0x1c] sm:$0xf] %vm1057_vm11, %v2856_v38 }
 0x117   : > { %v1749_v53 = vrot.slane %v1747_v34, 5  ;;  %v1755_v15 = vrot.slane %v1753_v3, 5 }
 0x119   : > { %1405 = vrot.lane.b32.xlu1 %v1306_v23, %s2398_s30  ;;  %1250 = vrot.lane.b32.xlu0 %v1187_v24, %s2397_s29  ;;  %v2226_v23 = vld [vmem:[%s2447_s19 + $0xf0] sm:$0xf]  ;;  %v2250_v24 = vld [vmem:[%s2447_s19 + $0xe8] sm:$0xf] }
 0x11a   : > { %1407 = vrot.lane.b32.xlu2 %v1320_v36, %s2398_s30  ;;  %v1730_v35 = vshrl.u32 %v2250_v24, 16  ;;  %v1733_v36 = vshll.u32 %v2250_v24, 16 }
 0x11b   : > { %v1046_v37 = vpop.permute.xlu1 %1045  ;;  %v1044_v38 = vpop.permute.xlu0 %1043 }
 0x11c   : > { %1064 = vst.msk [vmem:[#allocation2 + $0x18] sm:$0xf] %vm1057_vm11, %v1046_v37  ;;  %v1414_v41 = vpop.permute.xlu2 %1413  ;;  %v1732_v54 = vrot.slane %v1730_v35, 4  ;;  %v1735_v55 = vrot.slane %v1733_v36, 5  ;;  %v2308_v36 = vld [vmem:[%s3078_s1 + $0x8] sm:$0xff] }
 0x11d   : > { %1063 = vst.msk [vmem:[#allocation2 + $0x14] sm:$0xf] %vm1057_vm11, %v1044_v38  ;;  %v1580_v38 = vrot.slane %v1578_v22, 5 }
 0x11e   : > { %1114 = vst.msk [vmem:[#allocation2 + $0x18] sm:$0xf] %vm1107_vm12, %v1096_v7  ;;  %v1571_v7 = vrot.slane %v1569_v56, 4  ;;  %v2251_v56 = vld [vmem:[%s2447_s19 + $0xec] sm:$0x1]  ;;  %v1736_v5 = vor.u32 %v1735_v55, %v1732_v54 }
 0x11f   : > { %v1739_v6 = vshll.u32 %v2251_v56, 16 }
 0x120   : > { %v1575_v21 = vor.u32 %v1574_v8, %v1571_v7 }
 0x121   : > { %1411 = vrot.lane.b32.xlu1 %v1348_v39, %s2398_s30  ;;  %1409 = vrot.lane.b32.xlu0 %v1334_v40, %s2398_s30  ;;  %v1567_v39 = vsel %vm2481_vm2, %v1562_v11, %v1566_v18  ;;  %v2227_v40 = vld [vmem:[%s2447_s19 + $0xf8] sm:$0xf]  ;;  %v1767_v18 = vshll.u32 %v2255_v12, 16 }
 0x122   : > { %1455 = vrot.lane.b32.xlu2 %v2216_v43, %s2399_s4  ;;  %v1576_v37 = vrot.slane %v1575_v21, 4  ;;  %v1604_v43 = vrot.slane %v1603_v29, 4 }
 0x123   : > { %v1094_v44 = vpop.permute.xlu1 %1093  ;;  %v1092_v45 = vpop.permute.xlu0 %1091  ;;  %v1769_v24 = vrot.slane %v1767_v18, 5 }
 0x124   : > { %1113 = vst.msk [vmem:[#allocation2 + $0x14] sm:$0xf] %vm1107_vm12, %v1094_v44  ;;  %v2914_v52 = vpop.permute.xlu2 %1419  ;;  %v1609_v0 = vsel %vm2481_vm2, %v1604_v43, %v1608_v46 }
 0x125   : > { %1112 = vst.msk [vmem:[#allocation2 + $0x10] sm:$0xf] %vm1107_vm12, %v1092_v45  ;;  %v2249_v45 = vld [vmem:[%s2447_s19 + $0xe4] sm:$0x1] }
 0x126   : > { %1274 = vst.msk [vmem:[#allocation2 + $0x14] sm:$0xf] %vm1268_vm13, %v1255_v31  ;;  %v1589_v31 = vor.u32 %v1588_v16, %v1585_v4  ;;  %v1737_v4 = vrot.slane %v1736_v5, 4  ;;  %v1741_v16 = vrot.slane %v1739_v6, 5 }
 0x128   : > { %v1590_v47 = vrot.slane %v1589_v31, 4  ;;  %v1742_v22 = vsel %vm2481_vm2, %v1737_v4, %v1741_v16 }
 0x129   : > { %1459 = vrot.lane.b32.xlu1 %v2218_v48, %s2399_s4  ;;  %1457 = vrot.lane.b32.xlu0 %v2217_v49, %s2399_s4  ;;  %v1594_v48 = vrot.slane %v1592_v32, 5  ;;  %v1746_v49 = vrot.slane %v1744_v33, 4  ;;  %v2309_v33 = vld [vmem:[%s3078_s1 + $0x10] sm:$0xff] }
 0x12a   : > { %1461 = vrot.lane.b32.xlu2 %v2219_v58, %s2399_s4  ;;  %v1725_v58 = vshll.u32 %v2249_v45, 16  ;;  %2315 = vmatpush.bf16.msra.mxu2 %v2309_v33 }
 0x12b   : > { %v1253_v61 = vpop.permute.xlu1 %1252  ;;  %v1098_v62 = vpop.permute.xlu0 %1097  ;;  %v1595_v1 = vsel %vm2481_vm2, %v1590_v47, %v1594_v48  ;;  %2316 = vmatpush.bf16.msra.mxu3 %v2309_v33  ;;  %1942 = vmatpush.bf16.msra.mxu0 %v2309_v33 }
 0x12c   : > { %1273 = vst.msk [vmem:[#allocation2 + $0x10] sm:$0xf] %vm1268_vm13, %v1253_v61  ;;  %v2930_v14 = vpop.permute.xlu2 %1467  ;;  %v1761_v61 = vshll.u32 %v2254_v50, 16  ;;  %v1727_v8 = vrot.slane %v1725_v58, 5  ;;  %2314 = vmatpush.bf16.msra.mxu1 %v2309_v33 }
 0x12d   : > { %1115 = vst.msk [vmem:[#allocation2 + $0x1c] sm:$0xf] %vm1107_vm12, %v1098_v62 }
 0x12e   : > { %1434 = vst.msk [vmem:[#allocation2 + $0x10] sm:$0xf] %vm1429_vm14, %v1414_v41  ;;  %v1718_v41 = vrot.slane %v1716_v25, 4  ;;  %v1763_v10 = vrot.slane %v1761_v61, 5  ;;  %2318 = vmatpush.bf16.msra.mxu2 %v2308_v36 }
 0x12f   : > { %2319 = vmatpush.bf16.msra.mxu3 %v2308_v36  ;;  %1943 = vmatpush.bf16.msra.mxu0 %v2308_v36 }
 0x130   : > { %v1722_v57 = vor.u32 %v1721_v42, %v1718_v41  ;;  %2317 = vmatpush.bf16.msra.mxu1 %v2308_v36 }
 0x131   : > { %1507 = vrot.lane.b32.xlu1 %v2225_v2, %s2400_s5  ;;  %1505 = vrot.lane.b32.xlu0 %v2224_v9, %s2400_s5  ;;  %v1750_v2 = vor.u32 %v1749_v53, %v1746_v49  ;;  %v1760_v9 = vrot.slane %v1758_v60, 4 }
 0x132   : > { %1509 = vrot.lane.b32.xlu2 %v2226_v23, %s2400_s5  ;;  %v1723_v7 = vrot.slane %v1722_v57, 4 }
 0x133   : > { %v1259_v27 = vpop.permute.xlu1 %1258  ;;  %v1257_v28 = vpop.permute.xlu0 %1256  ;;  %v1751_v13 = vrot.slane %v1750_v2, 4 }
 0x134   : > { %1276 = vst.msk [vmem:[#allocation2 + $0x1c] sm:$0xf] %vm1268_vm13, %v1259_v27  ;;  %v1516_v44 = vpop.permute.xlu2 %1515  ;;  %v1728_v17 = vsel %vm2481_vm2, %v1723_v7, %v1727_v8 }
 0x135   : > { %1275 = vst.msk [vmem:[#allocation2 + $0x18] sm:$0xf] %vm1268_vm13, %v1257_v28  ;;  %v1756_v21 = vsel %vm2481_vm2, %v1751_v13, %v1755_v15  ;;  %v2363_v15 = vld [vmem:[%s3079_s2] ss:$0 sm:$0xff] }
 0x136   : > { %1437 = vst.msk [vmem:[#allocation2 + $0x1c] sm:$0xf] %vm1429_vm14, %v2914_v52  ;;  %v1581_v52 = vsel %vm2481_vm2, %v1576_v37, %v1580_v38  ;;  %v2307_v38 = vld [vmem:[%s3078_s1] sm:$0xff] }
 0x137   : > { %2321 = vmatpush.bf16.msra.mxu2 %v2307_v38  ;;  %2322 = vmatpush.bf16.msra.mxu3 %v2307_v38 }
 0x138   : > { %1944 = vmatpush.bf16.msra.mxu0 %v2307_v38  ;;  %2320 = vmatpush.bf16.msra.mxu1 %v2307_v38 }
 0x139   : > { %1666 = vrot.lane.b32.xlu1 %v1567_v39, %s2401_s6  ;;  %1511 = vrot.lane.b32.xlu0 %v2227_v40, %s2400_s5 }
 0x13a   : > { %1668 = vrot.lane.b32.xlu2 %v1581_v52, %s2401_s6 }
 0x13b   : > { %v1418_v62 = vpop.permute.xlu1 %1417  ;;  %v1416_v63 = vpop.permute.xlu0 %1415 }
 0x13c   : > { %1436 = vst.msk [vmem:[#allocation2 + $0x18] sm:$0xf] %vm1429_vm14, %v1418_v62  ;;  %v1034_v11 = vpop.permute.xlu2 %1033 }
 0x13d   : > { %1435 = vst.msk [vmem:[#allocation2 + $0x14] sm:$0xf] %vm1429_vm14, %v1416_v63 }
 0x13e   : > { %1486 = vst.msk [vmem:[#allocation2 + $0x18] sm:$0xf] %vm1479_vm15, %v2930_v14  ;;  %v1764_v14 = vor.u32 %v1763_v10, %v1760_v9 }
 0x13f   : > { %1058 = vst.msk [vmem:[#allocation2] sm:$0xf] %vm1057_vm11, %v1034_v11 }
 0x140   : > { %v1765_v23 = vrot.slane %v1764_v14, 4 }
 0x141   : > { %1672 = vrot.lane.b32.xlu1 %v1609_v0, %s2401_s6  ;;  %1670 = vrot.lane.b32.xlu0 %v1595_v1, %s2401_s6 }
 0x142   : > { %1827 = vrot.lane.b32.xlu2 %v1728_v17, %s2402_s7  ;;  %v1770_v26 = vsel %vm2481_vm2, %v1765_v23, %v1769_v24  ;;  %vm1851_vm2 = vcmask 519648  }
 0x143   : > { %v1466_v19 = vpop.permute.xlu1 %1465  ;;  %v1464_v20 = vpop.permute.xlu0 %1463 }
 0x144   : > { %1485 = vst.msk [vmem:[#allocation2 + $0x14] sm:$0xf] %vm1479_vm15, %v1466_v19  ;;  %v1040_v25 = vpop.permute.xlu2 %1039 }
 0x145   : > { %1484 = vst.msk [vmem:[#allocation2 + $0x10] sm:$0xf] %vm1479_vm15, %v1464_v20 }
 0x146   : > { %1535 = vst.msk [vmem:[#allocation2 + $0x14] sm:$0xf] %vm1529_vm0, %v1516_v44 }
 0x147   : > { %1061 = vst.msk [vmem:[#allocation2 + $0xc] sm:$0xf] %vm1057_vm11, %v1040_v25 }
 0x149   : > { %1831 = vrot.lane.b32.xlu1 %v1756_v21, %s2402_s7  ;;  %1829 = vrot.lane.b32.xlu0 %v1742_v22, %s2402_s7 }
 0x14a   : > { %1833 = vrot.lane.b32.xlu2 %v1770_v26, %s2402_s7 }
 0x14b   : > { %v1514_v27 = vpop.permute.xlu1 %1513  ;;  %v1470_v28 = vpop.permute.xlu0 %1469 }
 0x14c   : > { %1534 = vst.msk [vmem:[#allocation2 + $0x10] sm:$0xf] %vm1529_vm0, %v1514_v27  ;;  %v1679_v29 = vpop.permute.xlu2 %1678 }
 0x14d   : > { %1487 = vst.msk [vmem:[#allocation2 + $0x1c] sm:$0xf] %vm1479_vm15, %v1470_v28 }
 0x153   : > { %v1520_v30 = vpop.permute.xlu1 %1519  ;;  %v1518_v31 = vpop.permute.xlu0 %1517 }
 0x154   : > { %1537 = vst.msk [vmem:[#allocation2 + $0x1c] sm:$0xf] %vm1529_vm0, %v1520_v30  ;;  %v1086_v32 = vpop.permute.xlu2 %1085 }
 0x155   : > { %1536 = vst.msk [vmem:[#allocation2 + $0x18] sm:$0xf] %vm1529_vm0, %v1518_v31 }
 0x156   : > { %1697 = vst.msk [vmem:[#allocation2 + $0x18] sm:$0xf] %vm1690_vm1, %v1679_v29 }
 0x15b   : > { %v1038_v34 = vpop.permute.xlu1 %1037  ;;  %v1036_v35 = vpop.permute.xlu0 %1035 }
 0x15c   : > { %1060 = vst.msk [vmem:[#allocation2 + $0x8] sm:$0xf] %vm1057_vm11, %v1038_v34  ;;  %v1836_v37 = vpop.permute.xlu2 %1835 }
 0x15d   : > { %1059 = vst.msk [vmem:[#allocation2 + $0x4] sm:$0xf] %vm1057_vm11, %v1036_v35 }
 0x15e   : > { %1109 = vst.msk [vmem:[#allocation2 + $0x4] sm:$0xf] %vm1107_vm12, %v1086_v32 }
 0x163   : > { %v1677_v39 = vpop.permute.xlu1 %1676  ;;  %v1675_v40 = vpop.permute.xlu0 %1674 }
 0x164   : > { %1696 = vst.msk [vmem:[#allocation2 + $0x14] sm:$0xf] %vm1690_vm1, %v1677_v39  ;;  %v1842_v41 = vpop.permute.xlu2 %1841 }
 0x165   : > { %1695 = vst.msk [vmem:[#allocation2 + $0x10] sm:$0xf] %vm1690_vm1, %v1675_v40 }
 0x166   : > { %1856 = vst.msk [vmem:[#allocation2 + $0x10] sm:$0xf] %vm1851_vm2, %v1836_v37 }
 0x16b   : > { %v1084_v42 = vpop.permute.xlu1 %1083  ;;  %v1681_v43 = vpop.permute.xlu0 %1680 }
 0x16c   : > { %1108 = vst.msk [vmem:[#allocation2] sm:$0xf] %vm1107_vm12, %v1084_v42  ;;  %v1249_v44 = vpop.permute.xlu2 %1248 }
 0x16d   : > { %1698 = vst.msk [vmem:[#allocation2 + $0x1c] sm:$0xf] %vm1690_vm1, %v1681_v43 }
 0x16e   : > { %1859 = vst.msk [vmem:[#allocation2 + $0x1c] sm:$0xf] %vm1851_vm2, %v1842_v41 }
 0x173   : > { %v1090_v45 = vpop.permute.xlu1 %1089  ;;  %v1088_v46 = vpop.permute.xlu0 %1087 }
 0x174   : > { %1111 = vst.msk [vmem:[#allocation2 + $0xc] sm:$0xf] %vm1107_vm12, %v1090_v45  ;;  %v1408_v47 = vpop.permute.xlu2 %1407 }
 0x175   : > { %1110 = vst.msk [vmem:[#allocation2 + $0x8] sm:$0xf] %vm1107_vm12, %v1088_v46 }
 0x176   : > { %1271 = vst.msk [vmem:[#allocation2 + $0x8] sm:$0xf] %vm1268_vm13, %v1249_v44 }
 0x17b   : > { %v1840_v48 = vpop.permute.xlu1 %1839  ;;  %v1838_v49 = vpop.permute.xlu0 %1837 }
 0x17c   : > { %1858 = vst.msk [vmem:[#allocation2 + $0x18] sm:$0xf] %vm1851_vm2, %v1840_v48  ;;  %v1456_v50 = vpop.permute.xlu2 %1455 }
 0x17d   : > { %1857 = vst.msk [vmem:[#allocation2 + $0x14] sm:$0xf] %vm1851_vm2, %v1838_v49 }
 0x183   : > { %v1247_v51 = vpop.permute.xlu1 %1246  ;;  %v1245_v53 = vpop.permute.xlu0 %1244  ;;  %v2306_v54 = vld [vmem:[#allocation2 + $0x18] sm:$0xff] }
 0x184   : > { %1270 = vst.msk [vmem:[#allocation2 + $0x4] sm:$0xf] %vm1268_vm13, %v1247_v51  ;;  %v2305_v55 = vld [vmem:[#allocation2 + $0x10] sm:$0xff]  ;;  %2299 = vmatmul.msk.bf16.vlgmr.msra.gmra.mxu3 %vm1924_vm3, %v2306_v54  ;;  %v1462_v52 = vpop.permute.xlu2 %1461 }
 0x185   : > { %1269 = vst.msk [vmem:[#allocation2] sm:$0xf] %vm1268_vm13, %v1245_v53  ;;  %2298 = vmatmul.msk.bf16.vlgmr.msra.gmra.mxu2 %vm1924_vm3, %v2305_v55 }
 0x186   : > { %1431 = vst.msk [vmem:[#allocation2 + $0x4] sm:$0xf] %vm1429_vm14, %v1408_v47 }
 0x18b   : > { %v1406_v56 = vpop.permute.xlu1 %1405  ;;  %v1251_v57 = vpop.permute.xlu0 %1250 }
 0x18c   : > { %1430 = vst.msk [vmem:[#allocation2] sm:$0xf] %vm1429_vm14, %v1406_v56  ;;  %v1510_v61 = vpop.permute.xlu2 %1509 }
 0x18d   : > { %1272 = vst.msk [vmem:[#allocation2 + $0xc] sm:$0xf] %vm1268_vm13, %v1251_v57 }
 0x18e   : > { %1480 = vst.msk [vmem:[#allocation2] sm:$0xf] %vm1479_vm15, %v1456_v50 }
 0x193   : > { %v1412_v58 = vpop.permute.xlu1 %1411  ;;  %v1410_v60 = vpop.permute.xlu0 %1409 }
 0x194   : > { %1433 = vst.msk [vmem:[#allocation2 + $0xc] sm:$0xf] %vm1429_vm14, %v1412_v58  ;;  %v1669_v0 = vpop.permute.xlu2 %1668 }
 0x195   : > { %1432 = vst.msk [vmem:[#allocation2 + $0x8] sm:$0xf] %vm1429_vm14, %v1410_v60 }
 0x196   : > { %1483 = vst.msk [vmem:[#allocation2 + $0xc] sm:$0xf] %vm1479_vm15, %v1462_v52 }
 0x19b   : > { %v1460_v62 = vpop.permute.xlu1 %1459  ;;  %v1458_v63 = vpop.permute.xlu0 %1457 }
 0x19c   : > { %1482 = vst.msk [vmem:[#allocation2 + $0x8] sm:$0xf] %vm1479_vm15, %v1460_v62  ;;  %v1828_v3 = vpop.permute.xlu2 %1827 }
 0x19d   : > { %1481 = vst.msk [vmem:[#allocation2 + $0x4] sm:$0xf] %vm1479_vm15, %v1458_v63 }
 0x19e   : > { %1532 = vst.msk [vmem:[#allocation2 + $0x8] sm:$0xf] %vm1529_vm0, %v1510_v61 }
 0x1a3   : > { %v1508_v1 = vpop.permute.xlu1 %1507  ;;  %v1506_v2 = vpop.permute.xlu0 %1505 }
 0x1a4   : > { %1531 = vst.msk [vmem:[#allocation2 + $0x4] sm:$0xf] %vm1529_vm0, %v1508_v1  ;;  %v1834_v7 = vpop.permute.xlu2 %1833 }
 0x1a5   : > { %1530 = vst.msk [vmem:[#allocation2] sm:$0xf] %vm1529_vm0, %v1506_v2 }
 0x1a6   : > { %1692 = vst.msk [vmem:[#allocation2 + $0x4] sm:$0xf] %vm1690_vm1, %v1669_v0 }
 0x1ab   : > { %v1667_v5 = vpop.permute.xlu1 %1666  ;;  %v1512_v6 = vpop.permute.xlu0 %1511 }
 0x1ac   : > { %1691 = vst.msk [vmem:[#allocation2] sm:$0xf] %vm1690_vm1, %v1667_v5 }
 0x1ad   : > { %1533 = vst.msk [vmem:[#allocation2 + $0xc] sm:$0xf] %vm1529_vm0, %v1512_v6 }
 0x1ae   : > { %1852 = vst.msk [vmem:[#allocation2] sm:$0xf] %vm1851_vm2, %v1828_v3 }
 0x1b3   : > { %v1673_v8 = vpop.permute.xlu1 %1672  ;;  %v1671_v9 = vpop.permute.xlu0 %1670 }
 0x1b4   : > { %1694 = vst.msk [vmem:[#allocation2 + $0xc] sm:$0xf] %vm1690_vm1, %v1673_v8 }
 0x1b5   : > { %1693 = vst.msk [vmem:[#allocation2 + $0x8] sm:$0xf] %vm1690_vm1, %v1671_v9 }
 0x1b6   : > { %1855 = vst.msk [vmem:[#allocation2 + $0xc] sm:$0xf] %vm1851_vm2, %v1834_v7 }
 0x1bb   : > { %v1832_v10 = vpop.permute.xlu1 %1831  ;;  %v1830_v11 = vpop.permute.xlu0 %1829 }
 0x1bc   : > { %1854 = vst.msk [vmem:[#allocation2 + $0x8] sm:$0xf] %vm1851_vm2, %v1832_v10 }
 0x1bd   : > { %1853 = vst.msk [vmem:[#allocation2 + $0x4] sm:$0xf] %vm1851_vm2, %v1830_v11 }
 0x1c3   : > { %v2304_v12 = vld [vmem:[#allocation2 + $0x8] sm:$0xff] }
 0x1c4   : > { %v2303_v13 = vld [vmem:[#allocation2] sm:$0xff]  ;;  %2297 = vmatmul.msk.bf16.vlgmr.msra.gmra.mxu1 %vm1924_vm3, %v2304_v12 }
 0x1c5   : > { %2296 = vmatmul.msk.bf16.vlgmr.msra.gmra.mxu0 %vm1924_vm3, %v2303_v13 }
 0x207   : > { %v1961_v4 = vpop.f32.mrf.mxu3 }
 0x208   : > { %v1956_v16 = vpop.f32.mrf.mxu2  ;;  %v1962_v17 = vadd.f32 %v2363_v15, %v1961_v4 }
 0x209   : > { %v1957_v14 = vadd.f32 %v2363_v15, %v1956_v16 }
 0x20a   : > { %vm1972_vm4 = vcmp.gt.f32.partialorder %v1962_v17, 0.0  ;;  %v1980_v18 = vmul.f32 0.2, %v1962_v17 }
 0x20b   : > { %vm1970_vm5 = vcmp.gt.f32.partialorder %v1957_v14, 0.0  ;;  %v1978_v19 = vmul.f32 0.2, %v1957_v14 }
 0x20c   : > { %v1988_v20 = vsel %vm1972_vm4, %v1962_v17, %v1980_v18 }
 0x20d   : > { %v1986_v21 = vsel %vm1970_vm5, %v1957_v14, %v1978_v19  ;;  %v1996_v22 = vpack.c.bf16 %v1988_v20, %v1988_v20 }
 0x20e   : > { %v1994_v23 = vpack.c.bf16 %v1986_v21, %v1986_v21 }
 0x20f   : > { %2005 = vst.msk [vmem:[%s3050_s25 + $0x18] sm:$0xf] %vm1998_vm6, %v1996_v22  ;;  %v1963_v24 = vpop.f32.mrf.mxu3 }
 0x210   : > { %2003 = vst.msk [vmem:[%s3050_s25 + $0x10] sm:$0xf] %vm1998_vm6, %v1994_v23  ;;  %v1958_v25 = vpop.f32.mrf.mxu2  ;;  %v1964_v26 = vadd.f32 %v2363_v15, %v1963_v24 }
 0x211   : > { %v1959_v27 = vadd.f32 %v2363_v15, %v1958_v25 }
 0x212   : > { %vm1973_vm7 = vcmp.gt.f32.partialorder %v1964_v26, 0.0  ;;  %v1981_v28 = vmul.f32 0.2, %v1964_v26 }
 0x213   : > { %vm1971_vm8 = vcmp.gt.f32.partialorder %v1959_v27, 0.0  ;;  %v1979_v29 = vmul.f32 0.2, %v1959_v27 }
 0x214   : > { %v1989_v30 = vsel %vm1973_vm7, %v1964_v26, %v1981_v28 }
 0x215   : > { %v1987_v31 = vsel %vm1971_vm8, %v1959_v27, %v1979_v29  ;;  %v1997_v59 = vpack.c.bf16 %v1989_v30, %v1989_v30 }
 0x216   : > { %v1995_v32 = vpack.c.bf16 %v1987_v31, %v1987_v31 }
 0x217   : > { %2006 = vst.msk [vmem:[%s3050_s25 + $0x1c] sm:$0xf] %vm1998_vm6, %v1997_v59 }
 0x218   : > { %2004 = vst.msk [vmem:[%s3050_s25 + $0x14] sm:$0xf] %vm1998_vm6, %v1995_v32 }
 0x241   : > { %v1951_v33 = vpop.f32.mrf.mxu1 }
 0x242   : > { %v1946_v34 = vpop.f32.mrf.mxu0  ;;  %v1952_v35 = vadd.f32 %v2363_v15, %v1951_v33 }
 0x243   : > { %v1947_v36 = vadd.f32 %v2363_v15, %v1946_v34 }
 0x244   : > { %vm1968_vm9 = vcmp.gt.f32.partialorder %v1952_v35, 0.0  ;;  %v1976_v37 = vmul.f32 0.2, %v1952_v35 }
 0x245   : > { %vm1966_vm10 = vcmp.gt.f32.partialorder %v1947_v36, 0.0  ;;  %v1974_v38 = vmul.f32 0.2, %v1947_v36 }
 0x246   : > { %v1984_v39 = vsel %vm1968_vm9, %v1952_v35, %v1976_v37 }
 0x247   : > { %v1982_v40 = vsel %vm1966_vm10, %v1947_v36, %v1974_v38  ;;  %v1992_v41 = vpack.c.bf16 %v1984_v39, %v1984_v39 }
 0x248   : > { %v1990_v42 = vpack.c.bf16 %v1982_v40, %v1982_v40 }
 0x249   : > { %2001 = vst.msk [vmem:[%s3050_s25 + $0x8] sm:$0xf] %vm1998_vm6, %v1992_v41  ;;  %v1953_v43 = vpop.f32.mrf.mxu1 }
 0x24a   : > { %1999 = vst.msk [vmem:[%s3050_s25] sm:$0xf] %vm1998_vm6, %v1990_v42  ;;  %v1948_v44 = vpop.f32.mrf.mxu0  ;;  %v1954_v45 = vadd.f32 %v2363_v15, %v1953_v43 }
 0x24b   : > { %v1949_v46 = vadd.f32 %v2363_v15, %v1948_v44 }
 0x24c   : > { %vm1969_vm11 = vcmp.gt.f32.partialorder %v1954_v45, 0.0  ;;  %v1977_v47 = vmul.f32 0.2, %v1954_v45 }
 0x24d   : > { %vm1967_vm12 = vcmp.gt.f32.partialorder %v1949_v46, 0.0  ;;  %v1975_v48 = vmul.f32 0.2, %v1949_v46 }
 0x24e   : > { %v1985_v49 = vsel %vm1969_vm11, %v1954_v45, %v1977_v47 }
 0x24f   : > { %v1983_v50 = vsel %vm1967_vm12, %v1949_v46, %v1975_v48  ;;  %v1993_v51 = vpack.c.bf16 %v1985_v49, %v1985_v49 }
 0x250   : > { %v1991_v53 = vpack.c.bf16 %v1983_v50, %v1983_v50 }
 0x251   : > { %2002 = vst.msk [vmem:[%s3050_s25 + $0xc] sm:$0xf] %vm1998_vm6, %v1993_v51 }
 0x252   : > { %2000 = vst.msk [vmem:[%s3050_s25 + $0x4] sm:$0xf] %vm1998_vm6, %v1991_v53 }
 0x253 PF: > { %s13_s14 = sadd.s32 1, %s2386_s14   ;;  %s3083_s12 = smov %s2382_s13 }
 0x254   : > { %p10_p5 = scmp.ge.s32.totalorder %s13_s14, 4   ;;  %s3084_s13 = smov %s3086_s15 }
 0x256   :  { %12 = sbr.rel (!%p10_p5) target bundleno = 2 (0x2), region = 69 }

// kernel: _lambda_.11
= control target key start
LH: loop header
LB: loop body
LE: loop exit
PB: predicated region body
PF: predicated region fallthrough
CT: control target
= control target key end

     0   :  { %s1168_s0 = inlined_call_operand.vmem [shape: bf16[2,5,5,32], index: 0, kind: input, shape index: {}]   ;;  %s1169_s1 = inlined_call_operand.vmem [shape: bf16[16,32], index: 1, kind: input, shape index: {}]   ;;  %s1170_s2 = inlined_call_operand.<no memory space> [shape: f32[1,1], index: 2, kind: input, shape index: {}]   ;;  %s1171_s3 = inlined_call_operand.hbm [shape: f32[2,2,2], index: 3, kind: output, shape index: {}]  }
   0x1   :  { %v8_v0 = vstv %s1170_s2 }
   0x2   :  { %9 = vst [vmem:[#allocation2] sm:$0x1] %v8_v0 }
   0x3   :  { %10 = vsyncpa [#allocation4], 0 }
   0x4   :  { %12 = vsyncpa [#allocation4 + $0x1], 0  ;;  %s906_s14 = smov 0   ;;  %s908_s15 = smov 0  }
   0x5   :  { %s910_s16 = smov 0   ;;  %s912_s17 = smov 0  }
   0x6   :  { %s914_s18 = smov 0   ;;  %s916_s19 = smov 0  }
   0x7 LB: > { %s697_s2 = sadd.s32 4294967295, %s880_s19   ;;  %s698_s20 = sadd.s32 4294967294, %s880_s19   ;;  %s880_s19 = sphi %s916_s19, %s18_s19   ;;  %s876_s18 = sphi %s914_s18, %s1178_s18   ;;  %s872_s17 = sphi %s912_s17, %s1177_s17   ;;  %s868_s16 = sphi %s910_s16, %s1176_s16   ;;  %s864_s15 = sphi %s908_s15, %s1175_s15   ;;  %s860_s14 = sphi %s906_s14, %s1174_s14  }
   0x8   : > { %s30_s21 = sadd.s32 1, %s876_s18  ;;  %s109_s22 = sadd.s32 1, %s868_s16 }
   0x9   : > { %p32_p0 = scmp.ge.s32.totalorder %s30_s21, 2  ;;  %p119_p1 = scmp.ne.s32.totalorder %s868_s16, %s864_s15 }
   0xa   : > { %p120_p2 = scmp.eq.s32.totalorder %s697_s2, 1  ;;  %p125_p3 = scmp.ne.s32.totalorder %s864_s15, %s860_s14 }
   0xb   : > { %s1180_s21 = smov (%p32_p0, %s30_s21), 0  ;;  %p126_p5 = scmp.eq.s32.totalorder %s698_s20, 1 }
   0xc   : > { %p946_p4 = por %p120_p2, %p119_p1  ;;  %s104_s24 = ssub.s32 %s876_s18, %s1180_s21 }
   0xd   : > { %p701_p6 = scmp.ge.s32.totalorder %s880_s19, 1  ;;  %p107_p7 = scmp.eq.s32.totalorder %s104_s24, 0 }
   0xe   : > { %p953_p8 = por %p126_p5, %p125_p3  ;;  %p160_p9 = scmp.lt.s32.totalorder %s880_s19, 3 }
   0xf   : > { %s959_s26 = scalar_select %p107_p7, %s868_s16, %s109_s22  }
  0x10   : > { %p161_p10 = pnand %p701_p6, %p160_p9 }
  0x11   : > { %p186_p11 = scmp.lt.s32.totalorder (!%p161_p10), %s872_s17, 1  ;;  %s182_s30 = sand.u32 (!%p161_p10), 1, %s864_s15  }
  0x12   : > { %164 = sbr.rel (%p161_p10) target bundleno = 250 (0xfa), region = 32  ;;  %s1127_s4 = sshll.u32 (!%p161_p10), %s182_s30, 1 }
  0x13   : > { %s731_s5 = sshll.u32 (!%p161_p10), %s872_s17, 1  ;;  %s613_s11 = scalar_lea.sflag (!%p161_p10), [#allocation4], %s182_s30 }
  0x14   : > { %s822_s22 = scalar_lea.hbm (!%p161_p10), %s1171_s3, 4 }
  0x17   : > { %v194_v1 = vld [vmem:[%s1169_s1] sm:$0x1]  ;;  %v235_v2 = vld [vmem:[%s1169_s1] sm:$0x2]  ;;  %v882_v3 = vmov 0   ;;  %s187_s8 = scalar_select %p186_p11, %s872_s17, 1 }
  0x18   : > { %791 = vset.pattern.permute.xlu1 %v882_v3  ;;  %v196_v4 = vpack.i.b16 %v194_v1, %v194_v1  ;;  %v212_v5 = vshrl.u32 %v194_v1, 16  ;;  %v237_v6 = vpack.i.b16 %v235_v2, %v235_v2  ;;  %v259_v7 = vshrl.u32 %v235_v2, 16  ;;  %v283_v8 = vld [vmem:[%s1169_s1] sm:$0x4]  ;;  %v324_v9 = vld [vmem:[%s1169_s1] sm:$0x8]  ;;  %792 = vset.pattern.permute.xlu0 %v882_v3 }
  0x19   : > { %v285_v10 = vpack.i.b16 %v283_v8, %v283_v8  ;;  %v301_v11 = vshrl.u32 %v283_v8, 16  ;;  %v326_v12 = vpack.i.b16 %v324_v9, %v324_v9  ;;  %v348_v13 = vshrl.u32 %v324_v9, 16  ;;  %s734_s9 = smul.u32 20, %s187_s8  ;;  %v986_v22 = vld [vmem:[%s1169_s1 + $0x4] sm:$0x2]  ;;  %s624_s8 = scalar_lea.hbm %s1171_s3, %s731_s5 }
  0x1a   : > { %v975_v14 = vperm.slane %v196_v4, 0  ;;  %v213_v15 = vpack.i.b16 %v212_v5, %v212_v5  ;;  %v977_v16 = vperm.slane %v237_v6, 1  ;;  %v260_v17 = vpack.i.b16 %v259_v7, %v259_v7  ;;  %v1000_v31 = vld [vmem:[%s1169_s1 + $0x4] sm:$0x1]  ;;  %s184_s17 = scalar_lea.vmem [#allocation3], %s1127_s4  ;;  %s628_s10 = sshll.u32 %s624_s8, 4  ;;  %s629_s10 = int_to_ptr.hbm [resolvable:$true] %s628_s10 }
  0x1b   : > { %v979_v18 = vperm.slane %v285_v10, 2  ;;  %v302_v19 = vpack.i.b16 %v301_v11, %v301_v11  ;;  %v981_v20 = vperm.slane %v326_v12, 3  ;;  %v349_v21 = vpack.i.b16 %v348_v13, %v348_v13  ;;  %s993_s2 = scalar_lea.vmem %s1168_s0, %s734_s9  ;;  %s626_s9 = sshll.u32 %s184_s17, 4  ;;  %s627_s9 = int_to_ptr.vmem [resolvable:$true] %s626_s9 }
  0x1c   : > { %v201_v23 = vunpack.c.l.bf16 %v975_v14  ;;  %v215_v24 = vperm.slane %v213_v15, 0  ;;  %v242_v25 = vunpack.c.l.bf16 %v977_v16  ;;  %v262_v26 = vperm.slane %v260_v17, 1  ;;  %v192_v32 = vld [vmem:[%s993_s2] sm:$0x1]  ;;  %v233_v35 = vld [vmem:[%s993_s2] sm:$0x2] }
  0x1d   : > { %v290_v27 = vunpack.c.l.bf16 %v979_v18  ;;  %v304_v28 = vperm.slane %v302_v19, 2  ;;  %v331_v29 = vunpack.c.l.bf16 %v981_v20  ;;  %v351_v30 = vperm.slane %v349_v21, 3  ;;  %v210_v33 = vld [vmem:[%s993_s2] sm:$0x3]  ;;  %v704_v43 = vld [vmem:[%s993_s2 + $0x4] sm:$0x1] }
  0x1e   : > { %v1004_v34 = vunpack.c.l.bf16 %v215_v24  ;;  %v1007_v36 = vunpack.c.l.bf16 %v262_v26  ;;  %v374_v37 = vpack.i.b16 %v1000_v31, %v1000_v31  ;;  %v415_v38 = vpack.i.b16 %v986_v22, %v986_v22  ;;  %v257_v42 = vld [vmem:[%s993_s2] sm:$0x6]  ;;  %v706_v44 = vld [vmem:[%s993_s2 + $0x4] sm:$0x3]  ;;  %v712_v8 = vld [vmem:[%s993_s2 + $0x8] sm:$0x1] }
  0x1f   : > { %v199_v39 = vunpack.c.l.bf16 %v192_v32  ;;  %v216_v40 = vunpack.c.l.bf16 %v210_v33  ;;  %v240_v41 = vunpack.c.l.bf16 %v233_v35  ;;  %v1016_v45 = vunpack.c.l.bf16 %v304_v28  ;;  %v708_v49 = vld [vmem:[%s993_s2 + $0x4] sm:$0x2]  ;;  %v714_v13 = vld [vmem:[%s993_s2 + $0x8] sm:$0x3]  ;;  %v793_v26 = vld [vmem:[#allocation2] ss:$0 sm:$0xff] }
  0x20   : > { %v263_v46 = vunpack.c.l.bf16 %v257_v42  ;;  %v288_v47 = vunpack.c.l.bf16 %v704_v43  ;;  %v305_v48 = vunpack.c.l.bf16 %v706_v44  ;;  %v710_v50 = vld [vmem:[%s993_s2 + $0x4] sm:$0x6]  ;;  %v1020_v51 = vunpack.c.l.bf16 %v351_v30  ;;  %v716_v15 = vld [vmem:[%s993_s2 + $0x8] sm:$0x2]  ;;  %v720_v43 = vld [vmem:[%s993_s2 + $0xc] sm:$0x1]  ;;  %558 = vperm.xlu1 %791, %v793_v26  }
  0x21   : > { %v202_v52 = vmul.f32 %v201_v23, %v199_v39  ;;  %v219_v53 = vmul.f32 %v1004_v34, %v216_v40  ;;  %v243_v54 = vmul.f32 %v242_v25, %v240_v41  ;;  %v329_v55 = vunpack.c.l.bf16 %v708_v49  ;;  %v718_v42 = vld [vmem:[%s993_s2 + $0x8] sm:$0x6]  ;;  %v719_v20 = vld [vmem:[%s993_s2 + $0xc] sm:$0x6]  ;;  %s816_s12 = sshra.s32 %s629_s10, 4  ;;  %s817_s12 = int_to_ptr.hbm [resolvable:$true] %s816_s12 }
  0x22   : > { %v266_v56 = vmul.f32 %v1007_v36, %v263_v46  ;;  %v291_v57 = vmul.f32 %v290_v27, %v288_v47  ;;  %v308_v58 = vmul.f32 %v1016_v45, %v305_v48  ;;  %v352_v59 = vunpack.c.l.bf16 %v710_v50  ;;  %s818_s13 = scalar_lea.hbm %s817_s12, 2  ;;  %p823_p1 = scmp.lt.s32.totalorder %s817_s12, %s1171_s3 }
  0x23   : > { %v204_v60 = vpack.c.bf16 %v202_v52, %v202_v52  ;;  %v221_v61 = vpack.c.bf16 %v219_v53, %v219_v53  ;;  %v245_v62 = vpack.c.bf16 %v243_v54, %v243_v54  ;;  %v332_v63 = vmul.f32 %v331_v29, %v329_v55  ;;  %v722_v53 = vld [vmem:[%s993_s2 + $0xc] sm:$0x3]  ;;  %p819_p12 = scmp.ne.s32.totalorder %s817_s12, %s818_s13  ;;  %p824_p2 = scmp.lt.s32.totalorder %s822_s22, %s818_s13 }
  0x24   : > { %v268_v0 = vpack.c.bf16 %v266_v56, %v266_v56  ;;  %v293_v1 = vpack.c.bf16 %v291_v57, %v291_v57  ;;  %v310_v2 = vpack.c.bf16 %v308_v58, %v308_v58  ;;  %v355_v3 = vmul.f32 %v1020_v51, %v352_v59 }
  0x25   : > { %v206_v4 = vunpack.c.l.bf16 %v204_v60  ;;  %v223_v5 = vunpack.c.l.bf16 %v221_v61  ;;  %v247_v6 = vunpack.c.l.bf16 %v245_v62  ;;  %v334_v7 = vpack.c.bf16 %v332_v63, %v332_v63  ;;  %v502_v61 = vld [vmem:[%s1169_s1 + $0x4] sm:$0x8]  ;;  %p820_p13 = pnand %p819_p12, %p946_p4  ;;  %p825_p3 = por %p824_p2, %p823_p1 }
  0x26   : > { %v270_v9 = vunpack.c.l.bf16 %v268_v0  ;;  %v295_v10 = vunpack.c.l.bf16 %v293_v1  ;;  %v312_v11 = vunpack.c.l.bf16 %v310_v2  ;;  %v357_v12 = vpack.c.bf16 %v355_v3, %v355_v3  ;;  %v724_v1 = vld [vmem:[%s993_s2 + $0xc] sm:$0x2] }
  0x27   : > { %v227_v17 = vrot.slane %v223_v5, 1  ;;  %v251_v19 = vrot.slane %v247_v6, 2  ;;  %v336_v21 = vunpack.c.l.bf16 %v334_v7  ;;  %v1037_v24 = vperm.slane %v374_v37, 0  ;;  %p821_p0 = pneg %p820_p13 }
  0x28   : > { %v274_v28 = vrot.slane %v270_v9, 3  ;;  %v316_v30 = vrot.slane %v312_v11, 1  ;;  %v359_v32 = vunpack.c.l.bf16 %v357_v12  ;;  %v377_v33 = vunpack.c.l.bf16 %v712_v8 }
  0x29   : > { %v231_v35 = vadd.f32 %v227_v17, %v206_v4  ;;  %v340_v39 = vrot.slane %v336_v21, 2  ;;  %v379_v40 = vunpack.c.l.bf16 %v1037_v24  ;;  %v390_v41 = vshrl.u32 %v1000_v31, 16  ;;  %v461_v31 = vld [vmem:[%s1169_s1 + $0x4] sm:$0x4]  ;;  %p826_p5 = pnand %p825_p3, %p821_p0 }
  0x2a   : > { %v363_v44 = vrot.slane %v359_v32, 3  ;;  %v394_v46 = vunpack.c.l.bf16 %v714_v13  ;;  %v1043_v47 = vperm.slane %v415_v38, 1  ;;  %v418_v37 = vunpack.c.l.bf16 %v716_v15 }
  0x2b   : > { %v255_v48 = vadd.f32 %v251_v19, %v231_v35  ;;  %v380_v49 = vmul.f32 %v379_v40, %v377_v33  ;;  %v391_v50 = vpack.i.b16 %v390_v41, %v390_v41  ;;  %v437_v52 = vshrl.u32 %v986_v22, 16  ;;  %v726_v33 = vld [vmem:[%s993_s2 + $0xc] sm:$0x6] }
  0x2c   : > { %v420_v54 = vunpack.c.l.bf16 %v1043_v47  ;;  %v441_v55 = vunpack.c.l.bf16 %v718_v42  ;;  %v463_v56 = vpack.i.b16 %v461_v31, %v461_v31  ;;  %v466_v38 = vunpack.c.l.bf16 %v720_v43 }
  0x2d   : > { %v278_v57 = vadd.f32 %v274_v28, %v255_v48  ;;  %v382_v58 = vpack.c.bf16 %v380_v49, %v380_v49  ;;  %v393_v59 = vperm.slane %v391_v50, 0  ;;  %v438_v60 = vpack.i.b16 %v437_v52, %v437_v52  ;;  %v193_v49 = vld [vmem:[%s993_s2 + $0x4] sm:$0x1] }
  0x2e   : > { %v421_v22 = vmul.f32 %v420_v54, %v418_v37  ;;  %v1058_v62 = vperm.slane %v463_v56, 2  ;;  %v479_v63 = vshrl.u32 %v461_v31, 16  ;;  %v483_v0 = vunpack.c.l.bf16 %v722_v53  ;;  %v211_v53 = vld [vmem:[%s993_s2 + $0x4] sm:$0x3] }
  0x2f   : > { %v297_v2 = vadd.f32 %v295_v10, %v278_v57  ;;  %v384_v3 = vunpack.c.l.bf16 %v382_v58  ;;  %v1061_v4 = vunpack.c.l.bf16 %v393_v59  ;;  %v440_v5 = vperm.slane %v438_v60, 1  ;;  %v234_v58 = vld [vmem:[%s993_s2 + $0x4] sm:$0x2] }
  0x30   : > { %v423_v6 = vpack.c.bf16 %v421_v22, %v421_v22  ;;  %v468_v7 = vunpack.c.l.bf16 %v1058_v62  ;;  %v480_v8 = vpack.i.b16 %v479_v63, %v479_v63  ;;  %v504_v9 = vpack.i.b16 %v502_v61, %v502_v61  ;;  %v258_v22 = vld [vmem:[%s993_s2 + $0x4] sm:$0x6] }
  0x31   : > { %v320_v11 = vadd.f32 %v316_v30, %v297_v2  ;;  %v397_v12 = vmul.f32 %v1061_v4, %v394_v46  ;;  %v1065_v13 = vunpack.c.l.bf16 %v440_v5  ;;  %v507_v15 = vunpack.c.l.bf16 %v724_v1 }
  0x32   : > { %v425_v17 = vunpack.c.l.bf16 %v423_v6  ;;  %v469_v10 = vmul.f32 %v468_v7, %v466_v38  ;;  %v482_v19 = vperm.slane %v480_v8, 2  ;;  %v1069_v21 = vperm.slane %v504_v9, 3 }
  0x33   : > { %v344_v26 = vadd.f32 %v340_v39, %v320_v11  ;;  %v399_v28 = vpack.c.bf16 %v397_v12, %v397_v12  ;;  %v444_v32 = vmul.f32 %v1065_v13, %v441_v55  ;;  %v526_v30 = vshrl.u32 %v502_v61, 16 }
  0x34   : > { %v471_v35 = vpack.c.bf16 %v469_v10, %v469_v10  ;;  %v1073_v41 = vunpack.c.l.bf16 %v482_v19  ;;  %v509_v42 = vunpack.c.l.bf16 %v1069_v21  ;;  %v429_v50 = vrot.slane %v425_v17, 2  ;;  %v705_v17 = vld [vmem:[%s993_s2 + $0x8] sm:$0x1] }
  0x35   : > { %v367_v43 = vadd.f32 %v363_v44, %v344_v26  ;;  %v401_v46 = vunpack.c.l.bf16 %v399_v28  ;;  %v446_v37 = vpack.c.bf16 %v444_v32, %v444_v32  ;;  %v527_v48 = vpack.i.b16 %v526_v30, %v526_v30  ;;  %v707_v10 = vld [vmem:[%s993_s2 + $0x8] sm:$0x3] }
  0x36   : > { %v486_v39 = vmul.f32 %v1073_v41, %v483_v0  ;;  %v510_v52 = vmul.f32 %v509_v42, %v507_v15  ;;  %v530_v31 = vunpack.c.l.bf16 %v726_v33  ;;  %v473_v59 = vunpack.c.l.bf16 %v471_v35  ;;  %v709_v35 = vld [vmem:[%s993_s2 + $0x8] sm:$0x2] }
  0x37   : > { %v386_v55 = vadd.f32 %v384_v3, %v367_v43  ;;  %v405_v56 = vrot.slane %v401_v46, 1  ;;  %v448_v38 = vunpack.c.l.bf16 %v446_v37  ;;  %v529_v57 = vperm.slane %v527_v48, 3 }
  0x38   : > { %v488_v44 = vpack.c.bf16 %v486_v39, %v486_v39  ;;  %v512_v60 = vpack.c.bf16 %v510_v52, %v510_v52  ;;  %v200_v61 = vunpack.c.l.bf16 %v193_v49  ;;  %v217_v2 = vunpack.c.l.bf16 %v211_v53 }
  0x39   : > { %v409_v63 = vadd.f32 %v405_v56, %v386_v55  ;;  %v452_v1 = vrot.slane %v448_v38, 3  ;;  %v1083_v0 = vunpack.c.l.bf16 %v529_v57  ;;  %v241_v8 = vunpack.c.l.bf16 %v234_v58  ;;  %v713_v57 = vld [vmem:[%s993_s2 + $0xc] sm:$0x1] }
  0x3a   : > { %v490_v5 = vunpack.c.l.bf16 %v488_v44  ;;  %v514_v6 = vunpack.c.l.bf16 %v512_v60  ;;  %v203_v3 = vmul.f32 %v201_v23, %v200_v61  ;;  %v220_v12 = vmul.f32 %v1004_v34, %v217_v2  ;;  %v715_v61 = vld [vmem:[%s993_s2 + $0xc] sm:$0x3] }
  0x3b   : > { %v433_v9 = vadd.f32 %v429_v50, %v409_v63  ;;  %v533_v11 = vmul.f32 %v1083_v0, %v530_v31  ;;  %v264_v15 = vunpack.c.l.bf16 %v258_v22  ;;  %vm547_vm0 = vcmask 254976   ;;  %v717_v63 = vld [vmem:[%s993_s2 + $0xc] sm:$0x2] }
  0x3c   : > { %v494_v19 = vrot.slane %v490_v5, 1  ;;  %v518_v26 = vrot.slane %v514_v6, 2  ;;  %v205_v28 = vpack.c.bf16 %v203_v3, %v203_v3  ;;  %v244_v32 = vmul.f32 %v242_v25, %v241_v8 }
  0x3d   : > { %v456_v33 = vadd.f32 %v452_v1, %v433_v9  ;;  %v535_v14 = vpack.c.bf16 %v533_v11, %v533_v11  ;;  %v222_v23 = vpack.c.bf16 %v220_v12, %v220_v12  ;;  %v267_v30 = vmul.f32 %v1007_v36, %v264_v15  ;;  %v711_v36 = vld [vmem:[%s993_s2 + $0x8] sm:$0x6] }
  0x3e   : > { %v207_v43 = vunpack.c.l.bf16 %v205_v28  ;;  %v246_v46 = vpack.c.bf16 %v244_v32, %v244_v32  ;;  %v289_v34 = vunpack.c.l.bf16 %v705_v17  ;;  %v306_v37 = vunpack.c.l.bf16 %v707_v10  ;;  %v721_v10 = vld [vmem:[%s993_s2 + $0x10] sm:$0x1] }
  0x3f   : > { %v475_v48 = vadd.f32 %v473_v59, %v456_v33  ;;  %v537_v49 = vunpack.c.l.bf16 %v535_v14  ;;  %v224_v50 = vunpack.c.l.bf16 %v222_v23  ;;  %v269_v39 = vpack.c.bf16 %v267_v30, %v267_v30  ;;  %v723_v33 = vld [vmem:[%s993_s2 + $0x10] sm:$0x3] }
  0x40   : > { %v248_v52 = vunpack.c.l.bf16 %v246_v46  ;;  %v292_v16 = vmul.f32 %v290_v27, %v289_v34  ;;  %v309_v25 = vmul.f32 %v1016_v45, %v306_v37  ;;  %v330_v31 = vunpack.c.l.bf16 %v709_v35  ;;  %v725_v46 = vld [vmem:[%s993_s2 + $0x10] sm:$0x2] }
  0x41   : > { %v498_v53 = vadd.f32 %v494_v19, %v475_v48  ;;  %v541_v55 = vrot.slane %v537_v49, 3  ;;  %v228_v56 = vrot.slane %v224_v50, 1  ;;  %v271_v38 = vunpack.c.l.bf16 %v269_v39  ;;  %v727_v49 = vld [vmem:[%s993_s2 + $0x10] sm:$0x6] }
  0x42   : > { %v252_v58 = vrot.slane %v248_v52, 2  ;;  %v294_v59 = vpack.c.bf16 %v292_v16, %v292_v16  ;;  %v311_v44 = vpack.c.bf16 %v309_v25, %v309_v25  ;;  %v333_v60 = vmul.f32 %v331_v29, %v330_v31 }
  0x43   : > { %v522_v18 = vadd.f32 %v518_v26, %v498_v53  ;;  %v232_v27 = vadd.f32 %v228_v56, %v207_v43  ;;  %v275_v22 = vrot.slane %v271_v38, 3  ;;  %v353_v45 = vunpack.c.l.bf16 %v711_v36 }
  0x44   : > { %v296_v1 = vunpack.c.l.bf16 %v294_v59  ;;  %v313_v2 = vunpack.c.l.bf16 %v311_v44  ;;  %v335_v5 = vpack.c.bf16 %v333_v60, %v333_v60  ;;  %v378_v6 = vunpack.c.l.bf16 %v713_v57 }
  0x45   : > { %v545_v3 = vadd.f32 %v541_v55, %v522_v18  ;;  %v256_v8 = vadd.f32 %v252_v58, %v232_v27  ;;  %v356_v9 = vmul.f32 %v1020_v51, %v353_v45  ;;  %v395_v11 = vunpack.c.l.bf16 %v715_v61 }
  0x46   : > { %v317_v12 = vrot.slane %v313_v2, 1  ;;  %v337_v29 = vunpack.c.l.bf16 %v335_v5  ;;  %v381_v15 = vmul.f32 %v379_v40, %v378_v6  ;;  %v419_v17 = vunpack.c.l.bf16 %v717_v63 }
  0x47   : > { %v548_v19 = vsel %vm547_vm0, %v545_v3, 0.0  ;;  %v279_v26 = vadd.f32 %v275_v22, %v256_v8  ;;  %v358_v28 = vpack.c.bf16 %v356_v9, %v356_v9  ;;  %v398_v32 = vmul.f32 %v1061_v4, %v395_v11 }
  0x48   : > { %549 = vadd.xlane.f32.xlu0 %v548_v19  ;;  %v341_v51 = vrot.slane %v337_v29, 2  ;;  %v383_v14 = vpack.c.bf16 %v381_v15, %v381_v15  ;;  %v422_v23 = vmul.f32 %v420_v54, %v419_v17  ;;  %v442_v30 = vunpack.c.l.bf16 %v719_v20 }
  0x49   : > { %v298_v24 = vadd.f32 %v296_v1, %v279_v26  ;;  %v360_v40 = vunpack.c.l.bf16 %v358_v28  ;;  %v400_v35 = vpack.c.bf16 %v398_v32, %v398_v32  ;;  %v467_v43 = vunpack.c.l.bf16 %v721_v10 }
  0x4a   : > { %v424_v34 = vpack.c.bf16 %v422_v23, %v422_v23  ;;  %v445_v37 = vmul.f32 %v1065_v13, %v442_v30  ;;  %v484_v48 = vunpack.c.l.bf16 %v723_v33  ;;  %v385_v52 = vunpack.c.l.bf16 %v383_v14 }
  0x4b   : > { %v321_v50 = vadd.f32 %v317_v12, %v298_v24  ;;  %v364_v4 = vrot.slane %v360_v40, 3  ;;  %v402_v39 = vunpack.c.l.bf16 %v400_v35  ;;  %v508_v47 = vunpack.c.l.bf16 %v725_v46 }
  0x4c   : > { %v447_v16 = vpack.c.bf16 %v445_v37, %v445_v37  ;;  %v487_v25 = vmul.f32 %v1073_v41, %v484_v48  ;;  %v426_v31 = vunpack.c.l.bf16 %v424_v34  ;;  %v470_v36 = vmul.f32 %v468_v7, %v467_v43 }
  0x4d   : > { %v345_v54 = vadd.f32 %v341_v51, %v321_v50  ;;  %v531_v53 = vunpack.c.l.bf16 %v727_v49  ;;  %v406_v55 = vrot.slane %v402_v39, 1  ;;  %v511_v13 = vmul.f32 %v509_v42, %v508_v47 }
  0x4e   : > { %v449_v38 = vunpack.c.l.bf16 %v447_v16  ;;  %v489_v57 = vpack.c.bf16 %v487_v25, %v487_v25  ;;  %v430_v44 = vrot.slane %v426_v31, 2  ;;  %v472_v60 = vpack.c.bf16 %v470_v36, %v470_v36 }
  0x4f   : > { %v368_v56 = vadd.f32 %v364_v4, %v345_v54  ;;  %v534_v58 = vmul.f32 %v1083_v0, %v531_v53  ;;  %v513_v41 = vpack.c.bf16 %v511_v13, %v511_v13  ;;  %v603_v46 = vlaneseq }
  0x50   : > { %v453_v18 = vrot.slane %v449_v38, 3  ;;  %v491_v27 = vunpack.c.l.bf16 %v489_v57  ;;  %v474_v7 = vunpack.c.l.bf16 %v472_v60  ;;  %vm607_vm9 = vcmask 1041409  }
  0x51   : > { %v387_v59 = vadd.f32 %v385_v52, %v368_v56  ;;  %v536_v22 = vpack.c.bf16 %v534_v58, %v534_v58  ;;  %v515_v45 = vunpack.c.l.bf16 %v513_v41  ;;  %v604_v39 = vand.u32 127, %v603_v46 }
  0x52   : > { %v495_v1 = vrot.slane %v491_v27, 1  ;;  %vm610_vm10 = vcmask 9216  }
  0x53   : > { %v410_v61 = vadd.f32 %v406_v55, %v387_v59  ;;  %v538_v21 = vunpack.c.l.bf16 %v536_v22  ;;  %v519_v2 = vrot.slane %v515_v45, 2 }
  0x55   : > { %v434_v62 = vadd.f32 %v430_v44, %v410_v61  ;;  %v542_v6 = vrot.slane %v538_v21, 3 }
  0x57   : > { %v457_v63 = vadd.f32 %v453_v18, %v434_v62 }
  0x59   : > { %v476_v42 = vadd.f32 %v474_v7, %v457_v63 }
  0x5b   : > { %v499_v5 = vadd.f32 %v495_v1, %v476_v42 }
  0x5d   : > { %v523_v3 = vadd.f32 %v519_v2, %v499_v5 }
  0x5f   : > { %v546_v0 = vadd.f32 %v542_v6, %v523_v3 }
  0x61   : > { %v551_v8 = vsel %vm547_vm0, %v546_v0, 0.0 }
  0x62   : > { %552 = vadd.xlane.f32.xlu0 %v551_v8 }
  0x92   : > { %v559_v9 = vpop.permute.xlu1 %558 }
  0xbb   : > { %v550_v11 = vpop.xlane.xlu0 %549 }
  0xbc   : > { %v561_v20 = vadd.f32 %v559_v9, %v550_v11 }
  0xbe   : > { %v728_v12 = vmul.f32 -1.442695, %v561_v20 }
  0xc0   : > { %794 = vpow2.f32 %v728_v12 }
  0xc6   : > { %v795_v29 = vpop.eup %794 }
  0xc7   : > { %v569_v15 = vadd.f32 1.0, %v795_v29 }
  0xc9   : > { %796 = vrcp.f32 %v569_v15  ;;  %v582_v40 = vand.u32 2147483648, %v569_v15  ;;  %vm576_vm2 = vweird.f32 %v569_v15  ;;  %v580_v43 = vand.u32 2147483647, %v569_v15 }
  0xcb   : > { %v583_v50 = vor.u32 1.1754944e-38, %v582_v40  ;;  %vm581_vm6 = vcmp.eq.f32.partialorder %v580_v43, 8.507059e+37 }
  0xcf   : > { %v797_v26 = vpop.eup %796 }
  0xd0   : > { %v572_v28 = vmul.f32 %v797_v26, %v569_v15  ;;  %vm577_vm1 = vweird.f32 %v797_v26 }
  0xd1   : > { %vm578_vm3 = vmor %vm576_vm2, %vm577_vm1 }
  0xd2   : > { %v573_v51 = vsub.f32 1.0, %v572_v28 }
  0xd4   : > { %v574_v14 = vmul.f32 %v797_v26, %v573_v51 }
  0xd5   : > { %v553_v17 = vpop.xlane.xlu0 %552 }
  0xd6   : > { %v562_v10 = vadd.f32 %v559_v9, %v553_v17  ;;  %v575_v24 = vadd.f32 %v797_v26, %v574_v14 }
  0xd8   : > { %v729_v19 = vmul.f32 -1.442695, %v562_v10  ;;  %v579_v48 = vsel %vm578_vm3, %v797_v26, %v575_v24 }
  0xd9   : > { %v584_v52 = vsel %vm581_vm6, %v583_v50, %v579_v48 }
  0xda   : > { %798 = vpow2.f32 %v729_v19  ;;  %v605_v54 = vperm.slane %v584_v52, %v604_v39 }
  0xe0   : > { %v799_v32 = vpop.eup %798 }
  0xe1   : > { %v570_v33 = vadd.f32 1.0, %v799_v32 }
  0xe3   : > { %800 = vrcp.f32 %v570_v33  ;;  %v597_v34 = vand.u32 2147483648, %v570_v33  ;;  %v595_v49 = vand.u32 2147483647, %v570_v33  ;;  %vm591_vm5 = vweird.f32 %v570_v33 }
  0xe5   : > { %v598_v16 = vor.u32 1.1754944e-38, %v597_v34  ;;  %vm596_vm8 = vcmp.eq.f32.partialorder %v595_v49, 8.507059e+37 }
  0xe9   : > { %v801_v23 = vpop.eup %800 }
  0xea   : > { %v587_v30 = vmul.f32 %v801_v23, %v570_v33  ;;  %vm592_vm4 = vweird.f32 %v801_v23 }
  0xeb   : > { %vm593_vm7 = vmor %vm591_vm5, %vm592_vm4 }
  0xec   : > { %v588_v35 = vsub.f32 1.0, %v587_v30 }
  0xee   : > { %v589_v37 = vmul.f32 %v801_v23, %v588_v35 }
  0xf0   : > { %v590_v4 = vadd.f32 %v801_v23, %v589_v37 }
  0xf2   : > { %v594_v25 = vsel %vm593_vm7, %v801_v23, %v590_v4 }
  0xf3   : > { %v599_v47 = vsel %vm596_vm8, %v598_v16, %v594_v25 }
  0xf4   : > { %v606_v31 = vperm.slane %v599_v47, %v604_v39 }
  0xf6   : > { %v608_v36 = vsel %vm607_vm9, %v606_v31, %v605_v54 }
  0xf7   : > { %611 = vst.msk [vmem:[%s184_s17] sm:$0x3] %vm610_vm10, %v608_v36 }
  0xf8   : > { %829 = shalt.err (!%p826_p5)
}
  0xf9   : > { %735 = dma.vmem_to_hbm [thread:$0]  (%p946_p4), %s627_s9, 32, %s629_s10, %s613_s11  }
  0xfa PF: > { %p741_p6 = scmp.ge.s32.totalorder %s880_s19, 2  ;;  %s640_s28 = sand.u32 1, %s860_s14  }
  0xfb   : > { %s641_s29 = scalar_lea.sflag [#allocation4], %s640_s28 }
  0xfc   : > { %p738_p7 = pnand %p741_p6, %p953_p8 }
  0xfe   : > { %p739_p9 = pneg %p738_p7 }
 0x100   : > { %855 = dma.done.wait (%p739_p9), %s641_s29, 32  }
 0x101   : > { %857 = vsyncadd (%p739_p9), %s641_s29, 4294967264  ;;  %s18_s19 = sadd.s32 1, %s880_s19   ;;  %s1174_s14 = smov %s864_s15 }
 0x102   : > { %p15_p10 = scmp.ge.s32.totalorder %s18_s19, 4   ;;  %s1175_s15 = smov %s868_s16 }
 0x103   : > { %s1176_s16 = smov %s959_s26  ;;  %s1177_s17 = smov %s876_s18 }
 0x104   : > { %s1178_s18 = smov %s1180_s21  ;;  %17 = sbr.rel (!%p15_p10) target bundleno = 7 (0x7), region = 70 }
 0x109   :  { %647 = vsyncpa [#allocation4], 1 }
 0x10a   :  { %649 = vsyncpa [#allocation4 + $0x1], 1 }

</bundles_post_ra>
